<compile_context>
chip_gen: v5e
topology: v5e:2x2
jax: 0.10.0
libtpu: 0.0.40
codegen_flags: <defaults>
</compile_context>

<pallas_src>
import functools

import numpy as np
import jax
import jax.numpy as jnp
from jax import lax
from jax.experimental import pallas as pl
from jax.experimental.pallas import tpu as pltpu

BN_EPS = 1e-5


def _round_up(x, m):
    return (x + m - 1) // m * m


def fold_bn(gamma, beta, mean, var):
    """Fold BatchNorm (eval mode) into per-channel scale/bias."""
    scale = gamma / jnp.sqrt(var + BN_EPS)
    bias = beta - mean * scale
    return scale, bias


# ----------------------------------------------------------------------------
# Fused Pallas kernel: one image per grid step, everything stays on-chip.
# ----------------------------------------------------------------------------
def _block_kernel(x_ref, w1_ref, w2_ref, s1_ref, b1_ref, s2_ref, b2_ref, *rest,
                  H, W, Cin, Cout, Ho, Wo, stride, dilation, left,
                  has_shortcut):
    if has_shortcut:
        wsc_ref, ssc_ref, bsc_ref, o_ref, xpad1, xpad2 = rest
    else:
        o_ref, xpad1, xpad2 = rest

    pad = dilation
    base_w = left - pad          # scratch column holding padded coordinate 0

    # Zero the padded scratch ONCE: scratch persists across grid iterations, the
    # interior is fully overwritten below on every step, and only the zero
    # border is ever read outside the interior.
    @pl.when(pl.program_id(0) == 0)
    def _():
        xpad1[...] = jnp.zeros_like(xpad1)
        xpad2[...] = jnp.zeros_like(xpad2)

    # Sublane-aligned interior store (left % 8 == 0, static offsets -> plain vst).
    xpad1[pl.ds(pad, H), pl.ds(left, W), :] = x_ref[...]

    def conv3x3(src, w_ref, C, s):
        """Dilated 3x3 conv as 9 accumulating per-tap MXU matmuls (K = C)."""
        acc = None
        for ky in range(3):
            for kx in range(3):
                h0 = ky * dilation              # rows: padded coord == scratch row
                w0 = base_w + kx * dilation
                if s == 1:
                    tap = src[pl.ds(h0, Ho), pl.ds(w0, Wo), :]
                else:
                    # strided ref read instead of load-then-slice relayout
                    tap = src[pl.ds(h0, Ho, stride=s),
                              pl.ds(w0, Wo, stride=s), :]
                t = jnp.dot(tap.reshape(Ho * Wo, C), w_ref[ky * 3 + kx],
                            preferred_element_type=jnp.float32)
                acc = t if acc is None else acc + t
        return acc                              # (Ho*Wo, Cout) f32

    # ---- conv1 (dilated 3x3, stride) + bn1 + relu
    acc1 = conv3x3(xpad1, w1_ref, Cin, stride)
    h1 = jnp.maximum(acc1 * s1_ref[...] + b1_ref[...], 0.0)

    # conv1 activation goes straight into the zero-padded VMEM scratch for conv2
    # (bf16, never touches HBM).  Wo % 8 == 0 keeps this reshape layout-preserving.
    xpad2[pl.ds(pad, Ho), pl.ds(left, Wo), :] = (
        h1.astype(xpad2.dtype).reshape(Ho, Wo, Cout))

    # ---- conv2 (dilated 3x3, stride 1) + bn2
    acc2 = conv3x3(xpad2, w2_ref, Cout, 1)

    # TODO(synk): nn.Dropout2d is identity in eval mode; training-mode
    # per-channel dropout (mask * 1/(1-p)) is intentionally not implemented.

    # ---- shortcut branch (computed after conv2 to keep the peak live set small)
    if has_shortcut:
        if stride == 1:
            xs = x_ref[...]
        else:
            xs = x_ref[pl.ds(0, Ho, stride=stride),
                       pl.ds(0, Wo, stride=stride), :]      # strided subsample
        res = jnp.dot(xs.reshape(Ho * Wo, Cin), wsc_ref[...],
                      preferred_element_type=jnp.float32)
        res = res * ssc_ref[...] + bsc_ref[...]
    else:
        # wrapper asserts stride == 1 and Cin == Cout on this path
        res = x_ref[...].reshape(Ho * Wo, Cout).astype(jnp.float32)

    # ---- bn2 scale/bias + residual add + relu, lane-dense flat output store
    out = jnp.maximum(acc2 * s2_ref[...] + b2_ref[...] + res, 0.0)
    o_ref[...] = out.astype(o_ref.dtype)


# ----------------------------------------------------------------------------
# Wrapper: BN folding, bf16 cast, layout plumbing, single pallas_call.
# ----------------------------------------------------------------------------
def dilated_basic_block(x_nchw, params, *, stride, dilation):
    N, Cin, H, W = x_nchw.shape
    Cout = params["w1"].shape[-1]
    pad = dilation
    Ho = (H + 2 * pad - 2 * dilation - 1) // stride + 1
    Wo = (W + 2 * pad - 2 * dilation - 1) // stride + 1

    has_sc = params["w_sc"] is not None
    if not has_sc:
        assert stride == 1 and Cin == Cout, (
            "identity shortcut requires stride==1 and Cin==Cout")

    # NCHW -> NHWC (channels on the lane axis); bf16 halves HBM traffic and runs
    # the MXU at bf16 rate (accumulation stays f32 inside the kernel).
    # TODO(synk): when stacking blocks, keep activations NHWC bf16 between blocks
    # and drop these per-block transposes (transpose only at network entry/exit).
    x = jnp.transpose(x_nchw, (0, 2, 3, 1)).astype(jnp.bfloat16)

    s1, b1 = fold_bn(*params["bn1"])
    s2, b2 = fold_bn(*params["bn2"])
    w1 = params["w1"].reshape(9, Cin, Cout).astype(jnp.bfloat16)   # per-tap weights
    w2 = params["w2"].reshape(9, Cout, Cout).astype(jnp.bfloat16)
    f32row = lambda v: v.reshape(1, Cout).astype(jnp.float32)

    # Padded-scratch geometry: interior column offset `left` is a multiple of 8
    # (sublane-aligned interior stores); widths rounded up to a multiple of 8.
    left = max(8, _round_up(pad, 8))
    Hp1, Wp1 = H + 2 * pad, _round_up(left + W + pad, 8)
    Hp2, Wp2 = Ho + 2 * pad, _round_up(left + Wo + pad, 8)

    args = [x, w1, w2, f32row(s1), f32row(b1), f32row(s2), f32row(b2)]
    in_specs = [
        pl.BlockSpec((None, H, W, Cin), lambda n: (n, 0, 0, 0)),
        pl.BlockSpec((9, Cin, Cout), lambda n: (0, 0, 0)),
        pl.BlockSpec((9, Cout, Cout), lambda n: (0, 0, 0)),
        pl.BlockSpec((1, Cout), lambda n: (0, 0)),
        pl.BlockSpec((1, Cout), lambda n: (0, 0)),
        pl.BlockSpec((1, Cout), lambda n: (0, 0)),
        pl.BlockSpec((1, Cout), lambda n: (0, 0)),
    ]
    if has_sc:
        ssc, bsc = fold_bn(*params["bn_sc"])
        args += [params["w_sc"].astype(jnp.bfloat16), f32row(ssc), f32row(bsc)]
        in_specs += [
            pl.BlockSpec((Cin, Cout), lambda n: (0, 0)),
            pl.BlockSpec((1, Cout), lambda n: (0, 0)),
            pl.BlockSpec((1, Cout), lambda n: (0, 0)),
        ]

    kernel = functools.partial(
        _block_kernel, H=H, W=W, Cin=Cin, Cout=Cout, Ho=Ho, Wo=Wo,
        stride=stride, dilation=dilation, left=left, has_shortcut=has_sc)

    # VMEM budget: persistent scratch + double-buffered in/out blocks + weights
    # + live f32 accumulators, with 2x headroom (floor 16 MiB, cap 100 MiB).
    vmem_bytes = (
        Hp1 * Wp1 * Cin * 2 + Hp2 * Wp2 * Cout * 2             # scratch (bf16)
        + 2 * H * W * Cin * 2 + 2 * Ho * Wo * Cout * 4         # in/out blocks
        + 2 * (9 * Cin + 9 * Cout + Cin) * Cout * 2            # weights
        + 8 * Ho * Wo * Cout * 4)                              # live f32 values
    vmem_limit = int(min(100 * 2**20, max(16 * 2**20, 2 * vmem_bytes)))

    # NOTE: with production channel counts (Cout >= 128) the (..., Cout) tiles are
    # lane-dense; at this toy Cout=8 lane utilization is 8/128 regardless.
    # TODO(synk): for large feature maps on v7x (64 MiB VMEM, 2 TCs) add an
    # Ho-tile "parallel" grid axis with dilation-wide halo rows (per-step halo
    # zeroing) instead of whole-image blocks on a single core.
    out_flat = pl.pallas_call(
        kernel,
        out_shape=jax.ShapeDtypeStruct((N, Ho * Wo, Cout), jnp.float32),
        grid=(N,),
        in_specs=in_specs,
        out_specs=pl.BlockSpec((None, Ho * Wo, Cout), lambda n: (n, 0, 0)),
        scratch_shapes=[
            pltpu.VMEM((Hp1, Wp1, Cin), jnp.bfloat16),
            pltpu.VMEM((Hp2, Wp2, Cout), jnp.bfloat16),
        ],
        compiler_params=pltpu.CompilerParams(
            # "arbitrary": the zero-once scratch border relies on program 0
            # running first on the core that owns the scratch.
            dimension_semantics=("arbitrary",),
            vmem_limit_bytes=vmem_limit),
    )(*args)

    # (Ho,Wo) split + NHWC -> NCHW happen once outside the kernel.
    return jnp.transpose(out_flat.reshape(N, Ho, Wo, Cout), (0, 3, 1, 2))


# ----------------------------------------------------------------------------
# Pure-JAX reference (mirrors the PyTorch forward in eval mode, f32)
# ----------------------------------------------------------------------------
def reference_block(x_nchw, params, *, stride, dilation):
    dn = ("NCHW", "HWIO", "NCHW")

    def conv(x, w, s, d, p):
        return lax.conv_general_dilated(
            x, w, (s, s), [(p, p), (p, p)], rhs_dilation=(d, d),
            dimension_numbers=dn, precision=lax.Precision.HIGHEST)

    def bn(x, p):
        g, b, m, v = p
        inv = g / jnp.sqrt(v + BN_EPS)
        return x * inv[None, :, None, None] + (b - m * inv)[None, :, None, None]

    out = jax.nn.relu(bn(conv(x_nchw, params["w1"], stride, dilation, dilation),
                         params["bn1"]))
    out = bn(conv(out, params["w2"], 1, dilation, dilation), params["bn2"])
    if params["w_sc"] is not None:
        w_sc = params["w_sc"][None, None, :, :]  # (1,1,Cin,Cout) HWIO
        sc = bn(lax.conv_general_dilated(
                    x_nchw, w_sc, (stride, stride), [(0, 0), (0, 0)],
                    dimension_numbers=dn, precision=lax.Precision.HIGHEST),
                params["bn_sc"])
    else:
        sc = x_nchw
    return jax.nn.relu(out + sc)


if __name__ == "__main__":
    N, Cin, H, W = 2, 4, 16, 16
    Cout = 8
    stride, dilation = 1, 2   # Cin != Cout -> 1x1-conv+BN shortcut path exercised

    key = jax.random.PRNGKey(0)
    ks = jax.random.split(key, 8)

    def bn_params(k):
        k1, k2, k3, k4 = jax.random.split(k, 4)
        gamma = 1.0 + 0.1 * jax.random.normal(k1, (Cout,), jnp.float32)
        beta = 0.1 * jax.random.normal(k2, (Cout,), jnp.float32)
        mean = 0.1 * jax.random.normal(k3, (Cout,), jnp.float32)
        var = 0.5 + 0.5 * jnp.abs(jax.random.normal(k4, (Cout,), jnp.float32))
        return (gamma, beta, mean, var)

    params = {
        "w1": 0.2 * jax.random.normal(ks[0], (3, 3, Cin, Cout), jnp.float32),
        "w2": 0.2 * jax.random.normal(ks[1], (3, 3, Cout, Cout), jnp.float32),
        "bn1": bn_params(ks[2]),
        "bn2": bn_params(ks[3]),
    }
    if stride != 1 or Cin != Cout:
        params["w_sc"] = 0.2 * jax.random.normal(ks[4], (Cin, Cout), jnp.float32)
        params["bn_sc"] = bn_params(ks[5])
    else:
        params["w_sc"] = None
        params["bn_sc"] = None

    x = jax.random.normal(ks[6], (N, Cin, H, W), jnp.float32)

    out = jax.block_until_ready(
        dilated_basic_block(x, params, stride=stride, dilation=dilation))
    ref = jax.block_until_ready(
        reference_block(x, params, stride=stride, dilation=dilation))

    assert out.shape == ref.shape, (out.shape, ref.shape)
    np.testing.assert_allclose(np.asarray(out), np.asarray(ref),
                               rtol=5e-2, atol=5e-2)
    print("KERNEL_OK")
</pallas_src>

<mosaic_0001>
module attributes {stable_mosaic.version = 11 : i64} {
  func.func @_block_kernel(%arg0: i32, %arg1: memref<1x16x16x4xbf16, #tpu.memory_space<vmem>>, %arg2: memref<9x4x8xbf16, #tpu.memory_space<vmem>>, %arg3: memref<9x8x8xbf16, #tpu.memory_space<vmem>>, %arg4: memref<1x8xf32, #tpu.memory_space<vmem>>, %arg5: memref<1x8xf32, #tpu.memory_space<vmem>>, %arg6: memref<1x8xf32, #tpu.memory_space<vmem>>, %arg7: memref<1x8xf32, #tpu.memory_space<vmem>>, %arg8: memref<4x8xbf16, #tpu.memory_space<vmem>>, %arg9: memref<1x8xf32, #tpu.memory_space<vmem>>, %arg10: memref<1x8xf32, #tpu.memory_space<vmem>>, %arg11: memref<1x256x8xf32, #tpu.memory_space<vmem>>, %arg12: memref<20x32x4xbf16, #tpu.memory_space<vmem>>, %arg13: memref<20x32x8xbf16, #tpu.memory_space<vmem>>) attributes {dimension_semantics = [#tpu.dimension_semantics<arbitrary>], iteration_bounds = array<i64: 2>, scalar_prefetch = 0 : i64, scratch_operands = 2 : i64, tpu.core_type = #tpu.core_type<tc>, window_params = [{transform_indices = @transform_0, window_bounds = array<i64: 1, 16, 16, 4>}, {pipeline_mode = #tpu.pipeline_mode<synchronous>, transform_indices = @transform_1, window_bounds = array<i64: 9, 4, 8>}, {pipeline_mode = #tpu.pipeline_mode<synchronous>, transform_indices = @transform_2, window_bounds = array<i64: 9, 8, 8>}, {pipeline_mode = #tpu.pipeline_mode<synchronous>, transform_indices = @transform_3, window_bounds = array<i64: 1, 8>}, {pipeline_mode = #tpu.pipeline_mode<synchronous>, transform_indices = @transform_4, window_bounds = array<i64: 1, 8>}, {pipeline_mode = #tpu.pipeline_mode<synchronous>, transform_indices = @transform_5, window_bounds = array<i64: 1, 8>}, {pipeline_mode = #tpu.pipeline_mode<synchronous>, transform_indices = @transform_6, window_bounds = array<i64: 1, 8>}, {pipeline_mode = #tpu.pipeline_mode<synchronous>, transform_indices = @transform_7, window_bounds = array<i64: 4, 8>}, {pipeline_mode = #tpu.pipeline_mode<synchronous>, transform_indices = @transform_8, window_bounds = array<i64: 1, 8>}, {pipeline_mode = #tpu.pipeline_mode<synchronous>, transform_indices = @transform_9, window_bounds = array<i64: 1, 8>}, {transform_indices = @transform_10, window_bounds = array<i64: 1, 256, 8>}]} {
    %c0_i32 = arith.constant 0 : i32
    %0 = arith.cmpi eq, %arg0, %c0_i32 : i32
    %1 = arith.extui %0 : i1 to i32
    %c0_i32_0 = arith.constant 0 : i32
    %2 = arith.cmpi ne, %1, %c0_i32_0 : i32
    scf.if %2 {
      %cst_150 = arith.constant 0.000000e+00 : bf16
      %146 = vector.broadcast %cst_150 : bf16 to vector<20x32x4xbf16>
      %c0_151 = arith.constant 0 : index
      %c0_152 = arith.constant 0 : index
      %c0_153 = arith.constant 0 : index
      %147 = vector.load %arg12[%c0_151, %c0_152, %c0_153] : memref<20x32x4xbf16, #tpu.memory_space<vmem>>, vector<20x32x4xbf16>
      tpu.vector_store %arg12[%c0_151, %c0_152, %c0_153], %146 {strides = array<i32>} : memref<20x32x4xbf16, #tpu.memory_space<vmem>>, vector<20x32x4xbf16>,
      %cst_154 = arith.constant 0.000000e+00 : bf16
      %148 = vector.broadcast %cst_154 : bf16 to vector<20x32x8xbf16>
      %c0_155 = arith.constant 0 : index
      %c0_156 = arith.constant 0 : index
      %c0_157 = arith.constant 0 : index
      %149 = vector.load %arg13[%c0_155, %c0_156, %c0_157] : memref<20x32x8xbf16, #tpu.memory_space<vmem>>, vector<20x32x8xbf16>
      tpu.vector_store %arg13[%c0_155, %c0_156, %c0_157], %148 {strides = array<i32>} : memref<20x32x8xbf16, #tpu.memory_space<vmem>>, vector<20x32x8xbf16>,
    } else {
    }
    %c0 = arith.constant 0 : index
    %c0_1 = arith.constant 0 : index
    %c0_2 = arith.constant 0 : index
    %c0_3 = arith.constant 0 : index
    %3 = vector.load %arg1[%c0, %c0_1, %c0_2, %c0_3] : memref<1x16x16x4xbf16, #tpu.memory_space<vmem>>, vector<1x16x16x4xbf16>
    %4 = vector.shape_cast %3 : vector<1x16x16x4xbf16> to vector<16x16x4xbf16>
    %c2 = arith.constant 2 : index
    %c8 = arith.constant 8 : index
    %c0_4 = arith.constant 0 : index
    %5 = vector.load %arg12[%c2, %c8, %c0_4] : memref<20x32x4xbf16, #tpu.memory_space<vmem>>, vector<16x16x4xbf16>
    tpu.vector_store %arg12[%c2, %c8, %c0_4], %4 {strides = array<i32>} : memref<20x32x4xbf16, #tpu.memory_space<vmem>>, vector<16x16x4xbf16>,
    %c0_5 = arith.constant 0 : index
    %c6 = arith.constant 6 : index
    %c0_6 = arith.constant 0 : index
    %6 = vector.load %arg12[%c0_5, %c6, %c0_6] : memref<20x32x4xbf16, #tpu.memory_space<vmem>>, vector<16x16x4xbf16>
    %7 = vector.shape_cast %6 : vector<16x16x4xbf16> to vector<256x4xbf16>
    %c0_7 = arith.constant 0 : index
    %c0_8 = arith.constant 0 : index
    %c0_9 = arith.constant 0 : index
    %8 = vector.load %arg2[%c0_7, %c0_8, %c0_9] : memref<9x4x8xbf16, #tpu.memory_space<vmem>>, vector<1x4x8xbf16>
    %9 = vector.shape_cast %8 : vector<1x4x8xbf16> to vector<4x8xbf16>
    %cst = arith.constant dense<0.000000e+00> : vector<256x8xf32>
    %10 = tpu.matmul %7, %9, %cst {dimension_numbers = #tpu.dot_dimension_numbers<[1], [0], [0], [1], [0, 0, 1, 1], [], []>} : vector<256x4xbf16>, vector<4x8xbf16>, vector<256x8xf32> -> vector<256x8xf32>
    %c0_10 = arith.constant 0 : index
    %c8_11 = arith.constant 8 : index
    %c0_12 = arith.constant 0 : index
    %11 = vector.load %arg12[%c0_10, %c8_11, %c0_12] : memref<20x32x4xbf16, #tpu.memory_space<vmem>>, vector<16x16x4xbf16>
    %12 = vector.shape_cast %11 : vector<16x16x4xbf16> to vector<256x4xbf16>
    %c1 = arith.constant 1 : index
    %c0_13 = arith.constant 0 : index
    %c0_14 = arith.constant 0 : index
    %13 = vector.load %arg2[%c1, %c0_13, %c0_14] : memref<9x4x8xbf16, #tpu.memory_space<vmem>>, vector<1x4x8xbf16>
    %14 = vector.shape_cast %13 : vector<1x4x8xbf16> to vector<4x8xbf16>
    %cst_15 = arith.constant dense<0.000000e+00> : vector<256x8xf32>
    %15 = tpu.matmul %12, %14, %cst_15 {dimension_numbers = #tpu.dot_dimension_numbers<[1], [0], [0], [1], [0, 0, 1, 1], [], []>} : vector<256x4xbf16>, vector<4x8xbf16>, vector<256x8xf32> -> vector<256x8xf32>
    %16 = arith.addf %10, %15 : vector<256x8xf32>
    %c0_16 = arith.constant 0 : index
    %c10 = arith.constant 10 : index
    %c0_17 = arith.constant 0 : index
    %17 = vector.load %arg12[%c0_16, %c10, %c0_17] : memref<20x32x4xbf16, #tpu.memory_space<vmem>>, vector<16x16x4xbf16>
    %18 = vector.shape_cast %17 : vector<16x16x4xbf16> to vector<256x4xbf16>
    %c2_18 = arith.constant 2 : index
    %c0_19 = arith.constant 0 : index
    %c0_20 = arith.constant 0 : index
    %19 = vector.load %arg2[%c2_18, %c0_19, %c0_20] : memref<9x4x8xbf16, #tpu.memory_space<vmem>>, vector<1x4x8xbf16>
    %20 = vector.shape_cast %19 : vector<1x4x8xbf16> to vector<4x8xbf16>
    %cst_21 = arith.constant dense<0.000000e+00> : vector<256x8xf32>
    %21 = tpu.matmul %18, %20, %cst_21 {dimension_numbers = #tpu.dot_dimension_numbers<[1], [0], [0], [1], [0, 0, 1, 1], [], []>} : vector<256x4xbf16>, vector<4x8xbf16>, vector<256x8xf32> -> vector<256x8xf32>
    %22 = arith.addf %16, %21 : vector<256x8xf32>
    %c2_22 = arith.constant 2 : index
    %c6_23 = arith.constant 6 : index
    %c0_24 = arith.constant 0 : index
    %23 = vector.load %arg12[%c2_22, %c6_23, %c0_24] : memref<20x32x4xbf16, #tpu.memory_space<vmem>>, vector<16x16x4xbf16>
    %24 = vector.shape_cast %23 : vector<16x16x4xbf16> to vector<256x4xbf16>
    %c3 = arith.constant 3 : index
    %c0_25 = arith.constant 0 : index
    %c0_26 = arith.constant 0 : index
    %25 = vector.load %arg2[%c3, %c0_25, %c0_26] : memref<9x4x8xbf16, #tpu.memory_space<vmem>>, vector<1x4x8xbf16>
    %26 = vector.shape_cast %25 : vector<1x4x8xbf16> to vector<4x8xbf16>
    %cst_27 = arith.constant dense<0.000000e+00> : vector<256x8xf32>
    %27 = tpu.matmul %24, %26, %cst_27 {dimension_numbers = #tpu.dot_dimension_numbers<[1], [0], [0], [1], [0, 0, 1, 1], [], []>} : vector<256x4xbf16>, vector<4x8xbf16>, vector<256x8xf32> -> vector<256x8xf32>
    %28 = arith.addf %22, %27 : vector<256x8xf32>
    %c2_28 = arith.constant 2 : index
    %c8_29 = arith.constant 8 : index
    %c0_30 = arith.constant 0 : index
    %29 = vector.load %arg12[%c2_28, %c8_29, %c0_30] : memref<20x32x4xbf16, #tpu.memory_space<vmem>>, vector<16x16x4xbf16>
    %30 = vector.shape_cast %29 : vector<16x16x4xbf16> to vector<256x4xbf16>
    %c4 = arith.constant 4 : index
    %c0_31 = arith.constant 0 : index
    %c0_32 = arith.constant 0 : index
    %31 = vector.load %arg2[%c4, %c0_31, %c0_32] : memref<9x4x8xbf16, #tpu.memory_space<vmem>>, vector<1x4x8xbf16>
    %32 = vector.shape_cast %31 : vector<1x4x8xbf16> to vector<4x8xbf16>
    %cst_33 = arith.constant dense<0.000000e+00> : vector<256x8xf32>
    %33 = tpu.matmul %30, %32, %cst_33 {dimension_numbers = #tpu.dot_dimension_numbers<[1], [0], [0], [1], [0, 0, 1, 1], [], []>} : vector<256x4xbf16>, vector<4x8xbf16>, vector<256x8xf32> -> vector<256x8xf32>
    %34 = arith.addf %28, %33 : vector<256x8xf32>
    %c2_34 = arith.constant 2 : index
    %c10_35 = arith.constant 10 : index
    %c0_36 = arith.constant 0 : index
    %35 = vector.load %arg12[%c2_34, %c10_35, %c0_36] : memref<20x32x4xbf16, #tpu.memory_space<vmem>>, vector<16x16x4xbf16>
    %36 = vector.shape_cast %35 : vector<16x16x4xbf16> to vector<256x4xbf16>
    %c5 = arith.constant 5 : index
    %c0_37 = arith.constant 0 : index
    %c0_38 = arith.constant 0 : index
    %37 = vector.load %arg2[%c5, %c0_37, %c0_38] : memref<9x4x8xbf16, #tpu.memory_space<vmem>>, vector<1x4x8xbf16>
    %38 = vector.shape_cast %37 : vector<1x4x8xbf16> to vector<4x8xbf16>
    %cst_39 = arith.constant dense<0.000000e+00> : vector<256x8xf32>
    %39 = tpu.matmul %36, %38, %cst_39 {dimension_numbers = #tpu.dot_dimension_numbers<[1], [0], [0], [1], [0, 0, 1, 1], [], []>} : vector<256x4xbf16>, vector<4x8xbf16>, vector<256x8xf32> -> vector<256x8xf32>
    %40 = arith.addf %34, %39 : vector<256x8xf32>
    %c4_40 = arith.constant 4 : index
    %c6_41 = arith.constant 6 : index
    %c0_42 = arith.constant 0 : index
    %41 = vector.load %arg12[%c4_40, %c6_41, %c0_42] : memref<20x32x4xbf16, #tpu.memory_space<vmem>>, vector<16x16x4xbf16>
    %42 = vector.shape_cast %41 : vector<16x16x4xbf16> to vector<256x4xbf16>
    %c6_43 = arith.constant 6 : index
    %c0_44 = arith.constant 0 : index
    %c0_45 = arith.constant 0 : index
    %43 = vector.load %arg2[%c6_43, %c0_44, %c0_45] : memref<9x4x8xbf16, #tpu.memory_space<vmem>>, vector<1x4x8xbf16>
    %44 = vector.shape_cast %43 : vector<1x4x8xbf16> to vector<4x8xbf16>
    %cst_46 = arith.constant dense<0.000000e+00> : vector<256x8xf32>
    %45 = tpu.matmul %42, %44, %cst_46 {dimension_numbers = #tpu.dot_dimension_numbers<[1], [0], [0], [1], [0, 0, 1, 1], [], []>} : vector<256x4xbf16>, vector<4x8xbf16>, vector<256x8xf32> -> vector<256x8xf32>
    %46 = arith.addf %40, %45 : vector<256x8xf32>
    %c4_47 = arith.constant 4 : index
    %c8_48 = arith.constant 8 : index
    %c0_49 = arith.constant 0 : index
    %47 = vector.load %arg12[%c4_47, %c8_48, %c0_49] : memref<20x32x4xbf16, #tpu.memory_space<vmem>>, vector<16x16x4xbf16>
    %48 = vector.shape_cast %47 : vector<16x16x4xbf16> to vector<256x4xbf16>
    %c7 = arith.constant 7 : index
    %c0_50 = arith.constant 0 : index
    %c0_51 = arith.constant 0 : index
    %49 = vector.load %arg2[%c7, %c0_50, %c0_51] : memref<9x4x8xbf16, #tpu.memory_space<vmem>>, vector<1x4x8xbf16>
    %50 = vector.shape_cast %49 : vector<1x4x8xbf16> to vector<4x8xbf16>
    %cst_52 = arith.constant dense<0.000000e+00> : vector<256x8xf32>
    %51 = tpu.matmul %48, %50, %cst_52 {dimension_numbers = #tpu.dot_dimension_numbers<[1], [0], [0], [1], [0, 0, 1, 1], [], []>} : vector<256x4xbf16>, vector<4x8xbf16>, vector<256x8xf32> -> vector<256x8xf32>
    %52 = arith.addf %46, %51 : vector<256x8xf32>
    %c4_53 = arith.constant 4 : index
    %c10_54 = arith.constant 10 : index
    %c0_55 = arith.constant 0 : index
    %53 = vector.load %arg12[%c4_53, %c10_54, %c0_55] : memref<20x32x4xbf16, #tpu.memory_space<vmem>>, vector<16x16x4xbf16>
    %54 = vector.shape_cast %53 : vector<16x16x4xbf16> to vector<256x4xbf16>
    %c8_56 = arith.constant 8 : index
    %c0_57 = arith.constant 0 : index
    %c0_58 = arith.constant 0 : index
    %55 = vector.load %arg2[%c8_56, %c0_57, %c0_58] : memref<9x4x8xbf16, #tpu.memory_space<vmem>>, vector<1x4x8xbf16>
    %56 = vector.shape_cast %55 : vector<1x4x8xbf16> to vector<4x8xbf16>
    %cst_59 = arith.constant dense<0.000000e+00> : vector<256x8xf32>
    %57 = tpu.matmul %54, %56, %cst_59 {dimension_numbers = #tpu.dot_dimension_numbers<[1], [0], [0], [1], [0, 0, 1, 1], [], []>} : vector<256x4xbf16>, vector<4x8xbf16>, vector<256x8xf32> -> vector<256x8xf32>
    %58 = arith.addf %52, %57 : vector<256x8xf32>
    %c0_60 = arith.constant 0 : index
    %c0_61 = arith.constant 0 : index
    %59 = vector.load %arg4[%c0_60, %c0_61] : memref<1x8xf32, #tpu.memory_space<vmem>>, vector<1x8xf32>
    %60 = vector.broadcast %59 : vector<1x8xf32> to vector<256x8xf32>
    %61 = arith.mulf %58, %60 : vector<256x8xf32>
    %c0_62 = arith.constant 0 : index
    %c0_63 = arith.constant 0 : index
    %62 = vector.load %arg5[%c0_62, %c0_63] : memref<1x8xf32, #tpu.memory_space<vmem>>, vector<1x8xf32>
    %63 = vector.broadcast %62 : vector<1x8xf32> to vector<256x8xf32>
    %64 = arith.addf %61, %63 : vector<256x8xf32>
    %cst_64 = arith.constant 0.000000e+00 : f32
    %65 = vector.broadcast %cst_64 : f32 to vector<256x8xf32>
    %66 = arith.maximumf %64, %65 : vector<256x8xf32>
    %67 = arith.truncf %66 : vector<256x8xf32> to vector<256x8xbf16>
    %68 = vector.shape_cast %67 : vector<256x8xbf16> to vector<16x16x8xbf16>
    %c2_65 = arith.constant 2 : index
    %c8_66 = arith.constant 8 : index
    %c0_67 = arith.constant 0 : index
    %69 = vector.load %arg13[%c2_65, %c8_66, %c0_67] : memref<20x32x8xbf16, #tpu.memory_space<vmem>>, vector<16x16x8xbf16>
    tpu.vector_store %arg13[%c2_65, %c8_66, %c0_67], %68 {strides = array<i32>} : memref<20x32x8xbf16, #tpu.memory_space<vmem>>, vector<16x16x8xbf16>,
    %c0_68 = arith.constant 0 : index
    %c6_69 = arith.constant 6 : index
    %c0_70 = arith.constant 0 : index
    %70 = vector.load %arg13[%c0_68, %c6_69, %c0_70] : memref<20x32x8xbf16, #tpu.memory_space<vmem>>, vector<16x16x8xbf16>
    %71 = vector.shape_cast %70 : vector<16x16x8xbf16> to vector<256x8xbf16>
    %c0_71 = arith.constant 0 : index
    %c0_72 = arith.constant 0 : index
    %c0_73 = arith.constant 0 : index
    %72 = vector.load %arg3[%c0_71, %c0_72, %c0_73] : memref<9x8x8xbf16, #tpu.memory_space<vmem>>, vector<1x8x8xbf16>
    %73 = vector.shape_cast %72 : vector<1x8x8xbf16> to vector<8x8xbf16>
    %cst_74 = arith.constant dense<0.000000e+00> : vector<256x8xf32>
    %74 = tpu.matmul %71, %73, %cst_74 {dimension_numbers = #tpu.dot_dimension_numbers<[1], [0], [0], [1], [0, 0, 1, 1], [], []>} : vector<256x8xbf16>, vector<8x8xbf16>, vector<256x8xf32> -> vector<256x8xf32>
    %c0_75 = arith.constant 0 : index
    %c8_76 = arith.constant 8 : index
    %c0_77 = arith.constant 0 : index
    %75 = vector.load %arg13[%c0_75, %c8_76, %c0_77] : memref<20x32x8xbf16, #tpu.memory_space<vmem>>, vector<16x16x8xbf16>
    %76 = vector.shape_cast %75 : vector<16x16x8xbf16> to vector<256x8xbf16>
    %c1_78 = arith.constant 1 : index
    %c0_79 = arith.constant 0 : index
    %c0_80 = arith.constant 0 : index
    %77 = vector.load %arg3[%c1_78, %c0_79, %c0_80] : memref<9x8x8xbf16, #tpu.memory_space<vmem>>, vector<1x8x8xbf16>
    %78 = vector.shape_cast %77 : vector<1x8x8xbf16> to vector<8x8xbf16>
    %cst_81 = arith.constant dense<0.000000e+00> : vector<256x8xf32>
    %79 = tpu.matmul %76, %78, %cst_81 {dimension_numbers = #tpu.dot_dimension_numbers<[1], [0], [0], [1], [0, 0, 1, 1], [], []>} : vector<256x8xbf16>, vector<8x8xbf16>, vector<256x8xf32> -> vector<256x8xf32>
    %80 = arith.addf %74, %79 : vector<256x8xf32>
    %c0_82 = arith.constant 0 : index
    %c10_83 = arith.constant 10 : index
    %c0_84 = arith.constant 0 : index
    %81 = vector.load %arg13[%c0_82, %c10_83, %c0_84] : memref<20x32x8xbf16, #tpu.memory_space<vmem>>, vector<16x16x8xbf16>
    %82 = vector.shape_cast %81 : vector<16x16x8xbf16> to vector<256x8xbf16>
    %c2_85 = arith.constant 2 : index
    %c0_86 = arith.constant 0 : index
    %c0_87 = arith.constant 0 : index
    %83 = vector.load %arg3[%c2_85, %c0_86, %c0_87] : memref<9x8x8xbf16, #tpu.memory_space<vmem>>, vector<1x8x8xbf16>
    %84 = vector.shape_cast %83 : vector<1x8x8xbf16> to vector<8x8xbf16>
    %cst_88 = arith.constant dense<0.000000e+00> : vector<256x8xf32>
    %85 = tpu.matmul %82, %84, %cst_88 {dimension_numbers = #tpu.dot_dimension_numbers<[1], [0], [0], [1], [0, 0, 1, 1], [], []>} : vector<256x8xbf16>, vector<8x8xbf16>, vector<256x8xf32> -> vector<256x8xf32>
    %86 = arith.addf %80, %85 : vector<256x8xf32>
    %c2_89 = arith.constant 2 : index
    %c6_90 = arith.constant 6 : index
    %c0_91 = arith.constant 0 : index
    %87 = vector.load %arg13[%c2_89, %c6_90, %c0_91] : memref<20x32x8xbf16, #tpu.memory_space<vmem>>, vector<16x16x8xbf16>
    %88 = vector.shape_cast %87 : vector<16x16x8xbf16> to vector<256x8xbf16>
    %c3_92 = arith.constant 3 : index
    %c0_93 = arith.constant 0 : index
    %c0_94 = arith.constant 0 : index
    %89 = vector.load %arg3[%c3_92, %c0_93, %c0_94] : memref<9x8x8xbf16, #tpu.memory_space<vmem>>, vector<1x8x8xbf16>
    %90 = vector.shape_cast %89 : vector<1x8x8xbf16> to vector<8x8xbf16>
    %cst_95 = arith.constant dense<0.000000e+00> : vector<256x8xf32>
    %91 = tpu.matmul %88, %90, %cst_95 {dimension_numbers = #tpu.dot_dimension_numbers<[1], [0], [0], [1], [0, 0, 1, 1], [], []>} : vector<256x8xbf16>, vector<8x8xbf16>, vector<256x8xf32> -> vector<256x8xf32>
    %92 = arith.addf %86, %91 : vector<256x8xf32>
    %c2_96 = arith.constant 2 : index
    %c8_97 = arith.constant 8 : index
    %c0_98 = arith.constant 0 : index
    %93 = vector.load %arg13[%c2_96, %c8_97, %c0_98] : memref<20x32x8xbf16, #tpu.memory_space<vmem>>, vector<16x16x8xbf16>
    %94 = vector.shape_cast %93 : vector<16x16x8xbf16> to vector<256x8xbf16>
    %c4_99 = arith.constant 4 : index
    %c0_100 = arith.constant 0 : index
    %c0_101 = arith.constant 0 : index
    %95 = vector.load %arg3[%c4_99, %c0_100, %c0_101] : memref<9x8x8xbf16, #tpu.memory_space<vmem>>, vector<1x8x8xbf16>
    %96 = vector.shape_cast %95 : vector<1x8x8xbf16> to vector<8x8xbf16>
    %cst_102 = arith.constant dense<0.000000e+00> : vector<256x8xf32>
    %97 = tpu.matmul %94, %96, %cst_102 {dimension_numbers = #tpu.dot_dimension_numbers<[1], [0], [0], [1], [0, 0, 1, 1], [], []>} : vector<256x8xbf16>, vector<8x8xbf16>, vector<256x8xf32> -> vector<256x8xf32>
    %98 = arith.addf %92, %97 : vector<256x8xf32>
    %c2_103 = arith.constant 2 : index
    %c10_104 = arith.constant 10 : index
    %c0_105 = arith.constant 0 : index
    %99 = vector.load %arg13[%c2_103, %c10_104, %c0_105] : memref<20x32x8xbf16, #tpu.memory_space<vmem>>, vector<16x16x8xbf16>
    %100 = vector.shape_cast %99 : vector<16x16x8xbf16> to vector<256x8xbf16>
    %c5_106 = arith.constant 5 : index
    %c0_107 = arith.constant 0 : index
    %c0_108 = arith.constant 0 : index
    %101 = vector.load %arg3[%c5_106, %c0_107, %c0_108] : memref<9x8x8xbf16, #tpu.memory_space<vmem>>, vector<1x8x8xbf16>
    %102 = vector.shape_cast %101 : vector<1x8x8xbf16> to vector<8x8xbf16>
    %cst_109 = arith.constant dense<0.000000e+00> : vector<256x8xf32>
    %103 = tpu.matmul %100, %102, %cst_109 {dimension_numbers = #tpu.dot_dimension_numbers<[1], [0], [0], [1], [0, 0, 1, 1], [], []>} : vector<256x8xbf16>, vector<8x8xbf16>, vector<256x8xf32> -> vector<256x8xf32>
    %104 = arith.addf %98, %103 : vector<256x8xf32>
    %c4_110 = arith.constant 4 : index
    %c6_111 = arith.constant 6 : index
    %c0_112 = arith.constant 0 : index
    %105 = vector.load %arg13[%c4_110, %c6_111, %c0_112] : memref<20x32x8xbf16, #tpu.memory_space<vmem>>, vector<16x16x8xbf16>
    %106 = vector.shape_cast %105 : vector<16x16x8xbf16> to vector<256x8xbf16>
    %c6_113 = arith.constant 6 : index
    %c0_114 = arith.constant 0 : index
    %c0_115 = arith.constant 0 : index
    %107 = vector.load %arg3[%c6_113, %c0_114, %c0_115] : memref<9x8x8xbf16, #tpu.memory_space<vmem>>, vector<1x8x8xbf16>
    %108 = vector.shape_cast %107 : vector<1x8x8xbf16> to vector<8x8xbf16>
    %cst_116 = arith.constant dense<0.000000e+00> : vector<256x8xf32>
    %109 = tpu.matmul %106, %108, %cst_116 {dimension_numbers = #tpu.dot_dimension_numbers<[1], [0], [0], [1], [0, 0, 1, 1], [], []>} : vector<256x8xbf16>, vector<8x8xbf16>, vector<256x8xf32> -> vector<256x8xf32>
    %110 = arith.addf %104, %109 : vector<256x8xf32>
    %c4_117 = arith.constant 4 : index
    %c8_118 = arith.constant 8 : index
    %c0_119 = arith.constant 0 : index
    %111 = vector.load %arg13[%c4_117, %c8_118, %c0_119] : memref<20x32x8xbf16, #tpu.memory_space<vmem>>, vector<16x16x8xbf16>
    %112 = vector.shape_cast %111 : vector<16x16x8xbf16> to vector<256x8xbf16>
    %c7_120 = arith.constant 7 : index
    %c0_121 = arith.constant 0 : index
    %c0_122 = arith.constant 0 : index
    %113 = vector.load %arg3[%c7_120, %c0_121, %c0_122] : memref<9x8x8xbf16, #tpu.memory_space<vmem>>, vector<1x8x8xbf16>
    %114 = vector.shape_cast %113 : vector<1x8x8xbf16> to vector<8x8xbf16>
    %cst_123 = arith.constant dense<0.000000e+00> : vector<256x8xf32>
    %115 = tpu.matmul %112, %114, %cst_123 {dimension_numbers = #tpu.dot_dimension_numbers<[1], [0], [0], [1], [0, 0, 1, 1], [], []>} : vector<256x8xbf16>, vector<8x8xbf16>, vector<256x8xf32> -> vector<256x8xf32>
    %116 = arith.addf %110, %115 : vector<256x8xf32>
    %c4_124 = arith.constant 4 : index
    %c10_125 = arith.constant 10 : index
    %c0_126 = arith.constant 0 : index
    %117 = vector.load %arg13[%c4_124, %c10_125, %c0_126] : memref<20x32x8xbf16, #tpu.memory_space<vmem>>, vector<16x16x8xbf16>
    %118 = vector.shape_cast %117 : vector<16x16x8xbf16> to vector<256x8xbf16>
    %c8_127 = arith.constant 8 : index
    %c0_128 = arith.constant 0 : index
    %c0_129 = arith.constant 0 : index
    %119 = vector.load %arg3[%c8_127, %c0_128, %c0_129] : memref<9x8x8xbf16, #tpu.memory_space<vmem>>, vector<1x8x8xbf16>
    %120 = vector.shape_cast %119 : vector<1x8x8xbf16> to vector<8x8xbf16>
    %cst_130 = arith.constant dense<0.000000e+00> : vector<256x8xf32>
    %121 = tpu.matmul %118, %120, %cst_130 {dimension_numbers = #tpu.dot_dimension_numbers<[1], [0], [0], [1], [0, 0, 1, 1], [], []>} : vector<256x8xbf16>, vector<8x8xbf16>, vector<256x8xf32> -> vector<256x8xf32>
    %122 = arith.addf %116, %121 : vector<256x8xf32>
    %c0_131 = arith.constant 0 : index
    %c0_132 = arith.constant 0 : index
    %c0_133 = arith.constant 0 : index
    %c0_134 = arith.constant 0 : index
    %123 = vector.load %arg1[%c0_131, %c0_132, %c0_133, %c0_134] : memref<1x16x16x4xbf16, #tpu.memory_space<vmem>>, vector<1x16x16x4xbf16>
    %124 = vector.shape_cast %123 : vector<1x16x16x4xbf16> to vector<16x16x4xbf16>
    %125 = vector.shape_cast %124 : vector<16x16x4xbf16> to vector<256x4xbf16>
    %c0_135 = arith.constant 0 : index
    %c0_136 = arith.constant 0 : index
    %126 = vector.load %arg8[%c0_135, %c0_136] : memref<4x8xbf16, #tpu.memory_space<vmem>>, vector<4x8xbf16>
    %cst_137 = arith.constant dense<0.000000e+00> : vector<256x8xf32>
    %127 = tpu.matmul %125, %126, %cst_137 {dimension_numbers = #tpu.dot_dimension_numbers<[1], [0], [0], [1], [0, 0, 1, 1], [], []>} : vector<256x4xbf16>, vector<4x8xbf16>, vector<256x8xf32> -> vector<256x8xf32>
    %c0_138 = arith.constant 0 : index
    %c0_139 = arith.constant 0 : index
    %128 = vector.load %arg9[%c0_138, %c0_139] : memref<1x8xf32, #tpu.memory_space<vmem>>, vector<1x8xf32>
    %129 = vector.broadcast %128 : vector<1x8xf32> to vector<256x8xf32>
    %130 = arith.mulf %127, %129 : vector<256x8xf32>
    %c0_140 = arith.constant 0 : index
    %c0_141 = arith.constant 0 : index
    %131 = vector.load %arg10[%c0_140, %c0_141] : memref<1x8xf32, #tpu.memory_space<vmem>>, vector<1x8xf32>
    %132 = vector.broadcast %131 : vector<1x8xf32> to vector<256x8xf32>
    %133 = arith.addf %130, %132 : vector<256x8xf32>
    %c0_142 = arith.constant 0 : index
    %c0_143 = arith.constant 0 : index
    %134 = vector.load %arg6[%c0_142, %c0_143] : memref<1x8xf32, #tpu.memory_space<vmem>>, vector<1x8xf32>
    %135 = vector.broadcast %134 : vector<1x8xf32> to vector<256x8xf32>
    %136 = arith.mulf %122, %135 : vector<256x8xf32>
    %c0_144 = arith.constant 0 : index
    %c0_145 = arith.constant 0 : index
    %137 = vector.load %arg7[%c0_144, %c0_145] : memref<1x8xf32, #tpu.memory_space<vmem>>, vector<1x8xf32>
    %138 = vector.broadcast %137 : vector<1x8xf32> to vector<256x8xf32>
    %139 = arith.addf %136, %138 : vector<256x8xf32>
    %140 = arith.addf %139, %133 : vector<256x8xf32>
    %cst_146 = arith.constant 0.000000e+00 : f32
    %141 = vector.broadcast %cst_146 : f32 to vector<256x8xf32>
    %142 = arith.maximumf %140, %141 : vector<256x8xf32>
    %c0_147 = arith.constant 0 : index
    %c0_148 = arith.constant 0 : index
    %c0_149 = arith.constant 0 : index
    %143 = vector.load %arg11[%c0_147, %c0_148, %c0_149] : memref<1x256x8xf32, #tpu.memory_space<vmem>>, vector<1x256x8xf32>
    %144 = vector.shape_cast %143 : vector<1x256x8xf32> to vector<256x8xf32>
    %145 = vector.shape_cast %142 : vector<256x8xf32> to vector<1x256x8xf32>
    tpu.vector_store %arg11[%c0_147, %c0_148, %c0_149], %145 {strides = array<i32>} : memref<1x256x8xf32, #tpu.memory_space<vmem>>, vector<1x256x8xf32>,
    return
  }
  func.func @transform_0(%arg0: i32) -> (i32, i32, i32, i32) {
    %c0_i32 = arith.constant 0 : i32
    %c0_i32_0 = arith.constant 0 : i32
    %c0_i32_1 = arith.constant 0 : i32
    %c0_i32_2 = arith.constant 0 : i32
    return %arg0, %c0_i32, %c0_i32_0, %c0_i32_1 : i32, i32, i32, i32
  }
  func.func @transform_1(%arg0: i32) -> (i32, i32, i32) {
    %c0_i32 = arith.constant 0 : i32
    %c0_i32_0 = arith.constant 0 : i32
    %c0_i32_1 = arith.constant 0 : i32
    %c0_i32_2 = arith.constant 0 : i32
    return %c0_i32, %c0_i32_0, %c0_i32_1 : i32, i32, i32
  }
  func.func @transform_2(%arg0: i32) -> (i32, i32, i32) {
    %c0_i32 = arith.constant 0 : i32
    %c0_i32_0 = arith.constant 0 : i32
    %c0_i32_1 = arith.constant 0 : i32
    %c0_i32_2 = arith.constant 0 : i32
    return %c0_i32, %c0_i32_0, %c0_i32_1 : i32, i32, i32
  }
  func.func @transform_3(%arg0: i32) -> (i32, i32) {
    %c0_i32 = arith.constant 0 : i32
    %c0_i32_0 = arith.constant 0 : i32
    %c0_i32_1 = arith.constant 0 : i32
    return %c0_i32, %c0_i32_0 : i32, i32
  }
  func.func @transform_4(%arg0: i32) -> (i32, i32) {
    %c0_i32 = arith.constant 0 : i32
    %c0_i32_0 = arith.constant 0 : i32
    %c0_i32_1 = arith.constant 0 : i32
    return %c0_i32, %c0_i32_0 : i32, i32
  }
  func.func @transform_5(%arg0: i32) -> (i32, i32) {
    %c0_i32 = arith.constant 0 : i32
    %c0_i32_0 = arith.constant 0 : i32
    %c0_i32_1 = arith.constant 0 : i32
    return %c0_i32, %c0_i32_0 : i32, i32
  }
  func.func @transform_6(%arg0: i32) -> (i32, i32) {
    %c0_i32 = arith.constant 0 : i32
    %c0_i32_0 = arith.constant 0 : i32
    %c0_i32_1 = arith.constant 0 : i32
    return %c0_i32, %c0_i32_0 : i32, i32
  }
  func.func @transform_7(%arg0: i32) -> (i32, i32) {
    %c0_i32 = arith.constant 0 : i32
    %c0_i32_0 = arith.constant 0 : i32
    %c0_i32_1 = arith.constant 0 : i32
    return %c0_i32, %c0_i32_0 : i32, i32
  }
  func.func @transform_8(%arg0: i32) -> (i32, i32) {
    %c0_i32 = arith.constant 0 : i32
    %c0_i32_0 = arith.constant 0 : i32
    %c0_i32_1 = arith.constant 0 : i32
    return %c0_i32, %c0_i32_0 : i32, i32
  }
  func.func @transform_9(%arg0: i32) -> (i32, i32) {
    %c0_i32 = arith.constant 0 : i32
    %c0_i32_0 = arith.constant 0 : i32
    %c0_i32_1 = arith.constant 0 : i32
    return %c0_i32, %c0_i32_0 : i32, i32
  }
  func.func @transform_10(%arg0: i32) -> (i32, i32, i32) {
    %c0_i32 = arith.constant 0 : i32
    %c0_i32_0 = arith.constant 0 : i32
    %c0_i32_1 = arith.constant 0 : i32
    return %arg0, %c0_i32, %c0_i32_0 : i32, i32, i32
  }
}

</mosaic_0001>

<bundles_post_ra>
// kernel: tpu_custom_call.1
= control target key start
LH: loop header
LB: loop body
LE: loop exit
PB: predicated region body
PF: predicated region fallthrough
CT: control target
= control target key end

     0   :  { %s9051_s13 = smov 0   ;;  %s11913_s0 = inlined_call_operand.vmem [shape: bf16[2,16,16,4], index: 0, kind: input, shape index: {}]   ;;  %s11914_s1 = inlined_call_operand.vmem [shape: bf16[9,4,8], index: 1, kind: input, shape index: {}]   ;;  %s11915_s2 = inlined_call_operand.vmem [shape: bf16[9,8,8], index: 2, kind: input, shape index: {}]   ;;  %s11916_s3 = inlined_call_operand.vmem [shape: f32[1,8], index: 3, kind: input, shape index: {}]   ;;  %s11917_s4 = inlined_call_operand.vmem [shape: f32[1,8], index: 4, kind: input, shape index: {}]   ;;  %s11918_s5 = inlined_call_operand.vmem [shape: f32[1,8], index: 5, kind: input, shape index: {}]   ;;  %s11919_s6 = inlined_call_operand.vmem [shape: f32[1,8], index: 6, kind: input, shape index: {}]   ;;  %s11920_s7 = inlined_call_operand.vmem [shape: bf16[4,8], index: 7, kind: input, shape index: {}]   ;;  %s11921_s8 = inlined_call_operand.vmem [shape: f32[1,8], index: 8, kind: input, shape index: {}]   ;;  %s11922_s9 = inlined_call_operand.vmem [shape: f32[1,8], index: 9, kind: input, shape index: {}]   ;;  %s11923_s10 = inlined_call_operand.vmem [shape: f32[2,256,8], index: 10, kind: output, shape index: {}]  }
   0x1 LB: > { %s7877_s14 = sadd.s32 4294967295, %s8993_s13   ;;  %p7881_p0 = scmp.ge.s32.totalorder %s8993_s13, 1  ;;  %s8993_s13 = sphi %s9051_s13, %s20_s13  }
   0x2   : > { %p312_p1 = scmp.lt.s32.totalorder %s8993_s13, 3 }
   0x4   : > { %p313_p2 = pnand %p7881_p0, %p312_p1 }
   0x6   : > { %316 = sbr.rel (%p313_p2) target bundleno = 1679 (0x68f), region = 60 }
   0xb   : > { %p350_p3 = scmp.lt.s32.totalorder %s7877_s14, 1  ;;  %p7886_p4 = scmp.ne.s32.totalorder %s7877_s14, 0 }
   0xd   : > { %s351_s15 = scalar_select %p350_p3, %s7877_s14, 1 }
   0xe   : > { %364 = sbr.rel (%p7886_p4) target bundleno = 180 (0xb4), region = 64 }
   0xf   : > { %s8849_s16 = sshll.u32 %s351_s15, 7  ;;  %s8850_s17 = sshll.u32 %s351_s15, 8 }
  0x10   : > { %s9062_s20 = scalar_lea.vmem %s11913_s0, %s8849_s16  ;;  %s9067_s23 = scalar_lea.vmem %s11923_s10, %s8850_s17 }
  0x13   : > { %vm365_vm0 = vcmask 27648   ;;  %v8995_v0 = vmov 0   ;;  %vm446_vm1 = vcmask 60416  }
  0x14   : > { %366 = vst.msk [vmem:[#allocation2] sm:$0xf] %vm365_vm0, %v8995_v0 }
  0x15   : > { %367 = vst.msk [vmem:[#allocation2 + $0x4] sm:$0xf] %vm365_vm0, %v8995_v0 }
  0x16   : > { %368 = vst.msk [vmem:[#allocation2 + $0x8] sm:$0xf] %vm365_vm0, %v8995_v0 }
  0x17   : > { %369 = vst.msk [vmem:[#allocation2 + $0xc] sm:$0xf] %vm365_vm0, %v8995_v0 }
  0x18   : > { %370 = vst.msk [vmem:[#allocation2 + $0x10] sm:$0xf] %vm365_vm0, %v8995_v0 }
  0x19   : > { %371 = vst.msk [vmem:[#allocation2 + $0x14] sm:$0xf] %vm365_vm0, %v8995_v0 }
  0x1a   : > { %372 = vst.msk [vmem:[#allocation2 + $0x18] sm:$0xf] %vm365_vm0, %v8995_v0 }
  0x1b   : > { %373 = vst.msk [vmem:[#allocation2 + $0x1c] sm:$0xf] %vm365_vm0, %v8995_v0 }
  0x1c   : > { %374 = vst.msk [vmem:[#allocation2 + $0x20] sm:$0xf] %vm365_vm0, %v8995_v0 }
  0x1d   : > { %375 = vst.msk [vmem:[#allocation2 + $0x24] sm:$0xf] %vm365_vm0, %v8995_v0 }
  0x1e   : > { %376 = vst.msk [vmem:[#allocation2 + $0x28] sm:$0xf] %vm365_vm0, %v8995_v0 }
  0x1f   : > { %377 = vst.msk [vmem:[#allocation2 + $0x2c] sm:$0xf] %vm365_vm0, %v8995_v0 }
  0x20   : > { %378 = vst.msk [vmem:[#allocation2 + $0x30] sm:$0xf] %vm365_vm0, %v8995_v0 }
  0x21   : > { %379 = vst.msk [vmem:[#allocation2 + $0x34] sm:$0xf] %vm365_vm0, %v8995_v0 }
  0x22   : > { %380 = vst.msk [vmem:[#allocation2 + $0x38] sm:$0xf] %vm365_vm0, %v8995_v0 }
  0x23   : > { %381 = vst.msk [vmem:[#allocation2 + $0x3c] sm:$0xf] %vm365_vm0, %v8995_v0 }
  0x24   : > { %382 = vst.msk [vmem:[#allocation2 + $0x40] sm:$0xf] %vm365_vm0, %v8995_v0 }
  0x25   : > { %383 = vst.msk [vmem:[#allocation2 + $0x44] sm:$0xf] %vm365_vm0, %v8995_v0 }
  0x26   : > { %384 = vst.msk [vmem:[#allocation2 + $0x48] sm:$0xf] %vm365_vm0, %v8995_v0 }
  0x27   : > { %385 = vst.msk [vmem:[#allocation2 + $0x4c] sm:$0xf] %vm365_vm0, %v8995_v0 }
  0x28   : > { %386 = vst.msk [vmem:[#allocation2 + $0x50] sm:$0xf] %vm365_vm0, %v8995_v0 }
  0x29   : > { %387 = vst.msk [vmem:[#allocation2 + $0x54] sm:$0xf] %vm365_vm0, %v8995_v0 }
  0x2a   : > { %388 = vst.msk [vmem:[#allocation2 + $0x58] sm:$0xf] %vm365_vm0, %v8995_v0 }
  0x2b   : > { %389 = vst.msk [vmem:[#allocation2 + $0x5c] sm:$0xf] %vm365_vm0, %v8995_v0 }
  0x2c   : > { %390 = vst.msk [vmem:[#allocation2 + $0x60] sm:$0xf] %vm365_vm0, %v8995_v0 }
  0x2d   : > { %391 = vst.msk [vmem:[#allocation2 + $0x64] sm:$0xf] %vm365_vm0, %v8995_v0 }
  0x2e   : > { %392 = vst.msk [vmem:[#allocation2 + $0x68] sm:$0xf] %vm365_vm0, %v8995_v0 }
  0x2f   : > { %393 = vst.msk [vmem:[#allocation2 + $0x6c] sm:$0xf] %vm365_vm0, %v8995_v0 }
  0x30   : > { %394 = vst.msk [vmem:[#allocation2 + $0x70] sm:$0xf] %vm365_vm0, %v8995_v0 }
  0x31   : > { %395 = vst.msk [vmem:[#allocation2 + $0x74] sm:$0xf] %vm365_vm0, %v8995_v0 }
  0x32   : > { %396 = vst.msk [vmem:[#allocation2 + $0x78] sm:$0xf] %vm365_vm0, %v8995_v0 }
  0x33   : > { %397 = vst.msk [vmem:[#allocation2 + $0x7c] sm:$0xf] %vm365_vm0, %v8995_v0 }
  0x34   : > { %398 = vst.msk [vmem:[#allocation2 + $0x80] sm:$0xf] %vm365_vm0, %v8995_v0 }
  0x35   : > { %399 = vst.msk [vmem:[#allocation2 + $0x84] sm:$0xf] %vm365_vm0, %v8995_v0 }
  0x36   : > { %400 = vst.msk [vmem:[#allocation2 + $0x88] sm:$0xf] %vm365_vm0, %v8995_v0 }
  0x37   : > { %401 = vst.msk [vmem:[#allocation2 + $0x8c] sm:$0xf] %vm365_vm0, %v8995_v0 }
  0x38   : > { %402 = vst.msk [vmem:[#allocation2 + $0x90] sm:$0xf] %vm365_vm0, %v8995_v0 }
  0x39   : > { %403 = vst.msk [vmem:[#allocation2 + $0x94] sm:$0xf] %vm365_vm0, %v8995_v0 }
  0x3a   : > { %404 = vst.msk [vmem:[#allocation2 + $0x98] sm:$0xf] %vm365_vm0, %v8995_v0 }
  0x3b   : > { %405 = vst.msk [vmem:[#allocation2 + $0x9c] sm:$0xf] %vm365_vm0, %v8995_v0 }
  0x3c   : > { %406 = vst.msk [vmem:[#allocation2 + $0xa0] sm:$0xf] %vm365_vm0, %v8995_v0 }
  0x3d   : > { %407 = vst.msk [vmem:[#allocation2 + $0xa4] sm:$0xf] %vm365_vm0, %v8995_v0 }
  0x3e   : > { %408 = vst.msk [vmem:[#allocation2 + $0xa8] sm:$0xf] %vm365_vm0, %v8995_v0 }
  0x3f   : > { %409 = vst.msk [vmem:[#allocation2 + $0xac] sm:$0xf] %vm365_vm0, %v8995_v0 }
  0x40   : > { %410 = vst.msk [vmem:[#allocation2 + $0xb0] sm:$0xf] %vm365_vm0, %v8995_v0 }
  0x41   : > { %411 = vst.msk [vmem:[#allocation2 + $0xb4] sm:$0xf] %vm365_vm0, %v8995_v0 }
  0x42   : > { %412 = vst.msk [vmem:[#allocation2 + $0xb8] sm:$0xf] %vm365_vm0, %v8995_v0 }
  0x43   : > { %413 = vst.msk [vmem:[#allocation2 + $0xbc] sm:$0xf] %vm365_vm0, %v8995_v0 }
  0x44   : > { %414 = vst.msk [vmem:[#allocation2 + $0xc0] sm:$0xf] %vm365_vm0, %v8995_v0 }
  0x45   : > { %415 = vst.msk [vmem:[#allocation2 + $0xc4] sm:$0xf] %vm365_vm0, %v8995_v0 }
  0x46   : > { %416 = vst.msk [vmem:[#allocation2 + $0xc8] sm:$0xf] %vm365_vm0, %v8995_v0 }
  0x47   : > { %417 = vst.msk [vmem:[#allocation2 + $0xcc] sm:$0xf] %vm365_vm0, %v8995_v0 }
  0x48   : > { %418 = vst.msk [vmem:[#allocation2 + $0xd0] sm:$0xf] %vm365_vm0, %v8995_v0 }
  0x49   : > { %419 = vst.msk [vmem:[#allocation2 + $0xd4] sm:$0xf] %vm365_vm0, %v8995_v0 }
  0x4a   : > { %420 = vst.msk [vmem:[#allocation2 + $0xd8] sm:$0xf] %vm365_vm0, %v8995_v0 }
  0x4b   : > { %421 = vst.msk [vmem:[#allocation2 + $0xdc] sm:$0xf] %vm365_vm0, %v8995_v0 }
  0x4c   : > { %422 = vst.msk [vmem:[#allocation2 + $0xe0] sm:$0xf] %vm365_vm0, %v8995_v0 }
  0x4d   : > { %423 = vst.msk [vmem:[#allocation2 + $0xe4] sm:$0xf] %vm365_vm0, %v8995_v0 }
  0x4e   : > { %424 = vst.msk [vmem:[#allocation2 + $0xe8] sm:$0xf] %vm365_vm0, %v8995_v0 }
  0x4f   : > { %425 = vst.msk [vmem:[#allocation2 + $0xec] sm:$0xf] %vm365_vm0, %v8995_v0 }
  0x50   : > { %426 = vst.msk [vmem:[#allocation2 + $0xf0] sm:$0xf] %vm365_vm0, %v8995_v0 }
  0x51   : > { %427 = vst.msk [vmem:[#allocation2 + $0xf4] sm:$0xf] %vm365_vm0, %v8995_v0 }
  0x52   : > { %428 = vst.msk [vmem:[#allocation2 + $0xf8] sm:$0xf] %vm365_vm0, %v8995_v0 }
  0x53   : > { %429 = vst.msk [vmem:[#allocation2 + $0xfc] sm:$0xf] %vm365_vm0, %v8995_v0 }
  0x54   : > { %430 = vst.msk [vmem:[#allocation2 + $0x100] sm:$0xf] %vm365_vm0, %v8995_v0 }
  0x55   : > { %431 = vst.msk [vmem:[#allocation2 + $0x104] sm:$0xf] %vm365_vm0, %v8995_v0 }
  0x56   : > { %432 = vst.msk [vmem:[#allocation2 + $0x108] sm:$0xf] %vm365_vm0, %v8995_v0 }
  0x57   : > { %433 = vst.msk [vmem:[#allocation2 + $0x10c] sm:$0xf] %vm365_vm0, %v8995_v0 }
  0x58   : > { %434 = vst.msk [vmem:[#allocation2 + $0x110] sm:$0xf] %vm365_vm0, %v8995_v0 }
  0x59   : > { %435 = vst.msk [vmem:[#allocation2 + $0x114] sm:$0xf] %vm365_vm0, %v8995_v0 }
  0x5a   : > { %436 = vst.msk [vmem:[#allocation2 + $0x118] sm:$0xf] %vm365_vm0, %v8995_v0 }
  0x5b   : > { %437 = vst.msk [vmem:[#allocation2 + $0x11c] sm:$0xf] %vm365_vm0, %v8995_v0 }
  0x5c   : > { %438 = vst.msk [vmem:[#allocation2 + $0x120] sm:$0xf] %vm365_vm0, %v8995_v0 }
  0x5d   : > { %439 = vst.msk [vmem:[#allocation2 + $0x124] sm:$0xf] %vm365_vm0, %v8995_v0 }
  0x5e   : > { %440 = vst.msk [vmem:[#allocation2 + $0x128] sm:$0xf] %vm365_vm0, %v8995_v0 }
  0x5f   : > { %441 = vst.msk [vmem:[#allocation2 + $0x12c] sm:$0xf] %vm365_vm0, %v8995_v0 }
  0x60   : > { %442 = vst.msk [vmem:[#allocation2 + $0x130] sm:$0xf] %vm365_vm0, %v8995_v0 }
  0x61   : > { %443 = vst.msk [vmem:[#allocation2 + $0x134] sm:$0xf] %vm365_vm0, %v8995_v0 }
  0x62   : > { %444 = vst.msk [vmem:[#allocation2 + $0x138] sm:$0xf] %vm365_vm0, %v8995_v0 }
  0x63   : > { %445 = vst.msk [vmem:[#allocation2 + $0x13c] sm:$0xf] %vm365_vm0, %v8995_v0 }
  0x64   : > { %447 = vst.msk [vmem:[#allocation3] sm:$0xf] %vm446_vm1, %v8995_v0 }
  0x65   : > { %448 = vst.msk [vmem:[#allocation3 + $0x4] sm:$0xf] %vm446_vm1, %v8995_v0 }
  0x66   : > { %449 = vst.msk [vmem:[#allocation3 + $0x8] sm:$0xf] %vm446_vm1, %v8995_v0 }
  0x67   : > { %450 = vst.msk [vmem:[#allocation3 + $0xc] sm:$0xf] %vm446_vm1, %v8995_v0 }
  0x68   : > { %451 = vst.msk [vmem:[#allocation3 + $0x10] sm:$0xf] %vm446_vm1, %v8995_v0 }
  0x69   : > { %452 = vst.msk [vmem:[#allocation3 + $0x14] sm:$0xf] %vm446_vm1, %v8995_v0 }
  0x6a   : > { %453 = vst.msk [vmem:[#allocation3 + $0x18] sm:$0xf] %vm446_vm1, %v8995_v0 }
  0x6b   : > { %454 = vst.msk [vmem:[#allocation3 + $0x1c] sm:$0xf] %vm446_vm1, %v8995_v0 }
  0x6c   : > { %455 = vst.msk [vmem:[#allocation3 + $0x20] sm:$0xf] %vm446_vm1, %v8995_v0 }
  0x6d   : > { %456 = vst.msk [vmem:[#allocation3 + $0x24] sm:$0xf] %vm446_vm1, %v8995_v0 }
  0x6e   : > { %457 = vst.msk [vmem:[#allocation3 + $0x28] sm:$0xf] %vm446_vm1, %v8995_v0 }
  0x6f   : > { %458 = vst.msk [vmem:[#allocation3 + $0x2c] sm:$0xf] %vm446_vm1, %v8995_v0 }
  0x70   : > { %459 = vst.msk [vmem:[#allocation3 + $0x30] sm:$0xf] %vm446_vm1, %v8995_v0 }
  0x71   : > { %460 = vst.msk [vmem:[#allocation3 + $0x34] sm:$0xf] %vm446_vm1, %v8995_v0 }
  0x72   : > { %461 = vst.msk [vmem:[#allocation3 + $0x38] sm:$0xf] %vm446_vm1, %v8995_v0 }
  0x73   : > { %462 = vst.msk [vmem:[#allocation3 + $0x3c] sm:$0xf] %vm446_vm1, %v8995_v0 }
  0x74   : > { %463 = vst.msk [vmem:[#allocation3 + $0x40] sm:$0xf] %vm446_vm1, %v8995_v0 }
  0x75   : > { %464 = vst.msk [vmem:[#allocation3 + $0x44] sm:$0xf] %vm446_vm1, %v8995_v0 }
  0x76   : > { %465 = vst.msk [vmem:[#allocation3 + $0x48] sm:$0xf] %vm446_vm1, %v8995_v0 }
  0x77   : > { %466 = vst.msk [vmem:[#allocation3 + $0x4c] sm:$0xf] %vm446_vm1, %v8995_v0 }
  0x78   : > { %467 = vst.msk [vmem:[#allocation3 + $0x50] sm:$0xf] %vm446_vm1, %v8995_v0 }
  0x79   : > { %468 = vst.msk [vmem:[#allocation3 + $0x54] sm:$0xf] %vm446_vm1, %v8995_v0 }
  0x7a   : > { %469 = vst.msk [vmem:[#allocation3 + $0x58] sm:$0xf] %vm446_vm1, %v8995_v0 }
  0x7b   : > { %470 = vst.msk [vmem:[#allocation3 + $0x5c] sm:$0xf] %vm446_vm1, %v8995_v0 }
  0x7c   : > { %471 = vst.msk [vmem:[#allocation3 + $0x60] sm:$0xf] %vm446_vm1, %v8995_v0 }
  0x7d   : > { %472 = vst.msk [vmem:[#allocation3 + $0x64] sm:$0xf] %vm446_vm1, %v8995_v0 }
  0x7e   : > { %473 = vst.msk [vmem:[#allocation3 + $0x68] sm:$0xf] %vm446_vm1, %v8995_v0 }
  0x7f   : > { %474 = vst.msk [vmem:[#allocation3 + $0x6c] sm:$0xf] %vm446_vm1, %v8995_v0 }
  0x80   : > { %475 = vst.msk [vmem:[#allocation3 + $0x70] sm:$0xf] %vm446_vm1, %v8995_v0 }
  0x81   : > { %476 = vst.msk [vmem:[#allocation3 + $0x74] sm:$0xf] %vm446_vm1, %v8995_v0 }
  0x82   : > { %477 = vst.msk [vmem:[#allocation3 + $0x78] sm:$0xf] %vm446_vm1, %v8995_v0 }
  0x83   : > { %478 = vst.msk [vmem:[#allocation3 + $0x7c] sm:$0xf] %vm446_vm1, %v8995_v0 }
  0x84   : > { %479 = vst.msk [vmem:[#allocation3 + $0x80] sm:$0xf] %vm446_vm1, %v8995_v0 }
  0x85   : > { %480 = vst.msk [vmem:[#allocation3 + $0x84] sm:$0xf] %vm446_vm1, %v8995_v0 }
  0x86   : > { %481 = vst.msk [vmem:[#allocation3 + $0x88] sm:$0xf] %vm446_vm1, %v8995_v0 }
  0x87   : > { %482 = vst.msk [vmem:[#allocation3 + $0x8c] sm:$0xf] %vm446_vm1, %v8995_v0 }
  0x88   : > { %483 = vst.msk [vmem:[#allocation3 + $0x90] sm:$0xf] %vm446_vm1, %v8995_v0 }
  0x89   : > { %484 = vst.msk [vmem:[#allocation3 + $0x94] sm:$0xf] %vm446_vm1, %v8995_v0 }
  0x8a   : > { %485 = vst.msk [vmem:[#allocation3 + $0x98] sm:$0xf] %vm446_vm1, %v8995_v0 }
  0x8b   : > { %486 = vst.msk [vmem:[#allocation3 + $0x9c] sm:$0xf] %vm446_vm1, %v8995_v0 }
  0x8c   : > { %487 = vst.msk [vmem:[#allocation3 + $0xa0] sm:$0xf] %vm446_vm1, %v8995_v0 }
  0x8d   : > { %488 = vst.msk [vmem:[#allocation3 + $0xa4] sm:$0xf] %vm446_vm1, %v8995_v0 }
  0x8e   : > { %489 = vst.msk [vmem:[#allocation3 + $0xa8] sm:$0xf] %vm446_vm1, %v8995_v0 }
  0x8f   : > { %490 = vst.msk [vmem:[#allocation3 + $0xac] sm:$0xf] %vm446_vm1, %v8995_v0 }
  0x90   : > { %491 = vst.msk [vmem:[#allocation3 + $0xb0] sm:$0xf] %vm446_vm1, %v8995_v0 }
  0x91   : > { %492 = vst.msk [vmem:[#allocation3 + $0xb4] sm:$0xf] %vm446_vm1, %v8995_v0 }
  0x92   : > { %493 = vst.msk [vmem:[#allocation3 + $0xb8] sm:$0xf] %vm446_vm1, %v8995_v0 }
  0x93   : > { %494 = vst.msk [vmem:[#allocation3 + $0xbc] sm:$0xf] %vm446_vm1, %v8995_v0 }
  0x94   : > { %495 = vst.msk [vmem:[#allocation3 + $0xc0] sm:$0xf] %vm446_vm1, %v8995_v0 }
  0x95   : > { %496 = vst.msk [vmem:[#allocation3 + $0xc4] sm:$0xf] %vm446_vm1, %v8995_v0 }
  0x96   : > { %497 = vst.msk [vmem:[#allocation3 + $0xc8] sm:$0xf] %vm446_vm1, %v8995_v0 }
  0x97   : > { %498 = vst.msk [vmem:[#allocation3 + $0xcc] sm:$0xf] %vm446_vm1, %v8995_v0 }
  0x98   : > { %499 = vst.msk [vmem:[#allocation3 + $0xd0] sm:$0xf] %vm446_vm1, %v8995_v0 }
  0x99   : > { %500 = vst.msk [vmem:[#allocation3 + $0xd4] sm:$0xf] %vm446_vm1, %v8995_v0 }
  0x9a   : > { %501 = vst.msk [vmem:[#allocation3 + $0xd8] sm:$0xf] %vm446_vm1, %v8995_v0 }
  0x9b   : > { %502 = vst.msk [vmem:[#allocation3 + $0xdc] sm:$0xf] %vm446_vm1, %v8995_v0 }
  0x9c   : > { %503 = vst.msk [vmem:[#allocation3 + $0xe0] sm:$0xf] %vm446_vm1, %v8995_v0 }
  0x9d   : > { %504 = vst.msk [vmem:[#allocation3 + $0xe4] sm:$0xf] %vm446_vm1, %v8995_v0 }
  0x9e   : > { %505 = vst.msk [vmem:[#allocation3 + $0xe8] sm:$0xf] %vm446_vm1, %v8995_v0 }
  0x9f   : > { %506 = vst.msk [vmem:[#allocation3 + $0xec] sm:$0xf] %vm446_vm1, %v8995_v0 }
  0xa0   : > { %507 = vst.msk [vmem:[#allocation3 + $0xf0] sm:$0xf] %vm446_vm1, %v8995_v0 }
  0xa1   : > { %508 = vst.msk [vmem:[#allocation3 + $0xf4] sm:$0xf] %vm446_vm1, %v8995_v0 }
  0xa2   : > { %509 = vst.msk [vmem:[#allocation3 + $0xf8] sm:$0xf] %vm446_vm1, %v8995_v0 }
  0xa3   : > { %510 = vst.msk [vmem:[#allocation3 + $0xfc] sm:$0xf] %vm446_vm1, %v8995_v0 }
  0xa4   : > { %511 = vst.msk [vmem:[#allocation3 + $0x100] sm:$0xf] %vm446_vm1, %v8995_v0 }
  0xa5   : > { %512 = vst.msk [vmem:[#allocation3 + $0x104] sm:$0xf] %vm446_vm1, %v8995_v0 }
  0xa6   : > { %513 = vst.msk [vmem:[#allocation3 + $0x108] sm:$0xf] %vm446_vm1, %v8995_v0 }
  0xa7   : > { %514 = vst.msk [vmem:[#allocation3 + $0x10c] sm:$0xf] %vm446_vm1, %v8995_v0 }
  0xa8   : > { %515 = vst.msk [vmem:[#allocation3 + $0x110] sm:$0xf] %vm446_vm1, %v8995_v0 }
  0xa9   : > { %516 = vst.msk [vmem:[#allocation3 + $0x114] sm:$0xf] %vm446_vm1, %v8995_v0 }
  0xaa   : > { %517 = vst.msk [vmem:[#allocation3 + $0x118] sm:$0xf] %vm446_vm1, %v8995_v0 }
  0xab   : > { %518 = vst.msk [vmem:[#allocation3 + $0x11c] sm:$0xf] %vm446_vm1, %v8995_v0 }
  0xac   : > { %519 = vst.msk [vmem:[#allocation3 + $0x120] sm:$0xf] %vm446_vm1, %v8995_v0 }
  0xad   : > { %520 = vst.msk [vmem:[#allocation3 + $0x124] sm:$0xf] %vm446_vm1, %v8995_v0 }
  0xae   : > { %521 = vst.msk [vmem:[#allocation3 + $0x128] sm:$0xf] %vm446_vm1, %v8995_v0 }
  0xaf   : > { %522 = vst.msk [vmem:[#allocation3 + $0x12c] sm:$0xf] %vm446_vm1, %v8995_v0 }
  0xb0   : > { %523 = vst.msk [vmem:[#allocation3 + $0x130] sm:$0xf] %vm446_vm1, %v8995_v0 }
  0xb1   : > { %524 = vst.msk [vmem:[#allocation3 + $0x134] sm:$0xf] %vm446_vm1, %v8995_v0 }
  0xb2   : > { %525 = vst.msk [vmem:[#allocation3 + $0x138] sm:$0xf] %vm446_vm1, %v8995_v0 }
  0xb3   : > { %526 = vst.msk [vmem:[#allocation3 + $0x13c] sm:$0xf] %vm446_vm1, %v8995_v0 }
  0xb4 PF: > { %v7903_v1 = vld [vmem:[%s11914_s1 + $0x2] sm:$0x3]  ;;  %vm936_vm2 = vcmask 1041408   ;;  %v8851_v2 = vld [vmem:[#allocation2 + $0x4] sm:$0xff]  ;;  %vm887_vm3 = vcmask 31744   ;;  %vm1313_vm4 = vcmask 1042432  }
  0xb5   : > { %v938_v3 = vsel %vm936_vm2, %v7903_v1, 0  ;;  %v8016_v4 = vld [vmem:[%s11914_s1 + $0x4] sm:$0x3]  ;;  %v804_v5 = vld [vmem:[%s11914_s1] sm:$0x3]  ;;  %vm1314_vm5 = vcmask 1046532  }
  0xb6   : > { %947 = vmatpush.bf16.msra.mxu0 %v938_v3  ;;  %v9400_v6 = vsel %vm936_vm2, %v8016_v4, 0  ;;  %8963 = vmatpush.bf16.msra.mxu3 %v938_v3  ;;  %v1126_v7 = vsel %vm936_vm2, %v804_v5, 0  ;;  %v1217_v8 = vld [vmem:[#allocation2 + $0x4] sm:$0xe]  ;;  %v1218_v9 = vld [vmem:[#allocation2 + $0x8] sm:$0xf]  ;;  %vm9403_vm6 = vmor %vm1313_vm4, %vm1314_vm5 }
  0xb7   : > { %1536 = vmatpush.bf16.msra.mxu2 %v9400_v6  ;;  %1135 = vmatpush.bf16.msra.mxu1 %v1126_v7  ;;  %v1219_v11 = vld [vmem:[#allocation2 + $0xc] sm:$0x1]  ;;  %v8000_v12 = vrot.slane %v1217_v8, 9  ;;  %v1318_v13 = vrot.slane %v1218_v9, 5  ;;  %v547_v14 = vld [vmem:[%s9062_s20 + $0x50] sm:$0xf] }
  0xb8   : > { %v1321_v15 = vrot.slane %v1219_v11, 5  ;;  %v548_v16 = vld [vmem:[%s9062_s20 + $0x54] sm:$0xf]  ;;  %vm560_vm7 = vcmask 27648   ;;  %v593_v17 = vld [vmem:[#allocation2] sm:$0x8] }
  0xb9   : > { %7968 = vmatmul.msk.bf16.vlgmr.msra.gmra.mxu0 %vm887_vm3, %v8851_v2  ;;  %v1319_v18 = vsel %vm9403_vm6, %v8000_v12, %v1318_v13  ;;  %v1320_v19 = vrot.slane %v1318_v13, 4  ;;  %581 = vst.msk [vmem:[#allocation2 + $0xc4] sm:$0xf] %vm560_vm7, %v547_v14  ;;  %v594_v20 = vld [vmem:[#allocation2 + $0x4] sm:$0xf]  ;;  %vm689_vm8 = vcmask 1040384  }
  0xba   : > { %8964 = vmatpush.bf16.msrb.mxu3 %v1126_v7  ;;  %v1430_v21 = vunpack.c.l.b16 %v1319_v18  ;;  %582 = vst.msk [vmem:[#allocation2 + $0xc8] sm:$0xf] %vm560_vm7, %v548_v16  ;;  %v595_v22 = vld [vmem:[#allocation2 + $0x8] sm:$0x7]  ;;  %vm690_vm9 = vcmask 1044484   ;;  %v7887_v23 = vrot.slane %v593_v17, 11 }
  0xbb   : > { %v1322_v24 = vsel %vm9403_vm6, %v1320_v19, %v1321_v15  ;;  %vm9417_vm10 = vmor %vm689_vm8, %vm690_vm9  ;;  %v694_v26 = vrot.slane %v594_v20, 7  ;;  %v697_v27 = vrot.slane %v595_v22, 7  ;;  %v8066_v28 = vld [vmem:[%s11914_s1 + $0x8] sm:$0x3]  ;;  %v1220_v31 = vld [vmem:[#allocation2 + $0x14] sm:$0xe] }
  0xbc   : > { %v1431_v29 = vunpack.c.l.b16 %v1322_v24  ;;  %v2211_v30 = vsel %vm936_vm2, %v8066_v28, 0  ;;  %v1221_v32 = vld [vmem:[#allocation2 + $0x18] sm:$0xf]  ;;  %v1222_v35 = vld [vmem:[#allocation2 + $0x1c] sm:$0x1]  ;;  %v8001_v42 = vrot.slane %v1220_v31, 9 }
  0xbd   : > { %v695_v33 = vsel %vm9417_vm10, %v7887_v23, %v694_v26  ;;  %v696_v34 = vrot.slane %v694_v26, 4  ;;  %2220 = vmatpush.bf16.msrb.mxu0 %v2211_v30  ;;  %v1325_v36 = vrot.slane %v1221_v32, 5  ;;  %v549_v39 = vld [vmem:[%s9062_s20 + $0x58] sm:$0xf]  ;;  %v550_v40 = vld [vmem:[%s9062_s20 + $0x5c] sm:$0xf] }
  0xbe   : > { %v1462_v37 = vpack.c.b16 %v1431_v29, %v1430_v21  ;;  %v1029_v38 = vunpack.c.l.b16 %v695_v33  ;;  %583 = vst.msk [vmem:[#allocation2 + $0xd4] sm:$0xf] %vm560_vm7, %v549_v39  ;;  %v1328_v45 = vrot.slane %v1222_v35, 5  ;;  %v597_v46 = vld [vmem:[#allocation2 + $0x14] sm:$0xf]  ;;  %vm4389_vm11 = vcmask 1043456  }
  0xbf   : > { %v698_v41 = vsel %vm9417_vm10, %v696_v34, %v697_v27  ;;  %v1327_v44 = vrot.slane %v1325_v36, 4  ;;  %584 = vst.msk [vmem:[#allocation2 + $0xd8] sm:$0xf] %vm560_vm7, %v550_v40  ;;  %v596_v48 = vld [vmem:[#allocation2 + $0x10] sm:$0x8]  ;;  %v701_v49 = vrot.slane %v597_v46, 7  ;;  %v1326_v58 = vsel %vm9403_vm6, %v8001_v42, %v1325_v36 }
  0xc0   : > { %8017 = vmatmul.msk.bf16.vlgmr.msra.gmra.mxu2 %vm887_vm3, %v1462_v37  ;;  %v1030_v43 = vunpack.c.l.b16 %v698_v41  ;;  %v527_v50 = vld [vmem:[%s9062_s20] sm:$0xf]  ;;  %v598_v52 = vld [vmem:[#allocation2 + $0x18] sm:$0x7]  ;;  %v528_v53 = vld [vmem:[%s9062_s20 + $0x4] sm:$0xf]  ;;  %v1432_v0 = vunpack.c.l.b16 %v1326_v58 }
  0xc1   : > { %v8863_v47 = vld [vmem:[#allocation2 + $0xc4] sm:$0xff]  ;;  %561 = vst.msk [vmem:[#allocation2 + $0x24] sm:$0xf] %vm560_vm7, %v527_v50  ;;  %v551_v54 = vld [vmem:[%s9062_s20 + $0x60] sm:$0xf]  ;;  %v8852_v55 = vld [vmem:[#allocation2 + $0x14] sm:$0xff]  ;;  %v1329_v59 = vsel %vm9403_vm6, %v1327_v44, %v1328_v45 }
  0xc2   : > { %v1061_v51 = vpack.c.b16 %v1030_v43, %v1029_v38  ;;  %7980 = vmatmul.msk.bf16.vlgmr.msra.gmra.mxu3 %vm887_vm3, %v8863_v47  ;;  %562 = vst.msk [vmem:[#allocation2 + $0x28] sm:$0xf] %vm560_vm7, %v528_v53  ;;  %v7888_v56 = vrot.slane %v596_v48, 11  ;;  %v552_v57 = vld [vmem:[%s9062_s20 + $0x64] sm:$0xf]  ;;  %v703_v60 = vrot.slane %v701_v49, 4  ;;  %v1433_v1 = vunpack.c.l.b16 %v1329_v59 }
  0xc3   : > { %585 = vst.msk [vmem:[#allocation2 + $0xe4] sm:$0xf] %vm560_vm7, %v551_v54  ;;  %8965 = vmatpush.bf16.msra.mxu3 %v9400_v6  ;;  %v704_v61 = vrot.slane %v598_v52, 7  ;;  %v529_v62 = vld [vmem:[%s9062_s20 + $0x8] sm:$0xf]  ;;  %vm4340_vm12 = vcmask 64512  }
  0xc4   : > { %7984 = vmatmul.msk.bf16.vlgmr.msra.gmra.mxu1 %vm887_vm3, %v1061_v51  ;;  %586 = vst.msk [vmem:[#allocation2 + $0xe8] sm:$0xf] %vm560_vm7, %v552_v57  ;;  %v530_v63 = vld [vmem:[%s9062_s20 + $0xc] sm:$0xf]  ;;  %v702_v2 = vsel %vm9417_vm10, %v7888_v56, %v701_v49  ;;  %v553_v5 = vld [vmem:[%s9062_s20 + $0x68] sm:$0xf]  ;;  %v1463_v6 = vpack.c.b16 %v1433_v1, %v1432_v0 }
  0xc5   : > { %563 = vst.msk [vmem:[#allocation2 + $0x34] sm:$0xf] %vm560_vm7, %v529_v62  ;;  %v705_v3 = vsel %vm9417_vm10, %v703_v60, %v704_v61  ;;  %v1031_v7 = vunpack.c.l.b16 %v702_v2  ;;  %v554_v9 = vld [vmem:[%s9062_s20 + $0x6c] sm:$0xf]  ;;  %v599_v20 = vld [vmem:[#allocation2 + $0x20] sm:$0x8] }
  0xc6   : > { %564 = vst.msk [vmem:[#allocation2 + $0x38] sm:$0xf] %vm560_vm7, %v530_v63  ;;  %v1032_v8 = vunpack.c.l.b16 %v705_v3  ;;  %v1225_v13 = vld [vmem:[#allocation2 + $0x2c] sm:$0x1]  ;;  %v8864_v15 = vld [vmem:[#allocation2 + $0xd4] sm:$0xff]  ;;  %v7889_v26 = vrot.slane %v599_v20, 11 }
  0xc7   : > { %587 = vst.msk [vmem:[#allocation2 + $0xf4] sm:$0xf] %vm560_vm7, %v553_v5  ;;  %v1335_v19 = vrot.slane %v1225_v13, 5  ;;  %v531_v23 = vld [vmem:[%s9062_s20 + $0x10] sm:$0xf]  ;;  %vm4016_vm13 = vcmask 60416  }
  0xc8   : > { %588 = vst.msk [vmem:[#allocation2 + $0xf8] sm:$0xf] %vm560_vm7, %v554_v9  ;;  %v1223_v12 = vld [vmem:[#allocation2 + $0x24] sm:$0xe]  ;;  %v1062_v16 = vpack.c.b16 %v1032_v8, %v1031_v7  ;;  %v532_v24 = vld [vmem:[%s9062_s20 + $0x14] sm:$0xf] }
  0xc9   : > { %7969 = vmatmul.msk.bf16.gmra.mxu0 %vm887_vm3, %v8852_v55  ;;  %v1224_v4 = vld [vmem:[#allocation2 + $0x28] sm:$0xf]  ;;  %v600_v14 = vld [vmem:[#allocation2 + $0x24] sm:$0xf]  ;;  %v8002_v17 = vrot.slane %v1223_v12, 9 }
  0xca   : > { %v1332_v11 = vrot.slane %v1224_v4, 5  ;;  %v708_v21 = vrot.slane %v600_v14, 7  ;;  %v601_v22 = vld [vmem:[#allocation2 + $0x28] sm:$0x7]  ;;  %565 = vst.msk [vmem:[#allocation2 + $0x44] sm:$0xf] %vm560_vm7, %v531_v23 }
  0xcb   : > { %566 = vst.msk [vmem:[#allocation2 + $0x48] sm:$0xf] %vm560_vm7, %v532_v24  ;;  %v8853_v27 = vld [vmem:[#allocation2 + $0x24] sm:$0xff]  ;;  %v711_v31 = vrot.slane %v601_v22, 7  ;;  %v1228_v42 = vld [vmem:[#allocation2 + $0x3c] sm:$0x1] }
  0xcc   : > { %v1334_v18 = vrot.slane %v1332_v11, 4  ;;  %v1333_v28 = vsel %vm9403_vm6, %v8002_v17, %v1332_v11  ;;  %v710_v30 = vrot.slane %v708_v21, 4  ;;  %v709_v34 = vsel %vm9417_vm10, %v7889_v26, %v708_v21  ;;  %v1226_v41 = vld [vmem:[#allocation2 + $0x34] sm:$0xe]  ;;  %v8865_v44 = vld [vmem:[#allocation2 + $0xe4] sm:$0xff] }
  0xcd   : > { %v1434_v32 = vunpack.c.l.b16 %v1333_v28  ;;  %v1227_v36 = vld [vmem:[#allocation2 + $0x38] sm:$0xf]  ;;  %v1033_v38 = vunpack.c.l.b16 %v709_v34  ;;  %v603_v43 = vld [vmem:[#allocation2 + $0x34] sm:$0xf]  ;;  %v8003_v46 = vrot.slane %v1226_v41, 9  ;;  %v1342_v48 = vrot.slane %v1228_v42, 5 }
  0xce   : > { %v1336_v29 = vsel %vm9403_vm6, %v1334_v18, %v1335_v19  ;;  %v712_v35 = vsel %vm9417_vm10, %v710_v30, %v711_v31  ;;  %v1339_v40 = vrot.slane %v1227_v36, 5  ;;  %v602_v49 = vld [vmem:[#allocation2 + $0x30] sm:$0x8]  ;;  %v715_v50 = vrot.slane %v603_v43, 7  ;;  %v604_v51 = vld [vmem:[#allocation2 + $0x38] sm:$0x7] }
  0xcf   : > { %v1435_v33 = vunpack.c.l.b16 %v1336_v29  ;;  %v1034_v39 = vunpack.c.l.b16 %v712_v35  ;;  %v533_v52 = vld [vmem:[%s9062_s20 + $0x18] sm:$0xf]  ;;  %v534_v53 = vld [vmem:[%s9062_s20 + $0x1c] sm:$0xf]  ;;  %v7890_v54 = vrot.slane %v602_v49, 11  ;;  %v718_v59 = vrot.slane %v604_v51, 7 }
  0xd0   : > { %8018 = vmatmul.msk.bf16.gmra.mxu2 %vm887_vm3, %v1463_v6  ;;  %v1341_v47 = vrot.slane %v1339_v40, 4  ;;  %567 = vst.msk [vmem:[#allocation2 + $0x54] sm:$0xf] %vm560_vm7, %v533_v52  ;;  %v8854_v55 = vld [vmem:[#allocation2 + $0x34] sm:$0xff]  ;;  %v1340_v56 = vsel %vm9403_vm6, %v8003_v46, %v1339_v40  ;;  %v717_v58 = vrot.slane %v715_v50, 4 }
  0xd1   : > { %v1464_v37 = vpack.c.b16 %v1435_v33, %v1434_v32  ;;  %v1063_v45 = vpack.c.b16 %v1034_v39, %v1033_v38  ;;  %568 = vst.msk [vmem:[#allocation2 + $0x58] sm:$0xf] %vm560_vm7, %v534_v53  ;;  %v1436_v60 = vunpack.c.l.b16 %v1340_v56  ;;  %v716_v62 = vsel %vm9417_vm10, %v7890_v54, %v715_v50  ;;  %v1231_v4 = vld [vmem:[#allocation2 + $0x4c] sm:$0x1]  ;;  %v1229_v5 = vld [vmem:[#allocation2 + $0x44] sm:$0xe] }
  0xd2   : > { %7981 = vmatmul.msk.bf16.gmra.mxu3 %vm887_vm3, %v8864_v15  ;;  %v1343_v57 = vsel %vm9403_vm6, %v1341_v47, %v1342_v48  ;;  %v719_v63 = vsel %vm9417_vm10, %v717_v58, %v718_v59  ;;  %v1230_v0 = vld [vmem:[#allocation2 + $0x48] sm:$0xf]  ;;  %v1035_v2 = vunpack.c.l.b16 %v716_v62  ;;  %v630_v7 = vld [vmem:[#allocation2 + $0xc4] sm:$0xf]  ;;  %v8866_v9 = vld [vmem:[#allocation2 + $0xf4] sm:$0xff]  ;;  %v8004_v12 = vrot.slane %v1229_v5, 9 }
  0xd3   : > { %v1437_v61 = vunpack.c.l.b16 %v1343_v57  ;;  %v1036_v3 = vunpack.c.l.b16 %v719_v63  ;;  %v1346_v6 = vrot.slane %v1230_v0, 5  ;;  %v606_v8 = vld [vmem:[#allocation2 + $0x44] sm:$0xf]  ;;  %v1349_v13 = vrot.slane %v1231_v4, 5  ;;  %v605_v14 = vld [vmem:[#allocation2 + $0x40] sm:$0x8] }
  0xd4   : > { %7985 = vmatmul.msk.bf16.gmra.mxu1 %vm887_vm3, %v1062_v16  ;;  %v778_v15 = vrot.slane %v630_v7, 7  ;;  %v722_v17 = vrot.slane %v606_v8, 7  ;;  %v629_v18 = vld [vmem:[#allocation2 + $0xc0] sm:$0x8]  ;;  %v631_v19 = vld [vmem:[#allocation2 + $0xc8] sm:$0x7] }
  0xd5   : > { %v1465_v1 = vpack.c.b16 %v1437_v61, %v1436_v60  ;;  %v1064_v11 = vpack.c.b16 %v1036_v3, %v1035_v2  ;;  %v1348_v16 = vrot.slane %v1346_v6, 4  ;;  %v607_v20 = vld [vmem:[#allocation2 + $0x48] sm:$0x7]  ;;  %v535_v21 = vld [vmem:[%s9062_s20 + $0x20] sm:$0xf]  ;;  %v7891_v23 = vrot.slane %v605_v14, 11 }
  0xd6   : > { %v536_v22 = vld [vmem:[%s9062_s20 + $0x24] sm:$0xf]  ;;  %569 = vst.msk [vmem:[#allocation2 + $0x64] sm:$0xf] %vm560_vm7, %v535_v21  ;;  %v7899_v24 = vrot.slane %v629_v18, 11  ;;  %v780_v26 = vrot.slane %v778_v15, 4  ;;  %v1347_v29 = vsel %vm9403_vm6, %v8004_v12, %v1346_v6 }
  0xd7   : > { %570 = vst.msk [vmem:[#allocation2 + $0x68] sm:$0xf] %vm560_vm7, %v536_v22  ;;  %v8855_v28 = vld [vmem:[#allocation2 + $0x44] sm:$0xff]  ;;  %v1350_v30 = vsel %vm9403_vm6, %v1348_v16, %v1349_v13  ;;  %v724_v31 = vrot.slane %v722_v17, 4  ;;  %v725_v32 = vrot.slane %v607_v20, 7  ;;  %v1438_v33 = vunpack.c.l.b16 %v1347_v29 }
  0xd8   : > { %v1439_v34 = vunpack.c.l.b16 %v1350_v30  ;;  %v779_v35 = vsel %vm9417_vm10, %v7899_v24, %v778_v15  ;;  %v1233_v39 = vld [vmem:[#allocation2 + $0x58] sm:$0xf]  ;;  %v1232_v46 = vld [vmem:[#allocation2 + $0x54] sm:$0xe]  ;;  %v608_v54 = vld [vmem:[#allocation2 + $0x50] sm:$0x8] }
  0xd9   : > { %7970 = vmatmul.msk.bf16.gmra.mxu0 %vm887_vm3, %v8853_v27  ;;  %v781_v27 = vrot.slane %v631_v19, 7  ;;  %v726_v38 = vsel %vm9417_vm10, %v724_v31, %v725_v32  ;;  %v1053_v40 = vunpack.c.l.b16 %v779_v35  ;;  %v1353_v47 = vrot.slane %v1233_v39, 5  ;;  %v633_v48 = vld [vmem:[#allocation2 + $0xd4] sm:$0xf]  ;;  %v632_v58 = vld [vmem:[#allocation2 + $0xd0] sm:$0x8] }
  0xda   : > { %v1466_v42 = vpack.c.b16 %v1439_v34, %v1438_v33  ;;  %v609_v49 = vld [vmem:[#allocation2 + $0x54] sm:$0xf]  ;;  %v8005_v52 = vrot.slane %v1232_v46, 9  ;;  %v634_v59 = vld [vmem:[#allocation2 + $0xd8] sm:$0x7]  ;;  %v7892_v63 = vrot.slane %v608_v54, 11 }
  0xdb   : > { %v782_v36 = vsel %vm9417_vm10, %v780_v26, %v781_v27  ;;  %v1355_v56 = vrot.slane %v1353_v47, 4  ;;  %v729_v57 = vrot.slane %v609_v49, 7  ;;  %v610_v60 = vld [vmem:[#allocation2 + $0x58] sm:$0x7]  ;;  %v537_v61 = vld [vmem:[%s9062_s20 + $0x28] sm:$0xf] }
  0xdc   : > { %v1054_v41 = vunpack.c.l.b16 %v782_v36  ;;  %v538_v62 = vld [vmem:[%s9062_s20 + $0x2c] sm:$0xf]  ;;  %571 = vst.msk [vmem:[#allocation2 + $0x74] sm:$0xf] %vm560_vm7, %v537_v61  ;;  %v7900_v0 = vrot.slane %v632_v58, 11  ;;  %v788_v2 = vrot.slane %v634_v59, 7  ;;  %v1354_v4 = vsel %vm9403_vm6, %v8005_v52, %v1353_v47 }
  0xdd   : > { %572 = vst.msk [vmem:[#allocation2 + $0x78] sm:$0xf] %vm560_vm7, %v538_v62  ;;  %v8856_v3 = vld [vmem:[#allocation2 + $0x54] sm:$0xff]  ;;  %v731_v6 = vrot.slane %v729_v57, 4  ;;  %v732_v7 = vrot.slane %v610_v60, 7  ;;  %v1440_v8 = vunpack.c.l.b16 %v1354_v4  ;;  %v730_v13 = vsel %vm9417_vm10, %v7892_v63, %v729_v57 }
  0xde   : > { %v1073_v50 = vpack.c.b16 %v1054_v41, %v1053_v40  ;;  %v1236_v15 = vld [vmem:[#allocation2 + $0x68] sm:$0xf]  ;;  %v1039_v19 = vunpack.c.l.b16 %v730_v13  ;;  %v1237_v21 = vld [vmem:[#allocation2 + $0x6c] sm:$0x1]  ;;  %v1235_v22 = vld [vmem:[#allocation2 + $0x64] sm:$0xe] }
  0xdf   : > { %v733_v14 = vsel %vm9417_vm10, %v731_v6, %v732_v7  ;;  %v636_v24 = vld [vmem:[#allocation2 + $0xe4] sm:$0xf]  ;;  %v8006_v29 = vrot.slane %v1235_v22, 9  ;;  %v1363_v30 = vrot.slane %v1237_v21, 5  ;;  %v611_v31 = vld [vmem:[#allocation2 + $0x60] sm:$0x8] }
  0xe0   : > { %8019 = vmatmul.msk.bf16.gmra.mxu2 %vm887_vm3, %v1464_v37  ;;  %v723_v37 = vsel %vm9417_vm10, %v7891_v23, %v722_v17  ;;  %v1040_v20 = vunpack.c.l.b16 %v733_v14  ;;  %v1360_v23 = vrot.slane %v1236_v15, 5  ;;  %v612_v26 = vld [vmem:[#allocation2 + $0x64] sm:$0xf]  ;;  %v792_v32 = vrot.slane %v636_v24, 7  ;;  %v635_v35 = vld [vmem:[#allocation2 + $0xe0] sm:$0x8] }
  0xe1   : > { %v1037_v43 = vunpack.c.l.b16 %v723_v37  ;;  %v736_v34 = vrot.slane %v612_v26, 7  ;;  %v637_v36 = vld [vmem:[#allocation2 + $0xe8] sm:$0x7]  ;;  %v540_v39 = vld [vmem:[%s9062_s20 + $0x34] sm:$0xf]  ;;  %v7893_v40 = vrot.slane %v611_v31, 11 }
  0xe2   : > { %7982 = vmatmul.msk.bf16.gmra.mxu3 %vm887_vm3, %v8865_v44  ;;  %v1038_v44 = vunpack.c.l.b16 %v726_v38  ;;  %v1362_v33 = vrot.slane %v1360_v23, 4  ;;  %v613_v37 = vld [vmem:[#allocation2 + $0x68] sm:$0x7]  ;;  %v539_v38 = vld [vmem:[%s9062_s20 + $0x30] sm:$0xf]  ;;  %v7901_v41 = vrot.slane %v635_v35, 11 }
  0xe3   : > { %573 = vst.msk [vmem:[#allocation2 + $0x84] sm:$0xf] %vm560_vm7, %v539_v38  ;;  %v738_v47 = vrot.slane %v736_v34, 4  ;;  %v615_v61 = vld [vmem:[#allocation2 + $0x74] sm:$0xf] }
  0xe4   : > { %7986 = vmatmul.msk.bf16.gmra.mxu1 %vm887_vm3, %v1063_v45  ;;  %v1234_v45 = vld [vmem:[#allocation2 + $0x5c] sm:$0x1]  ;;  %v1065_v51 = vpack.c.b16 %v1038_v44, %v1037_v43  ;;  %v795_v43 = vrot.slane %v637_v36, 7  ;;  %574 = vst.msk [vmem:[#allocation2 + $0x88] sm:$0xf] %vm560_vm7, %v540_v39  ;;  %v8857_v44 = vld [vmem:[#allocation2 + $0x64] sm:$0xff]  ;;  %v1364_v46 = vsel %vm9403_vm6, %v1362_v33, %v1363_v30 }
  0xe5   : > { %v1356_v53 = vrot.slane %v1234_v45, 5  ;;  %v1361_v45 = vsel %vm9403_vm6, %v8006_v29, %v1360_v23  ;;  %v639_v63 = vld [vmem:[#allocation2 + $0xf4] sm:$0xf]  ;;  %v638_v6 = vld [vmem:[#allocation2 + $0xf0] sm:$0x8] }
  0xe6   : > { %v1442_v49 = vunpack.c.l.b16 %v1361_v45  ;;  %v799_v7 = vrot.slane %v639_v63, 7  ;;  %v616_v13 = vld [vmem:[#allocation2 + $0x78] sm:$0x7]  ;;  %v542_v15 = vld [vmem:[%s9062_s20 + $0x3c] sm:$0xf] }
  0xe7   : > { %v1357_v5 = vsel %vm9403_vm6, %v1355_v56, %v1356_v53  ;;  %v737_v53 = vsel %vm9417_vm10, %v7893_v40, %v736_v34  ;;  %v541_v14 = vld [vmem:[%s9062_s20 + $0x38] sm:$0xf]  ;;  %v8049_v21 = vld [vmem:[%s11914_s1 + $0x6] sm:$0x3]  ;;  %576 = vst.msk [vmem:[#allocation2 + $0x98] sm:$0xf] %vm560_vm7, %v542_v15 }
  0xe8   : > { %v1041_v59 = vunpack.c.l.b16 %v737_v53  ;;  %575 = vst.msk [vmem:[#allocation2 + $0x94] sm:$0xf] %vm560_vm7, %v541_v14  ;;  %v8858_v22 = vld [vmem:[#allocation2 + $0x74] sm:$0xff]  ;;  %v746_v26 = vrot.slane %v616_v13, 7  ;;  %v8196_v35 = vld [vmem:[%s11914_s1 + $0xc] sm:$0x3] }
  0xe9   : > { %7971 = vmatmul.msk.bf16.gmra.mxu0 %vm887_vm3, %v8854_v55  ;;  %v785_v55 = vrot.slane %v633_v48, 7  ;;  %v739_v48 = vrot.slane %v613_v37, 7  ;;  %v3072_v38 = vsel %vm936_vm2, %v8196_v35, 0  ;;  %v1254_v45 = vld [vmem:[#allocation2 + $0xc8] sm:$0xf] }
  0xea   : > { %3081 = vmatpush.bf16.msrb.mxu2 %v3072_v38  ;;  %v1258_v38 = vld [vmem:[#allocation2 + $0xdc] sm:$0x1] }
  0xeb   : > { %v740_v54 = vsel %vm9417_vm10, %v738_v47, %v739_v48  ;;  %v1242_v34 = vld [vmem:[#allocation2 + $0x88] sm:$0xf] }
  0xec   : > { %v1042_v60 = vunpack.c.l.b16 %v740_v54  ;;  %v8163_v47 = vld [vmem:[%s11914_s1 + $0xa] sm:$0x3]  ;;  %v1402_v54 = vrot.slane %v1254_v45, 5 }
  0xee   : > { %v1067_v4 = vpack.c.b16 %v1042_v60, %v1041_v59  ;;  %v619_v59 = vld [vmem:[#allocation2 + $0x88] sm:$0x7]  ;;  %v543_v60 = vld [vmem:[%s9062_s20 + $0x40] sm:$0xf]  ;;  %v1245_v15 = vld [vmem:[#allocation2 + $0x98] sm:$0xf] }
  0xef   : > { %577 = vst.msk [vmem:[#allocation2 + $0xa4] sm:$0xf] %vm560_vm7, %v543_v60 }
  0xf0   : > { %8020 = vmatmul.msk.bf16.gmra.mxu2 %vm887_vm3, %v1465_v1  ;;  %v787_v1 = vrot.slane %v785_v55, 4 }
  0xf2   : > { %7983 = vmatmul.msk.bf16.gmra.mxu3 %vm887_vm3, %v8866_v9  ;;  %v1441_v9 = vunpack.c.l.b16 %v1357_v5  ;;  %v789_v12 = vsel %vm9417_vm10, %v787_v1, %v788_v2  ;;  %v1240_v1 = vld [vmem:[#allocation2 + $0x7c] sm:$0x1]  ;;  %v614_v5 = vld [vmem:[#allocation2 + $0x70] sm:$0x8] }
  0xf3   : > { %v1056_v17 = vunpack.c.l.b16 %v789_v12  ;;  %v640_v12 = vld [vmem:[#allocation2 + $0xf8] sm:$0x7] }
  0xf4   : > { %7987 = vmatmul.msk.bf16.gmra.mxu1 %vm887_vm3, %v1064_v11  ;;  %v786_v11 = vsel %vm9417_vm10, %v7900_v0, %v785_v55  ;;  %v1467_v18 = vpack.c.b16 %v1441_v9, %v1440_v8  ;;  %v1239_v55 = vld [vmem:[#allocation2 + $0x78] sm:$0xf]  ;;  %v1238_v0 = vld [vmem:[#allocation2 + $0x74] sm:$0xe] }
  0xf5   : > { %v1055_v16 = vunpack.c.l.b16 %v786_v11  ;;  %v1367_v62 = vrot.slane %v1239_v55, 5  ;;  %v8007_v8 = vrot.slane %v1238_v0, 9  ;;  %v1370_v11 = vrot.slane %v1240_v1, 5 }
  0xf6   : > { %v1404_v0 = vrot.slane %v1402_v54, 4 }
  0xf7   : > { %v1074_v27 = vpack.c.b16 %v1056_v17, %v1055_v16  ;;  %v1369_v9 = vrot.slane %v1367_v62, 4  ;;  %v7894_v16 = vrot.slane %v614_v5, 11  ;;  %v1368_v23 = vsel %vm9403_vm6, %v8007_v8, %v1367_v62 }
  0xf9   : > { %7972 = vmatmul.msk.bf16.gmra.mxu0 %vm887_vm3, %v8855_v28  ;;  %v1066_v28 = vpack.c.b16 %v1040_v20, %v1039_v19  ;;  %v801_v19 = vrot.slane %v799_v7, 4  ;;  %v802_v20 = vrot.slane %v640_v12, 7  ;;  %v1371_v24 = vsel %vm9403_vm6, %v1369_v9, %v1370_v11 }
  0xfa   : > { %v1445_v29 = vunpack.c.l.b16 %v1371_v24  ;;  %v1257_v24 = vld [vmem:[#allocation2 + $0xd8] sm:$0xf] }
  0xfb   : > { %v803_v31 = vsel %vm9417_vm10, %v801_v19, %v802_v20 }
  0xfc   : > { %v1060_v37 = vunpack.c.l.b16 %v803_v31  ;;  %v620_v31 = vld [vmem:[#allocation2 + $0x90] sm:$0x8] }
 0x100   : > { %8021 = vmatmul.msk.bf16.gmra.mxu2 %vm887_vm3, %v1466_v42  ;;  %v794_v42 = vrot.slane %v792_v32, 4 }
 0x102   : > { %7996 = vmatmul.msk.bf16.vlgmr.msrb.gmra.mxu3 %vm887_vm3, %v1073_v50  ;;  %v1443_v50 = vunpack.c.l.b16 %v1364_v46  ;;  %v796_v52 = vsel %vm9417_vm10, %v794_v42, %v795_v43  ;;  %v618_v42 = vld [vmem:[#allocation2 + $0x84] sm:$0xf]  ;;  %v1243_v46 = vld [vmem:[#allocation2 + $0x8c] sm:$0x1] }
 0x103   : > { %v1058_v57 = vunpack.c.l.b16 %v796_v52  ;;  %v1241_v43 = vld [vmem:[#allocation2 + $0x84] sm:$0xe]  ;;  %v617_v52 = vld [vmem:[#allocation2 + $0x80] sm:$0x8]  ;;  %v750_v53 = vrot.slane %v618_v42, 7 }
 0x104   : > { %7988 = vmatmul.msk.bf16.gmra.mxu1 %vm887_vm3, %v1065_v51  ;;  %v793_v51 = vsel %vm9417_vm10, %v7901_v41, %v792_v32  ;;  %v1468_v58 = vpack.c.b16 %v1443_v50, %v1442_v49  ;;  %v2641_v49 = vsel %vm936_vm2, %v8163_v47, 0  ;;  %v7895_v62 = vrot.slane %v617_v52, 11  ;;  %v546_v42 = vld [vmem:[%s9062_s20 + $0x4c] sm:$0xf] }
 0x105   : > { %v1057_v56 = vunpack.c.l.b16 %v793_v51  ;;  %v8008_v51 = vrot.slane %v1241_v43, 9  ;;  %2650 = vmatpush.bf16.msrb.mxu1 %v2641_v49  ;;  %v752_v5 = vrot.slane %v750_v53, 4  ;;  %580 = vst.msk [vmem:[#allocation2 + $0xb8] sm:$0xf] %vm560_vm7, %v546_v42  ;;  %v8860_v49 = vld [vmem:[#allocation2 + $0x94] sm:$0xff] }
 0x106   : > { %v751_v13 = vsel %vm9417_vm10, %v7895_v62, %v750_v53 }
 0x107   : > { %v1075_v2 = vpack.c.b16 %v1058_v57, %v1057_v56  ;;  %v1377_v56 = vrot.slane %v1243_v46, 5  ;;  %v1253_v57 = vld [vmem:[#allocation2 + $0xc4] sm:$0xe]  ;;  %v1045_v19 = vunpack.c.l.b16 %v751_v13 }
 0x108   : > { %v8012_v63 = vrot.slane %v1253_v57, 9 }
 0x109   : > { %7973 = vmatmul.msk.bf16.gmra.mxu0 %vm887_vm3, %v8856_v3  ;;  %v743_v3 = vrot.slane %v615_v61, 7  ;;  %v544_v61 = vld [vmem:[%s9062_s20 + $0x44] sm:$0xf] }
 0x10a   : > { %578 = vst.msk [vmem:[#allocation2 + $0xa8] sm:$0xf] %vm560_vm7, %v544_v61  ;;  %v1403_v11 = vsel %vm9403_vm6, %v8012_v63, %v1402_v54 }
 0x10b   : > { %v745_v17 = vrot.slane %v743_v3, 4  ;;  %v744_v32 = vsel %vm9417_vm10, %v7894_v16, %v743_v3  ;;  %v1454_v16 = vunpack.c.l.b16 %v1403_v11 }
 0x10c   : > { %v1043_v40 = vunpack.c.l.b16 %v744_v32 }
 0x10d   : > { %v747_v33 = vsel %vm9417_vm10, %v745_v17, %v746_v26 }
 0x10e   : > { %v1044_v41 = vunpack.c.l.b16 %v747_v33  ;;  %v1409_v33 = vrot.slane %v1257_v24, 5 }
 0x110   : > { %8022 = vmatmul.msk.bf16.gmra.mxu2 %vm887_vm3, %v1467_v18  ;;  %v7902_v18 = vrot.slane %v638_v6, 11  ;;  %v1068_v50 = vpack.c.b16 %v1044_v41, %v1043_v40  ;;  %v753_v6 = vrot.slane %v619_v59, 7  ;;  %v622_v40 = vld [vmem:[#allocation2 + $0x98] sm:$0x7]  ;;  %v545_v41 = vld [vmem:[%s9062_s20 + $0x48] sm:$0xf] }
 0x111   : > { %579 = vst.msk [vmem:[#allocation2 + $0xb4] sm:$0xf] %vm560_vm7, %v545_v41  ;;  %v1411_v47 = vrot.slane %v1409_v33, 4  ;;  %v760_v53 = vrot.slane %v622_v40, 7 }
 0x112   : > { %7997 = vmatmul.msk.bf16.gmra.mxu3 %vm887_vm3, %v1074_v27  ;;  %v1957_v27 = vsel %vm936_vm2, %v8049_v21, 0  ;;  %v800_v30 = vsel %vm9417_vm10, %v7902_v18, %v799_v7  ;;  %v754_v14 = vsel %vm9417_vm10, %v752_v5, %v753_v6  ;;  %v621_v21 = vld [vmem:[#allocation2 + $0x94] sm:$0xf] }
 0x113   : > { %1966 = vmatpush.bf16.msrb.mxu3 %v1957_v27  ;;  %v1059_v36 = vunpack.c.l.b16 %v800_v30  ;;  %v1046_v20 = vunpack.c.l.b16 %v754_v14  ;;  %v1246_v27 = vld [vmem:[#allocation2 + $0x9c] sm:$0x1]  ;;  %v757_v32 = vrot.slane %v621_v21, 7 }
 0x114   : > { %7989 = vmatmul.msk.bf16.gmra.mxu1 %vm887_vm3, %v1066_v28  ;;  %v1444_v28 = vunpack.c.l.b16 %v1368_v23  ;;  %v1381_v23 = vrot.slane %v1245_v15, 5  ;;  %v1249_v15 = vld [vmem:[#allocation2 + $0xac] sm:$0x1] }
 0x115   : > { %v1076_v48 = vpack.c.b16 %v1060_v37, %v1059_v36  ;;  %v1384_v36 = vrot.slane %v1246_v27, 5  ;;  %v1256_v37 = vld [vmem:[#allocation2 + $0xd4] sm:$0xe]  ;;  %v759_v52 = vrot.slane %v757_v32, 4  ;;  %v1391_v24 = vrot.slane %v1249_v15, 5 }
 0x116   : > { %v1469_v39 = vpack.c.b16 %v1445_v29, %v1444_v28  ;;  %v1069_v29 = vpack.c.b16 %v1046_v20, %v1045_v19  ;;  %v1383_v35 = vrot.slane %v1381_v23, 4  ;;  %v8013_v46 = vrot.slane %v1256_v37, 9  ;;  %v623_v19 = vld [vmem:[#allocation2 + $0xa0] sm:$0x8]  ;;  %v1261_v27 = vld [vmem:[#allocation2 + $0xec] sm:$0x1] }
 0x117   : > { %v761_v62 = vsel %vm9417_vm10, %v759_v52, %v760_v53  ;;  %v1251_v52 = vld [vmem:[#allocation2 + $0xb8] sm:$0xf] }
 0x119   : > { %7974 = vmatmul.msk.bf16.gmra.mxu0 %vm887_vm3, %v8857_v44  ;;  %v1374_v44 = vrot.slane %v1242_v34, 5 }
 0x11b   : > { %v1376_v55 = vrot.slane %v1374_v44, 4  ;;  %v1375_v3 = vsel %vm9403_vm6, %v8008_v51, %v1374_v44  ;;  %v7896_v44 = vrot.slane %v620_v31, 11  ;;  %v1385_v51 = vsel %vm9403_vm6, %v1383_v35, %v1384_v36  ;;  %v8861_v36 = vld [vmem:[#allocation2 + $0xa4] sm:$0xff] }
 0x11c   : > { %v1446_v8 = vunpack.c.l.b16 %v1375_v3  ;;  %v1449_v57 = vunpack.c.l.b16 %v1385_v51  ;;  %v7897_v31 = vrot.slane %v623_v19, 11  ;;  %v1419_v35 = vrot.slane %v1261_v27, 5  ;;  %v628_v19 = vld [vmem:[#allocation2 + $0xb8] sm:$0x7] }
 0x11d   : > { %v758_v61 = vsel %vm9417_vm10, %v7896_v44, %v757_v32 }
 0x11e   : > { %v1047_v6 = vunpack.c.l.b16 %v758_v61  ;;  %v1250_v61 = vld [vmem:[#allocation2 + $0xb4] sm:$0xe] }
 0x120   : > { %8023 = vmatmul.msk.bf16.gmra.mxu2 %vm887_vm3, %v1468_v58  ;;  %v1255_v58 = vld [vmem:[#allocation2 + $0xcc] sm:$0x1] }
 0x121   : > { %v1405_v1 = vrot.slane %v1255_v58, 5  ;;  %v1410_v58 = vsel %vm9403_vm6, %v8013_v46, %v1409_v33 }
 0x122   : > { %7998 = vmatmul.msk.bf16.gmra.mxu3 %vm887_vm3, %v1075_v2  ;;  %v8859_v2 = vld [vmem:[#allocation2 + $0x84] sm:$0xff] }
 0x123   : > { %v1406_v12 = vsel %vm9403_vm6, %v1404_v0, %v1405_v1  ;;  %v1248_v0 = vld [vmem:[#allocation2 + $0xa8] sm:$0xf] }
 0x124   : > { %7990 = vmatmul.msk.bf16.gmra.mxu1 %vm887_vm3, %v1067_v4  ;;  %v1378_v4 = vsel %vm9403_vm6, %v1376_v55, %v1377_v56  ;;  %v1455_v17 = vunpack.c.l.b16 %v1406_v12  ;;  %v1388_v11 = vrot.slane %v1248_v0, 5  ;;  %v1260_v12 = vld [vmem:[#allocation2 + $0xe8] sm:$0xf] }
 0x125   : > { %v1447_v9 = vunpack.c.l.b16 %v1378_v4  ;;  %v1416_v21 = vrot.slane %v1260_v12, 5 }
 0x126   : > { %v1474_v28 = vpack.c.b16 %v1455_v17, %v1454_v16 }
 0x127   : > { %v1470_v18 = vpack.c.b16 %v1447_v9, %v1446_v8  ;;  %v624_v8 = vld [vmem:[#allocation2 + $0xa4] sm:$0xf] }
 0x128   : > { %v1247_v9 = vld [vmem:[#allocation2 + $0xa4] sm:$0xe]  ;;  %v764_v20 = vrot.slane %v624_v8, 7  ;;  %v626_v8 = vld [vmem:[#allocation2 + $0xb0] sm:$0x8] }
 0x129   : > { %7975 = vmatmul.msk.bf16.gmra.mxu0 %vm887_vm3, %v8858_v22  ;;  %v1244_v22 = vld [vmem:[#allocation2 + $0x94] sm:$0xe] }
 0x12a   : > { %v8009_v30 = vrot.slane %v1244_v22, 9 }
 0x130   : > { %8024 = vmatmul.msk.bf16.gmra.mxu2 %vm887_vm3, %v1469_v39 }
 0x132   : > { %7999 = vmatmul.msk.bf16.gmra.mxu3 %vm887_vm3, %v1076_v48  ;;  %v1412_v48 = vrot.slane %v1258_v38, 5 }
 0x134   : > { %7991 = vmatmul.msk.bf16.gmra.mxu1 %vm887_vm3, %v1068_v50  ;;  %v1382_v50 = vsel %vm9403_vm6, %v8009_v30, %v1381_v23  ;;  %v1413_v59 = vsel %vm9403_vm6, %v1411_v47, %v1412_v48  ;;  %v1390_v23 = vrot.slane %v1388_v11, 4 }
 0x135   : > { %v1448_v56 = vunpack.c.l.b16 %v1382_v50  ;;  %v1457_v3 = vunpack.c.l.b16 %v1413_v59 }
 0x136   : > { %v949_v7 = vpop.f32.mrf.mxu0  ;;  %v1392_v38 = vsel %vm9403_vm6, %v1390_v23, %v1391_v24  ;;  %v8213_v24 = vld [vmem:[%s11914_s1 + $0xe] sm:$0x3] }
 0x137   : > { %v1471_v5 = vpack.c.b16 %v1449_v57, %v1448_v56  ;;  %v1451_v44 = vunpack.c.l.b16 %v1392_v38 }
 0x139   : > { %7976 = vmatmul.msk.bf16.gmra.mxu0 %vm887_vm3, %v8859_v2  ;;  %v1456_v2 = vunpack.c.l.b16 %v1410_v58 }
 0x13b   : > { %v1475_v16 = vpack.c.b16 %v1457_v3, %v1456_v2  ;;  %v1252_v2 = vld [vmem:[#allocation2 + $0xbc] sm:$0x1]  ;;  %v627_v3 = vld [vmem:[#allocation2 + $0xb4] sm:$0xf] }
 0x13c   : > { %v1398_v15 = vrot.slane %v1252_v2, 5  ;;  %v2335_v2 = vld [vmem:[#allocation2 + $0x28] sm:$0xf] }
 0x13e   : > { %v951_v26 = vpop.f32.mrf.mxu0 }
 0x140   : > { %8025 = vmatmul.msk.bf16.gmra.mxu2 %vm887_vm3, %v1470_v18  ;;  %v8010_v18 = vrot.slane %v1247_v9, 9  ;;  %v1262_v9 = vld [vmem:[#allocation2 + $0xf4] sm:$0xe] }
 0x141   : > { %v1137_v34 = vpop.f32.mrf.mxu1  ;;  %v8015_v23 = vrot.slane %v1262_v9, 9 }
 0x142   : > { %v1138_v39 = vadd.f32 %v1137_v34, %v949_v7  ;;  %8029 = vmatmul.msk.bf16.vlgmr.msra.gmra.mxu3 %vm887_vm3, %v1474_v28  ;;  %v1048_v7 = vunpack.c.l.b16 %v761_v62  ;;  %v1418_v34 = vrot.slane %v1416_v21, 4  ;;  %v1389_v37 = vsel %vm9403_vm6, %v8010_v18, %v1388_v11 }
 0x143   : > { %v1538_v43 = vpop.f32.mrf.mxu2  ;;  %v1395_v62 = vrot.slane %v1251_v52, 5 }
 0x144   : > { %7992 = vmatmul.msk.bf16.gmra.mxu1 %vm887_vm3, %v1069_v29  ;;  %v9612_v45 = vadd.f32 %v1538_v43, %v1138_v39  ;;  %v1070_v17 = vpack.c.b16 %v1048_v7, %v1047_v6  ;;  %v625_v29 = vld [vmem:[#allocation2 + $0xa8] sm:$0x7]  ;;  %v766_v39 = vrot.slane %v764_v20, 4  ;;  %v1450_v43 = vunpack.c.l.b16 %v1389_v37 }
 0x145   : > { %v9619_v54 = vpop.f32.mrf.mxu3  ;;  %v767_v40 = vrot.slane %v625_v29, 7  ;;  %v1420_v47 = vsel %vm9403_vm6, %v1418_v34, %v1419_v35  ;;  %v8011_v6 = vrot.slane %v1250_v61, 9  ;;  %v3326_v29 = vsel %vm936_vm2, %v8213_v24, 0  ;;  %v2765_v61 = vld [vmem:[#allocation2 + $0x40] sm:$0x8] }
 0x146   : > { %v954_v55 = vpop.f32.mrf.mxu0  ;;  %v1459_v56 = vunpack.c.l.b16 %v1420_v47  ;;  %v1472_v58 = vpack.c.b16 %v1451_v44, %v1450_v43  ;;  %v774_v34 = vrot.slane %v628_v19, 7  ;;  %3335 = vmatpush.bf16.msra.mxu3 %v3326_v29 }
 0x147   : > { %v768_v50 = vsel %vm9417_vm10, %v766_v39, %v767_v40 }
 0x149   : > { %v1139_v60 = vpop.f32.mrf.mxu1  ;;  %7977 = vmatmul.msk.bf16.gmra.mxu0 %vm887_vm3, %v8860_v49  ;;  %v765_v49 = vsel %vm9417_vm10, %v7897_v31, %v764_v20 }
 0x14a   : > { %v1140_v63 = vadd.f32 %v1139_v60, %v951_v26  ;;  %v1259_v26 = vld [vmem:[#allocation2 + $0xe4] sm:$0xe]  ;;  %v1049_v59 = vunpack.c.l.b16 %v765_v49  ;;  %v1050_v60 = vunpack.c.l.b16 %v768_v50 }
 0x14b   : > { %v1540_v1 = vpop.f32.mrf.mxu2  ;;  %v8014_v33 = vrot.slane %v1259_v26, 9 }
 0x14c   : > { %v9630_v4 = vadd.f32 %v1540_v1, %v1140_v63  ;;  %v1263_v63 = vld [vmem:[#allocation2 + $0xf8] sm:$0xf]  ;;  %v1071_v7 = vpack.c.b16 %v1050_v60, %v1049_v59  ;;  %v1651_v59 = vld [vmem:[#allocation2 + $0x24] sm:$0xf] }
 0x14d   : > { %v9632_v13 = vpop.f32.mrf.mxu3  ;;  %v1417_v46 = vsel %vm9403_vm6, %v8014_v33, %v1416_v21  ;;  %v1423_v11 = vrot.slane %v1263_v63, 5  ;;  %v1396_v21 = vsel %vm9403_vm6, %v8011_v6, %v1395_v62 }
 0x14e   : > { %v956_v14 = vpop.f32.mrf.mxu0  ;;  %v1452_v37 = vunpack.c.l.b16 %v1396_v21 }
 0x14f   : > { %v1425_v27 = vrot.slane %v1423_v11, 4  ;;  %v1424_v40 = vsel %vm9403_vm6, %v8015_v23, %v1423_v11 }
 0x150   : > { %8026 = vmatmul.msk.bf16.gmra.mxu2 %vm887_vm3, %v1471_v5 }
 0x151   : > { %v1142_v22 = vpop.f32.mrf.mxu1 }
 0x152   : > { %v1143_v28 = vadd.f32 %v1142_v22, %v954_v55  ;;  %8030 = vmatmul.msk.bf16.gmra.mxu3 %vm887_vm3, %v1475_v16  ;;  %v1458_v55 = vunpack.c.l.b16 %v1417_v46  ;;  %v771_v16 = vrot.slane %v627_v3, 7  ;;  %v7898_v22 = vrot.slane %v626_v8, 11  ;;  %v2766_v46 = vld [vmem:[#allocation2 + $0x44] sm:$0xf] }
 0x153   : > { %v1543_v30 = vpop.f32.mrf.mxu2  ;;  %v2863_v60 = vrot.slane %v2766_v46, 7  ;;  %v8180_v8 = vrot.slane %v2765_v61, 11 }
 0x154   : > { %7993 = vmatmul.msk.bf16.gmra.mxu1 %vm887_vm3, %v1070_v17  ;;  %v9637_v32 = vadd.f32 %v1543_v30, %v1143_v28  ;;  %v1476_v5 = vpack.c.b16 %v1459_v56, %v1458_v55  ;;  %v1264_v17 = vld [vmem:[#allocation2 + $0xfc] sm:$0x1]  ;;  %v8862_v30 = vld [vmem:[#allocation2 + $0xb4] sm:$0xff]  ;;  %v773_v33 = vrot.slane %v771_v16, 4  ;;  %v772_v39 = vsel %vm9417_vm10, %v7898_v22, %v771_v16 }
 0x155   : > { %v9643_v41 = vpop.f32.mrf.mxu3  ;;  %v1426_v28 = vrot.slane %v1264_v17, 5  ;;  %v1051_v50 = vunpack.c.l.b16 %v772_v39  ;;  %v2865_v9 = vrot.slane %v2863_v60, 4  ;;  %v2334_v17 = vld [vmem:[#allocation2 + $0x24] sm:$0xe]  ;;  %v2864_v24 = vsel %vm9417_vm10, %v8180_v8, %v2863_v60  ;;  %v2770_v60 = vld [vmem:[#allocation2 + $0x58] sm:$0x7] }
 0x156   : > { %v959_v42 = vpop.f32.mrf.mxu0  ;;  %v775_v44 = vsel %vm9417_vm10, %v773_v33, %v774_v34  ;;  %v8147_v29 = vrot.slane %v2334_v17, 9  ;;  %v2339_v17 = vld [vmem:[#allocation2 + $0x3c] sm:$0x1] }
 0x159   : > { %v1144_v48 = vpop.f32.mrf.mxu1  ;;  %7978 = vmatmul.msk.bf16.gmra.mxu0 %vm887_vm3, %v8861_v36 }
 0x15a   : > { %v1145_v51 = vadd.f32 %v1144_v48, %v956_v14  ;;  %v1397_v14 = vrot.slane %v1395_v62, 4  ;;  %v8310_v48 = vld [vmem:[%s11914_s1 + $0x10] sm:$0x3]  ;;  %v2767_v62 = vld [vmem:[#allocation2 + $0x48] sm:$0x7] }
 0x15b   : > { %v1545_v53 = vpop.f32.mrf.mxu2  ;;  %v2866_v11 = vrot.slane %v2767_v62, 7 }
 0x15c   : > { %v9654_v57 = vadd.f32 %v1545_v53, %v1145_v51  ;;  %v1399_v31 = vsel %vm9403_vm6, %v1397_v14, %v1398_v15  ;;  %v1460_v51 = vunpack.c.l.b16 %v1424_v40  ;;  %v3756_v53 = vsel %vm936_vm2, %v8310_v48, 0  ;;  %v1652_v14 = vld [vmem:[#allocation2 + $0x28] sm:$0x7] }
 0x15d   : > { %v9656_v0 = vpop.f32.mrf.mxu3  ;;  %v1453_v38 = vunpack.c.l.b16 %v1399_v31  ;;  %3765 = vmatpush.bf16.msra.mxu0 %v3756_v53  ;;  %v2432_v15 = vrot.slane %v2335_v2, 5  ;;  %v1751_v23 = vrot.slane %v1652_v14, 7  ;;  %v2338_v2 = vld [vmem:[#allocation2 + $0x38] sm:$0xf] }
 0x15e   : > { %v961_v1 = vpop.f32.mrf.mxu0  ;;  %v2439_v14 = vrot.slane %v2338_v2, 5  ;;  %v2771_v2 = vld [vmem:[#allocation2 + $0x60] sm:$0x8] }
 0x15f   : > { %v1473_v56 = vpack.c.b16 %v1453_v38, %v1452_v37 }
 0x160   : > { %8027 = vmatmul.msk.bf16.gmra.mxu2 %vm887_vm3, %v1472_v58  ;;  %v1052_v58 = vunpack.c.l.b16 %v775_v44  ;;  %v2769_v44 = vld [vmem:[#allocation2 + $0x54] sm:$0xf] }
 0x161   : > { %v1147_v12 = vpop.f32.mrf.mxu1 }
 0x162   : > { %v1148_v18 = vadd.f32 %v1147_v12, %v959_v42  ;;  %8031 = vmatmul.msk.bf16.gmra.mxu3 %vm887_vm3, %v1476_v5  ;;  %v1427_v42 = vsel %vm9403_vm6, %v1425_v27, %v1426_v28  ;;  %v1748_v5 = vrot.slane %v1651_v59, 7  ;;  %v1072_v6 = vpack.c.b16 %v1052_v58, %v1051_v50  ;;  %v8867_v28 = vld [vmem:[#allocation2 + $0x24] sm:$0xff]  ;;  %v2768_v59 = vld [vmem:[#allocation2 + $0x50] sm:$0x8] }
 0x163   : > { %v1548_v20 = vpop.f32.mrf.mxu2  ;;  %v1461_v52 = vunpack.c.l.b16 %v1427_v42  ;;  %v2867_v27 = vsel %vm9417_vm10, %v2865_v9, %v2866_v11  ;;  %v2433_v42 = vsel %vm9403_vm6, %v8147_v29, %v2432_v15  ;;  %v2870_v58 = vrot.slane %v2769_v44, 7 }
 0x164   : > { %7994 = vmatmul.msk.bf16.gmra.mxu1 %vm887_vm3, %v1071_v7  ;;  %v9666_v26 = vadd.f32 %v1548_v20, %v1148_v18  ;;  %v1650_v7 = vld [vmem:[#allocation2 + $0x20] sm:$0x8]  ;;  %v2336_v18 = vld [vmem:[#allocation2 + $0x2c] sm:$0x1]  ;;  %v1750_v21 = vrot.slane %v1748_v5, 4  ;;  %v2976_v37 = vunpack.c.l.b16 %v2867_v27  ;;  %v2873_v9 = vrot.slane %v2770_v60, 7 }
 0x165   : > { %v9671_v35 = vpop.f32.mrf.mxu3  ;;  %v1477_v3 = vpack.c.b16 %v1461_v52, %v1460_v51  ;;  %v8033_v20 = vrot.slane %v1650_v7, 11  ;;  %v2435_v31 = vrot.slane %v2336_v18, 5  ;;  %v2544_v52 = vunpack.c.l.b16 %v2433_v42 }
 0x166   : > { %v964_v36 = vpop.f32.mrf.mxu0  ;;  %v1752_v39 = vsel %vm9417_vm10, %v1750_v21, %v1751_v23  ;;  %v8181_v7 = vrot.slane %v2768_v59, 11  ;;  %v2872_v8 = vrot.slane %v2870_v58, 4  ;;  %v1657_v59 = vld [vmem:[#allocation2 + $0x44] sm:$0xf] }
 0x167   : > { %v1749_v38 = vsel %vm9417_vm10, %v8033_v20, %v1748_v5 }
 0x168   : > { %v1860_v48 = vunpack.c.l.b16 %v1749_v38  ;;  %v2874_v27 = vsel %vm9417_vm10, %v2872_v8, %v2873_v9 }
 0x169   : > { %v1149_v43 = vpop.f32.mrf.mxu1  ;;  %7979 = vmatmul.msk.bf16.gmra.mxu0 %vm887_vm3, %v8862_v30  ;;  %v2434_v30 = vrot.slane %v2432_v15, 4 }
 0x16a   : > { %v1150_v47 = vadd.f32 %v1149_v43, %v961_v1 }
 0x16b   : > { %v1550_v49 = vpop.f32.mrf.mxu2  ;;  %v2436_v43 = vsel %vm9403_vm6, %v2434_v30, %v2435_v31  ;;  %v2441_v30 = vrot.slane %v2439_v14, 4  ;;  %v2442_v31 = vrot.slane %v2339_v17, 5  ;;  %v1658_v17 = vld [vmem:[#allocation2 + $0x48] sm:$0x7] }
 0x16c   : > { %v9686_v55 = vadd.f32 %v1550_v49, %v1150_v47  ;;  %v1861_v49 = vunpack.c.l.b16 %v1752_v39  ;;  %v2545_v53 = vunpack.c.l.b16 %v2436_v43  ;;  %v2978_v39 = vunpack.c.l.b16 %v2874_v27 }
 0x16d   : > { %v9688_v63 = vpop.f32.mrf.mxu3 }
 0x16e   : > { %v966_v1 = vpop.f32.mrf.mxu0 }
 0x170   : > { %8028 = vmatmul.msk.bf16.gmra.mxu2 %vm887_vm3, %v1473_v56  ;;  %v1654_v56 = vld [vmem:[#allocation2 + $0x34] sm:$0xf] }
 0x171   : > { %v1152_v12 = vpop.f32.mrf.mxu1  ;;  %v1755_v5 = vrot.slane %v1654_v56, 7 }
 0x172   : > { %v1153_v16 = vadd.f32 %v1152_v12, %v964_v36  ;;  %8032 = vmatmul.msk.bf16.gmra.mxu3 %vm887_vm3, %v1477_v3  ;;  %v2975_v36 = vunpack.c.l.b16 %v2864_v24  ;;  %v1892_v3 = vpack.c.b16 %v1861_v49, %v1860_v48  ;;  %v1655_v12 = vld [vmem:[#allocation2 + $0x38] sm:$0x7]  ;;  %v2871_v24 = vsel %vm9417_vm10, %v8181_v7, %v2870_v58 }
 0x173   : > { %v1553_v19 = vpop.f32.mrf.mxu2  ;;  %v1757_v20 = vrot.slane %v1755_v5, 4  ;;  %v1758_v23 = vrot.slane %v1655_v12, 7  ;;  %v2977_v38 = vunpack.c.l.b16 %v2871_v24  ;;  %v8182_v12 = vrot.slane %v2771_v2, 11 }
 0x174   : > { %7995 = vmatmul.msk.bf16.gmra.mxu1 %vm887_vm3, %v1072_v6  ;;  %v9693_v22 = vadd.f32 %v1553_v19, %v1153_v16  ;;  %v3007_v50 = vpack.c.b16 %v2976_v37, %v2975_v36  ;;  %v1653_v6 = vld [vmem:[#allocation2 + $0x30] sm:$0x8]  ;;  %v2337_v16 = vld [vmem:[#allocation2 + $0x34] sm:$0xe] }
 0x175   : > { %v9699_v33 = vpop.f32.mrf.mxu3  ;;  %v8034_v19 = vrot.slane %v1653_v6, 11  ;;  %v8148_v29 = vrot.slane %v2337_v16, 9  ;;  %v1759_v42 = vsel %vm9417_vm10, %v1757_v20, %v1758_v23  ;;  %v2341_v6 = vld [vmem:[#allocation2 + $0x48] sm:$0xf]  ;;  %v2340_v20 = vld [vmem:[#allocation2 + $0x44] sm:$0xe] }
 0x176   : > { %v969_v34 = vpop.f32.mrf.mxu0  ;;  %v2342_v23 = vld [vmem:[#allocation2 + $0x4c] sm:$0x1] }
 0x177   : > { %v2440_v44 = vsel %vm9403_vm6, %v8148_v29, %v2439_v14  ;;  %v1765_v29 = vrot.slane %v1658_v17, 7 }
 0x178   : > { %v2546_v56 = vunpack.c.l.b16 %v2440_v44 }
 0x179   : > { %v1154_v40 = vpop.f32.mrf.mxu1  ;;  %8131 = vmatmul.msk.bf16.vlgmr.msrb.gmra.mxu0 %vm887_vm3, %v8867_v28  ;;  %v8868_v28 = vld [vmem:[#allocation2 + $0x34] sm:$0xff] }
 0x17a   : > { %v1155_v46 = vadd.f32 %v1154_v40, %v966_v1  ;;  %v2576_v1 = vpack.c.b16 %v2545_v53, %v2544_v52  ;;  %v1756_v40 = vsel %vm9417_vm10, %v8034_v19, %v1755_v5  ;;  %v3008_v52 = vpack.c.b16 %v2978_v39, %v2977_v38 }
 0x17b   : > { %v1555_v47 = vpop.f32.mrf.mxu2  ;;  %v1862_v49 = vunpack.c.l.b16 %v1756_v40  ;;  %v2449_v39 = vrot.slane %v2342_v23, 5 }
 0x17c   : > { %v9710_v51 = vadd.f32 %v1555_v47, %v1155_v46  ;;  %v2443_v46 = vsel %vm9403_vm6, %v2441_v30, %v2442_v31  ;;  %v2772_v47 = vld [vmem:[#allocation2 + $0x64] sm:$0xf] }
 0x17d   : > { %v9712_v61 = vpop.f32.mrf.mxu3  ;;  %v2547_v58 = vunpack.c.l.b16 %v2443_v46  ;;  %v2877_v60 = vrot.slane %v2772_v47, 7 }
 0x17e   : > { %v971_v62 = vpop.f32.mrf.mxu0 }
 0x17f   : > { %v2577_v9 = vpack.c.b16 %v2547_v58, %v2546_v56  ;;  %v2879_v14 = vrot.slane %v2877_v60, 4  ;;  %v2878_v30 = vsel %vm9417_vm10, %v8182_v12, %v2877_v60 }
 0x180   : > { %8197 = vmatmul.msk.bf16.vlgmr.msrb.gmra.mxu2 %vm887_vm3, %v3007_v50  ;;  %v1863_v50 = vunpack.c.l.b16 %v1759_v42  ;;  %v2979_v44 = vunpack.c.l.b16 %v2878_v30  ;;  %v2343_v30 = vld [vmem:[#allocation2 + $0x54] sm:$0xe] }
 0x181   : > { %v1157_v11 = vpop.f32.mrf.mxu1 }
 0x182   : > { %v1158_v15 = vadd.f32 %v1157_v11, %v969_v34  ;;  %8050 = vmatmul.msk.bf16.vlgmr.msrb.gmra.mxu3 %vm887_vm3, %v1892_v3  ;;  %v2773_v3 = vld [vmem:[#allocation2 + $0x68] sm:$0x7]  ;;  %v1893_v8 = vpack.c.b16 %v1863_v50, %v1862_v49  ;;  %v1656_v11 = vld [vmem:[#allocation2 + $0x40] sm:$0x8] }
 0x183   : > { %v1558_v18 = vpop.f32.mrf.mxu2 }
 0x184   : > { %v9716_v21 = vadd.f32 %v1558_v18, %v1158_v15  ;;  %8164 = vmatmul.msk.bf16.vlgmr.msrb.gmra.mxu1 %vm887_vm3, %v2576_v1  ;;  %v2880_v15 = vrot.slane %v2773_v3, 7  ;;  %v2446_v18 = vrot.slane %v2341_v6, 5  ;;  %v1660_v6 = vld [vmem:[#allocation2 + $0x54] sm:$0xf] }
 0x185   : > { %v1197_v34 = vpop.f32.mrf.mxu3 }
 0x186   : > { %v974_v36 = vpop.f32.mrf.mxu0  ;;  %v9724_v37 = vadd.f32 %v1197_v34, %v9619_v54  ;;  %v2881_v31 = vsel %vm9417_vm10, %v2879_v14, %v2880_v15  ;;  %v8869_v34 = vld [vmem:[#allocation2 + $0x44] sm:$0xff]  ;;  %v2448_v38 = vrot.slane %v2446_v18, 4  ;;  %v2344_v14 = vld [vmem:[#allocation2 + $0x58] sm:$0xf] }
 0x187   : > { %v2980_v46 = vunpack.c.l.b16 %v2881_v31  ;;  %v2345_v31 = vld [vmem:[#allocation2 + $0x5c] sm:$0x1] }
 0x188   : > { %v2450_v50 = vsel %vm9403_vm6, %v2448_v38, %v2449_v39 }
 0x189   : > { %v1159_v43 = vpop.f32.mrf.mxu1  ;;  %8132 = vmatmul.msk.bf16.gmra.mxu0 %vm887_vm3, %v8868_v28  ;;  %v3009_v60 = vpack.c.b16 %v2980_v46, %v2979_v44  ;;  %v8870_v46 = vld [vmem:[#allocation2 + $0x54] sm:$0xff] }
 0x18a   : > { %v1160_v54 = vadd.f32 %v1159_v43, %v971_v62  ;;  %v1762_v62 = vrot.slane %v1657_v59, 7 }
 0x18b   : > { %v1560_v48 = vpop.f32.mrf.mxu2 }
 0x18c   : > { %v9735_v53 = vadd.f32 %v1560_v48, %v1160_v54  ;;  %v1764_v27 = vrot.slane %v1762_v62, 4 }
 0x18d   : > { %v1199_v5 = vpop.f32.mrf.mxu3 }
 0x18e   : > { %v976_v1 = vpop.f32.mrf.mxu0  ;;  %v9738_v7 = vadd.f32 %v1199_v5, %v9632_v13  ;;  %v8035_v13 = vrot.slane %v1656_v11, 11  ;;  %v1766_v54 = vsel %vm9417_vm10, %v1764_v27, %v1765_v29  ;;  %v2549_v5 = vunpack.c.l.b16 %v2450_v50 }
 0x18f   : > { %v1865_v59 = vunpack.c.l.b16 %v1766_v54  ;;  %v2453_v27 = vrot.slane %v2344_v14, 5  ;;  %v2456_v54 = vrot.slane %v2345_v31, 5 }
 0x190   : > { %8198 = vmatmul.msk.bf16.gmra.mxu2 %vm887_vm3, %v3008_v52  ;;  %v1763_v47 = vsel %vm9417_vm10, %v8035_v13, %v1762_v62  ;;  %v2775_v52 = vld [vmem:[#allocation2 + $0x74] sm:$0xf]  ;;  %v2774_v62 = vld [vmem:[#allocation2 + $0x70] sm:$0x8]  ;;  %v1661_v13 = vld [vmem:[#allocation2 + $0x58] sm:$0x7] }
 0x191   : > { %v1162_v16 = vpop.f32.mrf.mxu1  ;;  %v1864_v58 = vunpack.c.l.b16 %v1763_v47  ;;  %v1772_v39 = vrot.slane %v1661_v13, 7  ;;  %v2455_v47 = vrot.slane %v2453_v27, 4 }
 0x192   : > { %v1163_v19 = vadd.f32 %v1162_v16, %v974_v36  ;;  %8051 = vmatmul.msk.bf16.gmra.mxu3 %vm887_vm3, %v1893_v8  ;;  %v8149_v36 = vrot.slane %v2340_v20, 9  ;;  %v2884_v8 = vrot.slane %v2775_v52, 7 }
 0x193   : > { %v1563_v24 = vpop.f32.mrf.mxu2  ;;  %v1894_v16 = vpack.c.b16 %v1865_v59, %v1864_v58 }
 0x194   : > { %v9742_v28 = vadd.f32 %v1563_v24, %v1163_v19  ;;  %8165 = vmatmul.msk.bf16.gmra.mxu1 %vm887_vm3, %v2577_v9  ;;  %v2447_v49 = vsel %vm9403_vm6, %v8149_v36, %v2446_v18  ;;  %v2776_v9 = vld [vmem:[#allocation2 + $0x78] sm:$0x7]  ;;  %v1659_v18 = vld [vmem:[#allocation2 + $0x50] sm:$0x8]  ;;  %v8183_v19 = vrot.slane %v2774_v62, 11  ;;  %v2886_v20 = vrot.slane %v2884_v8, 4 }
 0x195   : > { %v1202_v40 = vpop.f32.mrf.mxu3  ;;  %v2548_v3 = vunpack.c.l.b16 %v2447_v49  ;;  %v2887_v23 = vrot.slane %v2776_v9, 7 }
 0x196   : > { %v979_v42 = vpop.f32.mrf.mxu0  ;;  %v9750_v43 = vadd.f32 %v1202_v40, %v9643_v41  ;;  %v2885_v40 = vsel %vm9417_vm10, %v8183_v19, %v2884_v8  ;;  %v2779_v19 = vld [vmem:[#allocation2 + $0x88] sm:$0x7] }
 0x197   : > { %v2578_v17 = vpack.c.b16 %v2549_v5, %v2548_v3  ;;  %v2888_v44 = vsel %vm9417_vm10, %v2886_v20, %v2887_v23  ;;  %v2981_v52 = vunpack.c.l.b16 %v2885_v40  ;;  %v2457_v3 = vsel %vm9403_vm6, %v2455_v47, %v2456_v54  ;;  %v2778_v5 = vld [vmem:[#allocation2 + $0x84] sm:$0xf] }
 0x199   : > { %v1164_v48 = vpop.f32.mrf.mxu1  ;;  %8133 = vmatmul.msk.bf16.gmra.mxu0 %vm887_vm3, %v8869_v34 }
 0x19a   : > { %v1165_v41 = vadd.f32 %v1164_v48, %v976_v1  ;;  %v1769_v1 = vrot.slane %v1660_v6, 7 }
 0x19b   : > { %v1565_v56 = vpop.f32.mrf.mxu2 }
 0x19c   : > { %v9761_v2 = vadd.f32 %v1565_v56, %v1165_v41  ;;  %v1771_v36 = vrot.slane %v1769_v1, 4  ;;  %v2982_v41 = vunpack.c.l.b16 %v2888_v44 }
 0x19d   : > { %v1204_v11 = vpop.f32.mrf.mxu3 }
 0x19e   : > { %v981_v12 = vpop.f32.mrf.mxu0  ;;  %v9764_v15 = vadd.f32 %v1204_v11, %v9656_v0  ;;  %v8036_v0 = vrot.slane %v1659_v18, 11  ;;  %v1773_v58 = vsel %vm9417_vm10, %v1771_v36, %v1772_v39  ;;  %v3010_v9 = vpack.c.b16 %v2982_v41, %v2981_v52  ;;  %v2777_v18 = vld [vmem:[#allocation2 + $0x80] sm:$0x8]  ;;  %v1664_v39 = vld [vmem:[#allocation2 + $0x68] sm:$0x7] }
 0x19f   : > { %v1867_v62 = vunpack.c.l.b16 %v1773_v58  ;;  %v8184_v31 = vrot.slane %v2777_v18, 11  ;;  %v1779_v52 = vrot.slane %v1664_v39, 7  ;;  %v8871_v58 = vld [vmem:[#allocation2 + $0x64] sm:$0xff] }
 0x1a0   : > { %8199 = vmatmul.msk.bf16.gmra.mxu2 %vm887_vm3, %v3009_v60  ;;  %v1770_v56 = vsel %vm9417_vm10, %v8036_v0, %v1769_v1  ;;  %v1663_v1 = vld [vmem:[#allocation2 + $0x64] sm:$0xf]  ;;  %v2894_v0 = vrot.slane %v2779_v19, 7 }
 0x1a1   : > { %v1167_v24 = vpop.f32.mrf.mxu1  ;;  %v1866_v8 = vunpack.c.l.b16 %v1770_v56 }
 0x1a2   : > { %v1168_v29 = vadd.f32 %v1167_v24, %v979_v42  ;;  %8052 = vmatmul.msk.bf16.gmra.mxu3 %vm887_vm3, %v1894_v16  ;;  %v8150_v42 = vrot.slane %v2343_v30, 9  ;;  %v2551_v16 = vunpack.c.l.b16 %v2457_v3  ;;  %v2347_v24 = vld [vmem:[#allocation2 + $0x68] sm:$0xf]  ;;  %v1662_v30 = vld [vmem:[#allocation2 + $0x60] sm:$0x8] }
 0x1a3   : > { %v1568_v34 = vpop.f32.mrf.mxu2  ;;  %v2460_v40 = vrot.slane %v2347_v24, 5 }
 0x1a4   : > { %v9768_v38 = vadd.f32 %v1568_v34, %v1168_v29  ;;  %8166 = vmatmul.msk.bf16.gmra.mxu1 %vm887_vm3, %v2578_v17  ;;  %v2454_v60 = vsel %vm9403_vm6, %v8150_v42, %v2453_v27  ;;  %v2891_v17 = vrot.slane %v2778_v5, 7  ;;  %v1895_v27 = vpack.c.b16 %v1867_v62, %v1866_v8  ;;  %v2348_v42 = vld [vmem:[#allocation2 + $0x6c] sm:$0x1] }
 0x1a5   : > { %v1207_v48 = vpop.f32.mrf.mxu3  ;;  %v2550_v14 = vunpack.c.l.b16 %v2454_v60  ;;  %v2463_v60 = vrot.slane %v2348_v42, 5 }
 0x1a6   : > { %v984_v49 = vpop.f32.mrf.mxu0  ;;  %v9776_v50 = vadd.f32 %v1207_v48, %v9671_v35  ;;  %v2893_v34 = vrot.slane %v2891_v17, 4  ;;  %v2892_v41 = vsel %vm9417_vm10, %v8184_v31, %v2891_v17  ;;  %v2781_v17 = vld [vmem:[#allocation2 + $0x94] sm:$0xf] }
 0x1a7   : > { %v2579_v29 = vpack.c.b16 %v2551_v16, %v2550_v14  ;;  %v2898_v31 = vrot.slane %v2781_v17, 7 }
 0x1a8   : > { %v2895_v56 = vsel %vm9417_vm10, %v2893_v34, %v2894_v0  ;;  %v2780_v34 = vld [vmem:[#allocation2 + $0x90] sm:$0x8]  ;;  %v2782_v0 = vld [vmem:[#allocation2 + $0x98] sm:$0x7] }
 0x1a9   : > { %v1169_v59 = vpop.f32.mrf.mxu1  ;;  %8134 = vmatmul.msk.bf16.gmra.mxu0 %vm887_vm3, %v8870_v46  ;;  %v2346_v46 = vld [vmem:[#allocation2 + $0x64] sm:$0xe]  ;;  %v2984_v8 = vunpack.c.l.b16 %v2895_v56  ;;  %v1667_v56 = vld [vmem:[#allocation2 + $0x78] sm:$0x7] }
 0x1aa   : > { %v1170_v35 = vadd.f32 %v1169_v59, %v981_v12  ;;  %v1776_v12 = vrot.slane %v1663_v1, 7  ;;  %v2462_v59 = vrot.slane %v2460_v40, 4 }
 0x1ab   : > { %v1570_v6 = vpop.f32.mrf.mxu2 }
 0x1ac   : > { %v9787_v11 = vadd.f32 %v1570_v6, %v1170_v35  ;;  %v1778_v54 = vrot.slane %v1776_v12, 4  ;;  %v2983_v6 = vunpack.c.l.b16 %v2892_v41  ;;  %v2464_v1 = vsel %vm9403_vm6, %v2462_v59, %v2463_v60  ;;  %v2349_v59 = vld [vmem:[#allocation2 + $0x74] sm:$0xe]  ;;  %v2351_v60 = vld [vmem:[#allocation2 + $0x7c] sm:$0x1] }
 0x1ad   : > { %v1209_v20 = vpop.f32.mrf.mxu3  ;;  %v2470_v17 = vrot.slane %v2351_v60, 5 }
 0x1ae   : > { %v986_v23 = vpop.f32.mrf.mxu0  ;;  %v9790_v13 = vadd.f32 %v1209_v20, %v9688_v63  ;;  %v8037_v63 = vrot.slane %v1662_v30, 11  ;;  %v3011_v24 = vpack.c.b16 %v2984_v8, %v2983_v6  ;;  %v1666_v30 = vld [vmem:[#allocation2 + $0x74] sm:$0xf] }
 0x1b0   : > { %8200 = vmatmul.msk.bf16.gmra.mxu2 %vm887_vm3, %v3010_v9  ;;  %v1777_v62 = vsel %vm9417_vm10, %v8037_v63, %v1776_v12  ;;  %v1780_v9 = vsel %vm9417_vm10, %v1778_v54, %v1779_v52  ;;  %v8185_v63 = vrot.slane %v2780_v34, 11  ;;  %v2900_v54 = vrot.slane %v2898_v31, 4 }
 0x1b1   : > { %v1172_v36 = vpop.f32.mrf.mxu1  ;;  %v1868_v19 = vunpack.c.l.b16 %v1777_v62  ;;  %v1869_v20 = vunpack.c.l.b16 %v1780_v9  ;;  %v2901_v52 = vrot.slane %v2782_v0, 7  ;;  %v1786_v62 = vrot.slane %v1667_v56, 7  ;;  %v2784_v0 = vld [vmem:[#allocation2 + $0xa4] sm:$0xf]  ;;  %v2785_v56 = vld [vmem:[#allocation2 + $0xa8] sm:$0x7] }
 0x1b2   : > { %v1173_v44 = vadd.f32 %v1172_v36, %v984_v49  ;;  %8053 = vmatmul.msk.bf16.gmra.mxu3 %vm887_vm3, %v1895_v27  ;;  %v8151_v49 = vrot.slane %v2346_v46, 9  ;;  %v2899_v9 = vsel %vm9417_vm10, %v8185_v63, %v2898_v31 }
 0x1b3   : > { %v1573_v47 = vpop.f32.mrf.mxu2  ;;  %v1896_v46 = vpack.c.b16 %v1869_v20, %v1868_v19  ;;  %v2985_v20 = vunpack.c.l.b16 %v2899_v9 }
 0x1b4   : > { %v9794_v48 = vadd.f32 %v1573_v47, %v1173_v44  ;;  %8167 = vmatmul.msk.bf16.gmra.mxu1 %vm887_vm3, %v2579_v29  ;;  %v2461_v16 = vsel %vm9403_vm6, %v8151_v49, %v2460_v40  ;;  %v2553_v29 = vunpack.c.l.b16 %v2464_v1  ;;  %v2350_v40 = vld [vmem:[#allocation2 + $0x78] sm:$0xf]  ;;  %v1665_v47 = vld [vmem:[#allocation2 + $0x70] sm:$0x8] }
 0x1b5   : > { %v1212_v3 = vpop.f32.mrf.mxu3  ;;  %v2552_v12 = vunpack.c.l.b16 %v2461_v16  ;;  %v8872_v16 = vld [vmem:[#allocation2 + $0x74] sm:$0xff] }
 0x1b6   : > { %v989_v5 = vpop.f32.mrf.mxu0  ;;  %v9802_v35 = vadd.f32 %v1212_v3, %v9699_v33 }
 0x1b7   : > { %v2580_v42 = vpack.c.b16 %v2553_v29, %v2552_v12 }
 0x1b9   : > { %v1174_v14 = vpop.f32.mrf.mxu1  ;;  %8135 = vmatmul.msk.bf16.gmra.mxu0 %vm887_vm3, %v8871_v58  ;;  %v2467_v58 = vrot.slane %v2350_v40, 5 }
 0x1ba   : > { %v1175_v33 = vadd.f32 %v1174_v14, %v986_v23  ;;  %v1783_v23 = vrot.slane %v1666_v30, 7  ;;  %v2902_v14 = vsel %vm9417_vm10, %v2900_v54, %v2901_v52  ;;  %v1669_v54 = vld [vmem:[#allocation2 + $0x84] sm:$0xf]  ;;  %v2905_v52 = vrot.slane %v2784_v0, 7 }
 0x1bb   : > { %v1575_v18 = vpop.f32.mrf.mxu2  ;;  %v2469_v1 = vrot.slane %v2467_v58, 4  ;;  %v8873_v0 = vld [vmem:[#allocation2 + $0x84] sm:$0xff] }
 0x1bc   : > { %v9813_v27 = vadd.f32 %v1575_v18, %v1175_v33  ;;  %v1785_v6 = vrot.slane %v1783_v23, 4  ;;  %v2907_v9 = vrot.slane %v2905_v52, 4 }
 0x1bd   : > { %v1214_v36 = vpop.f32.mrf.mxu3  ;;  %v2471_v34 = vsel %vm9403_vm6, %v2469_v1, %v2470_v17 }
 0x1be   : > { %v991_v39 = vpop.f32.mrf.mxu0  ;;  %v9816_v44 = vadd.f32 %v1214_v36, %v9712_v61  ;;  %v8038_v61 = vrot.slane %v1665_v47, 11  ;;  %v1787_v29 = vsel %vm9417_vm10, %v1785_v6, %v1786_v62  ;;  %v2555_v63 = vunpack.c.l.b16 %v2471_v34  ;;  %v1668_v6 = vld [vmem:[#allocation2 + $0x80] sm:$0x8] }
 0x1c0   : > { %8201 = vmatmul.msk.bf16.gmra.mxu2 %vm887_vm3, %v3011_v24  ;;  %v2986_v24 = vunpack.c.l.b16 %v2902_v14  ;;  %v1784_v12 = vsel %vm9417_vm10, %v8038_v61, %v1783_v23  ;;  %v2908_v14 = vrot.slane %v2785_v56, 7 }
 0x1c1   : > { %v1177_v41 = vpop.f32.mrf.mxu1  ;;  %v1870_v40 = vunpack.c.l.b16 %v1784_v12 }
 0x1c2   : > { %v1178_v49 = vadd.f32 %v1177_v41, %v989_v5  ;;  %8054 = vmatmul.msk.bf16.gmra.mxu3 %vm887_vm3, %v1896_v46  ;;  %v8152_v5 = vrot.slane %v2349_v59, 9  ;;  %v1871_v46 = vunpack.c.l.b16 %v1787_v29  ;;  %v2783_v41 = vld [vmem:[#allocation2 + $0xa0] sm:$0x8]  ;;  %v2909_v34 = vsel %vm9417_vm10, %v2907_v9, %v2908_v14 }
 0x1c3   : > { %v1578_v3 = vpop.f32.mrf.mxu2  ;;  %v8186_v62 = vrot.slane %v2783_v41, 11 }
 0x1c4   : > { %v9820_v8 = vadd.f32 %v1578_v3, %v1178_v49  ;;  %8168 = vmatmul.msk.bf16.gmra.mxu1 %vm887_vm3, %v2580_v42  ;;  %v2468_v31 = vsel %vm9403_vm6, %v8152_v5, %v2467_v58  ;;  %v3012_v42 = vpack.c.b16 %v2986_v24, %v2985_v20  ;;  %v2353_v58 = vld [vmem:[#allocation2 + $0x88] sm:$0xf]  ;;  %v1897_v3 = vpack.c.b16 %v1871_v46, %v1870_v40  ;;  %v2354_v20 = vld [vmem:[#allocation2 + $0x8c] sm:$0x1] }
 0x1c5   : > { %v1598_v33 = vpop.f32.mrf.mxu3  ;;  %v2554_v23 = vunpack.c.l.b16 %v2468_v31  ;;  %v1670_v5 = vld [vmem:[#allocation2 + $0x88] sm:$0x7]  ;;  %v2474_v1 = vrot.slane %v2353_v58, 5  ;;  %v2906_v31 = vsel %vm9417_vm10, %v8186_v62, %v2905_v52  ;;  %v2787_v58 = vld [vmem:[#allocation2 + $0xb4] sm:$0xf] }
 0x1c6   : > { %v994_v18 = vpop.f32.mrf.mxu0  ;;  %v9828_v19 = vadd.f32 %v1598_v33, %v9724_v37  ;;  %v2352_v33 = vld [vmem:[#allocation2 + $0x84] sm:$0xe] }
 0x1c7   : > { %v2581_v61 = vpack.c.b16 %v2555_v63, %v2554_v23  ;;  %v2987_v23 = vunpack.c.l.b16 %v2906_v31  ;;  %v2988_v63 = vunpack.c.l.b16 %v2909_v34  ;;  %v1671_v31 = vld [vmem:[#allocation2 + $0x90] sm:$0x8] }
 0x1c9   : > { %v1179_v30 = vpop.f32.mrf.mxu1  ;;  %8136 = vmatmul.msk.bf16.gmra.mxu0 %vm887_vm3, %v8872_v16  ;;  %v3013_v62 = vpack.c.b16 %v2988_v63, %v2987_v23  ;;  %v2355_v63 = vld [vmem:[#allocation2 + $0x94] sm:$0xe] }
 0x1ca   : > { %v1180_v37 = vadd.f32 %v1179_v30, %v991_v39  ;;  %v1790_v39 = vrot.slane %v1669_v54, 7  ;;  %v1793_v30 = vrot.slane %v1670_v5, 7  ;;  %v2912_v5 = vrot.slane %v2787_v58, 7 }
 0x1cb   : > { %v1580_v36 = vpop.f32.mrf.mxu2 }
 0x1cc   : > { %v9839_v47 = vadd.f32 %v1580_v36, %v1180_v37  ;;  %v1792_v12 = vrot.slane %v1790_v39, 4  ;;  %v2476_v37 = vrot.slane %v2474_v1, 4  ;;  %v2477_v36 = vrot.slane %v2354_v20, 5 }
 0x1cd   : > { %v1600_v49 = vpop.f32.mrf.mxu3 }
 0x1ce   : > { %v996_v59 = vpop.f32.mrf.mxu0  ;;  %v9842_v60 = vadd.f32 %v1600_v49, %v9738_v7  ;;  %v8039_v7 = vrot.slane %v1668_v6, 11  ;;  %v1794_v52 = vsel %vm9417_vm10, %v1792_v12, %v1793_v30  ;;  %v2478_v49 = vsel %vm9403_vm6, %v2476_v37, %v2477_v36  ;;  %v1673_v36 = vld [vmem:[#allocation2 + $0x98] sm:$0x7] }
 0x1cf   : > { %v1873_v6 = vunpack.c.l.b16 %v1794_v52  ;;  %v2557_v14 = vunpack.c.l.b16 %v2478_v49  ;;  %v1800_v49 = vrot.slane %v1673_v36, 7 }
 0x1d0   : > { %8202 = vmatmul.msk.bf16.gmra.mxu2 %vm887_vm3, %v3012_v42  ;;  %v1791_v54 = vsel %vm9417_vm10, %v8039_v7, %v1790_v39 }
 0x1d1   : > { %v1182_v16 = vpop.f32.mrf.mxu1 }
 0x1d2   : > { %v1183_v17 = vadd.f32 %v1182_v16, %v994_v18  ;;  %8055 = vmatmul.msk.bf16.gmra.mxu3 %vm887_vm3, %v1897_v3  ;;  %v8153_v18 = vrot.slane %v2352_v33, 9  ;;  %v1672_v16 = vld [vmem:[#allocation2 + $0x94] sm:$0xf]  ;;  %v2788_v33 = vld [vmem:[#allocation2 + $0xb8] sm:$0x7] }
 0x1d3   : > { %v1583_v24 = vpop.f32.mrf.mxu2 }
 0x1d4   : > { %v9846_v29 = vadd.f32 %v1583_v24, %v1183_v17  ;;  %8169 = vmatmul.msk.bf16.gmra.mxu1 %vm887_vm3, %v2581_v61  ;;  %v2475_v56 = vsel %vm9403_vm6, %v8153_v18, %v2474_v1  ;;  %v1872_v61 = vunpack.c.l.b16 %v1791_v54  ;;  %v2786_v17 = vld [vmem:[#allocation2 + $0xb0] sm:$0x8]  ;;  %v2356_v1 = vld [vmem:[#allocation2 + $0x98] sm:$0xf]  ;;  %v2915_v18 = vrot.slane %v2788_v33, 7 }
 0x1d5   : > { %v1603_v40 = vpop.f32.mrf.mxu3  ;;  %v2556_v39 = vunpack.c.l.b16 %v2475_v56  ;;  %v8187_v34 = vrot.slane %v2786_v17, 11  ;;  %v2357_v54 = vld [vmem:[#allocation2 + $0x9c] sm:$0x1] }
 0x1d6   : > { %v999_v46 = vpop.f32.mrf.mxu0  ;;  %v9854_v42 = vadd.f32 %v1603_v40, %v9750_v43  ;;  %v1898_v12 = vpack.c.b16 %v1873_v6, %v1872_v61  ;;  %v2481_v40 = vrot.slane %v2356_v1, 5  ;;  %v2484_v6 = vrot.slane %v2357_v54, 5  ;;  %v2789_v54 = vld [vmem:[#allocation2 + $0xc0] sm:$0x8] }
 0x1d7   : > { %v2582_v30 = vpack.c.b16 %v2557_v14, %v2556_v39  ;;  %v2913_v58 = vsel %vm9417_vm10, %v8187_v34, %v2912_v5 }
 0x1d8   : > { %v2483_v61 = vrot.slane %v2481_v40, 4 }
 0x1d9   : > { %v1184_v41 = vpop.f32.mrf.mxu1  ;;  %8137 = vmatmul.msk.bf16.gmra.mxu0 %vm887_vm3, %v8873_v0  ;;  %v2914_v0 = vrot.slane %v2912_v5, 4 }
 0x1da   : > { %v1185_v43 = vadd.f32 %v1184_v41, %v996_v59  ;;  %v1797_v59 = vrot.slane %v1672_v16, 7  ;;  %v2989_v16 = vunpack.c.l.b16 %v2913_v58 }
 0x1db   : > { %v1585_v3 = vpop.f32.mrf.mxu2 }
 0x1dc   : > { %v9865_v9 = vadd.f32 %v1585_v3, %v1185_v43  ;;  %v1799_v41 = vrot.slane %v1797_v59, 4  ;;  %v2916_v43 = vsel %vm9417_vm10, %v2914_v0, %v2915_v18  ;;  %v8874_v3 = vld [vmem:[#allocation2 + $0x94] sm:$0xff] }
 0x1dd   : > { %v1605_v20 = vpop.f32.mrf.mxu3  ;;  %v2990_v17 = vunpack.c.l.b16 %v2916_v43 }
 0x1de   : > { %v1001_v24 = vpop.f32.mrf.mxu0  ;;  %v9868_v7 = vadd.f32 %v1605_v20, %v9764_v15  ;;  %v8040_v15 = vrot.slane %v1671_v31, 11  ;;  %v1801_v5 = vsel %vm9417_vm10, %v1799_v41, %v1800_v49  ;;  %v2791_v41 = vld [vmem:[#allocation2 + $0xc8] sm:$0x7] }
 0x1df   : > { %v1875_v0 = vunpack.c.l.b16 %v1801_v5  ;;  %v3014_v18 = vpack.c.b16 %v2990_v17, %v2989_v16  ;;  %v2359_v49 = vld [vmem:[#allocation2 + $0xa8] sm:$0xf] }
 0x1e0   : > { %8203 = vmatmul.msk.bf16.gmra.mxu2 %vm887_vm3, %v3013_v62  ;;  %v1798_v33 = vsel %vm9417_vm10, %v8040_v15, %v1797_v59  ;;  %v4257_v59 = vld [vmem:[%s11915_s2] sm:$0xf] }
 0x1e1   : > { %v1187_v37 = vpop.f32.mrf.mxu1  ;;  %v1874_v34 = vunpack.c.l.b16 %v1798_v33  ;;  %v1676_v33 = vld [vmem:[#allocation2 + $0xa8] sm:$0x7] }
 0x1e2   : > { %v1188_v23 = vadd.f32 %v1187_v37, %v999_v46  ;;  %8056 = vmatmul.msk.bf16.gmra.mxu3 %vm887_vm3, %v1898_v12  ;;  %v8154_v46 = vrot.slane %v2355_v63, 9  ;;  %v2485_v12 = vsel %vm9403_vm6, %v2483_v61, %v2484_v6  ;;  %v1675_v63 = vld [vmem:[#allocation2 + $0xa4] sm:$0xf]  ;;  %v1674_v61 = vld [vmem:[#allocation2 + $0xa0] sm:$0x8] }
 0x1e3   : > { %v1588_v52 = vpop.f32.mrf.mxu2  ;;  %v1899_v43 = vpack.c.b16 %v1875_v0, %v1874_v34  ;;  %v1804_v6 = vrot.slane %v1675_v63, 7 }
 0x1e4   : > { %v9872_v56 = vadd.f32 %v1588_v52, %v1188_v23  ;;  %8170 = vmatmul.msk.bf16.gmra.mxu1 %vm887_vm3, %v2582_v30  ;;  %v2482_v1 = vsel %vm9403_vm6, %v8154_v46, %v2481_v40  ;;  %v2559_v23 = vunpack.c.l.b16 %v2485_v12  ;;  %v4579_v40 = vsel %vm4389_vm11, %v4257_v59, 0  ;;  %v2358_v12 = vld [vmem:[#allocation2 + $0xa4] sm:$0xe] }
 0x1e5   : > { %v1608_v62 = vpop.f32.mrf.mxu3  ;;  %v2558_v36 = vunpack.c.l.b16 %v2482_v1  ;;  %4588 = vmatpush.bf16.msra.mxu2 %v4579_v40  ;;  %v2488_v1 = vrot.slane %v2359_v49, 5  ;;  %v1806_v0 = vrot.slane %v1804_v6, 4 }
 0x1e6   : > { %v1004_v39 = vpop.f32.mrf.mxu0  ;;  %v9880_v14 = vadd.f32 %v1608_v62, %v9776_v50  ;;  %v2790_v50 = vld [vmem:[#allocation2 + $0xc4] sm:$0xf]  ;;  %v8188_v62 = vrot.slane %v2789_v54, 11 }
 0x1e7   : > { %v2919_v52 = vrot.slane %v2790_v50, 7  ;;  %v2583_v46 = vpack.c.b16 %v2559_v23, %v2558_v36  ;;  %v8875_v36 = vld [vmem:[#allocation2 + $0xa4] sm:$0xff]  ;;  %v2490_v40 = vrot.slane %v2488_v1, 4 }
 0x1e9   : > { %v1189_v20 = vpop.f32.mrf.mxu1  ;;  %8138 = vmatmul.msk.bf16.gmra.mxu0 %vm887_vm3, %v8874_v3  ;;  %v8343_v3 = vld [vmem:[%s11915_s2 + $0x4] sm:$0xf]  ;;  %v2921_v5 = vrot.slane %v2919_v52, 4  ;;  %v2920_v59 = vsel %vm9417_vm10, %v8188_v62, %v2919_v52 }
 0x1ea   : > { %v1190_v30 = vadd.f32 %v1189_v20, %v1001_v24  ;;  %v4391_v16 = vsel %vm4389_vm11, %v8343_v3, 0  ;;  %v2922_v20 = vrot.slane %v2791_v41, 7  ;;  %v2991_v3 = vunpack.c.l.b16 %v2920_v59  ;;  %v2362_v59 = vld [vmem:[#allocation2 + $0xb8] sm:$0xf] }
 0x1eb   : > { %v1590_v31 = vpop.f32.mrf.mxu2  ;;  %4400 = vmatpush.bf16.msra.mxu1 %v4391_v16 }
 0x1ec   : > { %v9894_v37 = vadd.f32 %v1590_v31, %v1190_v30  ;;  %v2360_v30 = vld [vmem:[#allocation2 + $0xac] sm:$0x1]  ;;  %v8041_v31 = vrot.slane %v1674_v61, 11  ;;  %v2923_v23 = vsel %vm9417_vm10, %v2921_v5, %v2922_v20 }
 0x1ed   : > { %v1610_v24 = vpop.f32.mrf.mxu3  ;;  %v2491_v63 = vrot.slane %v2360_v30, 5  ;;  %v2992_v52 = vunpack.c.l.b16 %v2923_v23  ;;  %v1678_v30 = vld [vmem:[#allocation2 + $0xb4] sm:$0xf] }
 0x1ee   : > { %v1006_v15 = vpop.f32.mrf.mxu0  ;;  %v9898_v58 = vadd.f32 %v1610_v24, %v9790_v13  ;;  %v1805_v49 = vsel %vm9417_vm10, %v8041_v31, %v1804_v6 }
 0x1ef   : > { %v2492_v62 = vsel %vm9403_vm6, %v2490_v40, %v2491_v63  ;;  %v3015_v20 = vpack.c.b16 %v2992_v52, %v2991_v3  ;;  %v1811_v40 = vrot.slane %v1678_v30, 7  ;;  %v2495_v52 = vrot.slane %v2362_v59, 5 }
 0x1f0   : > { %8204 = vmatmul.msk.bf16.gmra.mxu2 %vm887_vm3, %v3014_v18  ;;  %v1807_v18 = vrot.slane %v1676_v33, 7  ;;  %v1876_v33 = vunpack.c.l.b16 %v1805_v49  ;;  %v1679_v49 = vld [vmem:[#allocation2 + $0xb8] sm:$0x7] }
 0x1f1   : > { %v1192_v17 = vpop.f32.mrf.mxu1 }
 0x1f2   : > { %v1193_v13 = vadd.f32 %v1192_v17, %v1004_v39  ;;  %8057 = vmatmul.msk.bf16.gmra.mxu3 %vm887_vm3, %v1899_v43  ;;  %v8155_v39 = vrot.slane %v2358_v12, 9  ;;  %v1808_v43 = vsel %vm9417_vm10, %v1806_v0, %v1807_v18  ;;  %v2561_v12 = vunpack.c.l.b16 %v2492_v62 }
 0x1f3   : > { %v1593_v50 = vpop.f32.mrf.mxu2  ;;  %v1877_v5 = vunpack.c.l.b16 %v1808_v43 }
 0x1f4   : > { %v9906_v34 = vadd.f32 %v1593_v50, %v1193_v13  ;;  %8171 = vmatmul.msk.bf16.gmra.mxu1 %vm887_vm3, %v2583_v46  ;;  %v2489_v61 = vsel %vm9403_vm6, %v8155_v39, %v2488_v1  ;;  %v2792_v50 = vld [vmem:[#allocation2 + $0xd0] sm:$0x8]  ;;  %v2794_v1 = vld [vmem:[#allocation2 + $0xd8] sm:$0x7] }
 0x1f5   : > { %v1613_v54 = vpop.f32.mrf.mxu3  ;;  %v2560_v13 = vunpack.c.l.b16 %v2489_v61  ;;  %v1677_v39 = vld [vmem:[#allocation2 + $0xb0] sm:$0x8]  ;;  %v8189_v63 = vrot.slane %v2792_v50, 11  ;;  %v2929_v3 = vrot.slane %v2794_v1, 7  ;;  %v2363_v61 = vld [vmem:[#allocation2 + $0xbc] sm:$0x1] }
 0x1f6   : > { %v2222_v24 = vpop.f32.mrf.mxu0  ;;  %v9914_v41 = vadd.f32 %v1613_v54, %v9802_v35  ;;  %v2793_v35 = vld [vmem:[#allocation2 + $0xd4] sm:$0xf] }
 0x1f7   : > { %v2926_v31 = vrot.slane %v2793_v35, 7  ;;  %v2584_v23 = vpack.c.b16 %v2561_v12, %v2560_v13  ;;  %v1814_v35 = vrot.slane %v1679_v49, 7  ;;  %v2497_v13 = vrot.slane %v2495_v52, 4 }
 0x1f8   : > { %v2498_v12 = vrot.slane %v2363_v61, 5 }
 0x1f9   : > { %v1194_v46 = vpop.f32.mrf.mxu1  ;;  %8139 = vmatmul.msk.bf16.gmra.mxu0 %vm887_vm3, %v8875_v36  ;;  %v2928_v43 = vrot.slane %v2926_v31, 4 }
 0x1fa   : > { %v1195_v16 = vadd.f32 %v1194_v46, %v1006_v15  ;;  %v1900_v15 = vpack.c.b16 %v1877_v5, %v1876_v33  ;;  %v2361_v46 = vld [vmem:[#allocation2 + $0xb4] sm:$0xe]  ;;  %v2499_v49 = vsel %vm9403_vm6, %v2497_v13, %v2498_v12 }
 0x1fb   : > { %v1595_v17 = vpop.f32.mrf.mxu2  ;;  %v8876_v33 = vld [vmem:[#allocation2 + $0xb4] sm:$0xff]  ;;  %v2930_v5 = vsel %vm9417_vm10, %v2928_v43, %v2929_v3  ;;  %v2796_v43 = vld [vmem:[#allocation2 + $0xe4] sm:$0xf] }
 0x1fc   : > { %v9925_v6 = vadd.f32 %v1595_v17, %v1195_v16  ;;  %v1813_v16 = vrot.slane %v1811_v40, 4  ;;  %v2927_v17 = vsel %vm9417_vm10, %v8189_v63, %v2926_v31  ;;  %v2994_v31 = vunpack.c.l.b16 %v2930_v5  ;;  %v2797_v5 = vld [vmem:[#allocation2 + $0xe8] sm:$0x7] }
 0x1fd   : > { %v1615_v0 = vpop.f32.mrf.mxu3 }
 0x1fe   : > { %v9927_v18 = vpop.f32.mrf.mxu0  ;;  %v9930_v36 = vadd.f32 %v1615_v0, %v9816_v44  ;;  %v8042_v44 = vrot.slane %v1677_v39, 11  ;;  %v1815_v59 = vsel %vm9417_vm10, %v1813_v16, %v1814_v35  ;;  %v2563_v16 = vunpack.c.l.b16 %v2499_v49  ;;  %v1681_v35 = vld [vmem:[#allocation2 + $0xc4] sm:$0xf] }
 0x200   : > { %8205 = vmatmul.msk.bf16.gmra.mxu2 %vm887_vm3, %v3015_v20  ;;  %v8156_v20 = vrot.slane %v2361_v46, 9  ;;  %v1812_v1 = vsel %vm9417_vm10, %v8042_v44, %v1811_v40  ;;  %v1879_v46 = vunpack.c.l.b16 %v1815_v59 }
 0x201   : > { %v2652_v54 = vpop.f32.mrf.mxu1  ;;  %v1878_v3 = vunpack.c.l.b16 %v1812_v1  ;;  %v1680_v1 = vld [vmem:[#allocation2 + $0xc0] sm:$0x8] }
 0x202   : > { %8058 = vmatmul.msk.bf16.gmra.mxu3 %vm887_vm3, %v1900_v15  ;;  %v2993_v15 = vunpack.c.l.b16 %v2927_v17  ;;  %v2496_v63 = vsel %vm9403_vm6, %v8156_v20, %v2495_v52  ;;  %v2933_v17 = vrot.slane %v2796_v43, 7  ;;  %v2365_v52 = vld [vmem:[#allocation2 + $0xc8] sm:$0xf]  ;;  %v2364_v43 = vld [vmem:[#allocation2 + $0xc4] sm:$0xe] }
 0x203   : > { %v3083_v62 = vpop.f32.mrf.mxu2  ;;  %v2562_v44 = vunpack.c.l.b16 %v2496_v63  ;;  %v1901_v13 = vpack.c.b16 %v1879_v46, %v1878_v3  ;;  %v1682_v63 = vld [vmem:[#allocation2 + $0xc8] sm:$0x7]  ;;  %v2502_v49 = vrot.slane %v2365_v52, 5  ;;  %v8043_v3 = vrot.slane %v1680_v1, 11 }
 0x204   : > { %8172 = vmatmul.msk.bf16.gmra.mxu1 %vm887_vm3, %v2584_v23  ;;  %v3016_v61 = vpack.c.b16 %v2994_v31, %v2993_v15  ;;  %v2935_v15 = vrot.slane %v2933_v17, 4  ;;  %v2936_v31 = vrot.slane %v2797_v5, 7 }
 0x205   : > { %v1968_v30 = vpop.f32.mrf.mxu3  ;;  %v2585_v12 = vpack.c.b16 %v2563_v16, %v2562_v44 }
 0x206   : > { %v9939_v50 = vpop.f32.mrf.mxu0  ;;  %v2048_v0 = vadd.f32 %v1968_v30, %v9612_v45 }
 0x208   : > { %v2302_v23 = vadd.f32 %v2222_v24, %v2048_v0 }
 0x209   : > { %8140 = vmatmul.msk.bf16.gmra.mxu0 %vm887_vm3, %v8876_v33  ;;  %v2654_v39 = vpop.f32.mrf.mxu1  ;;  %v2795_v33 = vld [vmem:[#allocation2 + $0xe0] sm:$0x8] }
 0x20a   : > { %v2732_v45 = vadd.f32 %v2652_v54, %v2302_v23  ;;  %v1818_v54 = vrot.slane %v1681_v35, 7  ;;  %v8190_v59 = vrot.slane %v2795_v33, 11  ;;  %v8877_v35 = vld [vmem:[#allocation2 + $0xc4] sm:$0xff]  ;;  %v8157_v33 = vrot.slane %v2364_v43, 9 }
 0x20b   : > { %v3085_v40 = vpop.f32.mrf.mxu2 }
 0x20c   : > { %v9951_v24 = vadd.f32 %v3083_v62, %v2732_v45  ;;  %v2366_v45 = vld [vmem:[#allocation2 + $0xcc] sm:$0x1]  ;;  %v1820_v46 = vrot.slane %v1818_v54, 4  ;;  %v2934_v44 = vsel %vm9417_vm10, %v8190_v59, %v2933_v17 }
 0x20d   : > { %v1970_v30 = vpop.f32.mrf.mxu3  ;;  %v2505_v5 = vrot.slane %v2366_v45, 5 }
 0x20e   : > { %11928 = vst [vmem:[#allocation4_spill] sm:$0xff] %v9951_v24  ;;  %v9953_v0 = vpop.f32.mrf.mxu0  ;;  %v2049_v20 = vadd.f32 %v1970_v30, %v9630_v4 }
 0x210   : > { %8206 = vmatmul.msk.bf16.gmra.mxu2 %vm887_vm3, %v3016_v61  ;;  %v2303_v62 = vadd.f32 %v9927_v18, %v2049_v20  ;;  %v1821_v61 = vrot.slane %v1682_v63, 7  ;;  %v2937_v18 = vsel %vm9417_vm10, %v2935_v15, %v2936_v31  ;;  %v2503_v15 = vsel %vm9403_vm6, %v8157_v33, %v2502_v49  ;;  %v2799_v31 = vld [vmem:[#allocation2 + $0xf4] sm:$0xf] }
 0x211   : > { %v2657_v23 = vpop.f32.mrf.mxu1  ;;  %v2996_v1 = vunpack.c.l.b16 %v2937_v18 }
 0x212   : > { %v2733_v24 = vadd.f32 %v2654_v39, %v2303_v62  ;;  %8059 = vmatmul.msk.bf16.gmra.mxu3 %vm887_vm3, %v1901_v13  ;;  %v2504_v39 = vrot.slane %v2502_v49, 4  ;;  %v1819_v13 = vsel %vm9417_vm10, %v8043_v3, %v1818_v54  ;;  %v1822_v17 = vsel %vm9417_vm10, %v1820_v46, %v1821_v61  ;;  %v556_v54 = vld [vmem:[%s9062_s20 + $0x74] sm:$0xf]  ;;  %v2798_v49 = vld [vmem:[#allocation2 + $0xf0] sm:$0x8] }
 0x213   : > { %v3088_v4 = vpop.f32.mrf.mxu2  ;;  %v1880_v63 = vunpack.c.l.b16 %v1819_v13  ;;  %v1881_v43 = vunpack.c.l.b16 %v1822_v17  ;;  %590 = vst.msk [vmem:[#allocation2 + $0x108] sm:$0xf] %vm560_vm7, %v556_v54  ;;  %v2564_v3 = vunpack.c.l.b16 %v2503_v15  ;;  %v1684_v61 = vld [vmem:[#allocation2 + $0xd4] sm:$0xf]  ;;  %v1683_v17 = vld [vmem:[#allocation2 + $0xd0] sm:$0x8] }
 0x214   : > { %8173 = vmatmul.msk.bf16.gmra.mxu1 %vm887_vm3, %v2585_v12  ;;  %v9964_v16 = vadd.f32 %v3085_v40, %v2733_v24  ;;  %v2995_v12 = vunpack.c.l.b16 %v2934_v44  ;;  %v555_v40 = vld [vmem:[%s9062_s20 + $0x70] sm:$0xf]  ;;  %v2940_v44 = vrot.slane %v2799_v31, 7  ;;  %v1685_v15 = vld [vmem:[#allocation2 + $0xd8] sm:$0x7] }
 0x215   : > { %v1973_v30 = vpop.f32.mrf.mxu3  ;;  %589 = vst.msk [vmem:[#allocation2 + $0x104] sm:$0xf] %vm560_vm7, %v555_v40  ;;  %v2367_v31 = vld [vmem:[#allocation2 + $0xd4] sm:$0xe]  ;;  %v2369_v54 = vld [vmem:[#allocation2 + $0xdc] sm:$0x1] }
 0x216   : > { %v9966_v52 = vpop.f32.mrf.mxu0  ;;  %v2050_v20 = vadd.f32 %v1973_v30, %v9637_v32  ;;  %v2506_v32 = vsel %vm9403_vm6, %v2504_v39, %v2505_v5  ;;  %v2368_v5 = vld [vmem:[#allocation2 + $0xd8] sm:$0xf]  ;;  %v1902_v30 = vpack.c.b16 %v1881_v43, %v1880_v63  ;;  %v8044_v63 = vrot.slane %v1683_v17, 11 }
 0x217   : > { %v2565_v46 = vunpack.c.l.b16 %v2506_v32  ;;  %v2509_v32 = vrot.slane %v2368_v5, 5 }
 0x218   : > { %v2304_v24 = vadd.f32 %v9939_v50, %v2050_v20  ;;  %v3017_v50 = vpack.c.b16 %v2996_v1, %v2995_v12  ;;  %v1825_v20 = vrot.slane %v1684_v61, 7  ;;  %v8191_v12 = vrot.slane %v2798_v49, 11  ;;  %v8878_v61 = vld [vmem:[#allocation2 + $0xd4] sm:$0xff] }
 0x219   : > { %8141 = vmatmul.msk.bf16.gmra.mxu0 %vm887_vm3, %v8877_v35  ;;  %v2659_v59 = vpop.f32.mrf.mxu1  ;;  %v2800_v35 = vld [vmem:[#allocation2 + $0xf8] sm:$0x7]  ;;  %v2586_v13 = vpack.c.b16 %v2565_v46, %v2564_v3  ;;  %v2942_v1 = vrot.slane %v2940_v44, 4  ;;  %v8158_v49 = vrot.slane %v2367_v31, 9 }
 0x21a   : > { %v2734_v62 = vadd.f32 %v2657_v23, %v2304_v24  ;;  %v2943_v40 = vrot.slane %v2800_v35, 7  ;;  %v1827_v43 = vrot.slane %v1825_v20, 4  ;;  %v2941_v3 = vsel %vm9417_vm10, %v8191_v12, %v2940_v44 }
 0x21b   : > { %v3090_v45 = vpop.f32.mrf.mxu2  ;;  %v2512_v35 = vrot.slane %v2369_v54, 5 }
 0x21c   : > { %v9983_v18 = vadd.f32 %v3088_v4, %v2734_v62 }
 0x21d   : > { %v1975_v33 = vpop.f32.mrf.mxu3 }
 0x21e   : > { %v9985_v39 = vpop.f32.mrf.mxu0  ;;  %v2051_v23 = vadd.f32 %v1975_v33, %v9654_v57 }
 0x220   : > { %8207 = vmatmul.msk.bf16.gmra.mxu2 %vm887_vm3, %v3017_v50  ;;  %v2305_v4 = vadd.f32 %v9953_v0, %v2051_v23  ;;  %v1828_v50 = vrot.slane %v1685_v15, 7  ;;  %v2944_v0 = vsel %vm9417_vm10, %v2942_v1, %v2943_v40  ;;  %v2510_v40 = vsel %vm9403_vm6, %v8158_v49, %v2509_v32 }
 0x221   : > { %v2662_v24 = vpop.f32.mrf.mxu1  ;;  %v2998_v17 = vunpack.c.l.b16 %v2944_v0 }
 0x222   : > { %v2735_v62 = vadd.f32 %v2659_v59, %v2305_v4  ;;  %8060 = vmatmul.msk.bf16.gmra.mxu3 %vm887_vm3, %v1902_v30  ;;  %v2511_v59 = vrot.slane %v2509_v32, 4  ;;  %v1826_v30 = vsel %vm9417_vm10, %v8044_v63, %v1825_v20  ;;  %v1829_v44 = vsel %vm9417_vm10, %v1827_v43, %v1828_v50  ;;  %v2802_v4 = vld [vmem:[#allocation2 + $0x104] sm:$0xf]  ;;  %v558_v20 = vld [vmem:[%s9062_s20 + $0x7c] sm:$0xf] }
 0x223   : > { %v3093_v57 = vpop.f32.mrf.mxu2  ;;  %v1882_v31 = vunpack.c.l.b16 %v1826_v30  ;;  %v1883_v54 = vunpack.c.l.b16 %v1829_v44  ;;  %592 = vst.msk [vmem:[#allocation2 + $0x118] sm:$0xf] %vm560_vm7, %v558_v20  ;;  %v2566_v63 = vunpack.c.l.b16 %v2510_v40  ;;  %v1687_v50 = vld [vmem:[#allocation2 + $0xe4] sm:$0xf]  ;;  %v2801_v32 = vld [vmem:[#allocation2 + $0x100] sm:$0x8] }
 0x224   : > { %8174 = vmatmul.msk.bf16.gmra.mxu1 %vm887_vm3, %v2586_v13  ;;  %v9996_v46 = vadd.f32 %v3090_v45, %v2735_v62  ;;  %v2997_v13 = vunpack.c.l.b16 %v2941_v3  ;;  %v557_v45 = vld [vmem:[%s9062_s20 + $0x78] sm:$0xf]  ;;  %v2947_v3 = vrot.slane %v2802_v4, 7  ;;  %v1686_v44 = vld [vmem:[#allocation2 + $0xe0] sm:$0x8] }
 0x225   : > { %v1978_v33 = vpop.f32.mrf.mxu3  ;;  %591 = vst.msk [vmem:[#allocation2 + $0x114] sm:$0xf] %vm560_vm7, %v557_v45  ;;  %v1688_v40 = vld [vmem:[#allocation2 + $0xe8] sm:$0x7]  ;;  %v2370_v4 = vld [vmem:[#allocation2 + $0xe4] sm:$0xe] }
 0x226   : > { %v9998_v5 = vpop.f32.mrf.mxu0  ;;  %v2052_v23 = vadd.f32 %v1978_v33, %v9666_v26  ;;  %v2513_v26 = vsel %vm9403_vm6, %v2511_v59, %v2512_v35  ;;  %v2371_v35 = vld [vmem:[#allocation2 + $0xe8] sm:$0xf]  ;;  %v1903_v33 = vpack.c.b16 %v1883_v54, %v1882_v31  ;;  %v2372_v20 = vld [vmem:[#allocation2 + $0xec] sm:$0x1]  ;;  %v8045_v31 = vrot.slane %v1686_v44, 11 }
 0x227   : > { %v2567_v43 = vunpack.c.l.b16 %v2513_v26  ;;  %v2516_v26 = vrot.slane %v2371_v35, 5 }
 0x228   : > { %v2306_v12 = vadd.f32 %v9966_v52, %v2052_v23  ;;  %v3018_v52 = vpack.c.b16 %v2998_v17, %v2997_v13  ;;  %v1832_v23 = vrot.slane %v1687_v50, 7  ;;  %v8192_v13 = vrot.slane %v2801_v32, 11  ;;  %v8879_v50 = vld [vmem:[#allocation2 + $0xe4] sm:$0xff] }
 0x229   : > { %8142 = vmatmul.msk.bf16.gmra.mxu0 %vm887_vm3, %v8878_v61  ;;  %v2664_v1 = vpop.f32.mrf.mxu1  ;;  %v2803_v61 = vld [vmem:[#allocation2 + $0x108] sm:$0x7]  ;;  %v2587_v30 = vpack.c.b16 %v2567_v43, %v2566_v63  ;;  %v2949_v17 = vrot.slane %v2947_v3, 4  ;;  %v8159_v32 = vrot.slane %v2370_v4, 9 }
 0x22a   : > { %v2736_v15 = vadd.f32 %v2662_v24, %v2306_v12  ;;  %v2950_v45 = vrot.slane %v2803_v61, 7  ;;  %v1834_v54 = vrot.slane %v1832_v23, 4  ;;  %v2948_v63 = vsel %vm9417_vm10, %v8192_v13, %v2947_v3 }
 0x22b   : > { %v3095_v62 = vpop.f32.mrf.mxu2  ;;  %v2518_v61 = vrot.slane %v2516_v26, 4 }
 0x22c   : > { %v10015_v0 = vadd.f32 %v3093_v57, %v2736_v15 }
 0x22d   : > { %v1980_v49 = vpop.f32.mrf.mxu3 }
 0x22e   : > { %v10017_v59 = vpop.f32.mrf.mxu0  ;;  %v2053_v24 = vadd.f32 %v1980_v49, %v9686_v55 }
 0x230   : > { %8208 = vmatmul.msk.bf16.gmra.mxu2 %vm887_vm3, %v3018_v52  ;;  %v2307_v57 = vadd.f32 %v9985_v39, %v2053_v24  ;;  %v1835_v52 = vrot.slane %v1688_v40, 7  ;;  %v2951_v39 = vsel %vm9417_vm10, %v2949_v17, %v2950_v45  ;;  %v2517_v17 = vsel %vm9403_vm6, %v8159_v32, %v2516_v26  ;;  %v2374_v26 = vld [vmem:[#allocation2 + $0xf8] sm:$0xf] }
 0x231   : > { %v2667_v12 = vpop.f32.mrf.mxu1  ;;  %v3000_v44 = vunpack.c.l.b16 %v2951_v39  ;;  %v2806_v39 = vld [vmem:[#allocation2 + $0x118] sm:$0x7] }
 0x232   : > { %v2737_v15 = vadd.f32 %v2664_v1, %v2307_v57  ;;  %8061 = vmatmul.msk.bf16.gmra.mxu3 %vm887_vm3, %v1903_v33  ;;  %v2519_v1 = vrot.slane %v2372_v20, 5  ;;  %v1833_v33 = vsel %vm9417_vm10, %v8045_v31, %v1832_v23  ;;  %v1836_v3 = vsel %vm9417_vm10, %v1834_v54, %v1835_v52  ;;  %v1690_v54 = vld [vmem:[#allocation2 + $0xf4] sm:$0xf] }
 0x233   : > { %v3098_v55 = vpop.f32.mrf.mxu2  ;;  %v1884_v40 = vunpack.c.l.b16 %v1833_v33  ;;  %v1885_v23 = vunpack.c.l.b16 %v1836_v3 }
 0x234   : > { %8175 = vmatmul.msk.bf16.gmra.mxu1 %vm887_vm3, %v2587_v30  ;;  %v10028_v43 = vadd.f32 %v3095_v62, %v2737_v15  ;;  %v2999_v30 = vunpack.c.l.b16 %v2948_v63  ;;  %v2520_v45 = vsel %vm9403_vm6, %v2518_v61, %v2519_v1  ;;  %v2568_v15 = vunpack.c.l.b16 %v2517_v17  ;;  %v2804_v63 = vld [vmem:[#allocation2 + $0x110] sm:$0x8] }
 0x235   : > { %v1983_v49 = vpop.f32.mrf.mxu3  ;;  %v2569_v31 = vunpack.c.l.b16 %v2520_v45  ;;  %v1904_v61 = vpack.c.b16 %v1885_v23, %v1884_v40  ;;  %v8193_v33 = vrot.slane %v2804_v63, 11  ;;  %v2523_v17 = vrot.slane %v2374_v26, 5  ;;  %v2373_v45 = vld [vmem:[#allocation2 + $0xf4] sm:$0xe] }
 0x236   : > { %v10030_v35 = vpop.f32.mrf.mxu0  ;;  %v2054_v24 = vadd.f32 %v1983_v49, %v9693_v22  ;;  %v2805_v22 = vld [vmem:[#allocation2 + $0x114] sm:$0xf]  ;;  %v3019_v20 = vpack.c.b16 %v3000_v44, %v2999_v30  ;;  %v2957_v30 = vrot.slane %v2806_v39, 7  ;;  %v8160_v63 = vrot.slane %v2373_v45, 9 }
 0x237   : > { %v2954_v52 = vrot.slane %v2805_v22, 7  ;;  %v2588_v1 = vpack.c.b16 %v2569_v31, %v2568_v15  ;;  %v2375_v22 = vld [vmem:[#allocation2 + $0xfc] sm:$0x1]  ;;  %v2525_v39 = vrot.slane %v2523_v17, 4 }
 0x238   : > { %v2308_v62 = vadd.f32 %v9998_v5, %v2054_v24  ;;  %v1689_v24 = vld [vmem:[#allocation2 + $0xf0] sm:$0x8] }
 0x239   : > { %8143 = vmatmul.msk.bf16.gmra.mxu0 %vm887_vm3, %v8879_v50  ;;  %v2669_v13 = vpop.f32.mrf.mxu1  ;;  %v2956_v3 = vrot.slane %v2954_v52, 4  ;;  %v8046_v40 = vrot.slane %v1689_v24, 11  ;;  %v2955_v15 = vsel %vm9417_vm10, %v8193_v33, %v2954_v52 }
 0x23a   : > { %v2738_v57 = vadd.f32 %v2667_v12, %v2308_v62  ;;  %v1839_v12 = vrot.slane %v1690_v54, 7  ;;  %v1691_v62 = vld [vmem:[#allocation2 + $0xf8] sm:$0x7]  ;;  %v3001_v52 = vunpack.c.l.b16 %v2955_v15 }
 0x23b   : > { %v3100_v4 = vpop.f32.mrf.mxu2  ;;  %v8880_v54 = vld [vmem:[#allocation2 + $0xf4] sm:$0xff] }
 0x23c   : > { %v10043_v5 = vadd.f32 %v3098_v55, %v2738_v57  ;;  %v1841_v23 = vrot.slane %v1839_v12, 4 }
 0x23d   : > { %v1985_v50 = vpop.f32.mrf.mxu3 }
 0x23e   : > { %v10045_v49 = vpop.f32.mrf.mxu0  ;;  %v2055_v32 = vadd.f32 %v1985_v50, %v9710_v51 }
 0x240   : > { %8209 = vmatmul.msk.bf16.gmra.mxu2 %vm887_vm3, %v3019_v20  ;;  %v2309_v55 = vadd.f32 %v10017_v59, %v2055_v32  ;;  %v1842_v20 = vrot.slane %v1691_v62, 7  ;;  %v2958_v59 = vsel %vm9417_vm10, %v2956_v3, %v2957_v30  ;;  %v2524_v3 = vsel %vm9403_vm6, %v8160_v63, %v2523_v17  ;;  %v2808_v30 = vld [vmem:[#allocation2 + $0x124] sm:$0xf]  ;;  %v2809_v17 = vld [vmem:[#allocation2 + $0x128] sm:$0x7] }
 0x241   : > { %v2672_v44 = vpop.f32.mrf.mxu1  ;;  %v3002_v24 = vunpack.c.l.b16 %v2958_v59  ;;  %v2961_v15 = vrot.slane %v2808_v30, 7  ;;  %v2377_v63 = vld [vmem:[#allocation2 + $0x108] sm:$0xf]  ;;  %v2378_v30 = vld [vmem:[#allocation2 + $0x10c] sm:$0x1] }
 0x242   : > { %v2739_v57 = vadd.f32 %v2669_v13, %v2309_v55  ;;  %8062 = vmatmul.msk.bf16.gmra.mxu3 %vm887_vm3, %v1904_v61  ;;  %v2526_v13 = vrot.slane %v2375_v22, 5  ;;  %v1840_v61 = vsel %vm9417_vm10, %v8046_v40, %v1839_v12 }
 0x243   : > { %v3103_v51 = vpop.f32.mrf.mxu2  ;;  %v1886_v12 = vunpack.c.l.b16 %v1840_v61  ;;  %v3020_v22 = vpack.c.b16 %v3002_v24, %v3001_v52  ;;  %v1694_v52 = vld [vmem:[#allocation2 + $0x108] sm:$0x7]  ;;  %v2963_v24 = vrot.slane %v2961_v15, 4 }
 0x244   : > { %8176 = vmatmul.msk.bf16.gmra.mxu1 %vm887_vm3, %v2588_v1  ;;  %v10056_v31 = vadd.f32 %v3100_v4, %v2739_v57  ;;  %v1843_v1 = vsel %vm9417_vm10, %v1841_v23, %v1842_v20  ;;  %v2570_v57 = vunpack.c.l.b16 %v2524_v3  ;;  %v1693_v23 = vld [vmem:[#allocation2 + $0x104] sm:$0xf]  ;;  %v2807_v20 = vld [vmem:[#allocation2 + $0x120] sm:$0x8]  ;;  %v2530_v3 = vrot.slane %v2377_v63, 5 }
 0x245   : > { %v1988_v50 = vpop.f32.mrf.mxu3  ;;  %v1887_v62 = vunpack.c.l.b16 %v1843_v1  ;;  %v8194_v61 = vrot.slane %v2807_v20, 11  ;;  %v2533_v20 = vrot.slane %v2378_v30, 5 }
 0x246   : > { %v2247_v26 = vpop.f32.mrf.mxu0  ;;  %v2056_v32 = vadd.f32 %v1988_v50, %v9716_v21  ;;  %v2527_v21 = vsel %vm9403_vm6, %v2525_v39, %v2526_v13  ;;  %v1692_v50 = vld [vmem:[#allocation2 + $0x100] sm:$0x8] }
 0x247   : > { %v2571_v40 = vunpack.c.l.b16 %v2527_v21  ;;  %v2376_v21 = vld [vmem:[#allocation2 + $0x104] sm:$0xe] }
 0x248   : > { %v2310_v33 = vadd.f32 %v10030_v35, %v2056_v32  ;;  %v1846_v32 = vrot.slane %v1693_v23, 7  ;;  %v2532_v23 = vrot.slane %v2530_v3, 4 }
 0x249   : > { %8144 = vmatmul.msk.bf16.gmra.mxu0 %vm887_vm3, %v8880_v54  ;;  %v10065_v4 = vpop.f32.mrf.mxu1  ;;  %v2589_v13 = vpack.c.b16 %v2571_v40, %v2570_v57  ;;  %v8161_v40 = vrot.slane %v2376_v21, 9 }
 0x24a   : > { %v2740_v55 = vadd.f32 %v2672_v44, %v2310_v33  ;;  %v1905_v44 = vpack.c.b16 %v1887_v62, %v1886_v12  ;;  %v2964_v33 = vrot.slane %v2809_v17, 7  ;;  %v1848_v12 = vrot.slane %v1846_v32, 4 }
 0x24b   : > { %v10071_v45 = vpop.f32.mrf.mxu2  ;;  %v1849_v62 = vrot.slane %v1694_v52, 7  ;;  %v2531_v52 = vsel %vm9403_vm6, %v8161_v40, %v2530_v3  ;;  %v2812_v3 = vld [vmem:[#allocation2 + $0x138] sm:$0x7] }
 0x24c   : > { %v10073_v35 = vadd.f32 %v3103_v51, %v2740_v55  ;;  %v8047_v55 = vrot.slane %v1692_v50, 11  ;;  %v2965_v57 = vsel %vm9417_vm10, %v2963_v24, %v2964_v33  ;;  %v2534_v24 = vsel %vm9403_vm6, %v2532_v23, %v2533_v20  ;;  %v2380_v40 = vld [vmem:[#allocation2 + $0x118] sm:$0xf] }
 0x24d   : > { %v1990_v59 = vpop.f32.mrf.mxu3 }
 0x24e   : > { %v10075_v54 = vpop.f32.mrf.mxu0  ;;  %v2057_v39 = vadd.f32 %v1990_v59, %v9735_v53 }
 0x250   : > { %8210 = vmatmul.msk.bf16.gmra.mxu2 %vm887_vm3, %v3020_v22  ;;  %v10080_v51 = vadd.f32 %v10045_v49, %v2057_v39  ;;  %v2962_v22 = vsel %vm9417_vm10, %v8194_v61, %v2961_v15  ;;  %v8881_v49 = vld [vmem:[#allocation2 + $0x104] sm:$0xff]  ;;  %v1847_v39 = vsel %vm9417_vm10, %v8047_v55, %v1846_v32  ;;  %v3004_v15 = vunpack.c.l.b16 %v2965_v57 }
 0x251   : > { %v2677_v1 = vpop.f32.mrf.mxu1  ;;  %v1888_v21 = vunpack.c.l.b16 %v1847_v39  ;;  %v1695_v39 = vld [vmem:[#allocation2 + $0x110] sm:$0x8] }
 0x252   : > { %8063 = vmatmul.msk.bf16.gmra.mxu3 %vm887_vm3, %v1905_v44  ;;  %v1850_v44 = vsel %vm9417_vm10, %v1848_v12, %v1849_v62  ;;  %v2572_v12 = vunpack.c.l.b16 %v2531_v52  ;;  %v2573_v62 = vunpack.c.l.b16 %v2534_v24  ;;  %v2971_v24 = vrot.slane %v2812_v3, 7 }
 0x253   : > { %v3108_v53 = vpop.f32.mrf.mxu2  ;;  %v1889_v32 = vunpack.c.l.b16 %v1850_v44 }
 0x254   : > { %8177 = vmatmul.msk.bf16.gmra.mxu1 %vm887_vm3, %v2589_v13  ;;  %v3003_v13 = vunpack.c.l.b16 %v2962_v22  ;;  %v1696_v22 = vld [vmem:[#allocation2 + $0x114] sm:$0xf]  ;;  %v2590_v20 = vpack.c.b16 %v2573_v62, %v2572_v12 }
 0x255   : > { %v1993_v59 = vpop.f32.mrf.mxu3  ;;  %v1853_v44 = vrot.slane %v1696_v22, 7  ;;  %v8882_v62 = vld [vmem:[#allocation2 + $0x114] sm:$0xff] }
 0x256   : > { %v10088_v17 = vpop.f32.mrf.mxu0  ;;  %v2058_v63 = vadd.f32 %v1993_v59, %v9742_v28  ;;  %v2811_v28 = vld [vmem:[#allocation2 + $0x134] sm:$0xf]  ;;  %v3021_v55 = vpack.c.b16 %v3004_v15, %v3003_v13 }
 0x257   : > { %v2968_v57 = vrot.slane %v2811_v28, 7  ;;  %v2537_v28 = vrot.slane %v2380_v40, 5 }
 0x258   : > { %v2312_v50 = vadd.f32 %v2247_v26, %v2058_v63 }
 0x259   : > { %8145 = vmatmul.msk.bf16.gmra.mxu0 %vm887_vm3, %v8881_v49  ;;  %v10096_v61 = vpop.f32.mrf.mxu1  ;;  %v2810_v49 = vld [vmem:[#allocation2 + $0x130] sm:$0x8]  ;;  %v2970_v52 = vrot.slane %v2968_v57, 4 }
 0x25a   : > { %11929 = vst [vmem:[#allocation5_spill] sm:$0xff] %v10096_v61  ;;  %v2742_v33 = vadd.f32 %v2677_v1, %v2312_v50  ;;  %v1906_v1 = vpack.c.b16 %v1889_v32, %v1888_v21  ;;  %v8195_v13 = vrot.slane %v2810_v49, 11  ;;  %v1697_v50 = vld [vmem:[#allocation2 + $0x118] sm:$0x7]  ;;  %v3450_v21 = vld [vmem:[#allocation2 + $0x48] sm:$0xf] }
 0x25b   : > { %v10102_v30 = vpop.f32.mrf.mxu2  ;;  %v8048_v32 = vrot.slane %v1695_v39, 11  ;;  %v1856_v12 = vrot.slane %v1697_v50, 7  ;;  %v2972_v22 = vsel %vm9417_vm10, %v2970_v52, %v2971_v24 }
 0x25c   : > { %11930 = vst [vmem:[#allocation6_spill] sm:$0xff] %v10102_v30  ;;  %v10104_v26 = vadd.f32 %v3108_v53, %v2742_v33  ;;  %v2379_v33 = vld [vmem:[#allocation2 + $0x114] sm:$0xe]  ;;  %v2381_v30 = vld [vmem:[#allocation2 + $0x11c] sm:$0x1]  ;;  %v3006_v50 = vunpack.c.l.b16 %v2972_v22 }
 0x25d   : > { %v1995_v59 = vpop.f32.mrf.mxu3  ;;  %v8162_v49 = vrot.slane %v2379_v33, 9  ;;  %v2540_v3 = vrot.slane %v2381_v30, 5  ;;  %v1854_v39 = vsel %vm9417_vm10, %v8048_v32, %v1853_v44 }
 0x25e   : > { %v10106_v63 = vpop.f32.mrf.mxu0  ;;  %v2059_v23 = vadd.f32 %v1995_v59, %v9761_v2  ;;  %v2539_v59 = vrot.slane %v2537_v28, 4 }
 0x25f   : > { %v2538_v24 = vsel %vm9403_vm6, %v8162_v49, %v2537_v28 }
 0x260   : > { %8211 = vmatmul.msk.bf16.gmra.mxu2 %vm887_vm3, %v3021_v55  ;;  %v10111_v53 = vadd.f32 %v10075_v54, %v2059_v23  ;;  %v1855_v55 = vrot.slane %v1853_v44, 4  ;;  %v2969_v54 = vsel %vm9417_vm10, %v8195_v13, %v2968_v57 }
 0x261   : > { %v2682_v15 = vpop.f32.mrf.mxu1  ;;  %v3005_v13 = vunpack.c.l.b16 %v2969_v54 }
 0x262   : > { %11931 = vst [vmem:[#allocation7_spill] sm:$0xff] %v10111_v53  ;;  %8064 = vmatmul.msk.bf16.gmra.mxu3 %vm887_vm3, %v1906_v1  ;;  %v3547_v1 = vrot.slane %v3450_v21, 5  ;;  %v3449_v53 = vld [vmem:[#allocation2 + $0x44] sm:$0xe]  ;;  %v1857_v57 = vsel %vm9417_vm10, %v1855_v55, %v1856_v12 }
 0x263   : > { %v3113_v2 = vpop.f32.mrf.mxu2  ;;  %v8294_v33 = vrot.slane %v3449_v53, 9  ;;  %v1891_v55 = vunpack.c.l.b16 %v1857_v57  ;;  %v3022_v54 = vpack.c.b16 %v3006_v50, %v3005_v13  ;;  %v3453_v13 = vld [vmem:[#allocation2 + $0x58] sm:$0xf] }
 0x264   : > { %8178 = vmatmul.msk.bf16.gmra.mxu1 %vm887_vm3, %v2590_v20  ;;  %v3451_v20 = vld [vmem:[#allocation2 + $0x4c] sm:$0x1]  ;;  %v3549_v21 = vrot.slane %v3547_v1, 4 }
 0x265   : > { %v1998_v40 = vpop.f32.mrf.mxu3  ;;  %v3550_v44 = vrot.slane %v3451_v20, 5  ;;  %v3548_v28 = vsel %vm9403_vm6, %v8294_v33, %v3547_v1  ;;  %v3454_v33 = vld [vmem:[#allocation2 + $0x5c] sm:$0x1] }
 0x266   : > { %v2257_v23 = vpop.f32.mrf.mxu0  ;;  %v2060_v61 = vadd.f32 %v1998_v40, %v9768_v38  ;;  %v2541_v38 = vsel %vm9403_vm6, %v2539_v59, %v2540_v3  ;;  %v1890_v40 = vunpack.c.l.b16 %v1854_v39 }
 0x267   : > { %v3551_v53 = vsel %vm9403_vm6, %v3549_v21, %v3550_v44 }
 0x268   : > { %v2314_v52 = vadd.f32 %v10088_v17, %v2060_v61  ;;  %v2574_v17 = vunpack.c.l.b16 %v2538_v24  ;;  %v2575_v61 = vunpack.c.l.b16 %v2541_v38  ;;  %v3660_v39 = vunpack.c.l.b16 %v3551_v53  ;;  %v3452_v38 = vld [vmem:[#allocation2 + $0x54] sm:$0xe]  ;;  %v8883_v53 = vld [vmem:[#allocation2 + $0x44] sm:$0xff] }
 0x269   : > { %8146 = vmatmul.msk.bf16.gmra.mxu0 %vm887_vm3, %v8882_v62  ;;  %v10126_v30 = vpop.f32.mrf.mxu1  ;;  %v8295_v44 = vrot.slane %v3452_v38, 9  ;;  %v3457_v38 = vld [vmem:[#allocation2 + $0x6c] sm:$0x1] }
 0x26a   : > { %11932 = vst [vmem:[#allocation8_spill] sm:$0xff] %v10126_v30  ;;  %v2744_v32 = vadd.f32 %v2682_v15, %v2314_v52  ;;  %v1907_v15 = vpack.c.b16 %v1891_v55, %v1890_v40  ;;  %v2591_v59 = vpack.c.b16 %v2575_v61, %v2574_v17  ;;  %v3557_v40 = vrot.slane %v3454_v33, 5 }
 0x26b   : > { %v10132_v12 = vpop.f32.mrf.mxu2 }
 0x26c   : > { %v10134_v62 = vadd.f32 %v3113_v2, %v2744_v32  ;;  %v3659_v2 = vunpack.c.l.b16 %v3548_v28 }
 0x26d   : > { %v2000_v22 = vpop.f32.mrf.mxu3 }
 0x26e   : > { %v2259_v30 = vpop.f32.mrf.mxu0  ;;  %v2061_v49 = vadd.f32 %v2000_v22, %v9787_v11  ;;  %v3691_v1 = vpack.c.b16 %v3660_v39, %v3659_v2  ;;  %v3554_v11 = vrot.slane %v3453_v13, 5  ;;  %v3456_v39 = vld [vmem:[#allocation2 + $0x68] sm:$0xf] }
 0x270   : > { %8212 = vmatmul.msk.bf16.gmra.mxu2 %vm887_vm3, %v3022_v54  ;;  %v10143_v3 = vadd.f32 %v10106_v63, %v2061_v49  ;;  %v3556_v32 = vrot.slane %v3554_v11, 4 }
 0x271   : > { %v2687_v20 = vpop.f32.mrf.mxu1 }
 0x272   : > { %8065 = vmatmul.msk.bf16.gmra.mxu3 %vm887_vm3, %v1907_v15 }
 0x273   : > { %v3118_v57 = vpop.f32.mrf.mxu2 }
 0x274   : > { %8179 = vmatmul.msk.bf16.gmra.mxu1 %vm887_vm3, %v2591_v59 }
 0x275   : > { %v2003_v50 = vpop.f32.mrf.mxu3 }
 0x276   : > { %v2262_v52 = vpop.f32.mrf.mxu0  ;;  %v2062_v24 = vadd.f32 %v2003_v50, %v9794_v48  ;;  %v3555_v48 = vsel %vm9403_vm6, %v8295_v44, %v3554_v11  ;;  %v3561_v50 = vrot.slane %v3456_v39, 5  ;;  %v3564_v44 = vrot.slane %v3457_v38, 5  ;;  %v3459_v39 = vld [vmem:[#allocation2 + $0x78] sm:$0xf]  ;;  %v3458_v38 = vld [vmem:[#allocation2 + $0x74] sm:$0xe] }
 0x277   : > { %v3661_v59 = vunpack.c.l.b16 %v3555_v48 }
 0x278   : > { %v2316_v21 = vadd.f32 %v2257_v23, %v2062_v24  ;;  %v3558_v23 = vsel %vm9403_vm6, %v3556_v32, %v3557_v40  ;;  %v3455_v24 = vld [vmem:[#allocation2 + $0x64] sm:$0xe] }
 0x279   : > { %8311 = vmatmul.msk.bf16.vlgmr.msra.gmra.mxu0 %vm887_vm3, %v3691_v1  ;;  %v10149_v63 = vpop.f32.mrf.mxu1 }
 0x27a   : > { %v2746_v55 = vadd.f32 %v2687_v20, %v2316_v21  ;;  %v3662_v20 = vunpack.c.l.b16 %v3558_v23  ;;  %v3563_v21 = vrot.slane %v3561_v50, 4 }
 0x27b   : > { %v10151_v54 = vpop.f32.mrf.mxu2 }
 0x27c   : > { %v10153_v17 = vadd.f32 %v3118_v57, %v2746_v55  ;;  %v3692_v57 = vpack.c.b16 %v3662_v20, %v3661_v59 }
 0x27d   : > { %v2005_v61 = vpop.f32.mrf.mxu3 }
 0x27e   : > { %v2264_v22 = vpop.f32.mrf.mxu0  ;;  %v2063_v28 = vadd.f32 %v2005_v61, %v9813_v27 }
 0x280   : > { %v10160_v49 = vadd.f32 %v2259_v30, %v2063_v28  ;;  %v8296_v30 = vrot.slane %v3455_v24, 9  ;;  %v8884_v28 = vld [vmem:[#allocation2 + $0x54] sm:$0xff]  ;;  %v3568_v24 = vrot.slane %v3459_v39, 5 }
 0x281   : > { %v2692_v15 = vpop.f32.mrf.mxu1 }
 0x282   : > { %8278 = vmatmul.msk.bf16.vlgmr.msra.gmra.mxu3 %vm887_vm3, %v8883_v53 }
 0x283   : > { %v3123_v2 = vpop.f32.mrf.mxu2 }
 0x285   : > { %v2008_v13 = vpop.f32.mrf.mxu3 }
 0x286   : > { %v2267_v1 = vpop.f32.mrf.mxu0  ;;  %v2064_v11 = vadd.f32 %v2008_v13, %v9820_v8  ;;  %v3562_v8 = vsel %vm9403_vm6, %v8296_v30, %v3561_v50 }
 0x287   : > { %v3663_v20 = vunpack.c.l.b16 %v3562_v8 }
 0x288   : > { %v2318_v33 = vadd.f32 %v2262_v52, %v2064_v11  ;;  %v3565_v52 = vsel %vm9403_vm6, %v3563_v21, %v3564_v44  ;;  %v3570_v21 = vrot.slane %v3568_v24, 4 }
 0x289   : > { %8312 = vmatmul.msk.bf16.gmra.mxu0 %vm887_vm3, %v3692_v57  ;;  %v10165_v27 = vpop.f32.mrf.mxu1 }
 0x28a   : > { %v2748_v32 = vadd.f32 %v2692_v15, %v2318_v33  ;;  %v3664_v15 = vunpack.c.l.b16 %v3565_v52  ;;  %v3460_v33 = vld [vmem:[#allocation2 + $0x7c] sm:$0x1] }
 0x28b   : > { %v10167_v40 = vpop.f32.mrf.mxu2  ;;  %v3571_v44 = vrot.slane %v3460_v33, 5 }
 0x28c   : > { %v10169_v55 = vadd.f32 %v3123_v2, %v2748_v32  ;;  %v3693_v57 = vpack.c.b16 %v3664_v15, %v3663_v20  ;;  %v8885_v20 = vld [vmem:[#allocation2 + $0x64] sm:$0xff] }
 0x28d   : > { %v2010_v61 = vpop.f32.mrf.mxu3 }
 0x28e   : > { %v2269_v48 = vpop.f32.mrf.mxu0  ;;  %v2065_v23 = vadd.f32 %v2010_v61, %v9839_v47 }
 0x290   : > { %v10176_v53 = vadd.f32 %v2264_v22, %v2065_v23  ;;  %v8297_v22 = vrot.slane %v3458_v38, 9 }
 0x291   : > { %v2697_v59 = vpop.f32.mrf.mxu1 }
 0x292   : > { %8279 = vmatmul.msk.bf16.gmra.mxu3 %vm887_vm3, %v8884_v28 }
 0x293   : > { %v3128_v2 = vpop.f32.mrf.mxu2 }
 0x295   : > { %v2013_v13 = vpop.f32.mrf.mxu3 }
 0x296   : > { %v2272_v11 = vpop.f32.mrf.mxu0  ;;  %v2066_v50 = vadd.f32 %v2013_v13, %v9846_v29  ;;  %v3569_v29 = vsel %vm9403_vm6, %v8297_v22, %v3568_v24  ;;  %v3462_v13 = vld [vmem:[#allocation2 + $0x88] sm:$0xf]  ;;  %v3461_v22 = vld [vmem:[#allocation2 + $0x84] sm:$0xe] }
 0x298   : > { %v2320_v30 = vadd.f32 %v2267_v1, %v2066_v50  ;;  %v3572_v1 = vsel %vm9403_vm6, %v3570_v21, %v3571_v44  ;;  %v3463_v21 = vld [vmem:[#allocation2 + $0x8c] sm:$0x1] }
 0x299   : > { %8313 = vmatmul.msk.bf16.gmra.mxu0 %vm887_vm3, %v3693_v57  ;;  %v10181_v47 = vpop.f32.mrf.mxu1  ;;  %v3665_v57 = vunpack.c.l.b16 %v3569_v29 }
 0x29a   : > { %v2750_v32 = vadd.f32 %v2697_v59, %v2320_v30  ;;  %v3666_v59 = vunpack.c.l.b16 %v3572_v1  ;;  %v3575_v30 = vrot.slane %v3462_v13, 5  ;;  %v8886_v13 = vld [vmem:[#allocation2 + $0x74] sm:$0xff] }
 0x29b   : > { %v10183_v61 = vpop.f32.mrf.mxu2 }
 0x29c   : > { %v10185_v8 = vadd.f32 %v3128_v2, %v2750_v32  ;;  %v3694_v50 = vpack.c.b16 %v3666_v59, %v3665_v57  ;;  %v3577_v32 = vrot.slane %v3575_v30, 4 }
 0x29d   : > { %v2015_v52 = vpop.f32.mrf.mxu3 }
 0x29e   : > { %v2274_v23 = vpop.f32.mrf.mxu0  ;;  %v2067_v28 = vadd.f32 %v2015_v52, %v9865_v9  ;;  %v3578_v52 = vrot.slane %v3463_v21, 5 }
 0x2a0   : > { %v10192_v15 = vadd.f32 %v2269_v48, %v2067_v28  ;;  %v8298_v48 = vrot.slane %v3461_v22, 9  ;;  %v3465_v22 = vld [vmem:[#allocation2 + $0x98] sm:$0xf] }
 0x2a1   : > { %v2702_v39 = vpop.f32.mrf.mxu1 }
 0x2a2   : > { %8280 = vmatmul.msk.bf16.gmra.mxu3 %vm887_vm3, %v8885_v20 }
 0x2a3   : > { %v3133_v2 = vpop.f32.mrf.mxu2 }
 0x2a5   : > { %v2018_v38 = vpop.f32.mrf.mxu3 }
 0x2a6   : > { %v2277_v33 = vpop.f32.mrf.mxu0  ;;  %v2068_v24 = vadd.f32 %v2018_v38, %v9872_v56  ;;  %v3576_v56 = vsel %vm9403_vm6, %v8298_v48, %v3575_v30  ;;  %v3464_v48 = vld [vmem:[#allocation2 + $0x94] sm:$0xe] }
 0x2a8   : > { %v2322_v44 = vadd.f32 %v2272_v11, %v2068_v24  ;;  %v3579_v11 = vsel %vm9403_vm6, %v3577_v32, %v3578_v52  ;;  %v3667_v24 = vunpack.c.l.b16 %v3576_v56  ;;  %v3466_v32 = vld [vmem:[#allocation2 + $0x9c] sm:$0x1] }
 0x2a9   : > { %8314 = vmatmul.msk.bf16.gmra.mxu0 %vm887_vm3, %v3694_v50  ;;  %v10197_v9 = vpop.f32.mrf.mxu1  ;;  %v3585_v56 = vrot.slane %v3466_v32, 5  ;;  %v3468_v32 = vld [vmem:[#allocation2 + $0xa8] sm:$0xf] }
 0x2aa   : > { %v2752_v29 = vadd.f32 %v2702_v39, %v2322_v44  ;;  %v3668_v39 = vunpack.c.l.b16 %v3579_v11 }
 0x2ab   : > { %v10199_v1 = vpop.f32.mrf.mxu2 }
 0x2ac   : > { %11933 = vst [vmem:[#allocation9_spill] sm:$0xff] %v10199_v1  ;;  %v10201_v28 = vadd.f32 %v3133_v2, %v2752_v29  ;;  %v3695_v21 = vpack.c.b16 %v3668_v39, %v3667_v24  ;;  %v3582_v1 = vrot.slane %v3465_v22, 5 }
 0x2ad   : > { %v2020_v20 = vpop.f32.mrf.mxu3 }
 0x2ae   : > { %v2279_v57 = vpop.f32.mrf.mxu0  ;;  %v2069_v59 = vadd.f32 %v2020_v20, %v9894_v37  ;;  %v3584_v20 = vrot.slane %v3582_v1, 4 }
 0x2b0   : > { %v10208_v50 = vadd.f32 %v2274_v23, %v2069_v59  ;;  %v8299_v23 = vrot.slane %v3464_v48, 9 }
 0x2b1   : > { %v2707_v38 = vpop.f32.mrf.mxu1 }
 0x2b2   : > { %8281 = vmatmul.msk.bf16.gmra.mxu3 %vm887_vm3, %v8886_v13 }
 0x2b3   : > { %v3138_v2 = vpop.f32.mrf.mxu2 }
 0x2b5   : > { %v2023_v44 = vpop.f32.mrf.mxu3 }
 0x2b6   : > { %v2282_v29 = vpop.f32.mrf.mxu0  ;;  %v2070_v30 = vadd.f32 %v2023_v44, %v9906_v34  ;;  %v3583_v34 = vsel %vm9403_vm6, %v8299_v23, %v3582_v1  ;;  %v3467_v23 = vld [vmem:[#allocation2 + $0xa4] sm:$0xe] }
 0x2b7   : > { %v3669_v48 = vunpack.c.l.b16 %v3583_v34 }
 0x2b8   : > { %v2324_v52 = vadd.f32 %v2277_v33, %v2070_v30  ;;  %v3586_v33 = vsel %vm9403_vm6, %v3584_v20, %v3585_v56  ;;  %v3469_v20 = vld [vmem:[#allocation2 + $0xac] sm:$0x1] }
 0x2b9   : > { %8315 = vmatmul.msk.bf16.gmra.mxu0 %vm887_vm3, %v3695_v21  ;;  %v10213_v37 = vpop.f32.mrf.mxu1  ;;  %v8887_v21 = vld [vmem:[#allocation2 + $0x84] sm:$0xff]  ;;  %v3592_v34 = vrot.slane %v3469_v20, 5  ;;  %v3471_v20 = vld [vmem:[#allocation2 + $0xb8] sm:$0xf] }
 0x2ba   : > { %11934 = vst [vmem:[#allocation10_spill] sm:$0xff] %v10213_v37  ;;  %v2754_v11 = vadd.f32 %v2707_v38, %v2324_v52  ;;  %v3670_v38 = vunpack.c.l.b16 %v3586_v33  ;;  %v3589_v37 = vrot.slane %v3468_v32, 5 }
 0x2bb   : > { %v10215_v59 = vpop.f32.mrf.mxu2 }
 0x2bc   : > { %11935 = vst [vmem:[#allocation11_spill] sm:$0xff] %v10215_v59  ;;  %v10217_v13 = vadd.f32 %v3138_v2, %v2754_v11  ;;  %v3696_v52 = vpack.c.b16 %v3670_v38, %v3669_v48 }
 0x2bd   : > { %v2025_v24 = vpop.f32.mrf.mxu3 }
 0x2be   : > { %v2284_v39 = vpop.f32.mrf.mxu0  ;;  %v2071_v22 = vadd.f32 %v2025_v24, %v9925_v6  ;;  %v3591_v24 = vrot.slane %v3589_v37, 4 }
 0x2c0   : > { %v10224_v44 = vadd.f32 %v2279_v57, %v2071_v22  ;;  %v8300_v57 = vrot.slane %v3467_v23, 9 }
 0x2c1   : > { %v2712_v30 = vpop.f32.mrf.mxu1 }
 0x2c2   : > { %11936 = vst [vmem:[#allocation12_spill] sm:$0xff] %v10224_v44  ;;  %8282 = vmatmul.msk.bf16.gmra.mxu3 %vm887_vm3, %v8887_v21 }
 0x2c3   : > { %v3143_v2 = vpop.f32.mrf.mxu2 }
 0x2c5   : > { %v2028_v11 = vpop.f32.mrf.mxu3 }
 0x2c6   : > { %v2287_v59 = vpop.f32.mrf.mxu0  ;;  %v2072_v1 = vadd.f32 %v2028_v11, %v9828_v19  ;;  %v3590_v19 = vsel %vm9403_vm6, %v8300_v57, %v3589_v37  ;;  %v3596_v37 = vrot.slane %v3471_v20, 5 }
 0x2c7   : > { %v3671_v23 = vunpack.c.l.b16 %v3590_v19 }
 0x2c8   : > { %v2326_v56 = vadd.f32 %v2282_v29, %v2072_v1  ;;  %v3593_v29 = vsel %vm9403_vm6, %v3591_v24, %v3592_v34  ;;  %v3472_v24 = vld [vmem:[#allocation2 + $0xbc] sm:$0x1]  ;;  %v4050_v34 = vld [vmem:[#allocation3 + $0x4] sm:$0xf] }
 0x2c9   : > { %8316 = vmatmul.msk.bf16.gmra.mxu0 %vm887_vm3, %v3696_v52  ;;  %v10229_v6 = vpop.f32.mrf.mxu1  ;;  %v8888_v52 = vld [vmem:[#allocation2 + $0x94] sm:$0xff] }
 0x2ca   : > { %11937 = vst [vmem:[#allocation13_spill] sm:$0xff] %v10229_v6  ;;  %v2756_v33 = vadd.f32 %v2712_v30, %v2326_v56  ;;  %v3672_v30 = vunpack.c.l.b16 %v3593_v29  ;;  %v3470_v6 = vld [vmem:[#allocation2 + $0xb4] sm:$0xe]  ;;  %v4049_v29 = vld [vmem:[#allocation3] sm:$0x8] }
 0x2cb   : > { %v10231_v22 = vpop.f32.mrf.mxu2  ;;  %v8301_v19 = vrot.slane %v3470_v6, 9 }
 0x2cc   : > { %11938 = vst [vmem:[#allocation14_spill] sm:$0xff] %v10231_v22  ;;  %v10233_v21 = vadd.f32 %v3143_v2, %v2756_v33  ;;  %v3697_v56 = vpack.c.b16 %v3672_v30, %v3671_v23  ;;  %v8327_v23 = vrot.slane %v4049_v29, 11  ;;  %v8889_v29 = vld [vmem:[#allocation2 + $0xa4] sm:$0xff] }
 0x2cd   : > { %v2030_v48 = vpop.f32.mrf.mxu3 }
 0x2ce   : > { %11939 = vst [vmem:[#allocation15_spill] sm:$0xff] %v10233_v21  ;;  %v2289_v38 = vpop.f32.mrf.mxu0  ;;  %v2073_v32 = vadd.f32 %v2030_v48, %v9842_v60  ;;  %v4147_v60 = vrot.slane %v4050_v34, 7 }
 0x2d0   : > { %v10240_v11 = vadd.f32 %v2284_v39, %v2073_v32  ;;  %v4051_v32 = vld [vmem:[#allocation3 + $0x8] sm:$0x7]  ;;  %v4149_v30 = vrot.slane %v4147_v60, 4 }
 0x2d1   : > { %v2717_v1 = vpop.f32.mrf.mxu1  ;;  %v4150_v20 = vrot.slane %v4051_v32, 7 }
 0x2d2   : > { %11940 = vst [vmem:[#allocation16_spill] sm:$0xff] %v10240_v11  ;;  %8283 = vmatmul.msk.bf16.gmra.mxu3 %vm887_vm3, %v8888_v52  ;;  %v3598_v52 = vrot.slane %v3596_v37, 4  ;;  %v3599_v11 = vrot.slane %v3472_v24, 5  ;;  %v3597_v24 = vsel %vm9403_vm6, %v8301_v19, %v3596_v37  ;;  %v8899_v37 = vld [vmem:[#allocation3 + $0x4] sm:$0xff] }
 0x2d3   : > { %v3148_v2 = vpop.f32.mrf.mxu2  ;;  %8408 = vmatmul.msk.bf16.vlgmr.msra.gmra.mxu1 %vm4340_vm12, %v8899_v37 }
 0x2d5   : > { %v2033_v33 = vpop.f32.mrf.mxu3 }
 0x2d6   : > { %v2292_v22 = vpop.f32.mrf.mxu0  ;;  %v2074_v57 = vadd.f32 %v2033_v33, %v9854_v42  ;;  %v4148_v42 = vsel %vm9417_vm10, %v8327_v23, %v4147_v60 }
 0x2d8   : > { %v2328_v48 = vadd.f32 %v2287_v59, %v2074_v57  ;;  %v4151_v59 = vsel %vm9417_vm10, %v4149_v30, %v4150_v20  ;;  %v3474_v30 = vld [vmem:[#allocation2 + $0xc8] sm:$0xf] }
 0x2d9   : > { %8317 = vmatmul.msk.bf16.gmra.mxu0 %vm887_vm3, %v3697_v56  ;;  %v10245_v39 = vpop.f32.mrf.mxu1  ;;  %v4482_v56 = vunpack.c.l.b16 %v4148_v42  ;;  %v4483_v34 = vunpack.c.l.b16 %v4151_v59  ;;  %v3603_v42 = vrot.slane %v3474_v30, 5 }
 0x2da   : > { %11941 = vst [vmem:[#allocation17_spill] sm:$0xff] %v10245_v39  ;;  %v2758_v21 = vadd.f32 %v2717_v1, %v2328_v48  ;;  %v3600_v1 = vsel %vm9403_vm6, %v3598_v52, %v3599_v11  ;;  %v3473_v52 = vld [vmem:[#allocation2 + $0xc4] sm:$0xe] }
 0x2db   : > { %v10247_v44 = vpop.f32.mrf.mxu2  ;;  %v4514_v60 = vpack.c.b16 %v4483_v34, %v4482_v56  ;;  %v3674_v32 = vunpack.c.l.b16 %v3600_v1 }
 0x2dc   : > { %11942 = vst [vmem:[#allocation18_spill] sm:$0xff] %v10247_v44  ;;  %v10251_v33 = vadd.f32 %v3148_v2, %v2758_v21  ;;  %v3673_v2 = vunpack.c.l.b16 %v3597_v24  ;;  %v4053_v24 = vld [vmem:[#allocation3 + $0x14] sm:$0xf] }
 0x2dd   : > { %v2035_v6 = vpop.f32.mrf.mxu3  ;;  %8424 = vmatmul.msk.bf16.vlgmr.msra.gmra.mxu2 %vm4340_vm12, %v4514_v60  ;;  %v4154_v1 = vrot.slane %v4053_v24, 7  ;;  %v4054_v60 = vld [vmem:[#allocation3 + $0x18] sm:$0x7] }
 0x2de   : > { %v2294_v57 = vpop.f32.mrf.mxu0  ;;  %v2075_v48 = vadd.f32 %v2035_v6, %v9868_v7  ;;  %v3698_v20 = vpack.c.b16 %v3674_v32, %v3673_v2  ;;  %v8456_v7 = vld [vmem:[%s11915_s2 + $0x8] sm:$0xf]  ;;  %v3475_v6 = vld [vmem:[#allocation2 + $0xcc] sm:$0x1]  ;;  %v3605_v2 = vrot.slane %v3603_v42, 4  ;;  %v4157_v30 = vrot.slane %v4054_v60, 7 }
 0x2df   : > { %v4977_v59 = vsel %vm4389_vm11, %v8456_v7, 0  ;;  %v3606_v32 = vrot.slane %v3475_v6, 5  ;;  %v4156_v44 = vrot.slane %v4154_v1, 4  ;;  %v3477_v60 = vld [vmem:[#allocation2 + $0xd8] sm:$0xf] }
 0x2e0   : > { %v10260_v21 = vadd.f32 %v2289_v38, %v2075_v48  ;;  %4986 = vmatpush.bf16.msrb.mxu3 %v4977_v59  ;;  %v8302_v48 = vrot.slane %v3473_v52, 9 }
 0x2e1   : > { %v2722_v23 = vpop.f32.mrf.mxu1 }
 0x2e2   : > { %8284 = vmatmul.msk.bf16.gmra.mxu3 %vm887_vm3, %v8889_v29  ;;  %v4052_v29 = vld [vmem:[#allocation3 + $0x10] sm:$0x8] }
 0x2e3   : > { %v3153_v19 = vpop.f32.mrf.mxu2  ;;  %v8328_v37 = vrot.slane %v4052_v29, 11 }
 0x2e5   : > { %v2038_v11 = vpop.f32.mrf.mxu3  ;;  %v4155_v7 = vsel %vm9417_vm10, %v8328_v37, %v4154_v1  ;;  %v8890_v1 = vld [vmem:[#allocation2 + $0xb4] sm:$0xff] }
 0x2e6   : > { %v2297_v38 = vpop.f32.mrf.mxu0  ;;  %v2076_v56 = vadd.f32 %v2038_v11, %v9880_v14 }
 0x2e8   : > { %v2330_v34 = vadd.f32 %v2292_v22, %v2076_v56  ;;  %v4158_v22 = vsel %vm9417_vm10, %v4156_v44, %v4157_v30  ;;  %v3604_v56 = vsel %vm9403_vm6, %v8302_v48, %v3603_v42  ;;  %v8603_v42 = vld [vmem:[%s11915_s2 + $0x14] sm:$0xf] }
 0x2e9   : > { %8318 = vmatmul.msk.bf16.gmra.mxu0 %vm887_vm3, %v3698_v20  ;;  %v10275_v11 = vpop.f32.mrf.mxu1  ;;  %v4484_v20 = vunpack.c.l.b16 %v4155_v7  ;;  %v4485_v6 = vunpack.c.l.b16 %v4158_v22  ;;  %v3675_v29 = vunpack.c.l.b16 %v3604_v56  ;;  %v8900_v48 = vld [vmem:[#allocation3 + $0x14] sm:$0xff]  ;;  %v3610_v7 = vrot.slane %v3477_v60, 5 }
 0x2ea   : > { %v2760_v39 = vadd.f32 %v2722_v23, %v2330_v34  ;;  %v3607_v23 = vsel %vm9403_vm6, %v3605_v2, %v3606_v32  ;;  %v6091_v2 = vsel %vm4389_vm11, %v8603_v42, 0  ;;  %8409 = vmatmul.msk.bf16.gmra.mxu1 %vm4340_vm12, %v8900_v48 }
 0x2eb   : > { %v3676_v44 = vunpack.c.l.b16 %v3607_v23  ;;  %6100 = vmatpush.bf16.msrb.mxu2 %v6091_v2 }
 0x2ec   : > { %v10273_v14 = vadd.f32 %v3153_v19, %v2760_v39  ;;  %v10284_v39 = vpop.f32.mrf.mxu2  ;;  %v4515_v19 = vpack.c.b16 %v4485_v6, %v4484_v20  ;;  %v3476_v20 = vld [vmem:[#allocation2 + $0xd4] sm:$0xe] }
 0x2ed   : > { %v2040_v52 = vpop.f32.mrf.mxu3  ;;  %v3699_v32 = vpack.c.b16 %v3676_v44, %v3675_v29  ;;  %v8506_v44 = vld [vmem:[%s11915_s2 + $0x10] sm:$0xf] }
 0x2ee   : > { %v2299_v59 = vpop.f32.mrf.mxu0  ;;  %v2077_v24 = vadd.f32 %v2040_v52, %v9898_v58  ;;  %8425 = vmatmul.msk.bf16.gmra.mxu2 %vm4340_vm12, %v4515_v19  ;;  %v8489_v58 = vld [vmem:[%s11915_s2 + $0xc] sm:$0xf]  ;;  %v3478_v52 = vld [vmem:[#allocation2 + $0xdc] sm:$0x1]  ;;  %v5661_v60 = vsel %vm4389_vm11, %v8506_v44, 0 }
 0x2ef   : > { %v3613_v19 = vrot.slane %v3478_v52, 5  ;;  %5670 = vmatpush.bf16.msrb.mxu1 %v5661_v60 }
 0x2f0   : > { %v10286_v34 = vadd.f32 %v2294_v57, %v2077_v24  ;;  %v5407_v57 = vsel %vm4389_vm11, %v8489_v58, 0  ;;  %v8303_v24 = vrot.slane %v3476_v20, 9  ;;  %v3480_v20 = vld [vmem:[#allocation2 + $0xe8] sm:$0xf] }
 0x2f1   : > { %5416 = vmatpush.bf16.msrb.mxu0 %v5407_v57  ;;  %v2727_v56 = vpop.f32.mrf.mxu1  ;;  %v8891_v57 = vld [vmem:[#allocation2 + $0xc4] sm:$0xff] }
 0x2f2   : > { %8285 = vmatmul.msk.bf16.gmra.mxu3 %vm887_vm3, %v8890_v1  ;;  %v3612_v1 = vrot.slane %v3610_v7, 4 }
 0x2f4   : > { %v3158_v6 = vpop.f32.mrf.mxu2  ;;  %v3614_v48 = vsel %vm9403_vm6, %v3612_v1, %v3613_v19  ;;  %v10324_v1 = vld [vmem:[%s11917_s4] ss:$0 sm:$0xff] }
 0x2f5   : > { %v2043_v37 = vpop.f32.mrf.mxu3 }
 0x2f6   : > { %v3767_v30 = vpop.f32.mrf.mxu0  ;;  %v2078_v22 = vadd.f32 %v2043_v37, %v9914_v41 }
 0x2f8   : > { %v2332_v23 = vadd.f32 %v2297_v38, %v2078_v22  ;;  %v3611_v38 = vsel %vm9403_vm6, %v8303_v24, %v3610_v7  ;;  %v3678_v22 = vunpack.c.l.b16 %v3614_v48  ;;  %v10319_v7 = vld [vmem:[%s11916_s3] ss:$0 sm:$0xff]  ;;  %v3481_v24 = vld [vmem:[#allocation2 + $0xec] sm:$0x1] }
 0x2f9   : > { %8319 = vmatmul.msk.bf16.gmra.mxu0 %vm887_vm3, %v3699_v32  ;;  %v3677_v37 = vunpack.c.l.b16 %v3611_v38 }
 0x2fa   : > { %v2762_v29 = vadd.f32 %v2727_v56, %v2332_v23 }
 0x2fb   : > { %v3700_v52 = vpack.c.b16 %v3678_v22, %v3677_v37 }
 0x2fc   : > { %v10305_v42 = vadd.f32 %v3158_v6, %v2762_v29  ;;  %v3617_v6 = vrot.slane %v3480_v20, 5  ;;  %v11945_v29 = vld [vmem:[#allocation4_spill] sm:$0xff] }
 0x2fd   : > { %v2045_v41 = vpop.f32.mrf.mxu3 }
 0x2fe   : > { %11943 = vst [vmem:[#allocation19_spill] sm:$0xff] %v10305_v42  ;;  %v3769_v58 = vpop.f32.mrf.mxu0  ;;  %v2079_v2 = vadd.f32 %v2045_v41, %v9930_v36  ;;  %v3479_v36 = vld [vmem:[#allocation2 + $0xe4] sm:$0xe]  ;;  %v3619_v60 = vrot.slane %v3617_v6, 4  ;;  %v3620_v41 = vrot.slane %v3481_v24, 5 }
 0x2ff   : > { %v8304_v19 = vrot.slane %v3479_v36, 9 }
 0x300   : > { %v10312_v32 = vadd.f32 %v2299_v59, %v2079_v2 }
 0x301   : > { %v3618_v37 = vsel %vm9403_vm6, %v8304_v19, %v3617_v6 }
 0x302   : > { %11944 = vst [vmem:[#allocation20_spill] sm:$0xff] %v10312_v32  ;;  %8286 = vmatmul.msk.bf16.gmra.mxu3 %vm887_vm3, %v8891_v57 }
 0x305   : > { %v3337_v56 = vpop.f32.mrf.mxu3 }
 0x306   : > { %v3772_v23 = vpop.f32.mrf.mxu0  ;;  %v3417_v44 = vadd.f32 %v3337_v56, %v11945_v29  ;;  %v8892_v56 = vld [vmem:[#allocation2 + $0xd4] sm:$0xff] }
 0x308   : > { %v3847_v59 = vadd.f32 %v3767_v30, %v3417_v44  ;;  %v3621_v30 = vsel %vm9403_vm6, %v3619_v60, %v3620_v41  ;;  %v3679_v44 = vunpack.c.l.b16 %v3618_v37 }
 0x309   : > { %8320 = vmatmul.msk.bf16.gmra.mxu0 %vm887_vm3, %v3700_v52  ;;  %v3680_v36 = vunpack.c.l.b16 %v3621_v30 }
 0x30a   : > { %v3883_v38 = vmul.f32 %v10319_v7, %v3847_v59  ;;  %v3483_v59 = vld [vmem:[#allocation2 + $0xf8] sm:$0xf] }
 0x30b   : > { %v3701_v19 = vpack.c.b16 %v3680_v36, %v3679_v44 }
 0x30c   : > { %v3919_v48 = vadd.f32 %v10324_v1, %v3883_v38  ;;  %v3624_v38 = vrot.slane %v3483_v59, 5 }
 0x30d   : > { %v3339_v2 = vpop.f32.mrf.mxu3 }
 0x30e   : > { %v3774_v57 = vpop.f32.mrf.mxu0  ;;  %v3951_v22 = vmax.f32 %v3919_v48, 0.0  ;;  %v3418_v20 = vadd.f32 %v3339_v2, %v9964_v16  ;;  %v3482_v2 = vld [vmem:[#allocation2 + $0xf4] sm:$0xe] }
 0x310   : > { %v3983_v52 = vpack.c.bf16 %v3951_v22, %v3951_v22  ;;  %v3848_v29 = vadd.f32 %v3769_v58, %v3418_v20  ;;  %v3484_v58 = vld [vmem:[#allocation2 + $0xfc] sm:$0x1]  ;;  %v8305_v22 = vrot.slane %v3482_v2, 9  ;;  %v3626_v20 = vrot.slane %v3624_v38, 4 }
 0x312   : > { %4017 = vst.msk [vmem:[#allocation3 + $0x24] sm:$0xf] %vm4016_vm13, %v3983_v52  ;;  %v3884_v24 = vmul.f32 %v10319_v7, %v3848_v29  ;;  %8287 = vmatmul.msk.bf16.gmra.mxu3 %vm887_vm3, %v8892_v56  ;;  %v3627_v52 = vrot.slane %v3484_v58, 5  ;;  %v4055_v29 = vld [vmem:[#allocation3 + $0x20] sm:$0x8] }
 0x314   : > { %v3920_v6 = vadd.f32 %v10324_v1, %v3884_v24 }
 0x315   : > { %v3342_v60 = vpop.f32.mrf.mxu3 }
 0x316   : > { %v3777_v41 = vpop.f32.mrf.mxu0  ;;  %v3952_v16 = vmax.f32 %v3920_v6, 0.0  ;;  %v3419_v48 = vadd.f32 %v3342_v60, %v9983_v18  ;;  %v3625_v18 = vsel %vm9403_vm6, %v8305_v22, %v3624_v38  ;;  %v8893_v60 = vld [vmem:[#allocation2 + $0xe4] sm:$0xff] }
 0x318   : > { %v3984_v37 = vpack.c.bf16 %v3952_v16, %v3952_v16  ;;  %v3849_v30 = vadd.f32 %v3772_v23, %v3419_v48  ;;  %v3628_v23 = vsel %vm9403_vm6, %v3626_v20, %v3627_v52  ;;  %v8329_v16 = vrot.slane %v4055_v29, 11  ;;  %v3486_v20 = vld [vmem:[#allocation2 + $0x108] sm:$0xf] }
 0x319   : > { %8321 = vmatmul.msk.bf16.gmra.mxu0 %vm887_vm3, %v3701_v19  ;;  %v4056_v44 = vld [vmem:[#allocation3 + $0x24] sm:$0xf] }
 0x31a   : > { %4018 = vst.msk [vmem:[#allocation3 + $0x28] sm:$0xf] %vm4016_vm13, %v3984_v37  ;;  %v3885_v56 = vmul.f32 %v10319_v7, %v3849_v30  ;;  %v4161_v48 = vrot.slane %v4056_v44, 7  ;;  %v3681_v37 = vunpack.c.l.b16 %v3625_v18  ;;  %v3682_v30 = vunpack.c.l.b16 %v3628_v23 }
 0x31b   : > { %v3631_v23 = vrot.slane %v3486_v20, 5 }
 0x31c   : > { %v3921_v36 = vadd.f32 %v10324_v1, %v3885_v56  ;;  %v4162_v38 = vsel %vm9417_vm10, %v8329_v16, %v4161_v48  ;;  %v4163_v22 = vrot.slane %v4161_v48, 4  ;;  %v3702_v29 = vpack.c.b16 %v3682_v30, %v3681_v37  ;;  %v3487_v16 = vld [vmem:[#allocation2 + $0x10c] sm:$0x1] }
 0x31d   : > { %v3344_v24 = vpop.f32.mrf.mxu3  ;;  %v3634_v37 = vrot.slane %v3487_v16, 5 }
 0x31e   : > { %v3779_v59 = vpop.f32.mrf.mxu0  ;;  %v3953_v6 = vmax.f32 %v3921_v36, 0.0  ;;  %v3420_v19 = vadd.f32 %v3344_v24, %v9996_v46  ;;  %v4486_v24 = vunpack.c.l.b16 %v4162_v38 }
 0x320   : > { %v3985_v2 = vpack.c.bf16 %v3953_v6, %v3953_v6  ;;  %v3850_v58 = vadd.f32 %v3774_v57, %v3420_v19 }
 0x321   : > { %v8901_v32 = vld [vmem:[#allocation3 + $0x24] sm:$0xff] }
 0x322   : > { %v4057_v56 = vld [vmem:[#allocation3 + $0x28] sm:$0x7]  ;;  %4019 = vst.msk [vmem:[#allocation3 + $0x34] sm:$0xf] %vm4016_vm13, %v3985_v2  ;;  %v3886_v42 = vmul.f32 %v10319_v7, %v3850_v58  ;;  %8288 = vmatmul.msk.bf16.gmra.mxu3 %vm887_vm3, %v8893_v60  ;;  %8410 = vmatmul.msk.bf16.gmra.mxu1 %vm4340_vm12, %v8901_v32  ;;  %v3485_v60 = vld [vmem:[#allocation2 + $0x104] sm:$0xe] }
 0x323   : > { %v4164_v46 = vrot.slane %v4057_v56, 7  ;;  %v3633_v32 = vrot.slane %v3631_v23, 4  ;;  %v4058_v56 = vld [vmem:[#allocation3 + $0x30] sm:$0x8] }
 0x324   : > { %v3922_v57 = vadd.f32 %v10324_v1, %v3886_v42  ;;  %v8306_v42 = vrot.slane %v3485_v60, 9 }
 0x325   : > { %v4165_v52 = vsel %vm9417_vm10, %v4163_v22, %v4164_v46  ;;  %v3347_v44 = vpop.f32.mrf.mxu3  ;;  %v3635_v20 = vsel %vm9403_vm6, %v3633_v32, %v3634_v37 }
 0x326   : > { %v3782_v36 = vpop.f32.mrf.mxu0  ;;  %v4487_v18 = vunpack.c.l.b16 %v4165_v52  ;;  %v3954_v6 = vmax.f32 %v3922_v57, 0.0  ;;  %v3421_v19 = vadd.f32 %v3347_v44, %v10015_v0  ;;  %v8330_v44 = vrot.slane %v4058_v56, 11 }
 0x327   : > { %v3684_v60 = vunpack.c.l.b16 %v3635_v20 }
 0x328   : > { %v4516_v48 = vpack.c.b16 %v4487_v18, %v4486_v24  ;;  %v3986_v2 = vpack.c.bf16 %v3954_v6, %v3954_v6  ;;  %v3851_v58 = vadd.f32 %v3777_v41, %v3421_v19  ;;  %v3632_v41 = vsel %vm9403_vm6, %v8306_v42, %v3631_v23  ;;  %v3489_v42 = vld [vmem:[#allocation2 + $0x118] sm:$0xf] }
 0x329   : > { %8322 = vmatmul.msk.bf16.gmra.mxu0 %vm887_vm3, %v3702_v29  ;;  %v4059_v38 = vld [vmem:[#allocation3 + $0x34] sm:$0xf]  ;;  %v3683_v19 = vunpack.c.l.b16 %v3632_v41 }
 0x32a   : > { %8426 = vmatmul.msk.bf16.gmra.mxu2 %vm4340_vm12, %v4516_v48  ;;  %4020 = vst.msk [vmem:[#allocation3 + $0x38] sm:$0xf] %vm4016_vm13, %v3986_v2  ;;  %v3887_v30 = vmul.f32 %v10319_v7, %v3851_v58  ;;  %v8894_v29 = vld [vmem:[#allocation2 + $0xf4] sm:$0xff]  ;;  %v4168_v24 = vrot.slane %v4059_v38, 7 }
 0x32b   : > { %v3703_v37 = vpack.c.b16 %v3684_v60, %v3683_v19 }
 0x32c   : > { %v3923_v0 = vadd.f32 %v10324_v1, %v3887_v30  ;;  %v4169_v23 = vsel %vm9417_vm10, %v8330_v44, %v4168_v24  ;;  %v4170_v58 = vrot.slane %v4168_v24, 4 }
 0x32d   : > { %v3349_v22 = vpop.f32.mrf.mxu3  ;;  %v4488_v38 = vunpack.c.l.b16 %v4169_v23 }
 0x32e   : > { %v3784_v46 = vpop.f32.mrf.mxu0  ;;  %v3955_v57 = vmax.f32 %v3923_v0, 0.0  ;;  %v3422_v52 = vadd.f32 %v3349_v22, %v10028_v43  ;;  %v3638_v22 = vrot.slane %v3489_v42, 5 }
 0x330   : > { %v3987_v18 = vpack.c.bf16 %v3955_v57, %v3955_v57  ;;  %v3852_v6 = vadd.f32 %v3779_v59, %v3422_v52  ;;  %v3488_v57 = vld [vmem:[#allocation2 + $0x114] sm:$0xe]  ;;  %v3490_v52 = vld [vmem:[#allocation2 + $0x11c] sm:$0x1] }
 0x331   : > { %v8902_v16 = vld [vmem:[#allocation3 + $0x34] sm:$0xff]  ;;  %v3641_v19 = vrot.slane %v3490_v52, 5 }
 0x332   : > { %v4060_v48 = vld [vmem:[#allocation3 + $0x38] sm:$0x7]  ;;  %4021 = vst.msk [vmem:[#allocation3 + $0x44] sm:$0xf] %vm4016_vm13, %v3987_v18  ;;  %v3888_v2 = vmul.f32 %v10319_v7, %v3852_v6  ;;  %8289 = vmatmul.msk.bf16.gmra.mxu3 %vm887_vm3, %v8894_v29  ;;  %8411 = vmatmul.msk.bf16.gmra.mxu1 %vm4340_vm12, %v8902_v16  ;;  %v8307_v18 = vrot.slane %v3488_v57, 9  ;;  %v3640_v6 = vrot.slane %v3638_v22, 4 }
 0x333   : > { %v4171_v43 = vrot.slane %v4060_v48, 7  ;;  %v4061_v16 = vld [vmem:[#allocation3 + $0x40] sm:$0x8] }
 0x334   : > { %v3924_v59 = vadd.f32 %v10324_v1, %v3888_v2 }
 0x335   : > { %v4172_v32 = vsel %vm9417_vm10, %v4170_v58, %v4171_v43  ;;  %v3352_v30 = vpop.f32.mrf.mxu3  ;;  %v3642_v58 = vsel %vm9403_vm6, %v3640_v6, %v3641_v19 }
 0x336   : > { %v3787_v56 = vpop.f32.mrf.mxu0  ;;  %v4489_v0 = vunpack.c.l.b16 %v4172_v32  ;;  %v3956_v41 = vmax.f32 %v3924_v59, 0.0  ;;  %v3423_v20 = vadd.f32 %v3352_v30, %v10043_v5  ;;  %v8895_v59 = vld [vmem:[#allocation2 + $0x104] sm:$0xff]  ;;  %v8331_v32 = vrot.slane %v4061_v16, 11 }
 0x338   : > { %v4517_v29 = vpack.c.b16 %v4489_v0, %v4488_v38  ;;  %v3988_v44 = vpack.c.bf16 %v3956_v41, %v3956_v41  ;;  %v3853_v24 = vadd.f32 %v3782_v36, %v3423_v20  ;;  %v3639_v36 = vsel %vm9403_vm6, %v8307_v18, %v3638_v22 }
 0x339   : > { %8323 = vmatmul.msk.bf16.gmra.mxu0 %vm887_vm3, %v3703_v37  ;;  %v4062_v48 = vld [vmem:[#allocation3 + $0x44] sm:$0xf]  ;;  %v3685_v0 = vunpack.c.l.b16 %v3639_v36  ;;  %v3686_v41 = vunpack.c.l.b16 %v3642_v58  ;;  %v3493_v58 = vld [vmem:[#allocation2 + $0x12c] sm:$0x1] }
 0x33a   : > { %8427 = vmatmul.msk.bf16.gmra.mxu2 %vm4340_vm12, %v4517_v29  ;;  %4022 = vst.msk [vmem:[#allocation3 + $0x48] sm:$0xf] %vm4016_vm13, %v3988_v44  ;;  %v3889_v60 = vmul.f32 %v10319_v7, %v3853_v24  ;;  %v4175_v37 = vrot.slane %v4062_v48, 7  ;;  %v3492_v44 = vld [vmem:[#allocation2 + $0x128] sm:$0xf] }
 0x33b   : > { %v3704_v18 = vpack.c.b16 %v3686_v41, %v3685_v0  ;;  %v3645_v48 = vrot.slane %v3492_v44, 5  ;;  %v3491_v36 = vld [vmem:[#allocation2 + $0x124] sm:$0xe] }
 0x33c   : > { %v3925_v5 = vadd.f32 %v10324_v1, %v3889_v60  ;;  %v4176_v22 = vsel %vm9417_vm10, %v8331_v32, %v4175_v37  ;;  %v4177_v29 = vrot.slane %v4175_v37, 4  ;;  %v8308_v37 = vrot.slane %v3491_v36, 9 }
 0x33d   : > { %v3354_v2 = vpop.f32.mrf.mxu3  ;;  %v4490_v60 = vunpack.c.l.b16 %v4176_v22 }
 0x33e   : > { %v3789_v23 = vpop.f32.mrf.mxu0  ;;  %v3957_v43 = vmax.f32 %v3925_v5, 0.0  ;;  %v3424_v42 = vadd.f32 %v3354_v2, %v10056_v31 }
 0x340   : > { %v3989_v30 = vpack.c.bf16 %v3957_v43, %v3957_v43  ;;  %v3854_v38 = vadd.f32 %v3784_v46, %v3424_v42  ;;  %v2741_v42 = vadd.f32 %v10065_v4, %v10080_v51 }
 0x341   : > { %v8903_v20 = vld [vmem:[#allocation3 + $0x44] sm:$0xff] }
 0x342   : > { %v4063_v57 = vld [vmem:[#allocation3 + $0x48] sm:$0x7]  ;;  %4023 = vst.msk [vmem:[#allocation3 + $0x54] sm:$0xf] %vm4016_vm13, %v3989_v30  ;;  %v3890_v52 = vmul.f32 %v10319_v7, %v3854_v38  ;;  %8290 = vmatmul.msk.bf16.gmra.mxu3 %vm887_vm3, %v8895_v59  ;;  %8412 = vmatmul.msk.bf16.gmra.mxu1 %vm4340_vm12, %v8903_v20  ;;  %v3647_v30 = vrot.slane %v3645_v48, 4  ;;  %v3648_v38 = vrot.slane %v3493_v58, 5  ;;  %v3172_v20 = vadd.f32 %v10071_v45, %v2741_v42 }
 0x343   : > { %v4178_v31 = vrot.slane %v4063_v57, 7  ;;  %v3495_v58 = vld [vmem:[#allocation2 + $0x138] sm:$0xf] }
 0x344   : > { %v3926_v46 = vadd.f32 %v10324_v1, %v3890_v52  ;;  %v3649_v52 = vsel %vm9403_vm6, %v3647_v30, %v3648_v38  ;;  %v3652_v38 = vrot.slane %v3495_v58, 5 }
 0x345   : > { %v4179_v24 = vsel %vm9417_vm10, %v4177_v29, %v4178_v31  ;;  %v3357_v6 = vpop.f32.mrf.mxu3  ;;  %v8896_v31 = vld [vmem:[#allocation2 + $0x114] sm:$0xff] }
 0x346   : > { %v3792_v19 = vpop.f32.mrf.mxu0  ;;  %v4491_v16 = vunpack.c.l.b16 %v4179_v24  ;;  %v3958_v5 = vmax.f32 %v3926_v46, 0.0  ;;  %v3425_v2 = vadd.f32 %v3357_v6, %v10073_v35  ;;  %v4064_v35 = vld [vmem:[#allocation3 + $0x50] sm:$0x8] }
 0x347   : > { %v8332_v44 = vrot.slane %v4064_v35, 11 }
 0x348   : > { %v4518_v43 = vpack.c.b16 %v4491_v16, %v4490_v60  ;;  %v3990_v59 = vpack.c.bf16 %v3958_v5, %v3958_v5  ;;  %v3855_v32 = vadd.f32 %v3787_v56, %v3425_v2  ;;  %v3646_v56 = vsel %vm9403_vm6, %v8308_v37, %v3645_v48 }
 0x349   : > { %8324 = vmatmul.msk.bf16.gmra.mxu0 %vm887_vm3, %v3704_v18  ;;  %v4065_v41 = vld [vmem:[#allocation3 + $0x54] sm:$0xf]  ;;  %v3687_v6 = vunpack.c.l.b16 %v3646_v56  ;;  %v3688_v60 = vunpack.c.l.b16 %v3649_v52  ;;  %v11947_v56 = vld [vmem:[#allocation5_spill] sm:$0xff] }
 0x34a   : > { %8428 = vmatmul.msk.bf16.gmra.mxu2 %vm4340_vm12, %v4518_v43  ;;  %4024 = vst.msk [vmem:[#allocation3 + $0x58] sm:$0xf] %vm4016_vm13, %v3990_v59  ;;  %v3891_v0 = vmul.f32 %v10319_v7, %v3855_v32  ;;  %v4182_v46 = vrot.slane %v4065_v41, 7  ;;  %v3494_v41 = vld [vmem:[#allocation2 + $0x134] sm:$0xe] }
 0x34b   : > { %v3705_v42 = vpack.c.b16 %v3688_v60, %v3687_v6  ;;  %v11948_v6 = vld [vmem:[#allocation6_spill] sm:$0xff] }
 0x34c   : > { %v3927_v57 = vadd.f32 %v10324_v1, %v3891_v0  ;;  %v4183_v48 = vsel %vm9417_vm10, %v8332_v44, %v4182_v46  ;;  %v4184_v2 = vrot.slane %v4182_v46, 4  ;;  %v3654_v44 = vrot.slane %v3652_v38, 4 }
 0x34d   : > { %v3359_v4 = vpop.f32.mrf.mxu3  ;;  %v4492_v37 = vunpack.c.l.b16 %v4183_v48 }
 0x34e   : > { %v3794_v51 = vpop.f32.mrf.mxu0  ;;  %v3959_v22 = vmax.f32 %v3927_v57, 0.0  ;;  %v3426_v29 = vadd.f32 %v3359_v4, %v3172_v20  ;;  %v3496_v20 = vld [vmem:[#allocation2 + $0x13c] sm:$0x1] }
 0x34f   : > { %v11946_v4 = vld [vmem:[#allocation7_spill] sm:$0xff]  ;;  %v3655_v46 = vrot.slane %v3496_v20, 5 }
 0x350   : > { %v3991_v24 = vpack.c.bf16 %v3959_v22, %v3959_v22  ;;  %v3856_v18 = vadd.f32 %v3789_v23, %v3426_v29  ;;  %v2743_v52 = vadd.f32 %v11947_v56, %v11946_v4 }
 0x351   : > { %v8904_v45 = vld [vmem:[#allocation3 + $0x54] sm:$0xff] }
 0x352   : > { %v4066_v16 = vld [vmem:[#allocation3 + $0x58] sm:$0x7]  ;;  %4025 = vst.msk [vmem:[#allocation3 + $0x64] sm:$0xf] %vm4016_vm13, %v3991_v24  ;;  %v3892_v5 = vmul.f32 %v10319_v7, %v3856_v18  ;;  %8291 = vmatmul.msk.bf16.gmra.mxu3 %vm887_vm3, %v8896_v31  ;;  %8413 = vmatmul.msk.bf16.gmra.mxu1 %vm4340_vm12, %v8904_v45  ;;  %v8309_v31 = vrot.slane %v3494_v41, 9  ;;  %v3174_v60 = vadd.f32 %v11948_v6, %v2743_v52  ;;  %v10429_v45 = vpop.f32.mrf.mxu1 }
 0x353   : > { %v4185_v36 = vrot.slane %v4066_v16, 7  ;;  %v10431_v16 = vpop.f32.mrf.mxu2 }
 0x354   : > { %v3928_v23 = vadd.f32 %v10324_v1, %v3892_v5 }
 0x355   : > { %v4186_v43 = vsel %vm9417_vm10, %v4184_v2, %v4185_v36  ;;  %v3362_v59 = vpop.f32.mrf.mxu3  ;;  %v3653_v2 = vsel %vm9403_vm6, %v8309_v31, %v3652_v38  ;;  %v3656_v36 = vsel %vm9403_vm6, %v3654_v44, %v3655_v46 }
 0x356   : > { %v10419_v32 = vpop.f32.mrf.mxu0  ;;  %v4493_v30 = vunpack.c.l.b16 %v4186_v43  ;;  %v3960_v0 = vmax.f32 %v3928_v23, 0.0  ;;  %v3427_v35 = vadd.f32 %v3362_v59, %v10104_v26  ;;  %v4067_v26 = vld [vmem:[#allocation3 + $0x60] sm:$0x8]  ;;  %v8897_v43 = vld [vmem:[#allocation2 + $0x124] sm:$0xff] }
 0x358   : > { %v4519_v57 = vpack.c.b16 %v4493_v30, %v4492_v37  ;;  %v3992_v22 = vpack.c.bf16 %v3960_v0, %v3960_v0  ;;  %v3857_v29 = vadd.f32 %v3792_v19, %v3427_v35  ;;  %v3689_v0 = vunpack.c.l.b16 %v3653_v2 }
 0x359   : > { %8325 = vmatmul.msk.bf16.gmra.mxu0 %vm887_vm3, %v3705_v42  ;;  %v4068_v18 = vld [vmem:[#allocation3 + $0x64] sm:$0xf]  ;;  %v8333_v42 = vrot.slane %v4067_v26, 11  ;;  %v3690_v35 = vunpack.c.l.b16 %v3656_v36 }
 0x35a   : > { %8429 = vmatmul.msk.bf16.gmra.mxu2 %vm4340_vm12, %v4519_v57  ;;  %4026 = vst.msk [vmem:[#allocation3 + $0x68] sm:$0xf] %vm4016_vm13, %v3992_v22  ;;  %v3893_v24 = vmul.f32 %v10319_v7, %v3857_v29  ;;  %v4189_v59 = vrot.slane %v4068_v18, 7  ;;  %v5101_v29 = vld [vmem:[#allocation3 + $0x24] sm:$0xf]  ;;  %v4402_v31 = vpop.f32.mrf.mxu1 }
 0x35b   : > { %v3706_v22 = vpack.c.b16 %v3690_v35, %v3689_v0  ;;  %v5198_v2 = vrot.slane %v5101_v29, 7  ;;  %v11949_v36 = vld [vmem:[#allocation8_spill] sm:$0xff] }
 0x35c   : > { %v3929_v19 = vadd.f32 %v10324_v1, %v3893_v24  ;;  %v4190_v38 = vsel %vm9417_vm10, %v8333_v42, %v4189_v59  ;;  %v4191_v4 = vrot.slane %v4189_v59, 4 }
 0x35d   : > { %v3364_v5 = vpop.f32.mrf.mxu3  ;;  %v4494_v26 = vunpack.c.l.b16 %v4190_v38  ;;  %v5200_v35 = vrot.slane %v5198_v2, 4 }
 0x35e   : > { %v10434_v48 = vpop.f32.mrf.mxu0  ;;  %v3961_v58 = vmax.f32 %v3929_v19, 0.0  ;;  %v3428_v23 = vadd.f32 %v3364_v5, %v3174_v60  ;;  %v5102_v19 = vld [vmem:[#allocation3 + $0x28] sm:$0x7] }
 0x35f   : > { %v5201_v42 = vrot.slane %v5102_v19, 7 }
 0x360   : > { %v3993_v37 = vpack.c.bf16 %v3961_v58, %v3961_v58  ;;  %v3858_v30 = vadd.f32 %v3794_v51, %v3428_v23  ;;  %v4590_v44 = vpop.f32.mrf.mxu2  ;;  %v2745_v58 = vadd.f32 %v11949_v36, %v10143_v3 }
 0x361   : > { %v8905_v41 = vld [vmem:[#allocation3 + $0x64] sm:$0xff] }
 0x362   : > { %v4069_v20 = vld [vmem:[#allocation3 + $0x68] sm:$0x7]  ;;  %4027 = vst.msk [vmem:[#allocation3 + $0x74] sm:$0xf] %vm4016_vm13, %v3993_v37  ;;  %v3894_v57 = vmul.f32 %v10319_v7, %v3858_v30  ;;  %8292 = vmatmul.msk.bf16.gmra.mxu3 %vm887_vm3, %v8897_v43  ;;  %8414 = vmatmul.msk.bf16.gmra.mxu1 %vm4340_vm12, %v8905_v41  ;;  %v5100_v37 = vld [vmem:[#allocation3 + $0x20] sm:$0x8]  ;;  %v3176_v3 = vadd.f32 %v10132_v12, %v2745_v58 }
 0x363   : > { %v4192_v56 = vrot.slane %v4069_v20, 7  ;;  %v4070_v30 = vld [vmem:[#allocation3 + $0x70] sm:$0x8]  ;;  %v8473_v38 = vrot.slane %v5100_v37, 11 }
 0x364   : > { %v3930_v52 = vadd.f32 %v10324_v1, %v3894_v57 }
 0x365   : > { %v4193_v51 = vsel %vm9417_vm10, %v4191_v4, %v4192_v56  ;;  %v3367_v46 = vpop.f32.mrf.mxu3  ;;  %v5202_v4 = vsel %vm9417_vm10, %v5200_v35, %v5201_v42  ;;  %v5104_v35 = vld [vmem:[#allocation3 + $0x34] sm:$0xf] }
 0x366   : > { %v10449_v24 = vpop.f32.mrf.mxu0  ;;  %v4495_v18 = vunpack.c.l.b16 %v4193_v51  ;;  %v3962_v6 = vmax.f32 %v3930_v52, 0.0  ;;  %v3429_v60 = vadd.f32 %v3367_v46, %v10134_v62  ;;  %v10459_v62 = vadd.f32 %v4590_v44, %v4402_v31  ;;  %v8898_v51 = vld [vmem:[#allocation2 + $0x134] sm:$0xff]  ;;  %v10467_v44 = vpop.f32.mrf.mxu1 }
 0x367   : > { %v5311_v36 = vunpack.c.l.b16 %v5202_v4 }
 0x368   : > { %v4520_v5 = vpack.c.b16 %v4495_v18, %v4494_v26  ;;  %v3994_v23 = vpack.c.bf16 %v3962_v6, %v3962_v6  ;;  %v3859_v43 = vadd.f32 %v10419_v32, %v3429_v60  ;;  %v4671_v32 = vld [vmem:[#allocation3 + $0x8] sm:$0xf]  ;;  %v10469_v46 = vpop.f32.mrf.mxu2  ;;  %v4670_v18 = vld [vmem:[#allocation3 + $0x4] sm:$0xe]  ;;  %v4672_v6 = vld [vmem:[#allocation3 + $0xc] sm:$0x1] }
 0x369   : > { %8326 = vmatmul.msk.bf16.gmra.mxu0 %vm887_vm3, %v3706_v22  ;;  %v4071_v0 = vld [vmem:[#allocation3 + $0x74] sm:$0xf]  ;;  %v8334_v22 = vrot.slane %v4070_v30, 11  ;;  %v4768_v31 = vrot.slane %v4671_v32, 5  ;;  %v4771_v37 = vrot.slane %v4672_v6, 5 }
 0x36a   : > { %8430 = vmatmul.msk.bf16.gmra.mxu2 %vm4340_vm12, %v4520_v5  ;;  %4028 = vst.msk [vmem:[#allocation3 + $0x78] sm:$0xf] %vm4016_vm13, %v3994_v23  ;;  %v3895_v59 = vmul.f32 %v10319_v7, %v3859_v43  ;;  %v4196_v29 = vrot.slane %v4071_v0, 7  ;;  %v5199_v5 = vsel %vm9417_vm10, %v8473_v38, %v5198_v2 }
 0x36b   : > { %v5310_v0 = vunpack.c.l.b16 %v5199_v5 }
 0x36c   : > { %v3931_v41 = vadd.f32 %v10324_v1, %v3895_v59  ;;  %v4197_v23 = vsel %vm9417_vm10, %v8334_v22, %v4196_v29  ;;  %v4198_v43 = vrot.slane %v4196_v29, 4  ;;  %v4770_v59 = vrot.slane %v4768_v31, 4 }
 0x36d   : > { %v3369_v20 = vpop.f32.mrf.mxu3  ;;  %v4496_v32 = vunpack.c.l.b16 %v4197_v23  ;;  %v5103_v23 = vld [vmem:[#allocation3 + $0x30] sm:$0x8] }
 0x36e   : > { %v10463_v57 = vpop.f32.mrf.mxu0  ;;  %v3963_v56 = vmax.f32 %v3931_v41, 0.0  ;;  %v3430_v52 = vadd.f32 %v3369_v20, %v3176_v3  ;;  %v4772_v29 = vsel %vm9403_vm6, %v4770_v59, %v4771_v37 }
 0x370   : > { %v3995_v12 = vpack.c.bf16 %v3963_v56, %v3963_v56  ;;  %v3860_v26 = vadd.f32 %v10434_v48, %v3430_v52  ;;  %v8440_v48 = vrot.slane %v4670_v18, 9  ;;  %v5342_v56 = vpack.c.b16 %v5311_v36, %v5310_v0  ;;  %v5105_v52 = vld [vmem:[#allocation3 + $0x38] sm:$0x7] }
 0x371   : > { %v8906_v60 = vld [vmem:[#allocation3 + $0x74] sm:$0xff]  ;;  %v4881_v36 = vunpack.c.l.b16 %v4772_v29 }
 0x372   : > { %v4072_v19 = vld [vmem:[#allocation3 + $0x78] sm:$0x7]  ;;  %4029 = vst.msk [vmem:[#allocation3 + $0x84] sm:$0xf] %vm4016_vm13, %v3995_v12  ;;  %v3896_v58 = vmul.f32 %v10319_v7, %v3860_v26  ;;  %8293 = vmatmul.msk.bf16.gmra.mxu3 %vm887_vm3, %v8898_v51  ;;  %8415 = vmatmul.msk.bf16.gmra.mxu1 %vm4340_vm12, %v8906_v60  ;;  %v4769_v22 = vsel %vm9403_vm6, %v8440_v48, %v4768_v31  ;;  %v5205_v12 = vrot.slane %v5104_v35, 7  ;;  %v4407_v60 = vpop.f32.mrf.mxu1 }
 0x373   : > { %v4199_v42 = vrot.slane %v4072_v19, 7  ;;  %v2747_v26 = vadd.f32 %v10149_v63, %v10160_v49  ;;  %v4595_v19 = vpop.f32.mrf.mxu2  ;;  %v4880_v5 = vunpack.c.l.b16 %v4769_v22  ;;  %v4674_v48 = vld [vmem:[#allocation3 + $0x18] sm:$0xf] }
 0x374   : > { %v3932_v30 = vadd.f32 %v10324_v1, %v3896_v58  ;;  %v4073_v58 = vld [vmem:[#allocation3 + $0x80] sm:$0x8]  ;;  %v5207_v49 = vrot.slane %v5205_v12, 4 }
 0x375   : > { %v4200_v2 = vsel %vm9417_vm10, %v4198_v43, %v4199_v42  ;;  %v3372_v3 = vpop.f32.mrf.mxu3  ;;  %v10497_v43 = vadd.f32 %v4595_v19, %v4407_v60 }
 0x376   : > { %v10483_v41 = vpop.f32.mrf.mxu0  ;;  %v4497_v20 = vunpack.c.l.b16 %v4200_v2  ;;  %v3964_v38 = vmax.f32 %v3932_v30, 0.0  ;;  %v3431_v4 = vadd.f32 %v3372_v3, %v10153_v17  ;;  %v5208_v17 = vrot.slane %v5105_v52, 7  ;;  %v4675_v52 = vld [vmem:[#allocation3 + $0x1c] sm:$0x1] }
 0x377   : > { %v8335_v30 = vrot.slane %v4073_v58, 11  ;;  %v8474_v2 = vrot.slane %v5103_v23, 11  ;;  %v5107_v58 = vld [vmem:[#allocation3 + $0x44] sm:$0xf] }
 0x378   : > { %v4521_v51 = vpack.c.b16 %v4497_v20, %v4496_v32  ;;  %v3996_v18 = vpack.c.bf16 %v3964_v38, %v3964_v38  ;;  %v3861_v6 = vadd.f32 %v10449_v24, %v3431_v4  ;;  %v3178_v24 = vadd.f32 %v10151_v54, %v2747_v26  ;;  %v4673_v54 = vld [vmem:[#allocation3 + $0x14] sm:$0xe] }
 0x379   : > { %8490 = vmatmul.msk.bf16.vlgmr.msrb.gmra.mxu0 %vm4340_vm12, %v5342_v56  ;;  %v4074_v63 = vld [vmem:[#allocation3 + $0x84] sm:$0xf]  ;;  %v5209_v0 = vsel %vm9417_vm10, %v5207_v49, %v5208_v17  ;;  %v4912_v32 = vpack.c.b16 %v4881_v36, %v4880_v5  ;;  %v4775_v38 = vrot.slane %v4674_v48, 5  ;;  %v5206_v29 = vsel %vm9417_vm10, %v8474_v2, %v5205_v12 }
 0x37a   : > { %8431 = vmatmul.msk.bf16.gmra.mxu2 %vm4340_vm12, %v4521_v51  ;;  %4030 = vst.msk [vmem:[#allocation3 + $0x88] sm:$0xf] %vm4016_vm13, %v3996_v18  ;;  %v3897_v31 = vmul.f32 %v10319_v7, %v3861_v6  ;;  %v4203_v20 = vrot.slane %v4074_v63, 7  ;;  %v5313_v26 = vunpack.c.l.b16 %v5209_v0  ;;  %v5312_v36 = vunpack.c.l.b16 %v5206_v29 }
 0x37b   : > { %v4777_v19 = vrot.slane %v4775_v38, 4 }
 0x37c   : > { %v3933_v42 = vadd.f32 %v10324_v1, %v3897_v31  ;;  %v4204_v6 = vsel %vm9417_vm10, %v8335_v30, %v4203_v20  ;;  %v4205_v17 = vrot.slane %v4203_v20, 4  ;;  %v4778_v31 = vrot.slane %v4675_v52, 5  ;;  %v5108_v30 = vld [vmem:[#allocation3 + $0x48] sm:$0x7]  ;;  %v4076_v52 = vld [vmem:[#allocation3 + $0x90] sm:$0x8] }
 0x37d   : > { %v3374_v59 = vpop.f32.mrf.mxu3  ;;  %v4498_v49 = vunpack.c.l.b16 %v4204_v6 }
 0x37e   : > { %v10501_v37 = vpop.f32.mrf.mxu0  ;;  %v3965_v35 = vmax.f32 %v3933_v42, 0.0  ;;  %v3432_v3 = vadd.f32 %v3374_v59, %v3178_v24  ;;  %v5343_v59 = vpack.c.b16 %v5313_v26, %v5312_v36 }
 0x380   : > { %v3997_v4 = vpack.c.bf16 %v3965_v35, %v3965_v35  ;;  %v3862_v56 = vadd.f32 %v10463_v57, %v3432_v3  ;;  %v8441_v57 = vrot.slane %v4673_v54, 9  ;;  %v4779_v35 = vsel %vm9403_vm6, %v4777_v19, %v4778_v31 }
 0x381   : > { %v8907_v51 = vld [vmem:[#allocation3 + $0x84] sm:$0xff]  ;;  %v5212_v3 = vrot.slane %v5107_v58, 7  ;;  %v4883_v54 = vunpack.c.l.b16 %v4779_v35 }
 0x382   : > { %v4075_v22 = vld [vmem:[#allocation3 + $0x88] sm:$0x7]  ;;  %4031 = vst.msk [vmem:[#allocation3 + $0x94] sm:$0xf] %vm4016_vm13, %v3997_v4  ;;  %v3898_v18 = vmul.f32 %v10319_v7, %v3862_v56  ;;  %8457 = vmatmul.msk.bf16.vlgmr.msrb.gmra.mxu3 %vm4340_vm12, %v4912_v32  ;;  %8416 = vmatmul.msk.bf16.gmra.mxu1 %vm4340_vm12, %v8907_v51  ;;  %v4776_v0 = vsel %vm9403_vm6, %v8441_v57, %v4775_v38  ;;  %v5106_v51 = vld [vmem:[#allocation3 + $0x40] sm:$0x8] }
 0x383   : > { %v4206_v60 = vrot.slane %v4075_v22, 7  ;;  %v2749_v32 = vadd.f32 %v10165_v27, %v10176_v53  ;;  %v4882_v38 = vunpack.c.l.b16 %v4776_v0  ;;  %v5214_v29 = vrot.slane %v5212_v3, 4 }
 0x384   : > { %v3934_v5 = vadd.f32 %v10324_v1, %v3898_v18  ;;  %v8336_v18 = vrot.slane %v4076_v52, 11  ;;  %v8475_v6 = vrot.slane %v5106_v51, 11 }
 0x385   : > { %v4207_v12 = vsel %vm9417_vm10, %v4205_v17, %v4206_v60  ;;  %v3377_v23 = vpop.f32.mrf.mxu3  ;;  %v3180_v27 = vadd.f32 %v10167_v40, %v2749_v32  ;;  %v4913_v19 = vpack.c.b16 %v4883_v54, %v4882_v38 }
 0x386   : > { %v10517_v63 = vpop.f32.mrf.mxu0  ;;  %v4499_v24 = vunpack.c.l.b16 %v4207_v12  ;;  %v3966_v42 = vmax.f32 %v3934_v5, 0.0  ;;  %v3433_v48 = vadd.f32 %v3377_v23, %v10169_v55  ;;  %v5215_v55 = vrot.slane %v5108_v30, 7  ;;  %v4677_v5 = vld [vmem:[#allocation3 + $0x28] sm:$0xf] }
 0x387   : > { %v5213_v23 = vsel %vm9417_vm10, %v8475_v6, %v5212_v3  ;;  %v5110_v3 = vld [vmem:[#allocation3 + $0x54] sm:$0xf] }
 0x388   : > { %v4522_v2 = vpack.c.b16 %v4499_v24, %v4498_v49  ;;  %v3998_v20 = vpack.c.bf16 %v3966_v42, %v3966_v42  ;;  %v3863_v4 = vadd.f32 %v10483_v41, %v3433_v48  ;;  %v5216_v17 = vsel %vm9417_vm10, %v5214_v29, %v5215_v55 }
 0x389   : > { %8491 = vmatmul.msk.bf16.gmra.mxu0 %vm4340_vm12, %v5343_v59  ;;  %v4077_v22 = vld [vmem:[#allocation3 + $0x94] sm:$0xf]  ;;  %v5315_v49 = vunpack.c.l.b16 %v5216_v17  ;;  %v4782_v24 = vrot.slane %v4677_v5, 5  ;;  %v5314_v35 = vunpack.c.l.b16 %v5213_v23 }
 0x38a   : > { %8432 = vmatmul.msk.bf16.gmra.mxu2 %vm4340_vm12, %v4522_v2  ;;  %4032 = vst.msk [vmem:[#allocation3 + $0x98] sm:$0xf] %vm4016_vm13, %v3998_v20  ;;  %v3899_v56 = vmul.f32 %v10319_v7, %v3863_v4  ;;  %v4210_v31 = vrot.slane %v4077_v22, 7  ;;  %v4678_v2 = vld [vmem:[#allocation3 + $0x2c] sm:$0x1]  ;;  %v10552_v22 = vpop.f32.mrf.mxu1 }
 0x38b   : > { %v4784_v38 = vrot.slane %v4782_v24, 4  ;;  %v4785_v54 = vrot.slane %v4678_v2, 5  ;;  %v5344_v29 = vpack.c.b16 %v5315_v49, %v5314_v35 }
 0x38c   : > { %v3935_v53 = vadd.f32 %v10324_v1, %v3899_v56  ;;  %v4211_v48 = vsel %vm9417_vm10, %v8336_v18, %v4210_v31  ;;  %v4212_v59 = vrot.slane %v4210_v31, 4  ;;  %v4676_v56 = vld [vmem:[#allocation3 + $0x24] sm:$0xe]  ;;  %v2751_v18 = vadd.f32 %v10181_v47, %v10192_v15  ;;  %v5109_v47 = vld [vmem:[#allocation3 + $0x50] sm:$0x8] }
 0x38d   : > { %v3379_v41 = vpop.f32.mrf.mxu3  ;;  %v4500_v4 = vunpack.c.l.b16 %v4211_v48  ;;  %v4079_v15 = vld [vmem:[#allocation3 + $0xa0] sm:$0x8] }
 0x38e   : > { %v10533_v26 = vpop.f32.mrf.mxu0  ;;  %v3967_v60 = vmax.f32 %v3935_v53, 0.0  ;;  %v3434_v57 = vadd.f32 %v3379_v41, %v3180_v27  ;;  %v5111_v27 = vld [vmem:[#allocation3 + $0x58] sm:$0x7]  ;;  %v5219_v41 = vrot.slane %v5110_v3, 7 }
 0x390   : > { %v3999_v12 = vpack.c.bf16 %v3967_v60, %v3967_v60  ;;  %v3864_v36 = vadd.f32 %v10501_v37, %v3434_v57  ;;  %v8442_v60 = vrot.slane %v4676_v56, 9  ;;  %v5222_v57 = vrot.slane %v5111_v27, 7  ;;  %v10580_v27 = vpop.f32.mrf.mxu2 }
 0x391   : > { %v8908_v58 = vld [vmem:[#allocation3 + $0x94] sm:$0xff] }
 0x392   : > { %v4078_v40 = vld [vmem:[#allocation3 + $0x98] sm:$0x7]  ;;  %4033 = vst.msk [vmem:[#allocation3 + $0xa4] sm:$0xf] %vm4016_vm13, %v3999_v12  ;;  %v3900_v42 = vmul.f32 %v10319_v7, %v3864_v36  ;;  %8458 = vmatmul.msk.bf16.gmra.mxu3 %vm4340_vm12, %v4913_v19  ;;  %8417 = vmatmul.msk.bf16.gmra.mxu1 %vm4340_vm12, %v8908_v58  ;;  %v4783_v31 = vsel %vm9403_vm6, %v8442_v60, %v4782_v24  ;;  %v8337_v24 = vrot.slane %v4079_v15, 11 }
 0x393   : > { %v4213_v30 = vrot.slane %v4078_v40, 7  ;;  %v3182_v12 = vadd.f32 %v10183_v61, %v2751_v18  ;;  %v4884_v49 = vunpack.c.l.b16 %v4783_v31 }
 0x394   : > { %v3936_v37 = vadd.f32 %v10324_v1, %v3900_v42  ;;  %v8476_v42 = vrot.slane %v5109_v47, 11 }
 0x395   : > { %v4214_v0 = vsel %vm9417_vm10, %v4212_v59, %v4213_v30  ;;  %v3382_v32 = vpop.f32.mrf.mxu3 }
 0x396   : > { %v10549_v20 = vpop.f32.mrf.mxu0  ;;  %v4501_v55 = vunpack.c.l.b16 %v4214_v0  ;;  %v3968_v52 = vmax.f32 %v3936_v37, 0.0  ;;  %v3435_v51 = vadd.f32 %v3382_v32, %v10185_v8  ;;  %v4786_v8 = vsel %vm9403_vm6, %v4784_v38, %v4785_v54  ;;  %v4680_v37 = vld [vmem:[#allocation3 + $0x38] sm:$0xf] }
 0x397   : > { %v4885_v58 = vunpack.c.l.b16 %v4786_v8  ;;  %v4789_v38 = vrot.slane %v4680_v37, 5  ;;  %v11950_v37 = vld [vmem:[#allocation9_spill] sm:$0xff] }
 0x398   : > { %v4523_v53 = vpack.c.b16 %v4501_v55, %v4500_v4  ;;  %v4000_v6 = vpack.c.bf16 %v3968_v52, %v3968_v52  ;;  %v3865_v17 = vadd.f32 %v10517_v63, %v3435_v51  ;;  %v5221_v63 = vrot.slane %v5219_v41, 4 }
 0x399   : > { %8492 = vmatmul.msk.bf16.gmra.mxu0 %vm4340_vm12, %v5344_v29  ;;  %v4080_v5 = vld [vmem:[#allocation3 + $0xa4] sm:$0xf]  ;;  %v4914_v3 = vpack.c.b16 %v4885_v58, %v4884_v49  ;;  %v5220_v55 = vsel %vm9417_vm10, %v8476_v42, %v5219_v41  ;;  %v4681_v29 = vld [vmem:[#allocation3 + $0x3c] sm:$0x1] }
 0x39a   : > { %8433 = vmatmul.msk.bf16.gmra.mxu2 %vm4340_vm12, %v4523_v53  ;;  %4034 = vst.msk [vmem:[#allocation3 + $0xa8] sm:$0xf] %vm4016_vm13, %v4000_v6  ;;  %v3901_v19 = vmul.f32 %v10319_v7, %v3865_v17  ;;  %v5223_v48 = vsel %vm9417_vm10, %v5221_v63, %v5222_v57  ;;  %v4217_v2 = vrot.slane %v4080_v5, 7  ;;  %v5316_v18 = vunpack.c.l.b16 %v5220_v55  ;;  %v5113_v6 = vld [vmem:[#allocation3 + $0x64] sm:$0xf] }
 0x39b   : > { %v5317_v56 = vunpack.c.l.b16 %v5223_v48  ;;  %v4679_v57 = vld [vmem:[#allocation3 + $0x34] sm:$0xe]  ;;  %v4792_v31 = vrot.slane %v4681_v29, 5  ;;  %v5114_v63 = vld [vmem:[#allocation3 + $0x68] sm:$0x7] }
 0x39c   : > { %v3937_v36 = vadd.f32 %v10324_v1, %v3901_v19  ;;  %v4218_v52 = vsel %vm9417_vm10, %v8337_v24, %v4217_v2  ;;  %v4219_v51 = vrot.slane %v4217_v2, 4  ;;  %v4791_v19 = vrot.slane %v4789_v38, 4 }
 0x39d   : > { %v3384_v40 = vpop.f32.mrf.mxu3  ;;  %v4502_v60 = vunpack.c.l.b16 %v4218_v52  ;;  %v5345_v5 = vpack.c.b16 %v5317_v56, %v5316_v18  ;;  %v8443_v42 = vrot.slane %v4679_v57, 9  ;;  %v4683_v18 = vld [vmem:[#allocation3 + $0x48] sm:$0xf] }
 0x39e   : > { %v10567_v23 = vpop.f32.mrf.mxu0  ;;  %v3969_v59 = vmax.f32 %v3937_v36, 0.0  ;;  %v3436_v30 = vadd.f32 %v3384_v40, %v3182_v12  ;;  %v2753_v36 = vadd.f32 %v10197_v9, %v10208_v50  ;;  %v4793_v48 = vsel %vm9403_vm6, %v4791_v19, %v4792_v31 }
 0x39f   : > { %v4412_v61 = vpop.f32.mrf.mxu1  ;;  %v4790_v50 = vsel %vm9403_vm6, %v8443_v42, %v4789_v38 }
 0x3a0   : > { %v4001_v0 = vpack.c.bf16 %v3969_v59, %v3969_v59  ;;  %v3866_v35 = vadd.f32 %v10533_v26, %v3436_v30  ;;  %v10599_v59 = vld [vmem:[%s11916_s3] ss:$0 sm:$0xff]  ;;  %v4082_v30 = vld [vmem:[#allocation3 + $0xb0] sm:$0x8]  ;;  %v4886_v38 = vunpack.c.l.b16 %v4790_v50 }
 0x3a1   : > { %v8909_v32 = vld [vmem:[#allocation3 + $0xa4] sm:$0xff] }
 0x3a2   : > { %v4081_v4 = vld [vmem:[#allocation3 + $0xa8] sm:$0x7]  ;;  %4035 = vst.msk [vmem:[#allocation3 + $0xb4] sm:$0xf] %vm4016_vm13, %v4001_v0  ;;  %v3902_v54 = vmul.f32 %v10319_v7, %v3866_v35  ;;  %8459 = vmatmul.msk.bf16.gmra.mxu3 %vm4340_vm12, %v4914_v3  ;;  %8418 = vmatmul.msk.bf16.gmra.mxu1 %vm4340_vm12, %v8909_v32  ;;  %v3184_v0 = vadd.f32 %v11950_v37, %v2753_v36  ;;  %v10608_v35 = vld [vmem:[%s11917_s4] ss:$0 sm:$0xff] }
 0x3a3   : > { %v4220_v26 = vrot.slane %v4081_v4, 7  ;;  %v4887_v4 = vunpack.c.l.b16 %v4793_v48  ;;  %v5116_v48 = vld [vmem:[#allocation3 + $0x74] sm:$0xf] }
 0x3a4   : > { %v3938_v53 = vadd.f32 %v10324_v1, %v3902_v54  ;;  %v5226_v1 = vrot.slane %v5113_v6, 7 }
 0x3a5   : > { %v4221_v41 = vsel %vm9417_vm10, %v4219_v51, %v4220_v26  ;;  %v3387_v7 = vpop.f32.mrf.mxu3 }
 0x3a6   : > { %v10585_v17 = vpop.f32.mrf.mxu0  ;;  %v4503_v8 = vunpack.c.l.b16 %v4221_v41  ;;  %v3970_v47 = vmax.f32 %v3938_v53, 0.0  ;;  %v3437_v15 = vadd.f32 %v3387_v7, %v10201_v28  ;;  %v5229_v28 = vrot.slane %v5114_v63, 7 }
 0x3a7   : > { %v4414_v49 = vpop.f32.mrf.mxu1  ;;  %v5228_v2 = vrot.slane %v5226_v1, 4  ;;  %v8338_v53 = vrot.slane %v4082_v30, 11 }
 0x3a8   : > { %v4524_v12 = vpack.c.b16 %v4503_v8, %v4502_v60  ;;  %v4002_v58 = vpack.c.bf16 %v3970_v47, %v3970_v47  ;;  %v3867_v40 = vadd.f32 %v10549_v20, %v3437_v15  ;;  %v5112_v20 = vld [vmem:[#allocation3 + $0x60] sm:$0x8]  ;;  %v4915_v8 = vpack.c.b16 %v4887_v4, %v4886_v38  ;;  %v4684_v47 = vld [vmem:[#allocation3 + $0x4c] sm:$0x1] }
 0x3a9   : > { %8493 = vmatmul.msk.bf16.gmra.mxu0 %vm4340_vm12, %v5345_v5  ;;  %v4083_v24 = vld [vmem:[#allocation3 + $0xb4] sm:$0xf]  ;;  %v8477_v52 = vrot.slane %v5112_v20, 11  ;;  %v5230_v51 = vsel %vm9417_vm10, %v5228_v2, %v5229_v28  ;;  %v4796_v15 = vrot.slane %v4683_v18, 5  ;;  %v4799_v42 = vrot.slane %v4684_v47, 5  ;;  %v11951_v38 = vld [vmem:[#allocation12_spill] sm:$0xff] }
 0x3aa   : > { %8434 = vmatmul.msk.bf16.gmra.mxu2 %vm4340_vm12, %v4524_v12  ;;  %4036 = vst.msk [vmem:[#allocation3 + $0xb8] sm:$0xf] %vm4016_vm13, %v4002_v58  ;;  %v3903_v9 = vmul.f32 %v10599_v59, %v3867_v40  ;;  %v4224_v41 = vrot.slane %v4083_v24, 7  ;;  %v5319_v31 = vunpack.c.l.b16 %v5230_v51  ;;  %v4682_v24 = vld [vmem:[#allocation3 + $0x44] sm:$0xe] }
 0x3ab   : > { %v5227_v19 = vsel %vm9417_vm10, %v8477_v52, %v5226_v1  ;;  %v4798_v2 = vrot.slane %v4796_v15, 4  ;;  %v11952_v52 = vld [vmem:[#allocation10_spill] sm:$0xff] }
 0x3ac   : > { %v3939_v3 = vadd.f32 %v10608_v35, %v3903_v9  ;;  %v4225_v63 = vsel %vm9417_vm10, %v8338_v53, %v4224_v41  ;;  %v5318_v40 = vunpack.c.l.b16 %v5227_v19  ;;  %v2755_v51 = vadd.f32 %v11952_v52, %v11951_v38 }
 0x3ad   : > { %v4600_v32 = vpop.f32.mrf.mxu2  ;;  %v3389_v56 = vpop.f32.mrf.mxu3  ;;  %v4504_v20 = vunpack.c.l.b16 %v4225_v63  ;;  %v8444_v53 = vrot.slane %v4682_v24, 9 }
 0x3ae   : > { %v10611_v55 = vadd.f32 %v4600_v32, %v4412_v61  ;;  %v10613_v54 = vpop.f32.mrf.mxu0  ;;  %v3971_v26 = vmax.f32 %v3939_v3, 0.0  ;;  %v3438_v29 = vadd.f32 %v3389_v56, %v3184_v0  ;;  %v5346_v3 = vpack.c.b16 %v5319_v31, %v5318_v40  ;;  %v5117_v32 = vld [vmem:[#allocation3 + $0x78] sm:$0x7] }
 0x3af   : > { %v4417_v60 = vpop.f32.mrf.mxu1  ;;  %v5233_v56 = vrot.slane %v5116_v48, 7 }
 0x3b0   : > { %v4003_v6 = vpack.c.bf16 %v3971_v26, %v3971_v26  ;;  %v3868_v7 = vadd.f32 %v10567_v23, %v3438_v29  ;;  %v4226_v23 = vrot.slane %v4224_v41, 4  ;;  %v4800_v41 = vsel %vm9403_vm6, %v4798_v2, %v4799_v42 }
 0x3b1   : > { %v8910_v61 = vld [vmem:[#allocation3 + $0xb4] sm:$0xff] }
 0x3b2   : > { %v4084_v57 = vld [vmem:[#allocation3 + $0xb8] sm:$0x7]  ;;  %4037 = vst.msk [vmem:[#allocation3 + $0xc4] sm:$0xf] %vm4016_vm13, %v4003_v6  ;;  %v3904_v5 = vmul.f32 %v10599_v59, %v3868_v7  ;;  %8460 = vmatmul.msk.bf16.gmra.mxu3 %vm4340_vm12, %v4915_v8  ;;  %8419 = vmatmul.msk.bf16.gmra.mxu1 %vm4340_vm12, %v8910_v61  ;;  %v4797_v6 = vsel %vm9403_vm6, %v8444_v53, %v4796_v15  ;;  %v5115_v7 = vld [vmem:[#allocation3 + $0x70] sm:$0x8] }
 0x3b3   : > { %v4227_v12 = vrot.slane %v4084_v57, 7  ;;  %v4085_v8 = vld [vmem:[#allocation3 + $0xc0] sm:$0x8]  ;;  %v5235_v61 = vrot.slane %v5233_v56, 4  ;;  %v11953_v57 = vld [vmem:[#allocation11_spill] sm:$0xff] }
 0x3b4   : > { %v3940_v36 = vadd.f32 %v10608_v35, %v3904_v5  ;;  %v3186_v19 = vadd.f32 %v11953_v57, %v2755_v51  ;;  %v4889_v5 = vunpack.c.l.b16 %v4800_v41  ;;  %v8339_v42 = vrot.slane %v4085_v8, 11 }
 0x3b5   : > { %v4602_v58 = vpop.f32.mrf.mxu2  ;;  %v4228_v1 = vsel %vm9417_vm10, %v4226_v23, %v4227_v12  ;;  %v3392_v9 = vpop.f32.mrf.mxu3 }
 0x3b6   : > { %v10629_v28 = vadd.f32 %v4602_v58, %v4414_v49  ;;  %v10631_v50 = vpop.f32.mrf.mxu0  ;;  %v4505_v30 = vunpack.c.l.b16 %v4228_v1  ;;  %v3972_v37 = vmax.f32 %v3940_v36, 0.0  ;;  %v3439_v0 = vadd.f32 %v3392_v9, %v10217_v13  ;;  %v4686_v9 = vld [vmem:[#allocation3 + $0x58] sm:$0xf] }
 0x3b7   : > { %v4419_v29 = vpop.f32.mrf.mxu1  ;;  %v5236_v13 = vrot.slane %v5117_v32, 7  ;;  %v4888_v36 = vunpack.c.l.b16 %v4797_v6  ;;  %v8478_v58 = vrot.slane %v5115_v7, 11  ;;  %v4687_v32 = vld [vmem:[#allocation3 + $0x5c] sm:$0x1] }
 0x3b8   : > { %v4525_v4 = vpack.c.b16 %v4505_v30, %v4504_v20  ;;  %v4004_v26 = vpack.c.bf16 %v3972_v37, %v3972_v37  ;;  %v3869_v49 = vadd.f32 %v10585_v17, %v3439_v0  ;;  %v4806_v41 = vrot.slane %v4687_v32, 5  ;;  %v11957_v32 = vld [vmem:[#allocation14_spill] sm:$0xff] }
 0x3b9   : > { %8494 = vmatmul.msk.bf16.gmra.mxu0 %vm4340_vm12, %v5346_v3  ;;  %v4086_v17 = vld [vmem:[#allocation3 + $0xc4] sm:$0xf]  ;;  %v5237_v15 = vsel %vm9417_vm10, %v5235_v61, %v5236_v13  ;;  %v4916_v2 = vpack.c.b16 %v4889_v5, %v4888_v36  ;;  %v5234_v0 = vsel %vm9417_vm10, %v8478_v58, %v5233_v56  ;;  %v4685_v61 = vld [vmem:[#allocation3 + $0x54] sm:$0xe] }
 0x3ba   : > { %8435 = vmatmul.msk.bf16.gmra.mxu2 %vm4340_vm12, %v4525_v4  ;;  %4038 = vst.msk [vmem:[#allocation3 + $0xc8] sm:$0xf] %vm4016_vm13, %v4004_v26  ;;  %v3905_v18 = vmul.f32 %v10599_v59, %v3869_v49  ;;  %v4231_v48 = vrot.slane %v4086_v17, 7  ;;  %v5321_v3 = vunpack.c.l.b16 %v5237_v15  ;;  %v4803_v4 = vrot.slane %v4686_v9, 5  ;;  %v5119_v13 = vld [vmem:[#allocation3 + $0x84] sm:$0xf] }
 0x3bb   : > { %v5320_v53 = vunpack.c.l.b16 %v5234_v0  ;;  %v5240_v58 = vrot.slane %v5119_v13, 7  ;;  %v11955_v15 = vld [vmem:[#allocation16_spill] sm:$0xff]  ;;  %v8445_v9 = vrot.slane %v4685_v61, 9  ;;  %v4088_v0 = vld [vmem:[#allocation3 + $0xd0] sm:$0x8] }
 0x3bc   : > { %v3941_v31 = vadd.f32 %v10608_v35, %v3905_v18  ;;  %v4232_v52 = vsel %vm9417_vm10, %v8339_v42, %v4231_v48  ;;  %v4805_v57 = vrot.slane %v4803_v4, 4  ;;  %v4689_v61 = vld [vmem:[#allocation3 + $0x68] sm:$0xf] }
 0x3bd   : > { %v4605_v47 = vpop.f32.mrf.mxu2  ;;  %v3394_v23 = vpop.f32.mrf.mxu3  ;;  %v4506_v8 = vunpack.c.l.b16 %v4232_v52  ;;  %v5347_v5 = vpack.c.b16 %v5321_v3, %v5320_v53  ;;  %v5242_v3 = vrot.slane %v5240_v58, 4 }
 0x3be   : > { %v10647_v63 = vadd.f32 %v4605_v47, %v4417_v60  ;;  %v10649_v12 = vpop.f32.mrf.mxu0  ;;  %v3973_v1 = vmax.f32 %v3941_v31, 0.0  ;;  %v3440_v40 = vadd.f32 %v3394_v23, %v3186_v19  ;;  %v11954_v31 = vld [vmem:[#allocation15_spill] sm:$0xff]  ;;  %v5120_v23 = vld [vmem:[#allocation3 + $0x88] sm:$0x7] }
 0x3bf   : > { %v4422_v24 = vpop.f32.mrf.mxu1 }
 0x3c0   : > { %v4005_v20 = vpack.c.bf16 %v3973_v1, %v3973_v1  ;;  %v3870_v30 = vadd.f32 %v10613_v54, %v3440_v40  ;;  %v4233_v54 = vrot.slane %v4231_v48, 4  ;;  %v11956_v1 = vld [vmem:[#allocation13_spill] sm:$0xff] }
 0x3c1   : > { %v8911_v60 = vld [vmem:[#allocation3 + $0xc4] sm:$0xff]  ;;  %v2757_v40 = vadd.f32 %v11956_v1, %v11955_v15  ;;  %v4690_v15 = vld [vmem:[#allocation3 + $0x6c] sm:$0x1]  ;;  %v4810_v1 = vrot.slane %v4689_v61, 5 }
 0x3c2   : > { %v4087_v37 = vld [vmem:[#allocation3 + $0xc8] sm:$0x7]  ;;  %4039 = vst.msk [vmem:[#allocation3 + $0xd4] sm:$0xf] %vm4016_vm13, %v4005_v20  ;;  %v3906_v38 = vmul.f32 %v10599_v59, %v3870_v30  ;;  %8461 = vmatmul.msk.bf16.gmra.mxu3 %vm4340_vm12, %v4916_v2  ;;  %8420 = vmatmul.msk.bf16.gmra.mxu1 %vm4340_vm12, %v8911_v60  ;;  %v4807_v20 = vsel %vm9403_vm6, %v4805_v57, %v4806_v41  ;;  %v5243_v30 = vrot.slane %v5120_v23, 7 }
 0x3c3   : > { %v4234_v51 = vrot.slane %v4087_v37, 7  ;;  %v4804_v60 = vsel %vm9403_vm6, %v8445_v9, %v4803_v4  ;;  %v5118_v37 = vld [vmem:[#allocation3 + $0x80] sm:$0x8] }
 0x3c4   : > { %v3942_v26 = vadd.f32 %v10608_v35, %v3906_v38  ;;  %v3188_v38 = vadd.f32 %v11957_v32, %v2757_v40  ;;  %v4890_v53 = vunpack.c.l.b16 %v4804_v60  ;;  %v8479_v41 = vrot.slane %v5118_v37, 11  ;;  %v5122_v60 = vld [vmem:[#allocation3 + $0x94] sm:$0xf] }
 0x3c5   : > { %v4607_v49 = vpop.f32.mrf.mxu2  ;;  %v4235_v56 = vsel %vm9417_vm10, %v4233_v54, %v4234_v51  ;;  %v3397_v6 = vpop.f32.mrf.mxu3  ;;  %v4891_v51 = vunpack.c.l.b16 %v4807_v20  ;;  %v5244_v4 = vsel %vm9417_vm10, %v5242_v3, %v5243_v30 }
 0x3c6   : > { %v10665_v18 = vadd.f32 %v4607_v49, %v4419_v29  ;;  %v10667_v7 = vpop.f32.mrf.mxu0  ;;  %v4507_v17 = vunpack.c.l.b16 %v4235_v56  ;;  %v3974_v19 = vmax.f32 %v3942_v26, 0.0  ;;  %v3441_v47 = vadd.f32 %v3397_v6, %v11954_v31 }
 0x3c7   : > { %v4424_v48 = vpop.f32.mrf.mxu1  ;;  %v5241_v23 = vsel %vm9417_vm10, %v8479_v41, %v5240_v58 }
 0x3c8   : > { %v4526_v36 = vpack.c.b16 %v4507_v17, %v4506_v8  ;;  %v4006_v42 = vpack.c.bf16 %v3974_v19, %v3974_v19  ;;  %v3871_v29 = vadd.f32 %v10631_v50, %v3441_v47  ;;  %v8340_v8 = vrot.slane %v4088_v0, 11 }
 0x3c9   : > { %8495 = vmatmul.msk.bf16.gmra.mxu0 %vm4340_vm12, %v5347_v5  ;;  %v4089_v50 = vld [vmem:[#allocation3 + $0xd4] sm:$0xf]  ;;  %v4917_v47 = vpack.c.b16 %v4891_v51, %v4890_v53  ;;  %v5322_v30 = vunpack.c.l.b16 %v5241_v23  ;;  %v5123_v53 = vld [vmem:[#allocation3 + $0x98] sm:$0x7] }
 0x3ca   : > { %8436 = vmatmul.msk.bf16.gmra.mxu2 %vm4340_vm12, %v4526_v36  ;;  %4040 = vst.msk [vmem:[#allocation3 + $0xd8] sm:$0xf] %vm4016_vm13, %v4006_v42  ;;  %v3907_v2 = vmul.f32 %v10599_v59, %v3871_v29  ;;  %v4238_v17 = vrot.slane %v4089_v50, 7  ;;  %v5323_v36 = vunpack.c.l.b16 %v5244_v4  ;;  %v5247_v4 = vrot.slane %v5122_v60, 7  ;;  %v11959_v23 = vld [vmem:[#allocation18_spill] sm:$0xff] }
 0x3cc   : > { %v3943_v52 = vadd.f32 %v10608_v35, %v3907_v2  ;;  %v4239_v42 = vsel %vm9417_vm10, %v8340_v8, %v4238_v17  ;;  %v4813_v2 = vrot.slane %v4690_v15, 5 }
 0x3cd   : > { %v4610_v54 = vpop.f32.mrf.mxu2  ;;  %v3399_v49 = vpop.f32.mrf.mxu3  ;;  %v4508_v3 = vunpack.c.l.b16 %v4239_v42 }
 0x3ce   : > { %v10683_v26 = vadd.f32 %v4610_v54, %v4422_v24  ;;  %v10685_v56 = vpop.f32.mrf.mxu0  ;;  %v3975_v13 = vmax.f32 %v3943_v52, 0.0  ;;  %v3442_v6 = vadd.f32 %v3399_v49, %v3188_v38  ;;  %v4688_v38 = vld [vmem:[#allocation3 + $0x64] sm:$0xe]  ;;  %v4812_v52 = vrot.slane %v4810_v1, 4 }
 0x3cf   : > { %v4427_v31 = vpop.f32.mrf.mxu1  ;;  %v5348_v49 = vpack.c.b16 %v5323_v36, %v5322_v30  ;;  %v8446_v61 = vrot.slane %v4688_v38, 9 }
 0x3d0   : > { %v4007_v57 = vpack.c.bf16 %v3975_v13, %v3975_v13  ;;  %v3872_v19 = vadd.f32 %v10649_v12, %v3442_v6  ;;  %v4240_v12 = vrot.slane %v4238_v17, 4  ;;  %v11958_v13 = vld [vmem:[#allocation17_spill] sm:$0xff] }
 0x3d1   : > { %v8912_v24 = vld [vmem:[#allocation3 + $0xd4] sm:$0xff]  ;;  %v2759_v6 = vadd.f32 %v11958_v13, %v10260_v21  ;;  %v4811_v21 = vsel %vm9403_vm6, %v8446_v61, %v4810_v1 }
 0x3d2   : > { %v4090_v5 = vld [vmem:[#allocation3 + $0xd8] sm:$0x7]  ;;  %4041 = vst.msk [vmem:[#allocation3 + $0xe4] sm:$0xf] %vm4016_vm13, %v4007_v57  ;;  %v3908_v40 = vmul.f32 %v10599_v59, %v3872_v19  ;;  %8462 = vmatmul.msk.bf16.gmra.mxu3 %vm4340_vm12, %v4917_v47  ;;  %8421 = vmatmul.msk.bf16.gmra.mxu1 %vm4340_vm12, %v8912_v24  ;;  %v4814_v57 = vsel %vm9403_vm6, %v4812_v52, %v4813_v2  ;;  %v5121_v47 = vld [vmem:[#allocation3 + $0x90] sm:$0x8] }
 0x3d3   : > { %v4241_v29 = vrot.slane %v4090_v5, 7  ;;  %v4091_v24 = vld [vmem:[#allocation3 + $0xe0] sm:$0x8]  ;;  %v5249_v5 = vrot.slane %v5247_v4, 4  ;;  %v3190_v36 = vadd.f32 %v11959_v23, %v2759_v6  ;;  %v4893_v42 = vunpack.c.l.b16 %v4814_v57 }
 0x3d4   : > { %v3944_v9 = vadd.f32 %v10608_v35, %v3908_v40  ;;  %v8341_v60 = vrot.slane %v4091_v24, 11 }
 0x3d5   : > { %v4612_v20 = vpop.f32.mrf.mxu2  ;;  %v4242_v58 = vsel %vm9417_vm10, %v4240_v12, %v4241_v29  ;;  %v3402_v0 = vpop.f32.mrf.mxu3 }
 0x3d6   : > { %v10701_v37 = vadd.f32 %v4612_v20, %v4424_v48  ;;  %v10703_v50 = vpop.f32.mrf.mxu0  ;;  %v4509_v32 = vunpack.c.l.b16 %v4242_v58  ;;  %v3976_v54 = vmax.f32 %v3944_v9, 0.0  ;;  %v3443_v51 = vadd.f32 %v3402_v0, %v10251_v33 }
 0x3d7   : > { %v4429_v17 = vpop.f32.mrf.mxu1  ;;  %v5250_v33 = vrot.slane %v5123_v53, 7  ;;  %v4892_v20 = vunpack.c.l.b16 %v4811_v21  ;;  %v8480_v58 = vrot.slane %v5121_v47, 11  ;;  %v10737_v47 = vld [vmem:[#allocation3 + $0xa4] sm:$0xf] }
 0x3d8   : > { %v4527_v41 = vpack.c.b16 %v4509_v32, %v4508_v3  ;;  %v4008_v8 = vpack.c.bf16 %v3976_v54, %v3976_v54  ;;  %v3873_v48 = vadd.f32 %v10667_v7, %v3443_v51  ;;  %v4692_v3 = vld [vmem:[#allocation3 + $0x78] sm:$0xf] }
 0x3d9   : > { %8496 = vmatmul.msk.bf16.gmra.mxu0 %vm4340_vm12, %v5348_v49  ;;  %v4092_v7 = vld [vmem:[#allocation3 + $0xe4] sm:$0xf]  ;;  %v5251_v1 = vsel %vm9417_vm10, %v5249_v5, %v5250_v33  ;;  %v4918_v54 = vpack.c.b16 %v4893_v42, %v4892_v20  ;;  %v5248_v49 = vsel %vm9417_vm10, %v8480_v58, %v5247_v4  ;;  %v4817_v13 = vrot.slane %v4692_v3, 5  ;;  %v5126_v20 = vld [vmem:[#allocation3 + $0xa8] sm:$0x7] }
 0x3da   : > { %8437 = vmatmul.msk.bf16.gmra.mxu2 %vm4340_vm12, %v4527_v41  ;;  %4042 = vst.msk [vmem:[#allocation3 + $0xe8] sm:$0xf] %vm4016_vm13, %v4008_v8  ;;  %v3909_v19 = vmul.f32 %v10599_v59, %v3873_v48  ;;  %v4245_v0 = vrot.slane %v4092_v7, 7  ;;  %v5325_v53 = vunpack.c.l.b16 %v5251_v1  ;;  %v4693_v41 = vld [vmem:[#allocation3 + $0x7c] sm:$0x1]  ;;  %v5324_v33 = vunpack.c.l.b16 %v5248_v49 }
 0x3db   : > { %v4820_v21 = vrot.slane %v4693_v41, 5  ;;  %v2761_v58 = vadd.f32 %v10275_v11, %v10286_v34  ;;  %v5124_v11 = vld [vmem:[#allocation3 + $0xa0] sm:$0x8]  ;;  %v5257_v34 = vrot.slane %v5126_v20, 7  ;;  %v8653_v41 = vld [vmem:[%s11915_s2 + $0x1c] sm:$0xf] }
 0x3dc   : > { %v3945_v15 = vadd.f32 %v10608_v35, %v3909_v19  ;;  %v4246_v8 = vsel %vm9417_vm10, %v8341_v60, %v4245_v0  ;;  %v4691_v19 = vld [vmem:[#allocation3 + $0x74] sm:$0xe] }
 0x3dd   : > { %v4615_v40 = vpop.f32.mrf.mxu2  ;;  %v3404_v29 = vpop.f32.mrf.mxu3  ;;  %v4510_v23 = vunpack.c.l.b16 %v4246_v8 }
 0x3de   : > { %v10719_v12 = vadd.f32 %v4615_v40, %v4427_v31  ;;  %v10721_v9 = vpop.f32.mrf.mxu0  ;;  %v3977_v30 = vmax.f32 %v3945_v15, 0.0  ;;  %v3444_v2 = vadd.f32 %v3404_v29, %v3190_v36  ;;  %v4819_v15 = vrot.slane %v4817_v13, 4 }
 0x3df   : > { %v4432_v52 = vpop.f32.mrf.mxu1  ;;  %v5349_v29 = vpack.c.b16 %v5325_v53, %v5324_v33  ;;  %v7361_v53 = vld [vmem:[%s11920_s7] sm:$0x3] }
 0x3e0   : > { %v4009_v32 = vpack.c.bf16 %v3977_v30, %v3977_v30  ;;  %v3874_v38 = vadd.f32 %v10685_v56, %v3444_v2  ;;  %v4247_v56 = vrot.slane %v4245_v0, 4  ;;  %v8447_v30 = vrot.slane %v4691_v19, 9  ;;  %v10775_v19 = vld [vmem:[#allocation3 + $0x88] sm:$0xf] }
 0x3e1   : > { %v8913_v31 = vld [vmem:[#allocation3 + $0xe4] sm:$0xff]  ;;  %v5254_v2 = vrot.slane %v10737_v47, 7  ;;  %v4821_v3 = vsel %vm9403_vm6, %v4819_v15, %v4820_v21  ;;  %v6776_v21 = vsel %vm4389_vm11, %v8653_v41, 0 }
 0x3e2   : > { %v4093_v51 = vld [vmem:[#allocation3 + $0xe8] sm:$0x7]  ;;  %4043 = vst.msk [vmem:[#allocation3 + $0xf4] sm:$0xf] %vm4016_vm13, %v4009_v32  ;;  %v3910_v6 = vmul.f32 %v10599_v59, %v3874_v38  ;;  %8463 = vmatmul.msk.bf16.gmra.mxu3 %vm4340_vm12, %v4918_v54  ;;  %8422 = vmatmul.msk.bf16.gmra.mxu1 %vm4340_vm12, %v8913_v31  ;;  %v4094_v32 = vld [vmem:[#allocation3 + $0xf0] sm:$0x8]  ;;  %v3192_v31 = vadd.f32 %v10284_v39, %v2761_v58 }
 0x3e3   : > { %v4248_v48 = vrot.slane %v4093_v51, 7  ;;  %v5256_v51 = vrot.slane %v5254_v2, 4  ;;  %6785 = vmatpush.bf16.msra.mxu0 %v6776_v21 }
 0x3e4   : > { %v3946_v61 = vadd.f32 %v10608_v35, %v3910_v6 }
 0x3e5   : > { %v4617_v57 = vpop.f32.mrf.mxu2  ;;  %v4249_v4 = vsel %vm9417_vm10, %v4247_v56, %v4248_v48  ;;  %v3407_v7 = vpop.f32.mrf.mxu3  ;;  %v4895_v56 = vunpack.c.l.b16 %v4821_v3  ;;  %v7491_v48 = vsel %vm936_vm2, %v7361_v53, 0  ;;  %v5258_v33 = vsel %vm9417_vm10, %v5256_v51, %v5257_v34 }
 0x3e6   : > { %v10739_v24 = vadd.f32 %v4617_v57, %v4429_v17  ;;  %v10741_v5 = vpop.f32.mrf.mxu0  ;;  %v4511_v36 = vunpack.c.l.b16 %v4249_v4  ;;  %v3978_v40 = vmax.f32 %v3946_v61, 0.0  ;;  %v3445_v42 = vadd.f32 %v3407_v7, %v10273_v14  ;;  %7500 = vmatpush.bf16.msra.mxu2 %v7491_v48 }
 0x3e7   : > { %v4434_v0 = vpop.f32.mrf.mxu1  ;;  %v4818_v14 = vsel %vm9403_vm6, %v8447_v30, %v4817_v13  ;;  %v8481_v4 = vrot.slane %v5124_v11, 11 }
 0x3e8   : > { %v4528_v1 = vpack.c.b16 %v4511_v36, %v4510_v23  ;;  %v4010_v17 = vpack.c.bf16 %v3978_v40, %v3978_v40  ;;  %v3875_v60 = vadd.f32 %v10703_v50, %v3445_v42  ;;  %v8636_v50 = vld [vmem:[%s11915_s2 + $0x18] sm:$0xf]  ;;  %v4894_v8 = vunpack.c.l.b16 %v4818_v14 }
 0x3e9   : > { %8497 = vmatmul.msk.bf16.gmra.mxu0 %vm4340_vm12, %v5349_v29  ;;  %v4095_v54 = vld [vmem:[#allocation3 + $0xf4] sm:$0xf]  ;;  %v6522_v49 = vsel %vm4389_vm11, %v8636_v50, 0  ;;  %v8342_v23 = vrot.slane %v4094_v32, 11  ;;  %v5255_v30 = vsel %vm9417_vm10, %v8481_v4, %v5254_v2  ;;  %v4824_v14 = vrot.slane %v10775_v19, 5  ;;  %v11961_v19 = vld [vmem:[#allocation20_spill] sm:$0xff] }
 0x3ea   : > { %8438 = vmatmul.msk.bf16.gmra.mxu2 %vm4340_vm12, %v4528_v1  ;;  %4044 = vst.msk [vmem:[#allocation3 + $0xf8] sm:$0xf] %vm4016_vm13, %v4010_v17  ;;  %v3911_v38 = vmul.f32 %v10599_v59, %v3875_v60  ;;  %6531 = vmatpush.bf16.msra.mxu3 %v6522_v49  ;;  %v4252_v36 = vrot.slane %v4095_v54, 7  ;;  %v4919_v20 = vpack.c.b16 %v4895_v56, %v4894_v8  ;;  %v5327_v17 = vunpack.c.l.b16 %v5258_v33  ;;  %v4696_v60 = vld [vmem:[#allocation3 + $0x8c] sm:$0x1]  ;;  %v11960_v56 = vld [vmem:[#allocation19_spill] sm:$0xff] }
 0x3eb   : > { %v5326_v54 = vunpack.c.l.b16 %v5255_v30  ;;  %v4827_v50 = vrot.slane %v4696_v60, 5  ;;  %v4694_v4 = vld [vmem:[#allocation3 + $0x84] sm:$0xe]  ;;  %v5128_v33 = vld [vmem:[#allocation3 + $0xb4] sm:$0xf]  ;;  %v2763_v21 = vadd.f32 %v10429_v45, %v11961_v19 }
 0x3ec   : > { %v3947_v13 = vadd.f32 %v10608_v35, %v3911_v38  ;;  %v4254_v32 = vrot.slane %v4252_v36, 4 }
 0x3ed   : > { %v4620_v6 = vpop.f32.mrf.mxu2  ;;  %v3409_v61 = vpop.f32.mrf.mxu3 }
 0x3ee   : > { %v10769_v39 = vadd.f32 %v4620_v6, %v4432_v52  ;;  %v10771_v57 = vpop.f32.mrf.mxu0  ;;  %v3979_v47 = vmax.f32 %v3947_v13, 0.0  ;;  %v3446_v7 = vadd.f32 %v3409_v61, %v3192_v31  ;;  %v8750_v52 = vld [vmem:[%s11915_s2 + $0x20] sm:$0xf]  ;;  %v4826_v13 = vrot.slane %v4824_v14, 4  ;;  %v5785_v6 = vld [vmem:[#allocation3 + $0x28] sm:$0xf] }
 0x3ef   : > { %v7206_v15 = vsel %vm4389_vm11, %v8750_v52, 0  ;;  %v4437_v29 = vpop.f32.mrf.mxu1  ;;  %v5350_v61 = vpack.c.b16 %v5327_v17, %v5326_v54  ;;  %v5129_v52 = vld [vmem:[#allocation3 + $0xb8] sm:$0x7] }
 0x3f0   : > { %v4011_v40 = vpack.c.bf16 %v3979_v47, %v3979_v47  ;;  %v3876_v42 = vadd.f32 %v10721_v9, %v3446_v7  ;;  %7215 = vmatpush.bf16.msra.mxu1 %v7206_v15  ;;  %v4253_v9 = vsel %vm9417_vm10, %v8342_v23, %v4252_v36  ;;  %v5882_v36 = vrot.slane %v5785_v6, 5 }
 0x3f1   : > { %v8914_v58 = vld [vmem:[#allocation3 + $0xf4] sm:$0xff]  ;;  %v4512_v49 = vunpack.c.l.b16 %v4253_v9  ;;  %v8448_v15 = vrot.slane %v4694_v4, 9  ;;  %v5264_v30 = vrot.slane %v5129_v52, 7  ;;  %v5784_v9 = vld [vmem:[#allocation3 + $0x24] sm:$0xe] }
 0x3f2   : > { %v4096_v1 = vld [vmem:[#allocation3 + $0xf8] sm:$0x7]  ;;  %4045 = vst.msk [vmem:[#allocation3 + $0x104] sm:$0xf] %vm4016_vm13, %v4011_v40  ;;  %v3912_v3 = vmul.f32 %v10599_v59, %v3876_v42  ;;  %8464 = vmatmul.msk.bf16.gmra.mxu3 %vm4340_vm12, %v4919_v20  ;;  %8423 = vmatmul.msk.bf16.gmra.mxu1 %vm4340_vm12, %v8914_v58  ;;  %v4828_v40 = vsel %vm9403_vm6, %v4826_v13, %v4827_v50  ;;  %v5786_v42 = vld [vmem:[#allocation3 + $0x2c] sm:$0x1] }
 0x3f3   : > { %v4255_v11 = vrot.slane %v4096_v1, 7  ;;  %v5261_v20 = vrot.slane %v5128_v33, 7  ;;  %v5127_v58 = vld [vmem:[#allocation3 + $0xb0] sm:$0x8]  ;;  %v4825_v1 = vsel %vm9403_vm6, %v8448_v15, %v4824_v14  ;;  %v8587_v14 = vrot.slane %v5784_v9, 9 }
 0x3f4   : > { %v3948_v34 = vadd.f32 %v10608_v35, %v3912_v3  ;;  %v4897_v3 = vunpack.c.l.b16 %v4828_v40  ;;  %v8482_v54 = vrot.slane %v5127_v58, 11 }
 0x3f5   : > { %v4622_v2 = vpop.f32.mrf.mxu2  ;;  %v4256_v38 = vsel %vm9417_vm10, %v4254_v32, %v4255_v11  ;;  %v3412_v51 = vpop.f32.mrf.mxu3  ;;  %v5884_v32 = vrot.slane %v5882_v36, 4  ;;  %v5885_v11 = vrot.slane %v5786_v42, 5  ;;  %v5263_v50 = vrot.slane %v5261_v20, 4 }
 0x3f6   : > { %v10795_v31 = vadd.f32 %v4622_v2, %v4434_v0  ;;  %v4513_v53 = vunpack.c.l.b16 %v4256_v38  ;;  %v10797_v41 = vpop.f32.mrf.mxu0  ;;  %v3980_v8 = vmax.f32 %v3948_v34, 0.0  ;;  %v3447_v48 = vadd.f32 %v3412_v51, %v11960_v56 }
 0x3f7   : > { %v4439_v23 = vpop.f32.mrf.mxu1  ;;  %v5265_v13 = vsel %vm9417_vm10, %v5263_v50, %v5264_v30  ;;  %v5262_v4 = vsel %vm9417_vm10, %v8482_v54, %v5261_v20 }
 0x3f8   : > { %v4529_v47 = vpack.c.b16 %v4513_v53, %v4512_v49  ;;  %v4012_v7 = vpack.c.bf16 %v3980_v8, %v3980_v8  ;;  %v3877_v0 = vadd.f32 %v10741_v5, %v3447_v48  ;;  %v3194_v5 = vadd.f32 %v10431_v16, %v2763_v21  ;;  %v4698_v53 = vld [vmem:[#allocation3 + $0x98] sm:$0xf] }
 0x3f9   : > { %8498 = vmatmul.msk.bf16.gmra.mxu0 %vm4340_vm12, %v5350_v61  ;;  %v4896_v49 = vunpack.c.l.b16 %v4825_v1  ;;  %v8915_v61 = vld [vmem:[#allocation3 + $0x24] sm:$0xff]  ;;  %v4831_v33 = vrot.slane %v4698_v53, 5  ;;  %v5883_v21 = vsel %vm9403_vm6, %v8587_v14, %v5882_v36  ;;  %v5328_v15 = vunpack.c.l.b16 %v5262_v4 }
 0x3fa   : > { %8439 = vmatmul.msk.bf16.gmra.mxu2 %vm4340_vm12, %v4529_v47  ;;  %4046 = vst.msk [vmem:[#allocation3 + $0x108] sm:$0xf] %vm4016_vm13, %v4012_v7  ;;  %v3913_v45 = vmul.f32 %v10599_v59, %v3877_v0  ;;  %v4699_v47 = vld [vmem:[#allocation3 + $0x9c] sm:$0x1]  ;;  %v4593_v53 = vadd.f32 %v10469_v46, %v10467_v44 }
 0x3fb   : > { %v4920_v48 = vpack.c.b16 %v4897_v3, %v4896_v49  ;;  %v4834_v58 = vrot.slane %v4699_v47, 5  ;;  %v4701_v47 = vld [vmem:[#allocation3 + $0xa8] sm:$0xf] }
 0x3fc   : > { %v3949_v17 = vadd.f32 %v10608_v35, %v3913_v45  ;;  %v4833_v45 = vrot.slane %v4831_v33, 4 }
 0x3fd   : > { %v4625_v60 = vpop.f32.mrf.mxu2  ;;  %v3414_v2 = vpop.f32.mrf.mxu3 }
 0x3fe   : > { %v10813_v34 = vadd.f32 %v4625_v60, %v4437_v29  ;;  %v10815_v38 = vpop.f32.mrf.mxu0  ;;  %v3981_v51 = vmax.f32 %v3949_v17, 0.0  ;;  %v3448_v16 = vadd.f32 %v3414_v2, %v3194_v5  ;;  %v5886_v29 = vsel %vm9403_vm6, %v5884_v32, %v5885_v11  ;;  %v5788_v5 = vld [vmem:[#allocation3 + $0x38] sm:$0xf]  ;;  %v4697_v17 = vld [vmem:[#allocation3 + $0x94] sm:$0xe] }
 0x3ff   : > { %v4442_v56 = vpop.f32.mrf.mxu1  ;;  %v5995_v7 = vunpack.c.l.b16 %v5886_v29  ;;  %v5131_v60 = vld [vmem:[#allocation3 + $0xc4] sm:$0xf]  ;;  %v5132_v32 = vld [vmem:[#allocation3 + $0xc8] sm:$0x7]  ;;  %v8449_v2 = vrot.slane %v4697_v17, 9  ;;  %v4835_v54 = vsel %vm9403_vm6, %v4833_v45, %v4834_v58 }
 0x400   : > { %v4013_v6 = vpack.c.bf16 %v3981_v51, %v3981_v51  ;;  %v3878_v8 = vadd.f32 %v10771_v57, %v3448_v16  ;;  %v5329_v57 = vunpack.c.l.b16 %v5265_v13  ;;  %v5268_v50 = vrot.slane %v5131_v60, 7  ;;  %v5130_v51 = vld [vmem:[#allocation3 + $0xc0] sm:$0x8]  ;;  %v4702_v58 = vld [vmem:[#allocation3 + $0xac] sm:$0x1] }
 0x401   : > { %v4832_v16 = vsel %vm9403_vm6, %v8449_v2, %v4831_v33  ;;  %v5271_v49 = vrot.slane %v5132_v32, 7  ;;  %v4899_v14 = vunpack.c.l.b16 %v4835_v54  ;;  %v8483_v4 = vrot.slane %v5130_v51, 11  ;;  %v5791_v32 = vld [vmem:[#allocation3 + $0x48] sm:$0xf] }
 0x402   : > { %4047 = vst.msk [vmem:[#allocation3 + $0x114] sm:$0xf] %vm4016_vm13, %v4013_v6  ;;  %v3914_v19 = vmul.f32 %v10599_v59, %v3878_v8  ;;  %8465 = vmatmul.msk.bf16.gmra.mxu3 %vm4340_vm12, %v4920_v48  ;;  %8571 = vmatmul.msk.bf16.vlgmr.msrb.gmra.mxu1 %vm4340_vm12, %v8915_v61  ;;  %v5994_v59 = vunpack.c.l.b16 %v5883_v21  ;;  %v5351_v30 = vpack.c.b16 %v5329_v57, %v5328_v15  ;;  %v5787_v61 = vld [vmem:[#allocation3 + $0x34] sm:$0xe]  ;;  %v4898_v57 = vunpack.c.l.b16 %v4832_v16 }
 0x403   : > { %v8588_v46 = vrot.slane %v5787_v61, 9  ;;  %v5269_v15 = vsel %vm9417_vm10, %v8483_v4, %v5268_v50  ;;  %v5896_v16 = vrot.slane %v5791_v32, 5 }
 0x404   : > { %v3950_v0 = vadd.f32 %v10608_v35, %v3914_v19  ;;  %v6026_v3 = vpack.c.b16 %v5995_v7, %v5994_v59  ;;  %v5270_v19 = vrot.slane %v5268_v50, 4  ;;  %v4921_v44 = vpack.c.b16 %v4899_v14, %v4898_v57  ;;  %v5792_v14 = vld [vmem:[#allocation3 + $0x4c] sm:$0x1] }
 0x405   : > { %v4627_v52 = vpop.f32.mrf.mxu2  ;;  %v4988_v42 = vpop.f32.mrf.mxu3 }
 0x406   : > { %v10831_v40 = vadd.f32 %v4627_v52, %v4439_v23  ;;  %v10833_v20 = vpop.f32.mrf.mxu0  ;;  %v3982_v1 = vmax.f32 %v3950_v0, 0.0  ;;  %v5068_v36 = vadd.f32 %v4988_v42, %v10459_v62  ;;  %v5889_v23 = vrot.slane %v5788_v5, 5  ;;  %v5789_v62 = vld [vmem:[#allocation3 + $0x3c] sm:$0x1]  ;;  %v8916_v52 = vld [vmem:[#allocation3 + $0x34] sm:$0xff] }
 0x407   : > { %v4444_v35 = vpop.f32.mrf.mxu1  ;;  %v5892_v6 = vrot.slane %v5789_v62, 5  ;;  %v5272_v33 = vsel %vm9417_vm10, %v5270_v19, %v5271_v49  ;;  %v4838_v42 = vrot.slane %v4701_v47, 5  ;;  %v5134_v62 = vld [vmem:[#allocation3 + $0xd4] sm:$0xf]  ;;  %v5135_v49 = vld [vmem:[#allocation3 + $0xd8] sm:$0x7] }
 0x408   : > { %v4014_v9 = vpack.c.bf16 %v3982_v1, %v3982_v1  ;;  %v10838_v11 = vadd.f32 %v10797_v41, %v5068_v36  ;;  %v5891_v13 = vrot.slane %v5889_v23, 4  ;;  %v5890_v59 = vsel %vm9403_vm6, %v8588_v46, %v5889_v23  ;;  %v4700_v23 = vld [vmem:[#allocation3 + $0xa4] sm:$0xe] }
 0x409   : > { %8499 = vmatmul.msk.bf16.gmra.mxu0 %vm4340_vm12, %v5351_v30  ;;  %v5331_v45 = vunpack.c.l.b16 %v5272_v33  ;;  %v5330_v36 = vunpack.c.l.b16 %v5269_v15  ;;  %v5996_v60 = vunpack.c.l.b16 %v5890_v59  ;;  %v5898_v19 = vrot.slane %v5896_v16, 4  ;;  %v5790_v33 = vld [vmem:[#allocation3 + $0x44] sm:$0xe] }
 0x40a   : > { %8604 = vmatmul.msk.bf16.vlgmr.msrb.gmra.mxu2 %vm4340_vm12, %v6026_v3  ;;  %4048 = vst.msk [vmem:[#allocation3 + $0x118] sm:$0xf] %vm4016_vm13, %v4014_v9  ;;  %v5893_v0 = vsel %vm9403_vm6, %v5891_v13, %v5892_v6  ;;  %v4840_v3 = vrot.slane %v4838_v42, 4  ;;  %v4841_v9 = vrot.slane %v4702_v58, 5  ;;  %v5133_v13 = vld [vmem:[#allocation3 + $0xd0] sm:$0x8] }
 0x40b   : > { %v5997_v5 = vunpack.c.l.b16 %v5893_v0  ;;  %v5352_v54 = vpack.c.b16 %v5331_v45, %v5330_v36  ;;  %v8589_v45 = vrot.slane %v5790_v33, 9  ;;  %v5136_v33 = vld [vmem:[#allocation3 + $0xe0] sm:$0x8] }
 0x40d   : > { %v4630_v41 = vpop.f32.mrf.mxu2  ;;  %v4990_v48 = vpop.f32.mrf.mxu3  ;;  %v6027_v50 = vpack.c.b16 %v5997_v5, %v5996_v60  ;;  %v5897_v36 = vsel %vm9403_vm6, %v8589_v45, %v5896_v16  ;;  %v4705_v60 = vld [vmem:[#allocation3 + $0xbc] sm:$0x1] }
 0x40e   : > { %v10848_v8 = vadd.f32 %v4630_v41, %v4442_v56  ;;  %v10850_v29 = vpop.f32.mrf.mxu0  ;;  %v5069_v21 = vadd.f32 %v4990_v48, %v4593_v53  ;;  %v8450_v53 = vrot.slane %v4700_v23, 9  ;;  %v4842_v41 = vsel %vm9403_vm6, %v4840_v3, %v4841_v9 }
 0x40f   : > { %v4447_v7 = vpop.f32.mrf.mxu1  ;;  %v5278_v48 = vrot.slane %v5135_v49, 7  ;;  %v4901_v4 = vunpack.c.l.b16 %v4842_v41  ;;  %v4848_v49 = vrot.slane %v4705_v60, 5 }
 0x410   : > { %v10857_v56 = vadd.f32 %v10815_v38, %v5069_v21  ;;  %v4839_v6 = vsel %vm9403_vm6, %v8450_v53, %v4838_v42  ;;  %v5899_v21 = vrot.slane %v5792_v14, 5  ;;  %v5794_v53 = vld [vmem:[#allocation3 + $0x58] sm:$0xf]  ;;  %v4703_v14 = vld [vmem:[#allocation3 + $0xb4] sm:$0xe] }
 0x411   : > { %v4900_v0 = vunpack.c.l.b16 %v4839_v6 }
 0x412   : > { %8466 = vmatmul.msk.bf16.gmra.mxu3 %vm4340_vm12, %v4921_v44  ;;  %8572 = vmatmul.msk.bf16.gmra.mxu1 %vm4340_vm12, %v8916_v52  ;;  %v8484_v44 = vrot.slane %v5133_v13, 11  ;;  %v4704_v52 = vld [vmem:[#allocation3 + $0xb8] sm:$0xf]  ;;  %v5900_v58 = vsel %vm9403_vm6, %v5898_v19, %v5899_v21  ;;  %v5795_v19 = vld [vmem:[#allocation3 + $0x5c] sm:$0x1] }
 0x413   : > { %v4922_v59 = vpack.c.b16 %v4901_v4, %v4900_v0  ;;  %v5999_v3 = vunpack.c.l.b16 %v5900_v58 }
 0x415   : > { %v4632_v1 = vpop.f32.mrf.mxu2  ;;  %v4993_v38 = vpop.f32.mrf.mxu3 }
 0x416   : > { %v10865_v30 = vadd.f32 %v4632_v1, %v4444_v35  ;;  %v10867_v17 = vpop.f32.mrf.mxu0  ;;  %v5070_v2 = vadd.f32 %v4993_v38, %v10497_v43  ;;  %v5275_v43 = vrot.slane %v5134_v62, 7  ;;  %v4845_v1 = vrot.slane %v4704_v52, 5 }
 0x417   : > { %v4449_v51 = vpop.f32.mrf.mxu1  ;;  %v5998_v62 = vunpack.c.l.b16 %v5897_v36 }
 0x418   : > { %v10872_v35 = vadd.f32 %v10833_v20, %v5070_v2  ;;  %v5277_v46 = vrot.slane %v5275_v43, 4  ;;  %v5276_v5 = vsel %vm9417_vm10, %v8484_v44, %v5275_v43  ;;  %v5137_v43 = vld [vmem:[#allocation3 + $0xe4] sm:$0xf] }
 0x419   : > { %8500 = vmatmul.msk.bf16.gmra.mxu0 %vm4340_vm12, %v5352_v54  ;;  %v5332_v32 = vunpack.c.l.b16 %v5276_v5  ;;  %v6028_v13 = vpack.c.b16 %v5999_v3, %v5998_v62  ;;  %v5282_v21 = vrot.slane %v5137_v43, 7  ;;  %v8485_v5 = vrot.slane %v5136_v33, 11  ;;  %v4707_v3 = vld [vmem:[#allocation3 + $0xc8] sm:$0xf] }
 0x41a   : > { %8605 = vmatmul.msk.bf16.gmra.mxu2 %vm4340_vm12, %v6027_v50  ;;  %v5279_v15 = vsel %vm9417_vm10, %v5277_v46, %v5278_v48  ;;  %v4847_v50 = vrot.slane %v4845_v1, 4  ;;  %v5903_v48 = vrot.slane %v5794_v53, 5  ;;  %v4598_v62 = vadd.f32 %v10580_v27, %v10552_v22 }
 0x41b   : > { %v5333_v38 = vunpack.c.l.b16 %v5279_v15  ;;  %v5906_v15 = vrot.slane %v5795_v19, 5  ;;  %v5284_v36 = vrot.slane %v5282_v21, 4 }
 0x41c   : > { %v4849_v4 = vsel %vm9403_vm6, %v4847_v50, %v4848_v49  ;;  %v5905_v52 = vrot.slane %v5903_v48, 4  ;;  %v8918_v50 = vld [vmem:[#allocation3 + $0x54] sm:$0xff]  ;;  %v5283_v49 = vsel %vm9417_vm10, %v8485_v5, %v5282_v21 }
 0x41d   : > { %v4635_v61 = vpop.f32.mrf.mxu2  ;;  %v10881_v20 = vpop.f32.mrf.mxu3  ;;  %v5353_v16 = vpack.c.b16 %v5333_v38, %v5332_v32  ;;  %v4903_v0 = vunpack.c.l.b16 %v4849_v4 }
 0x41e   : > { %v10879_v57 = vadd.f32 %v4635_v61, %v4447_v7  ;;  %v10883_v47 = vpop.f32.mrf.mxu0  ;;  %v8917_v7 = vld [vmem:[#allocation3 + $0x44] sm:$0xff]  ;;  %v8451_v61 = vrot.slane %v4703_v14, 9  ;;  %v4708_v14 = vld [vmem:[#allocation3 + $0xcc] sm:$0x1]  ;;  %v5071_v43 = vadd.f32 %v10881_v20, %v4598_v62  ;;  %v5140_v20 = vld [vmem:[#allocation3 + $0xf4] sm:$0xf] }
 0x41f   : > { %v4452_v42 = vpop.f32.mrf.mxu1  ;;  %v4855_v33 = vrot.slane %v4708_v14, 5 }
 0x422   : > { %8467 = vmatmul.msk.bf16.gmra.mxu3 %vm4340_vm12, %v4922_v59  ;;  %8573 = vmatmul.msk.bf16.gmra.mxu1 %vm4340_vm12, %v8917_v7  ;;  %v5793_v7 = vld [vmem:[#allocation3 + $0x54] sm:$0xe] }
 0x425   : > { %v4637_v9 = vpop.f32.mrf.mxu2  ;;  %v4998_v54 = vpop.f32.mrf.mxu3 }
 0x426   : > { %v10895_v2 = vadd.f32 %v4637_v9, %v4449_v51  ;;  %v10897_v23 = vpop.f32.mrf.mxu0  ;;  %v10900_v41 = vadd.f32 %v4998_v54, %v10611_v55  ;;  %v5138_v51 = vld [vmem:[#allocation3 + $0xe8] sm:$0x7]  ;;  %v4846_v55 = vsel %vm9403_vm6, %v8451_v61, %v4845_v1  ;;  %v8590_v54 = vrot.slane %v5793_v7, 9 }
 0x427   : > { %v4454_v6 = vpop.f32.mrf.mxu1  ;;  %v5285_v44 = vrot.slane %v5138_v51, 7  ;;  %v4902_v60 = vunpack.c.l.b16 %v4846_v55  ;;  %v5334_v61 = vunpack.c.l.b16 %v5283_v49  ;;  %v5797_v55 = vld [vmem:[#allocation3 + $0x68] sm:$0xf] }
 0x428   : > { %v5904_v53 = vsel %vm9403_vm6, %v8590_v54, %v5903_v48 }
 0x429   : > { %8501 = vmatmul.msk.bf16.gmra.mxu0 %vm4340_vm12, %v5353_v16  ;;  %v5286_v1 = vsel %vm9417_vm10, %v5284_v36, %v5285_v44  ;;  %v4923_v32 = vpack.c.b16 %v4903_v0, %v4902_v60  ;;  %v6000_v19 = vunpack.c.l.b16 %v5904_v53  ;;  %v5289_v36 = vrot.slane %v5140_v20, 7  ;;  %v5139_v60 = vld [vmem:[#allocation3 + $0xf0] sm:$0x8]  ;;  %v5796_v53 = vld [vmem:[#allocation3 + $0x64] sm:$0xe] }
 0x42a   : > { %8606 = vmatmul.msk.bf16.gmra.mxu2 %vm4340_vm12, %v6028_v13  ;;  %v5335_v16 = vunpack.c.l.b16 %v5286_v1  ;;  %v4711_v20 = vld [vmem:[#allocation3 + $0xdc] sm:$0x1] }
 0x42b   : > { %v5291_v14 = vrot.slane %v5289_v36, 4 }
 0x42c   : > { %v5354_v44 = vpack.c.b16 %v5335_v16, %v5334_v61  ;;  %v8486_v16 = vrot.slane %v5139_v60, 11  ;;  %v10955_v61 = vadd.f32 %v10867_v17, %v10900_v41  ;;  %v4862_v60 = vrot.slane %v4711_v20, 5 }
 0x42d   : > { %v4640_v46 = vpop.f32.mrf.mxu2  ;;  %v5000_v45 = vpop.f32.mrf.mxu3 }
 0x42e   : > { %v10908_v59 = vadd.f32 %v4640_v46, %v4452_v42  ;;  %v10910_v58 = vpop.f32.mrf.mxu0  ;;  %v10913_v38 = vadd.f32 %v5000_v45, %v10629_v28  ;;  %v5907_v42 = vsel %vm9403_vm6, %v5905_v52, %v5906_v15  ;;  %v4852_v28 = vrot.slane %v4707_v3, 5  ;;  %v4706_v46 = vld [vmem:[#allocation3 + $0xc4] sm:$0xe]  ;;  %v5141_v45 = vld [vmem:[#allocation3 + $0xf8] sm:$0x7] }
 0x42f   : > { %v4457_v9 = vpop.f32.mrf.mxu1  ;;  %v6001_v13 = vunpack.c.l.b16 %v5907_v42  ;;  %v10936_v52 = vadd.f32 %v10850_v29, %v5071_v43  ;;  %v8452_v7 = vrot.slane %v4706_v46, 9  ;;  %v5292_v1 = vrot.slane %v5141_v45, 7 }
 0x430   : > { %v4854_v21 = vrot.slane %v4852_v28, 4 }
 0x431   : > { %v6029_v0 = vpack.c.b16 %v6001_v13, %v6000_v19  ;;  %v4853_v3 = vsel %vm9403_vm6, %v8452_v7, %v4852_v28  ;;  %v5293_v28 = vsel %vm9417_vm10, %v5291_v14, %v5292_v1  ;;  %v8591_v19 = vrot.slane %v5796_v53, 9  ;;  %v5144_v53 = vld [vmem:[#allocation3 + $0x108] sm:$0x7]  ;;  %v5801_v14 = vld [vmem:[#allocation3 + $0x7c] sm:$0x1] }
 0x432   : > { %8468 = vmatmul.msk.bf16.gmra.mxu3 %vm4340_vm12, %v4923_v32  ;;  %8574 = vmatmul.msk.bf16.gmra.mxu1 %vm4340_vm12, %v8918_v50  ;;  %v4856_v5 = vsel %vm9403_vm6, %v4854_v21, %v4855_v33  ;;  %v4904_v13 = vunpack.c.l.b16 %v4853_v3  ;;  %v8919_v33 = vld [vmem:[#allocation3 + $0x64] sm:$0xff]  ;;  %v5337_v46 = vunpack.c.l.b16 %v5293_v28 }
 0x433   : > { %v4905_v32 = vunpack.c.l.b16 %v4856_v5 }
 0x435   : > { %v4642_v51 = vpop.f32.mrf.mxu2  ;;  %v5003_v27 = vpop.f32.mrf.mxu3 }
 0x436   : > { %v10928_v22 = vadd.f32 %v4642_v51, %v4454_v6  ;;  %v10930_v4 = vpop.f32.mrf.mxu0  ;;  %v10933_v48 = vadd.f32 %v5003_v27, %v10647_v63  ;;  %v5910_v6 = vrot.slane %v5797_v55, 5  ;;  %v5798_v63 = vld [vmem:[#allocation3 + $0x6c] sm:$0x1]  ;;  %v4710_v51 = vld [vmem:[#allocation3 + $0xd8] sm:$0xf]  ;;  %v4924_v27 = vpack.c.b16 %v4905_v32, %v4904_v13 }
 0x437   : > { %v4459_v15 = vpop.f32.mrf.mxu1  ;;  %v5913_v42 = vrot.slane %v5798_v63, 5  ;;  %v4859_v55 = vrot.slane %v4710_v51, 5  ;;  %v5143_v32 = vld [vmem:[#allocation3 + $0x104] sm:$0xf]  ;;  %v5142_v51 = vld [vmem:[#allocation3 + $0x100] sm:$0x8] }
 0x438   : > { %v5912_v54 = vrot.slane %v5910_v6, 4  ;;  %v5296_v13 = vrot.slane %v5143_v32, 7 }
 0x439   : > { %8502 = vmatmul.msk.bf16.gmra.mxu0 %vm4340_vm12, %v5354_v44  ;;  %v5911_v44 = vsel %vm9403_vm6, %v8591_v19, %v5910_v6  ;;  %v4861_v63 = vrot.slane %v4859_v55, 4 }
 0x43a   : > { %8607 = vmatmul.msk.bf16.gmra.mxu2 %vm4340_vm12, %v6029_v0  ;;  %v5914_v21 = vsel %vm9403_vm6, %v5912_v54, %v5913_v42  ;;  %v6002_v5 = vunpack.c.l.b16 %v5911_v44  ;;  %v10974_v42 = vadd.f32 %v10883_v47, %v10913_v38  ;;  %v5799_v44 = vld [vmem:[#allocation3 + $0x74] sm:$0xe]  ;;  %v5298_v20 = vrot.slane %v5296_v13, 4 }
 0x43b   : > { %v6003_v17 = vunpack.c.l.b16 %v5914_v21  ;;  %v5920_v21 = vrot.slane %v5801_v14, 5 }
 0x43d   : > { %v4645_v29 = vpop.f32.mrf.mxu2  ;;  %v5005_v50 = vpop.f32.mrf.mxu3  ;;  %v6030_v54 = vpack.c.b16 %v6003_v17, %v6002_v5 }
 0x43e   : > { %v10944_v62 = vadd.f32 %v4645_v29, %v4457_v9  ;;  %v10946_v49 = vpop.f32.mrf.mxu0  ;;  %v10949_v43 = vadd.f32 %v5005_v50, %v10665_v18  ;;  %v5290_v18 = vsel %vm9417_vm10, %v8486_v16, %v5289_v36  ;;  %v5800_v36 = vld [vmem:[#allocation3 + $0x78] sm:$0xf]  ;;  %v4709_v29 = vld [vmem:[#allocation3 + $0xd4] sm:$0xe] }
 0x43f   : > { %v4462_v9 = vpop.f32.mrf.mxu1  ;;  %v5336_v0 = vunpack.c.l.b16 %v5290_v18  ;;  %v5917_v50 = vrot.slane %v5800_v36, 5  ;;  %v8453_v16 = vrot.slane %v4709_v29, 9 }
 0x441   : > { %v5355_v6 = vpack.c.b16 %v5337_v46, %v5336_v0  ;;  %v4860_v28 = vsel %vm9403_vm6, %v8453_v16, %v4859_v55  ;;  %v5919_v19 = vrot.slane %v5917_v50, 4  ;;  %v8487_v46 = vrot.slane %v5142_v51, 11  ;;  %v4713_v0 = vld [vmem:[#allocation3 + $0xe8] sm:$0xf] }
 0x442   : > { %8469 = vmatmul.msk.bf16.gmra.mxu3 %vm4340_vm12, %v4924_v27  ;;  %8575 = vmatmul.msk.bf16.gmra.mxu1 %vm4340_vm12, %v8919_v33  ;;  %v5299_v27 = vrot.slane %v5144_v53, 7  ;;  %v10991_v55 = vadd.f32 %v10897_v23, %v10933_v48  ;;  %v4866_v29 = vrot.slane %v4713_v0, 5  ;;  %v4714_v48 = vld [vmem:[#allocation3 + $0xec] sm:$0x1] }
 0x443   : > { %v5921_v36 = vsel %vm9403_vm6, %v5919_v19, %v5920_v21  ;;  %v4712_v19 = vld [vmem:[#allocation3 + $0xe4] sm:$0xe] }
 0x445   : > { %v4647_v41 = vpop.f32.mrf.mxu2  ;;  %v5008_v7 = vpop.f32.mrf.mxu3 }
 0x446   : > { %v10965_v45 = vadd.f32 %v4647_v41, %v4459_v15  ;;  %v10968_v3 = vadd.f32 %v5008_v7, %v10683_v26  ;;  %v10970_v1 = vpop.f32.mrf.mxu0  ;;  %v4863_v26 = vsel %vm9403_vm6, %v4861_v63, %v4862_v60  ;;  %v4906_v41 = vunpack.c.l.b16 %v4860_v28 }
 0x447   : > { %v4464_v15 = vpop.f32.mrf.mxu1  ;;  %v4907_v38 = vunpack.c.l.b16 %v4863_v26  ;;  %v5300_v7 = vsel %vm9417_vm10, %v5298_v20, %v5299_v27  ;;  %v8592_v60 = vrot.slane %v5799_v44, 9  ;;  %v4868_v28 = vrot.slane %v4866_v29, 4 }
 0x448   : > { %v5339_v23 = vunpack.c.l.b16 %v5300_v7  ;;  %v4869_v27 = vrot.slane %v4714_v48, 5  ;;  %v8454_v20 = vrot.slane %v4712_v19, 9  ;;  %v5802_v48 = vld [vmem:[#allocation3 + $0x84] sm:$0xe] }
 0x449   : > { %8503 = vmatmul.msk.bf16.gmra.mxu0 %vm4340_vm12, %v5355_v6  ;;  %v8920_v6 = vld [vmem:[#allocation3 + $0x74] sm:$0xff]  ;;  %v5918_v32 = vsel %vm9403_vm6, %v8592_v60, %v5917_v50  ;;  %v8921_v19 = vld [vmem:[#allocation3 + $0x84] sm:$0xff] }
 0x44a   : > { %8608 = vmatmul.msk.bf16.gmra.mxu2 %vm4340_vm12, %v6030_v54  ;;  %v6005_v54 = vunpack.c.l.b16 %v5921_v36  ;;  %v6004_v51 = vunpack.c.l.b16 %v5918_v32  ;;  %v5146_v50 = vld [vmem:[#allocation3 + $0x114] sm:$0xf] }
 0x44b   : > { %v5303_v0 = vrot.slane %v5146_v50, 7 }
 0x44c   : > { %v6031_v21 = vpack.c.b16 %v6005_v54, %v6004_v51  ;;  %v4716_v51 = vld [vmem:[#allocation3 + $0xf8] sm:$0xf] }
 0x44d   : > { %v4650_v47 = vpop.f32.mrf.mxu2  ;;  %v5010_v18 = vpop.f32.mrf.mxu3  ;;  %v4873_v50 = vrot.slane %v4716_v51, 5  ;;  %v5807_v51 = vld [vmem:[#allocation3 + $0x9c] sm:$0x1] }
 0x44e   : > { %v10982_v33 = vadd.f32 %v4650_v47, %v4462_v9  ;;  %v10985_v17 = vadd.f32 %v5010_v18, %v10701_v37  ;;  %v10993_v63 = vpop.f32.mrf.mxu0  ;;  %v4925_v9 = vpack.c.b16 %v4907_v38, %v4906_v41  ;;  %v5297_v37 = vsel %vm9417_vm10, %v8487_v46, %v5296_v13  ;;  %v5803_v13 = vld [vmem:[#allocation3 + $0x88] sm:$0xf]  ;;  %v5147_v46 = vld [vmem:[#allocation3 + $0x118] sm:$0x7]  ;;  %v5804_v41 = vld [vmem:[#allocation3 + $0x8c] sm:$0x1] }
 0x44f   : > { %v4467_v5 = vpop.f32.mrf.mxu1  ;;  %v5338_v16 = vunpack.c.l.b16 %v5297_v37  ;;  %v11010_v18 = vadd.f32 %v10910_v58, %v10949_v43  ;;  %v4867_v58 = vsel %vm9403_vm6, %v8454_v20, %v4866_v29  ;;  %v5306_v43 = vrot.slane %v5147_v46, 7  ;;  %v4717_v20 = vld [vmem:[#allocation3 + $0xfc] sm:$0x1] }
 0x450   : > { %v5927_v37 = vrot.slane %v5804_v41, 5  ;;  %v11029_v29 = vadd.f32 %v10930_v4, %v10968_v3 }
 0x451   : > { %v5356_v38 = vpack.c.b16 %v5339_v23, %v5338_v16 }
 0x452   : > { %8470 = vmatmul.msk.bf16.gmra.mxu3 %vm4340_vm12, %v4925_v9  ;;  %8576 = vmatmul.msk.bf16.gmra.mxu1 %vm4340_vm12, %v8920_v6  ;;  %v5145_v9 = vld [vmem:[#allocation3 + $0x110] sm:$0x8] }
 0x453   : > { %v8488_v54 = vrot.slane %v5145_v9, 11 }
 0x455   : > { %v4652_v53 = vpop.f32.mrf.mxu2  ;;  %v5013_v14 = vpop.f32.mrf.mxu3 }
 0x456   : > { %v11003_v26 = vadd.f32 %v4652_v53, %v4464_v15  ;;  %v11006_v47 = vadd.f32 %v5013_v14, %v10719_v12  ;;  %v5924_v15 = vrot.slane %v5803_v13, 5  ;;  %v4870_v12 = vsel %vm9403_vm6, %v4868_v28, %v4869_v27  ;;  %v11016_v7 = vpop.f32.mrf.mxu0 }
 0x457   : > { %v4469_v44 = vpop.f32.mrf.mxu1  ;;  %v4909_v36 = vunpack.c.l.b16 %v4870_v12  ;;  %v5305_v53 = vrot.slane %v5303_v0, 4  ;;  %v4908_v14 = vunpack.c.l.b16 %v4867_v58 }
 0x458   : > { %v5926_v6 = vrot.slane %v5924_v15, 4 }
 0x459   : > { %8504 = vmatmul.msk.bf16.gmra.mxu0 %vm4340_vm12, %v5356_v38  ;;  %v5307_v28 = vsel %vm9417_vm10, %v5305_v53, %v5306_v43  ;;  %v4926_v13 = vpack.c.b16 %v4909_v36, %v4908_v14  ;;  %v5806_v36 = vld [vmem:[#allocation3 + $0x98] sm:$0xf] }
 0x45a   : > { %8609 = vmatmul.msk.bf16.gmra.mxu2 %vm4340_vm12, %v6031_v21  ;;  %v5928_v38 = vsel %vm9403_vm6, %v5926_v6, %v5927_v37  ;;  %v5341_v46 = vunpack.c.l.b16 %v5307_v28  ;;  %v4715_v37 = vld [vmem:[#allocation3 + $0xf4] sm:$0xe] }
 0x45b   : > { %v6007_v4 = vunpack.c.l.b16 %v5928_v38  ;;  %v8455_v53 = vrot.slane %v4715_v37, 9  ;;  %v5934_v38 = vrot.slane %v5807_v51, 5  ;;  %v8931_v51 = vld [vmem:[#allocation3 + $0x44] sm:$0xff] }
 0x45d   : > { %v4655_v60 = vpop.f32.mrf.mxu2  ;;  %v5015_v23 = vpop.f32.mrf.mxu3 }
 0x45e   : > { %v11020_v32 = vadd.f32 %v4655_v60, %v4467_v5  ;;  %v11023_v16 = vadd.f32 %v5015_v23, %v10739_v24  ;;  %v8593_v5 = vrot.slane %v5802_v48, 9  ;;  %v5304_v24 = vsel %vm9417_vm10, %v8488_v54, %v5303_v0  ;;  %v11039_v3 = vpop.f32.mrf.mxu0 }
 0x45f   : > { %v4472_v27 = vpop.f32.mrf.mxu1  ;;  %v5340_v41 = vunpack.c.l.b16 %v5304_v24  ;;  %v4875_v0 = vrot.slane %v4873_v50, 4  ;;  %v4876_v60 = vrot.slane %v4717_v20, 5  ;;  %v11048_v48 = vadd.f32 %v10946_v49, %v10985_v17 }
 0x460   : > { %v5925_v21 = vsel %vm9403_vm6, %v8593_v5, %v5924_v15  ;;  %v11065_v20 = vadd.f32 %v10970_v1, %v11006_v47  ;;  %v6215_v47 = vld [vmem:[#allocation3 + $0x40] sm:$0x8] }
 0x461   : > { %v6006_v43 = vunpack.c.l.b16 %v5925_v21  ;;  %v5357_v15 = vpack.c.b16 %v5341_v46, %v5340_v41  ;;  %v4877_v14 = vsel %vm9403_vm6, %v4875_v0, %v4876_v60 }
 0x462   : > { %8471 = vmatmul.msk.bf16.gmra.mxu3 %vm4340_vm12, %v4926_v13  ;;  %8577 = vmatmul.msk.bf16.gmra.mxu1 %vm4340_vm12, %v8921_v19  ;;  %v4911_v13 = vunpack.c.l.b16 %v4877_v14  ;;  %v5805_v19 = vld [vmem:[#allocation3 + $0x94] sm:$0xe] }
 0x463   : > { %v6032_v23 = vpack.c.b16 %v6007_v4, %v6006_v43 }
 0x465   : > { %v4657_v12 = vpop.f32.mrf.mxu2  ;;  %v5018_v58 = vpop.f32.mrf.mxu3 }
 0x466   : > { %v11041_v9 = vadd.f32 %v4657_v12, %v4469_v44  ;;  %v11044_v6 = vadd.f32 %v5018_v58, %v10769_v39  ;;  %v5931_v44 = vrot.slane %v5806_v36, 5  ;;  %v4874_v39 = vsel %vm9403_vm6, %v8455_v53, %v4873_v50  ;;  %v11058_v24 = vpop.f32.mrf.mxu0  ;;  %v8922_v58 = vld [vmem:[#allocation3 + $0x94] sm:$0xff]  ;;  %v5809_v53 = vld [vmem:[#allocation3 + $0xa8] sm:$0xf] }
 0x467   : > { %v4474_v54 = vpop.f32.mrf.mxu1  ;;  %v4910_v46 = vunpack.c.l.b16 %v4874_v39  ;;  %v8594_v12 = vrot.slane %v5805_v19, 9 }
 0x468   : > { %v5933_v5 = vrot.slane %v5931_v44, 4 }
 0x469   : > { %8505 = vmatmul.msk.bf16.gmra.mxu0 %vm4340_vm12, %v5357_v15  ;;  %v4927_v50 = vpack.c.b16 %v4911_v13, %v4910_v46  ;;  %v5932_v43 = vsel %vm9403_vm6, %v8594_v12, %v5931_v44  ;;  %v11080_v13 = vadd.f32 %v10993_v63, %v11023_v16 }
 0x46a   : > { %8610 = vmatmul.msk.bf16.gmra.mxu2 %vm4340_vm12, %v6032_v23  ;;  %v5935_v41 = vsel %vm9403_vm6, %v5933_v5, %v5934_v38  ;;  %v6008_v37 = vunpack.c.l.b16 %v5932_v43 }
 0x46b   : > { %v6009_v0 = vunpack.c.l.b16 %v5935_v41 }
 0x46d   : > { %v4660_v28 = vpop.f32.mrf.mxu2  ;;  %v5020_v17 = vpop.f32.mrf.mxu3  ;;  %v6033_v39 = vpack.c.b16 %v6009_v0, %v6008_v37  ;;  %v8923_v37 = vld [vmem:[#allocation3 + $0xa4] sm:$0xff] }
 0x46e   : > { %v11056_v49 = vadd.f32 %v4660_v28, %v4472_v27  ;;  %v11061_v21 = vadd.f32 %v5020_v17, %v10795_v31  ;;  %v6216_v27 = vld [vmem:[#allocation3 + $0x44] sm:$0xf]  ;;  %v6217_v31 = vld [vmem:[#allocation3 + $0x48] sm:$0x7]  ;;  %v8620_v28 = vrot.slane %v6215_v47, 11  ;;  %v11082_v5 = vpop.f32.mrf.mxu0 }
 0x46f   : > { %v4477_v4 = vpop.f32.mrf.mxu1  ;;  %v6313_v60 = vrot.slane %v6216_v27, 7  ;;  %v6316_v23 = vrot.slane %v6217_v31, 7  ;;  %v5810_v17 = vld [vmem:[#allocation3 + $0xac] sm:$0x1]  ;;  %v5808_v27 = vld [vmem:[#allocation3 + $0xa4] sm:$0xe]  ;;  %v11097_v31 = vadd.f32 %v11016_v7, %v11044_v6 }
 0x470   : > { %v5941_v63 = vrot.slane %v5810_v17, 5  ;;  %v8595_v47 = vrot.slane %v5808_v27, 9  ;;  %v5812_v17 = vld [vmem:[#allocation3 + $0xb8] sm:$0xf] }
 0x471   : > { %v6315_v44 = vrot.slane %v6313_v60, 4  ;;  %v6314_v19 = vsel %vm9417_vm10, %v8620_v28, %v6313_v60 }
 0x472   : > { %8472 = vmatmul.msk.bf16.gmra.mxu3 %vm4340_vm12, %v4927_v50  ;;  %8578 = vmatmul.msk.bf16.gmra.mxu1 %vm4340_vm12, %v8922_v58  ;;  %v6425_v43 = vunpack.c.l.b16 %v6314_v19 }
 0x475   : > { %v4662_v1 = vpop.f32.mrf.mxu2  ;;  %v5023_v15 = vpop.f32.mrf.mxu3 }
 0x476   : > { %v11073_v36 = vadd.f32 %v4662_v1, %v4474_v54  ;;  %v11076_v14 = vadd.f32 %v5023_v15, %v10813_v34  ;;  %v5938_v54 = vrot.slane %v5809_v53, 5  ;;  %v6317_v34 = vsel %vm9417_vm10, %v6315_v44, %v6316_v23  ;;  %v6219_v15 = vld [vmem:[#allocation3 + $0x54] sm:$0xf]  ;;  %v11102_v23 = vpop.f32.mrf.mxu0  ;;  %v6220_v53 = vld [vmem:[#allocation3 + $0x58] sm:$0x7] }
 0x477   : > { %v4479_v38 = vpop.f32.mrf.mxu1  ;;  %v6426_v50 = vunpack.c.l.b16 %v6317_v34  ;;  %v6320_v6 = vrot.slane %v6219_v15, 7 }
 0x478   : > { %v5940_v12 = vrot.slane %v5938_v54, 4 }
 0x479   : > { %8718 = vmatmul.msk.bf16.vlgmr.msra.gmra.mxu0 %vm4340_vm12, %v8931_v51  ;;  %v6457_v1 = vpack.c.b16 %v6426_v50, %v6425_v43  ;;  %v5813_v43 = vld [vmem:[#allocation3 + $0xbc] sm:$0x1] }
 0x47a   : > { %8611 = vmatmul.msk.bf16.gmra.mxu2 %vm4340_vm12, %v6033_v39  ;;  %v5942_v60 = vsel %vm9403_vm6, %v5940_v12, %v5941_v63  ;;  %v6218_v39 = vld [vmem:[#allocation3 + $0x50] sm:$0x8]  ;;  %v11115_v63 = vadd.f32 %v11039_v3, %v11061_v21 }
 0x47b   : > { %v6011_v7 = vunpack.c.l.b16 %v5942_v60  ;;  %v8621_v12 = vrot.slane %v6218_v39, 11  ;;  %v5948_v60 = vrot.slane %v5813_v43, 5  ;;  %v5815_v43 = vld [vmem:[#allocation3 + $0xc8] sm:$0xf] }
 0x47d   : > { %v4665_v46 = vpop.f32.mrf.mxu2  ;;  %v5025_v41 = vpop.f32.mrf.mxu3 }
 0x47e   : > { %v11090_v16 = vadd.f32 %v4665_v46, %v4477_v4  ;;  %v11093_v58 = vadd.f32 %v5025_v41, %v10831_v40  ;;  %v5939_v40 = vsel %vm9403_vm6, %v8595_v47, %v5938_v54  ;;  %v8932_v46 = vld [vmem:[#allocation3 + $0x54] sm:$0xff]  ;;  %v6322_v54 = vrot.slane %v6320_v6, 4 }
 0x47f   : > { %v5672_v0 = vpop.f32.mrf.mxu1  ;;  %v6010_v34 = vunpack.c.l.b16 %v5939_v40  ;;  %v5811_v40 = vld [vmem:[#allocation3 + $0xb4] sm:$0xe] }
 0x480   : > { %v5752_v4 = vadd.f32 %v5672_v0, %v10838_v11  ;;  %v6323_v11 = vrot.slane %v6220_v53, 7  ;;  %v6321_v0 = vsel %vm9417_vm10, %v8621_v12, %v6320_v6  ;;  %v8596_v39 = vrot.slane %v5811_v40, 9 }
 0x481   : > { %v6034_v50 = vpack.c.b16 %v6011_v7, %v6010_v34  ;;  %v6427_v53 = vunpack.c.l.b16 %v6321_v0  ;;  %v11133_v7 = vadd.f32 %v11058_v24, %v11076_v14  ;;  %v6222_v34 = vld [vmem:[#allocation3 + $0x64] sm:$0xf] }
 0x482   : > { %8637 = vmatmul.msk.bf16.vlgmr.msra.gmra.mxu3 %vm4340_vm12, %v6457_v1  ;;  %8579 = vmatmul.msk.bf16.gmra.mxu1 %vm4340_vm12, %v8923_v37  ;;  %v11124_v1 = vpop.f32.mrf.mxu0  ;;  %v6327_v14 = vrot.slane %v6222_v34, 7 }
 0x485   : > { %v4667_v51 = vpop.f32.mrf.mxu2  ;;  %v5028_v44 = vpop.f32.mrf.mxu3 }
 0x486   : > { %v11108_v28 = vadd.f32 %v4667_v51, %v4479_v38  ;;  %v11111_v19 = vadd.f32 %v5028_v44, %v10848_v8  ;;  %v5945_v38 = vrot.slane %v5812_v17, 5  ;;  %v6324_v8 = vsel %vm9417_vm10, %v6322_v54, %v6323_v11  ;;  %v8924_v11 = vld [vmem:[#allocation3 + $0xb4] sm:$0xff]  ;;  %v6223_v17 = vld [vmem:[#allocation3 + $0x68] sm:$0x7] }
 0x487   : > { %v5674_v41 = vpop.f32.mrf.mxu1  ;;  %v6428_v3 = vunpack.c.l.b16 %v6324_v8  ;;  %v6330_v8 = vrot.slane %v6223_v17, 7 }
 0x488   : > { %v5753_v27 = vadd.f32 %v5674_v41, %v10857_v56  ;;  %v5947_v21 = vrot.slane %v5945_v38, 4  ;;  %v11167_v17 = vadd.f32 %v11102_v23, %v11111_v19 }
 0x489   : > { %8719 = vmatmul.msk.bf16.gmra.mxu0 %vm4340_vm12, %v8932_v46  ;;  %v6458_v6 = vpack.c.b16 %v6428_v3, %v6427_v53  ;;  %v5816_v53 = vld [vmem:[#allocation3 + $0xcc] sm:$0x1] }
 0x48a   : > { %8612 = vmatmul.msk.bf16.gmra.mxu2 %vm4340_vm12, %v6034_v50  ;;  %v5949_v44 = vsel %vm9403_vm6, %v5947_v21, %v5948_v60  ;;  %v6221_v50 = vld [vmem:[#allocation3 + $0x60] sm:$0x8]  ;;  %v6329_v21 = vrot.slane %v6327_v14, 4  ;;  %v11151_v60 = vadd.f32 %v11082_v5, %v11093_v58  ;;  %v5955_v5 = vrot.slane %v5816_v53, 5  ;;  %v5818_v53 = vld [vmem:[#allocation3 + $0xd8] sm:$0xf] }
 0x48b   : > { %v6013_v24 = vunpack.c.l.b16 %v5949_v44  ;;  %v8622_v3 = vrot.slane %v6221_v50, 11 }
 0x48d   : > { %v6102_v47 = vpop.f32.mrf.mxu2  ;;  %v5030_v37 = vpop.f32.mrf.mxu3 }
 0x48e   : > { %v11126_v15 = vadd.f32 %v6102_v47, %v5752_v4  ;;  %v11129_v56 = vadd.f32 %v5030_v37, %v10865_v30  ;;  %v5946_v30 = vsel %vm9403_vm6, %v8596_v39, %v5945_v38  ;;  %v8933_v47 = vld [vmem:[#allocation3 + $0x64] sm:$0xff] }
 0x48f   : > { %v5677_v51 = vpop.f32.mrf.mxu1  ;;  %v6012_v41 = vunpack.c.l.b16 %v5946_v30 }
 0x490   : > { %v5754_v4 = vadd.f32 %v5677_v51, %v10872_v35  ;;  %v11144_v35 = vpop.f32.mrf.mxu0  ;;  %v6328_v51 = vsel %vm9417_vm10, %v8622_v3, %v6327_v14 }
 0x491   : > { %v6035_v38 = vpack.c.b16 %v6013_v24, %v6012_v41 }
 0x492   : > { %8638 = vmatmul.msk.bf16.gmra.mxu3 %vm4340_vm12, %v6458_v6  ;;  %8580 = vmatmul.msk.bf16.gmra.mxu1 %vm4340_vm12, %v8924_v11  ;;  %v5814_v11 = vld [vmem:[#allocation3 + $0xc4] sm:$0xe] }
 0x493   : > { %v8597_v50 = vrot.slane %v5814_v11, 9  ;;  %v5819_v11 = vld [vmem:[#allocation3 + $0xdc] sm:$0x1] }
 0x495   : > { %v6104_v46 = vpop.f32.mrf.mxu2  ;;  %v5033_v54 = vpop.f32.mrf.mxu3 }
 0x496   : > { %v11142_v12 = vadd.f32 %v6104_v46, %v5753_v27  ;;  %v11147_v0 = vadd.f32 %v5033_v54, %v10879_v57  ;;  %v5952_v27 = vrot.slane %v5815_v43, 5  ;;  %v6331_v57 = vsel %vm9417_vm10, %v6329_v21, %v6330_v8  ;;  %v8925_v8 = vld [vmem:[#allocation3 + $0xc4] sm:$0xff]  ;;  %v6226_v43 = vld [vmem:[#allocation3 + $0x78] sm:$0x7] }
 0x497   : > { %v5679_v37 = vpop.f32.mrf.mxu1  ;;  %v6430_v39 = vunpack.c.l.b16 %v6331_v57  ;;  %v6337_v57 = vrot.slane %v6226_v43, 7 }
 0x498   : > { %v5755_v40 = vadd.f32 %v5679_v37, %v10936_v52  ;;  %v5954_v44 = vrot.slane %v5952_v27, 4  ;;  %v6429_v52 = vunpack.c.l.b16 %v6328_v51  ;;  %v11169_v24 = vpop.f32.mrf.mxu0  ;;  %v8934_v51 = vld [vmem:[#allocation3 + $0x74] sm:$0xff] }
 0x499   : > { %8720 = vmatmul.msk.bf16.gmra.mxu0 %vm4340_vm12, %v8933_v47 }
 0x49a   : > { %8613 = vmatmul.msk.bf16.gmra.mxu2 %vm4340_vm12, %v6035_v38  ;;  %v6459_v14 = vpack.c.b16 %v6430_v39, %v6429_v52  ;;  %v5956_v54 = vsel %vm9403_vm6, %v5954_v44, %v5955_v5  ;;  %v6224_v38 = vld [vmem:[#allocation3 + $0x70] sm:$0x8]  ;;  %v5959_v5 = vrot.slane %v5818_v53, 5  ;;  %v6229_v53 = vld [vmem:[#allocation3 + $0x88] sm:$0x7] }
 0x49b   : > { %v6015_v23 = vunpack.c.l.b16 %v5956_v54  ;;  %v8623_v39 = vrot.slane %v6224_v38, 11  ;;  %v5962_v54 = vrot.slane %v5819_v11, 5 }
 0x49d   : > { %v6107_v6 = vpop.f32.mrf.mxu2  ;;  %v5035_v34 = vpop.f32.mrf.mxu3 }
 0x49e   : > { %v11160_v58 = vadd.f32 %v6107_v6, %v5754_v4  ;;  %v11163_v30 = vadd.f32 %v5035_v34, %v10895_v2  ;;  %v6225_v4 = vld [vmem:[#allocation3 + $0x74] sm:$0xf]  ;;  %v5953_v2 = vsel %vm9403_vm6, %v8597_v50, %v5952_v27  ;;  %v5961_v50 = vrot.slane %v5959_v5, 4 }
 0x49f   : > { %v5682_v46 = vpop.f32.mrf.mxu1  ;;  %v6334_v19 = vrot.slane %v6225_v4, 7  ;;  %v6014_v37 = vunpack.c.l.b16 %v5953_v2  ;;  %v5817_v2 = vld [vmem:[#allocation3 + $0xd4] sm:$0xe] }
 0x4a0   : > { %v5756_v41 = vadd.f32 %v5682_v46, %v10955_v61  ;;  %v11188_v52 = vpop.f32.mrf.mxu0  ;;  %v8598_v38 = vrot.slane %v5817_v2, 9 }
 0x4a1   : > { %v6036_v6 = vpack.c.b16 %v6015_v23, %v6014_v37  ;;  %v6336_v27 = vrot.slane %v6334_v19, 4  ;;  %v6228_v37 = vld [vmem:[#allocation3 + $0x84] sm:$0xf] }
 0x4a2   : > { %8639 = vmatmul.msk.bf16.gmra.mxu3 %vm4340_vm12, %v6459_v14  ;;  %8581 = vmatmul.msk.bf16.gmra.mxu1 %vm4340_vm12, %v8925_v8 }
 0x4a5   : > { %v6109_v47 = vpop.f32.mrf.mxu2  ;;  %v5038_v21 = vpop.f32.mrf.mxu3 }
 0x4a6   : > { %v11178_v3 = vadd.f32 %v6109_v47, %v5755_v40  ;;  %v11181_v61 = vadd.f32 %v5038_v21, %v10908_v59  ;;  %v6338_v40 = vsel %vm9417_vm10, %v6336_v27, %v6337_v57  ;;  %v6335_v59 = vsel %vm9417_vm10, %v8623_v39, %v6334_v19  ;;  %v8926_v57 = vld [vmem:[#allocation3 + $0xd4] sm:$0xff]  ;;  %v6227_v27 = vld [vmem:[#allocation3 + $0x80] sm:$0x8] }
 0x4a7   : > { %v5684_v44 = vpop.f32.mrf.mxu1  ;;  %v6432_v14 = vunpack.c.l.b16 %v6338_v40  ;;  %v6431_v43 = vunpack.c.l.b16 %v6335_v59  ;;  %v5963_v21 = vsel %vm9403_vm6, %v5961_v50, %v5962_v54  ;;  %v5821_v59 = vld [vmem:[#allocation3 + $0xe8] sm:$0xf]  ;;  %v8624_v50 = vrot.slane %v6227_v27, 11 }
 0x4a8   : > { %v5757_v34 = vadd.f32 %v5684_v44, %v10974_v42  ;;  %v5966_v2 = vrot.slane %v5821_v59, 5 }
 0x4a9   : > { %8721 = vmatmul.msk.bf16.gmra.mxu0 %vm4340_vm12, %v8934_v51  ;;  %v6460_v47 = vpack.c.b16 %v6432_v14, %v6431_v43  ;;  %v6341_v51 = vrot.slane %v6228_v37, 7  ;;  %v8935_v14 = vld [vmem:[#allocation3 + $0x84] sm:$0xff] }
 0x4aa   : > { %8614 = vmatmul.msk.bf16.gmra.mxu2 %vm4340_vm12, %v6036_v6  ;;  %v11204_v6 = vpop.f32.mrf.mxu0 }
 0x4ab   : > { %v6343_v54 = vrot.slane %v6341_v51, 4 }
 0x4ad   : > { %v6112_v46 = vpop.f32.mrf.mxu2  ;;  %v5040_v8 = vpop.f32.mrf.mxu3 }
 0x4ae   : > { %v11192_v4 = vadd.f32 %v6112_v46, %v5756_v41  ;;  %v11195_v42 = vadd.f32 %v5040_v8, %v10928_v22  ;;  %v5960_v41 = vsel %vm9403_vm6, %v8598_v38, %v5959_v5  ;;  %v6017_v22 = vunpack.c.l.b16 %v5963_v21 }
 0x4af   : > { %v5687_v23 = vpop.f32.mrf.mxu1  ;;  %v6016_v11 = vunpack.c.l.b16 %v5960_v41  ;;  %v5968_v21 = vrot.slane %v5966_v2, 4 }
 0x4b0   : > { %v5758_v19 = vadd.f32 %v5687_v23, %v10991_v55  ;;  %v6344_v55 = vrot.slane %v6229_v53, 7  ;;  %v5822_v23 = vld [vmem:[#allocation3 + $0xec] sm:$0x1]  ;;  %v5820_v53 = vld [vmem:[#allocation3 + $0xe4] sm:$0xe] }
 0x4b1   : > { %v6037_v5 = vpack.c.b16 %v6017_v22, %v6016_v11  ;;  %v5969_v37 = vrot.slane %v5822_v23, 5  ;;  %v8599_v11 = vrot.slane %v5820_v53, 9 }
 0x4b2   : > { %8640 = vmatmul.msk.bf16.gmra.mxu3 %vm4340_vm12, %v6460_v47  ;;  %8582 = vmatmul.msk.bf16.gmra.mxu1 %vm4340_vm12, %v8926_v57  ;;  %v11220_v22 = vpop.f32.mrf.mxu0 }
 0x4b5   : > { %v6114_v39 = vpop.f32.mrf.mxu2  ;;  %v5043_v40 = vpop.f32.mrf.mxu3 }
 0x4b6   : > { %v11206_v44 = vadd.f32 %v6114_v39, %v5757_v34  ;;  %v11209_v46 = vadd.f32 %v5043_v40, %v10944_v62  ;;  %v6345_v34 = vsel %vm9417_vm10, %v6343_v54, %v6344_v55  ;;  %v6342_v62 = vsel %vm9417_vm10, %v8624_v50, %v6341_v51  ;;  %v6231_v55 = vld [vmem:[#allocation3 + $0x94] sm:$0xf] }
 0x4b7   : > { %v5689_v8 = vpop.f32.mrf.mxu1  ;;  %v6434_v38 = vunpack.c.l.b16 %v6345_v34  ;;  %v6433_v39 = vunpack.c.l.b16 %v6342_v62  ;;  %v5970_v51 = vsel %vm9403_vm6, %v5968_v21, %v5969_v37  ;;  %v6348_v50 = vrot.slane %v6231_v55, 7  ;;  %v8936_v21 = vld [vmem:[#allocation3 + $0x94] sm:$0xff] }
 0x4b8   : > { %v5759_v43 = vadd.f32 %v5689_v8, %v11010_v18  ;;  %v6230_v8 = vld [vmem:[#allocation3 + $0x90] sm:$0x8] }
 0x4b9   : > { %8722 = vmatmul.msk.bf16.gmra.mxu0 %vm4340_vm12, %v8935_v14  ;;  %v6461_v40 = vpack.c.b16 %v6434_v38, %v6433_v39  ;;  %v8927_v14 = vld [vmem:[#allocation3 + $0xe4] sm:$0xff]  ;;  %v5824_v38 = vld [vmem:[#allocation3 + $0xf8] sm:$0xf] }
 0x4ba   : > { %8615 = vmatmul.msk.bf16.gmra.mxu2 %vm4340_vm12, %v6037_v5  ;;  %v6232_v5 = vld [vmem:[#allocation3 + $0x98] sm:$0x7]  ;;  %v11237_v53 = vpop.f32.mrf.mxu0 }
 0x4bd   : > { %v6117_v47 = vpop.f32.mrf.mxu2  ;;  %v5045_v41 = vpop.f32.mrf.mxu3 }
 0x4be   : > { %v11218_v57 = vadd.f32 %v6117_v47, %v5758_v19  ;;  %v11223_v18 = vadd.f32 %v5045_v41, %v10965_v45  ;;  %v5967_v19 = vsel %vm9403_vm6, %v8599_v11, %v5966_v2  ;;  %v6019_v45 = vunpack.c.l.b16 %v5970_v51  ;;  %v5825_v11 = vld [vmem:[#allocation3 + $0xfc] sm:$0x1] }
 0x4bf   : > { %v5692_v27 = vpop.f32.mrf.mxu1  ;;  %v6018_v62 = vunpack.c.l.b16 %v5967_v19  ;;  %v6351_v47 = vrot.slane %v6232_v5, 7  ;;  %v8625_v41 = vrot.slane %v6230_v8, 11  ;;  %v6350_v2 = vrot.slane %v6348_v50, 4 }
 0x4c0   : > { %v5760_v59 = vadd.f32 %v5692_v27, %v11029_v29  ;;  %v5973_v27 = vrot.slane %v5824_v38, 5  ;;  %v5976_v19 = vrot.slane %v5825_v11, 5  ;;  %v6233_v11 = vld [vmem:[#allocation3 + $0xa0] sm:$0x8] }
 0x4c1   : > { %v6038_v37 = vpack.c.b16 %v6019_v45, %v6018_v62 }
 0x4c2   : > { %8641 = vmatmul.msk.bf16.gmra.mxu3 %vm4340_vm12, %v6461_v40  ;;  %8583 = vmatmul.msk.bf16.gmra.mxu1 %vm4340_vm12, %v8927_v14  ;;  %v6352_v40 = vsel %vm9417_vm10, %v6350_v2, %v6351_v47  ;;  %v5975_v14 = vrot.slane %v5973_v27, 4 }
 0x4c3   : > { %v6436_v55 = vunpack.c.l.b16 %v6352_v40 }
 0x4c4   : > { %v5977_v47 = vsel %vm9403_vm6, %v5975_v14, %v5976_v19  ;;  %v5827_v14 = vld [vmem:[#allocation3 + $0x108] sm:$0xf] }
 0x4c5   : > { %v6119_v54 = vpop.f32.mrf.mxu2  ;;  %v5048_v23 = vpop.f32.mrf.mxu3  ;;  %v6021_v2 = vunpack.c.l.b16 %v5977_v47  ;;  %v5828_v47 = vld [vmem:[#allocation3 + $0x10c] sm:$0x1] }
 0x4c6   : > { %v11232_v34 = vadd.f32 %v6119_v54, %v5759_v43  ;;  %v11235_v29 = vadd.f32 %v5048_v23, %v10982_v33  ;;  %v6349_v33 = vsel %vm9417_vm10, %v8625_v41, %v6348_v50  ;;  %v5823_v54 = vld [vmem:[#allocation3 + $0xf4] sm:$0xe]  ;;  %v11254_v41 = vpop.f32.mrf.mxu0 }
 0x4c7   : > { %v5694_v39 = vpop.f32.mrf.mxu1  ;;  %v8600_v38 = vrot.slane %v5823_v54, 9 }
 0x4c8   : > { %v5761_v43 = vadd.f32 %v5694_v39, %v11048_v48  ;;  %v6435_v48 = vunpack.c.l.b16 %v6349_v33 }
 0x4c9   : > { %8723 = vmatmul.msk.bf16.gmra.mxu0 %vm4340_vm12, %v8936_v21  ;;  %v6234_v21 = vld [vmem:[#allocation3 + $0xa4] sm:$0xf] }
 0x4ca   : > { %8616 = vmatmul.msk.bf16.gmra.mxu2 %vm4340_vm12, %v6038_v37  ;;  %v6462_v62 = vpack.c.b16 %v6436_v55, %v6435_v48  ;;  %v8928_v37 = vld [vmem:[#allocation3 + $0xf4] sm:$0xff]  ;;  %v6355_v39 = vrot.slane %v6234_v21, 7  ;;  %v8626_v48 = vrot.slane %v6233_v11, 11 }
 0x4cd   : > { %v6122_v51 = vpop.f32.mrf.mxu2  ;;  %v5050_v45 = vpop.f32.mrf.mxu3 }
 0x4ce   : > { %v11246_v5 = vadd.f32 %v6122_v51, %v5760_v59  ;;  %v11249_v8 = vadd.f32 %v5050_v45, %v11003_v26  ;;  %v5974_v59 = vsel %vm9403_vm6, %v8600_v38, %v5973_v27  ;;  %v6235_v26 = vld [vmem:[#allocation3 + $0xa8] sm:$0x7]  ;;  %v6357_v27 = vrot.slane %v6355_v39, 4  ;;  %v11272_v21 = vpop.f32.mrf.mxu0 }
 0x4cf   : > { %v5697_v23 = vpop.f32.mrf.mxu1  ;;  %v6020_v55 = vunpack.c.l.b16 %v5974_v59  ;;  %v8937_v45 = vld [vmem:[#allocation3 + $0xa4] sm:$0xff] }
 0x4d0   : > { %v5762_v50 = vadd.f32 %v5697_v23, %v11065_v20  ;;  %v6358_v20 = vrot.slane %v6235_v26, 7 }
 0x4d1   : > { %v6039_v54 = vpack.c.b16 %v6021_v2, %v6020_v55  ;;  %v5983_v2 = vrot.slane %v5828_v47, 5 }
 0x4d2   : > { %8642 = vmatmul.msk.bf16.gmra.mxu3 %vm4340_vm12, %v6462_v62  ;;  %8584 = vmatmul.msk.bf16.gmra.mxu1 %vm4340_vm12, %v8928_v37  ;;  %v5980_v62 = vrot.slane %v5827_v14, 5 }
 0x4d4   : > { %v5982_v26 = vrot.slane %v5980_v62, 4 }
 0x4d5   : > { %v6124_v40 = vpop.f32.mrf.mxu2  ;;  %v5053_v51 = vpop.f32.mrf.mxu3 }
 0x4d6   : > { %v11260_v33 = vadd.f32 %v6124_v40, %v5761_v43  ;;  %v11263_v19 = vadd.f32 %v5053_v51, %v11020_v32  ;;  %v6359_v43 = vsel %vm9417_vm10, %v6357_v27, %v6358_v20  ;;  %v6356_v32 = vsel %vm9417_vm10, %v8626_v48, %v6355_v39  ;;  %v5826_v51 = vld [vmem:[#allocation3 + $0x104] sm:$0xe] }
 0x4d7   : > { %v5699_v23 = vpop.f32.mrf.mxu1  ;;  %v6438_v59 = vunpack.c.l.b16 %v6359_v43  ;;  %v6437_v55 = vunpack.c.l.b16 %v6356_v32  ;;  %v5984_v39 = vsel %vm9403_vm6, %v5982_v26, %v5983_v2  ;;  %v8929_v27 = vld [vmem:[#allocation3 + $0x104] sm:$0xff]  ;;  %v6236_v32 = vld [vmem:[#allocation3 + $0xb0] sm:$0x8] }
 0x4d8   : > { %v5763_v38 = vadd.f32 %v5699_v23, %v11080_v13  ;;  %v6238_v23 = vld [vmem:[#allocation3 + $0xb8] sm:$0x7] }
 0x4d9   : > { %8724 = vmatmul.msk.bf16.gmra.mxu0 %vm4340_vm12, %v8937_v45  ;;  %v6463_v20 = vpack.c.b16 %v6438_v59, %v6437_v55  ;;  %v8601_v45 = vrot.slane %v5826_v51, 9  ;;  %v6365_v2 = vrot.slane %v6238_v23, 7  ;;  %v8938_v55 = vld [vmem:[#allocation3 + $0xb4] sm:$0xff] }
 0x4da   : > { %8617 = vmatmul.msk.bf16.gmra.mxu2 %vm4340_vm12, %v6039_v54  ;;  %v6237_v54 = vld [vmem:[#allocation3 + $0xb4] sm:$0xf] }
 0x4db   : > { %v6362_v43 = vrot.slane %v6237_v54, 7 }
 0x4dd   : > { %v6127_v37 = vpop.f32.mrf.mxu2  ;;  %v5055_v11 = vpop.f32.mrf.mxu3 }
 0x4de   : > { %v11274_v40 = vadd.f32 %v6127_v37, %v5762_v50  ;;  %v11277_v13 = vadd.f32 %v5055_v11, %v11041_v9  ;;  %v5981_v50 = vsel %vm9403_vm6, %v8601_v45, %v5980_v62  ;;  %v6023_v9 = vunpack.c.l.b16 %v5984_v39  ;;  %v5830_v11 = vld [vmem:[#allocation3 + $0x118] sm:$0xf] }
 0x4df   : > { %v5702_v14 = vpop.f32.mrf.mxu1  ;;  %v6022_v26 = vunpack.c.l.b16 %v5981_v50  ;;  %v5987_v39 = vrot.slane %v5830_v11, 5 }
 0x4e0   : > { %11962 = vst [vmem:[#allocation4_spill] sm:$0xff] %v11274_v40  ;;  %v5764_v48 = vadd.f32 %v5702_v14, %v11097_v31  ;;  %v11288_v31 = vpop.f32.mrf.mxu0  ;;  %v8627_v14 = vrot.slane %v6236_v32, 11 }
 0x4e1   : > { %v6040_v62 = vpack.c.b16 %v6023_v9, %v6022_v26  ;;  %v5989_v9 = vrot.slane %v5987_v39, 4  ;;  %v5829_v26 = vld [vmem:[#allocation3 + $0x114] sm:$0xe] }
 0x4e2   : > { %8643 = vmatmul.msk.bf16.gmra.mxu3 %vm4340_vm12, %v6463_v20  ;;  %8585 = vmatmul.msk.bf16.gmra.mxu1 %vm4340_vm12, %v8929_v27  ;;  %v6364_v20 = vrot.slane %v6362_v43, 4  ;;  %v5831_v27 = vld [vmem:[#allocation3 + $0x11c] sm:$0x1] }
 0x4e4   : > { %v6366_v54 = vsel %vm9417_vm10, %v6364_v20, %v6365_v2 }
 0x4e5   : > { %v6129_v47 = vpop.f32.mrf.mxu2  ;;  %v5058_v59 = vpop.f32.mrf.mxu3  ;;  %v6440_v23 = vunpack.c.l.b16 %v6366_v54 }
 0x4e6   : > { %v11286_v37 = vadd.f32 %v6129_v47, %v5763_v38  ;;  %v11291_v51 = vadd.f32 %v5058_v59, %v11056_v49  ;;  %v6363_v49 = vsel %vm9417_vm10, %v8627_v14, %v6362_v43  ;;  %v5990_v47 = vrot.slane %v5831_v27, 5  ;;  %v6240_v14 = vld [vmem:[#allocation3 + $0xc4] sm:$0xf]  ;;  %v6241_v27 = vld [vmem:[#allocation3 + $0xc8] sm:$0x7] }
 0x4e7   : > { %v5704_v45 = vpop.f32.mrf.mxu1 }
 0x4e8   : > { %11963 = vst [vmem:[#allocation7_spill] sm:$0xff] %v11286_v37  ;;  %v5765_v38 = vadd.f32 %v5704_v45, %v11115_v63  ;;  %v6439_v63 = vunpack.c.l.b16 %v6363_v49  ;;  %v8602_v45 = vrot.slane %v5829_v26, 9  ;;  %v5991_v43 = vsel %vm9403_vm6, %v5989_v9, %v5990_v47 }
 0x4e9   : > { %8725 = vmatmul.msk.bf16.gmra.mxu0 %vm4340_vm12, %v8938_v55  ;;  %v6900_v55 = vld [vmem:[#allocation3 + $0x48] sm:$0xf] }
 0x4ea   : > { %8618 = vmatmul.msk.bf16.gmra.mxu2 %vm4340_vm12, %v6040_v62  ;;  %v11305_v62 = vpop.f32.mrf.mxu0  ;;  %v6464_v20 = vpack.c.b16 %v6440_v23, %v6439_v63  ;;  %v6997_v49 = vrot.slane %v6900_v55, 5  ;;  %v6901_v23 = vld [vmem:[#allocation3 + $0x4c] sm:$0x1]  ;;  %v6239_v63 = vld [vmem:[#allocation3 + $0xc0] sm:$0x8] }
 0x4eb   : > { %v8628_v55 = vrot.slane %v6239_v63, 11 }
 0x4ec   : > { %v6999_v37 = vrot.slane %v6997_v49, 4 }
 0x4ed   : > { %v6132_v50 = vpop.f32.mrf.mxu2  ;;  %v5060_v59 = vpop.f32.mrf.mxu3 }
 0x4ee   : > { %v11300_v32 = vadd.f32 %v6132_v50, %v5764_v48  ;;  %v11303_v11 = vadd.f32 %v5060_v59, %v11073_v36  ;;  %v8930_v48 = vld [vmem:[#allocation3 + $0x114] sm:$0xff]  ;;  %v5988_v36 = vsel %vm9403_vm6, %v8602_v45, %v5987_v39  ;;  %v6025_v50 = vunpack.c.l.b16 %v5991_v43 }
 0x4ef   : > { %v5707_v2 = vpop.f32.mrf.mxu1  ;;  %v6369_v59 = vrot.slane %v6240_v14, 7  ;;  %v6024_v47 = vunpack.c.l.b16 %v5988_v36  ;;  %v7000_v39 = vrot.slane %v6901_v23, 5 }
 0x4f0   : > { %11964 = vst [vmem:[#allocation5_spill] sm:$0xff] %v11300_v32  ;;  %v5766_v54 = vadd.f32 %v5707_v2, %v11133_v7  ;;  %v6372_v7 = vrot.slane %v6241_v27, 7 }
 0x4f1   : > { %v6041_v45 = vpack.c.b16 %v6025_v50, %v6024_v47  ;;  %v6371_v40 = vrot.slane %v6369_v59, 4  ;;  %v7001_v27 = vsel %vm9403_vm6, %v6999_v37, %v7000_v39  ;;  %v6370_v50 = vsel %vm9417_vm10, %v8628_v55, %v6369_v59  ;;  %v6243_v39 = vld [vmem:[#allocation3 + $0xd4] sm:$0xf] }
 0x4f2   : > { %8644 = vmatmul.msk.bf16.gmra.mxu3 %vm4340_vm12, %v6464_v20  ;;  %8586 = vmatmul.msk.bf16.gmra.mxu1 %vm4340_vm12, %v8930_v48  ;;  %v8939_v20 = vld [vmem:[#allocation3 + $0xc4] sm:$0xff]  ;;  %v11324_v36 = vpop.f32.mrf.mxu0  ;;  %v7110_v47 = vunpack.c.l.b16 %v7001_v27  ;;  %v6242_v27 = vld [vmem:[#allocation3 + $0xd0] sm:$0x8] }
 0x4f3   : > { %v6899_v48 = vld [vmem:[#allocation3 + $0x44] sm:$0xe] }
 0x4f5   : > { %v6134_v26 = vpop.f32.mrf.mxu2  ;;  %v5063_v9 = vpop.f32.mrf.mxu3 }
 0x4f6   : > { %v11314_v32 = vadd.f32 %v6134_v26, %v5765_v38  ;;  %v11317_v2 = vadd.f32 %v5063_v9, %v11090_v16  ;;  %v6373_v38 = vsel %vm9417_vm10, %v6371_v40, %v6372_v7  ;;  %v8734_v16 = vrot.slane %v6899_v48, 9 }
 0x4f7   : > { %v5709_v43 = vpop.f32.mrf.mxu1  ;;  %v6442_v26 = vunpack.c.l.b16 %v6373_v38  ;;  %v6441_v7 = vunpack.c.l.b16 %v6370_v50  ;;  %v6904_v38 = vld [vmem:[#allocation3 + $0x5c] sm:$0x1] }
 0x4f8   : > { %v5767_v14 = vadd.f32 %v5709_v43, %v11151_v60  ;;  %v6998_v63 = vsel %vm9403_vm6, %v8734_v16, %v6997_v49  ;;  %v6244_v49 = vld [vmem:[#allocation3 + $0xd8] sm:$0x7]  ;;  %v6376_v43 = vrot.slane %v6243_v39, 7 }
 0x4f9   : > { %8726 = vmatmul.msk.bf16.gmra.mxu0 %vm4340_vm12, %v8939_v20  ;;  %v7109_v20 = vunpack.c.l.b16 %v6998_v63  ;;  %v6465_v37 = vpack.c.b16 %v6442_v26, %v6441_v7  ;;  %v8947_v26 = vld [vmem:[%s9062_s20] sm:$0xff]  ;;  %v6379_v63 = vrot.slane %v6244_v49, 7  ;;  %v7007_v7 = vrot.slane %v6904_v38, 5 }
 0x4fa   : > { %8619 = vmatmul.msk.bf16.gmra.mxu2 %vm4340_vm12, %v6041_v45  ;;  %v6903_v45 = vld [vmem:[#allocation3 + $0x58] sm:$0xf] }
 0x4fb   : > { %v7141_v55 = vpack.c.b16 %v7110_v47, %v7109_v20  ;;  %v5515_v20 = vadd.f32 %v11124_v1, %v11129_v56 }
 0x4fd   : > { %v6137_v23 = vpop.f32.mrf.mxu2  ;;  %v5065_v9 = vpop.f32.mrf.mxu3 }
 0x4fe   : > { %v11332_v60 = vadd.f32 %v6137_v23, %v5766_v54  ;;  %v11335_v40 = vadd.f32 %v5065_v9, %v11108_v28  ;;  %v7004_v54 = vrot.slane %v6903_v45, 5  ;;  %v11340_v28 = vpop.f32.mrf.mxu0  ;;  %v8940_v9 = vld [vmem:[#allocation3 + $0xd4] sm:$0xff]  ;;  %v8629_v45 = vrot.slane %v6242_v27, 11 }
 0x4ff   : > { %v5712_v48 = vpop.f32.mrf.mxu1 }
 0x500   : > { %v5768_v59 = vadd.f32 %v5712_v48, %v11167_v17  ;;  %v7006_v47 = vrot.slane %v7004_v54, 4  ;;  %v6378_v48 = vrot.slane %v6376_v43, 4  ;;  %v6377_v38 = vsel %vm9417_vm10, %v8629_v45, %v6376_v43  ;;  %v6906_v43 = vld [vmem:[#allocation3 + $0x68] sm:$0xf] }
 0x502   : > { %8645 = vmatmul.msk.bf16.gmra.mxu3 %vm4340_vm12, %v6465_v37  ;;  %8751 = vmatmul.msk.bf16.vlgmr.msra.gmra.mxu1 %vm4340_vm12, %v7141_v55  ;;  %v6902_v37 = vld [vmem:[#allocation3 + $0x54] sm:$0xe]  ;;  %v6380_v55 = vsel %vm9417_vm10, %v6378_v48, %v6379_v63  ;;  %v7008_v49 = vsel %vm9403_vm6, %v7006_v47, %v7007_v7  ;;  %v5516_v47 = vadd.f32 %v11144_v35, %v11147_v0  ;;  %v8948_v0 = vld [vmem:[%s9062_s20 + $0x8] sm:$0xff] }
 0x503   : > { %v6444_v56 = vunpack.c.l.b16 %v6380_v55  ;;  %v7011_v55 = vrot.slane %v6906_v43, 5 }
 0x505   : > { %v6139_v16 = vpop.f32.mrf.mxu2  ;;  %v6533_v23 = vpop.f32.mrf.mxu3 }
 0x506   : > { %v11342_v50 = vadd.f32 %v6139_v16, %v5767_v14  ;;  %v11346_v17 = vadd.f32 %v6533_v23, %v11126_v15  ;;  %v8735_v15 = vrot.slane %v6902_v37, 9  ;;  %v6246_v37 = vld [vmem:[#allocation3 + $0xe4] sm:$0xf] }
 0x507   : > { %v5714_v39 = vpop.f32.mrf.mxu1 }
 0x508   : > { %v5769_v14 = vadd.f32 %v5714_v39, %v5515_v20  ;;  %v7005_v16 = vsel %vm9403_vm6, %v8735_v15, %v7004_v54  ;;  %v6443_v20 = vunpack.c.l.b16 %v6377_v38  ;;  %v6247_v39 = vld [vmem:[#allocation3 + $0xe8] sm:$0x7]  ;;  %v6907_v15 = vld [vmem:[#allocation3 + $0x6c] sm:$0x1]  ;;  %v6245_v38 = vld [vmem:[#allocation3 + $0xe0] sm:$0x8] }
 0x509   : > { %8727 = vmatmul.msk.bf16.gmra.mxu0 %vm4340_vm12, %v8940_v9  ;;  %v7112_v9 = vunpack.c.l.b16 %v7008_v49  ;;  %v7111_v7 = vunpack.c.l.b16 %v7005_v16  ;;  %v6386_v16 = vrot.slane %v6247_v39, 7 }
 0x50a   : > { %8831 = vmatmul.msk.bf16.vlgmr.msra.gmra.mxu2 %vm887_vm3, %v8947_v26  ;;  %v11362_v26 = vpop.f32.mrf.mxu0  ;;  %v6466_v48 = vpack.c.b16 %v6444_v56, %v6443_v20  ;;  %v7014_v20 = vrot.slane %v6907_v15, 5 }
 0x50d   : > { %v6142_v1 = vpop.f32.mrf.mxu2  ;;  %v6535_v23 = vpop.f32.mrf.mxu3 }
 0x50e   : > { %v11360_v27 = vadd.f32 %v6142_v1, %v5768_v59  ;;  %v11365_v63 = vadd.f32 %v6535_v23, %v11142_v12  ;;  %v7142_v59 = vpack.c.b16 %v7112_v9, %v7111_v7  ;;  %v6383_v12 = vrot.slane %v6246_v37, 7  ;;  %v8941_v23 = vld [vmem:[#allocation3 + $0xe4] sm:$0xff] }
 0x50f   : > { %v5717_v45 = vpop.f32.mrf.mxu1  ;;  %v7013_v9 = vrot.slane %v7011_v55, 4  ;;  %v8630_v7 = vrot.slane %v6245_v38, 11 }
 0x510   : > { %v5770_v54 = vadd.f32 %v5717_v45, %v5516_v47  ;;  %v5517_v47 = vadd.f32 %v11169_v24, %v11163_v30  ;;  %v6385_v43 = vrot.slane %v6383_v12, 4  ;;  %v6905_v45 = vld [vmem:[#allocation3 + $0x64] sm:$0xe] }
 0x511   : > { %v7015_v39 = vsel %vm9403_vm6, %v7013_v9, %v7014_v20  ;;  %v6384_v30 = vsel %vm9417_vm10, %v8630_v7, %v6383_v12  ;;  %v6909_v20 = vld [vmem:[#allocation3 + $0x78] sm:$0xf]  ;;  %v6249_v7 = vld [vmem:[#allocation3 + $0xf4] sm:$0xf] }
 0x512   : > { %8646 = vmatmul.msk.bf16.gmra.mxu3 %vm4340_vm12, %v6466_v48  ;;  %8752 = vmatmul.msk.bf16.gmra.mxu1 %vm4340_vm12, %v7142_v59  ;;  %v11379_v48 = vpop.f32.mrf.mxu0  ;;  %v8736_v59 = vrot.slane %v6905_v45, 9 }
 0x515   : > { %v6144_v49 = vpop.f32.mrf.mxu2  ;;  %v6538_v35 = vpop.f32.mrf.mxu3 }
 0x516   : > { %v11371_v1 = vadd.f32 %v6144_v49, %v5769_v14  ;;  %v11375_v56 = vadd.f32 %v6538_v35, %v11160_v58  ;;  %v6387_v58 = vsel %vm9417_vm10, %v6385_v43, %v6386_v16  ;;  %v7012_v49 = vsel %vm9403_vm6, %v8736_v59, %v7011_v55  ;;  %v6910_v59 = vld [vmem:[#allocation3 + $0x7c] sm:$0x1] }
 0x517   : > { %v5719_v37 = vpop.f32.mrf.mxu1  ;;  %v6446_v15 = vunpack.c.l.b16 %v6387_v58  ;;  %v6445_v16 = vunpack.c.l.b16 %v6384_v30  ;;  %v7113_v9 = vunpack.c.l.b16 %v7012_v49  ;;  %v7018_v58 = vrot.slane %v6909_v20, 5 }
 0x518   : > { %v5771_v14 = vadd.f32 %v5719_v37, %v5517_v47  ;;  %v5518_v47 = vadd.f32 %v11188_v52, %v11181_v61  ;;  %v6248_v61 = vld [vmem:[#allocation3 + $0xf0] sm:$0x8] }
 0x519   : > { %8728 = vmatmul.msk.bf16.gmra.mxu0 %vm4340_vm12, %v8941_v23  ;;  %v7114_v23 = vunpack.c.l.b16 %v7015_v39  ;;  %v6467_v12 = vpack.c.b16 %v6446_v15, %v6445_v16  ;;  %v7021_v16 = vrot.slane %v6910_v59, 5 }
 0x51a   : > { %8832 = vmatmul.msk.bf16.gmra.mxu2 %vm887_vm3, %v8948_v0  ;;  %v11398_v55 = vpop.f32.mrf.mxu0 }
 0x51b   : > { %v7143_v37 = vpack.c.b16 %v7114_v23, %v7113_v9  ;;  %v7020_v23 = vrot.slane %v7018_v58, 4  ;;  %v8631_v9 = vrot.slane %v6248_v61, 11 }
 0x51d   : > { %v6147_v24 = vpop.f32.mrf.mxu2  ;;  %v6540_v35 = vpop.f32.mrf.mxu3 }
 0x51e   : > { %v11391_v38 = vadd.f32 %v6147_v24, %v5770_v54  ;;  %v11394_v0 = vadd.f32 %v6540_v35, %v11178_v3  ;;  %v6250_v54 = vld [vmem:[#allocation3 + $0xf8] sm:$0x7]  ;;  %v6390_v3 = vrot.slane %v6249_v7, 7  ;;  %v8949_v24 = vld [vmem:[%s9062_s20 + $0x10] sm:$0xff] }
 0x51f   : > { %v5722_v43 = vpop.f32.mrf.mxu1  ;;  %v6393_v15 = vrot.slane %v6250_v54, 7  ;;  %v8942_v35 = vld [vmem:[#allocation3 + $0xf4] sm:$0xff] }
 0x520   : > { %v5772_v45 = vadd.f32 %v5722_v43, %v5518_v47  ;;  %v5519_v47 = vadd.f32 %v11204_v6, %v11195_v42  ;;  %v6392_v20 = vrot.slane %v6390_v3, 4  ;;  %v6908_v43 = vld [vmem:[#allocation3 + $0x74] sm:$0xe]  ;;  %v6391_v54 = vsel %vm9417_vm10, %v8631_v9, %v6390_v3  ;;  %v6912_v3 = vld [vmem:[#allocation3 + $0x88] sm:$0xf] }
 0x522   : > { %8647 = vmatmul.msk.bf16.gmra.mxu3 %vm4340_vm12, %v6467_v12  ;;  %8753 = vmatmul.msk.bf16.gmra.mxu1 %vm4340_vm12, %v7143_v37  ;;  %v6394_v7 = vsel %vm9417_vm10, %v6392_v20, %v6393_v15  ;;  %v7022_v37 = vsel %vm9403_vm6, %v7020_v23, %v7021_v16  ;;  %v11418_v42 = vpop.f32.mrf.mxu0  ;;  %v5520_v23 = vadd.f32 %v11220_v22, %v11209_v46  ;;  %v6252_v20 = vld [vmem:[#allocation3 + $0x104] sm:$0xf]  ;;  %v8950_v22 = vld [vmem:[%s9062_s20 + $0x18] sm:$0xff] }
 0x523   : > { %v6448_v59 = vunpack.c.l.b16 %v6394_v7  ;;  %v6913_v7 = vld [vmem:[#allocation3 + $0x8c] sm:$0x1] }
 0x525   : > { %v6149_v39 = vpop.f32.mrf.mxu2  ;;  %v6543_v30 = vpop.f32.mrf.mxu3 }
 0x526   : > { %v11402_v52 = vadd.f32 %v6149_v39, %v5771_v14  ;;  %v11406_v49 = vadd.f32 %v6543_v30, %v11192_v4  ;;  %v8737_v4 = vrot.slane %v6908_v43, 9 }
 0x527   : > { %v5724_v12 = vpop.f32.mrf.mxu1 }
 0x528   : > { %v5773_v14 = vadd.f32 %v5724_v12, %v5519_v47  ;;  %v7019_v39 = vsel %vm9403_vm6, %v8737_v4, %v7018_v58  ;;  %v7025_v58 = vrot.slane %v6912_v3, 5 }
 0x529   : > { %8729 = vmatmul.msk.bf16.gmra.mxu0 %vm4340_vm12, %v8942_v35  ;;  %v6447_v35 = vunpack.c.l.b16 %v6391_v54  ;;  %v7115_v16 = vunpack.c.l.b16 %v7019_v39 }
 0x52a   : > { %8833 = vmatmul.msk.bf16.gmra.mxu2 %vm887_vm3, %v8949_v24  ;;  %v7116_v24 = vunpack.c.l.b16 %v7022_v37  ;;  %v6251_v37 = vld [vmem:[#allocation3 + $0x100] sm:$0x8]  ;;  %v11434_v39 = vpop.f32.mrf.mxu0 }
 0x52b   : > { %v6468_v9 = vpack.c.b16 %v6448_v59, %v6447_v35  ;;  %v7028_v35 = vrot.slane %v6913_v7, 5 }
 0x52c   : > { %v7144_v12 = vpack.c.b16 %v7116_v24, %v7115_v16  ;;  %v7027_v24 = vrot.slane %v7025_v58, 4  ;;  %v8632_v16 = vrot.slane %v6251_v37, 11 }
 0x52d   : > { %v6152_v6 = vpop.f32.mrf.mxu2  ;;  %v6545_v30 = vpop.f32.mrf.mxu3 }
 0x52e   : > { %v11422_v61 = vadd.f32 %v6152_v6, %v5772_v45  ;;  %v11425_v15 = vadd.f32 %v6545_v30, %v11206_v44  ;;  %v6253_v45 = vld [vmem:[#allocation3 + $0x108] sm:$0x7]  ;;  %v6397_v44 = vrot.slane %v6252_v20, 7 }
 0x52f   : > { %v5727_v47 = vpop.f32.mrf.mxu1  ;;  %v6400_v6 = vrot.slane %v6253_v45, 7  ;;  %v8943_v30 = vld [vmem:[#allocation3 + $0x104] sm:$0xff] }
 0x530   : > { %v5774_v43 = vadd.f32 %v5727_v47, %v5520_v23  ;;  %v5521_v23 = vadd.f32 %v11237_v53, %v11223_v18  ;;  %v6399_v3 = vrot.slane %v6397_v44, 4  ;;  %v6911_v47 = vld [vmem:[#allocation3 + $0x84] sm:$0xe]  ;;  %v6398_v45 = vsel %vm9417_vm10, %v8632_v16, %v6397_v44 }
 0x532   : > { %8648 = vmatmul.msk.bf16.gmra.mxu3 %vm4340_vm12, %v6468_v9  ;;  %8754 = vmatmul.msk.bf16.gmra.mxu1 %vm4340_vm12, %v7144_v12  ;;  %v6401_v20 = vsel %vm9417_vm10, %v6399_v3, %v6400_v6  ;;  %v7029_v12 = vsel %vm9403_vm6, %v7027_v24, %v7028_v35  ;;  %v6449_v6 = vunpack.c.l.b16 %v6398_v45  ;;  %v6915_v35 = vld [vmem:[#allocation3 + $0x98] sm:$0xf]  ;;  %v11458_v44 = vpop.f32.mrf.mxu0  ;;  %v6255_v3 = vld [vmem:[#allocation3 + $0x114] sm:$0xf] }
 0x533   : > { %v6450_v53 = vunpack.c.l.b16 %v6401_v20  ;;  %v6916_v20 = vld [vmem:[#allocation3 + $0x9c] sm:$0x1] }
 0x535   : > { %v6154_v4 = vpop.f32.mrf.mxu2  ;;  %v6548_v46 = vpop.f32.mrf.mxu3  ;;  %v6469_v16 = vpack.c.b16 %v6450_v53, %v6449_v6  ;;  %v7035_v53 = vrot.slane %v6916_v20, 5  ;;  %v6258_v20 = vld [vmem:[#allocation3 + $0x124] sm:$0xf] }
 0x536   : > { %v11431_v54 = vadd.f32 %v6154_v4, %v5773_v14  ;;  %v11437_v59 = vadd.f32 %v6548_v46, %v11218_v57  ;;  %v8738_v57 = vrot.slane %v6911_v47, 9  ;;  %v7118_v46 = vunpack.c.l.b16 %v7029_v12  ;;  %v6256_v47 = vld [vmem:[#allocation3 + $0x118] sm:$0x7]  ;;  %v8951_v12 = vld [vmem:[%s9062_s20 + $0x20] sm:$0xff] }
 0x537   : > { %v5729_v9 = vpop.f32.mrf.mxu1  ;;  %v6407_v45 = vrot.slane %v6256_v47, 7 }
 0x538   : > { %v5775_v14 = vadd.f32 %v5729_v9, %v5521_v23  ;;  %v7026_v7 = vsel %vm9403_vm6, %v8738_v57, %v7025_v58  ;;  %v7032_v9 = vrot.slane %v6915_v35, 5 }
 0x539   : > { %8730 = vmatmul.msk.bf16.gmra.mxu0 %vm4340_vm12, %v8943_v30  ;;  %v5522_v30 = vadd.f32 %v11254_v41, %v11235_v29  ;;  %v7117_v24 = vunpack.c.l.b16 %v7026_v7  ;;  %v6254_v29 = vld [vmem:[#allocation3 + $0x110] sm:$0x8] }
 0x53a   : > { %8834 = vmatmul.msk.bf16.gmra.mxu2 %vm887_vm3, %v8950_v22  ;;  %v7034_v7 = vrot.slane %v7032_v9, 4 }
 0x53d   : > { %v6157_v18 = vpop.f32.mrf.mxu2  ;;  %v6550_v37 = vpop.f32.mrf.mxu3 }
 0x53e   : > { %v11451_v4 = vadd.f32 %v6157_v18, %v5774_v43  ;;  %v11454_v22 = vadd.f32 %v6550_v37, %v11232_v34  ;;  %v7145_v43 = vpack.c.b16 %v7118_v46, %v7117_v24  ;;  %v6404_v34 = vrot.slane %v6255_v3, 7  ;;  %v8944_v18 = vld [vmem:[#allocation3 + $0x114] sm:$0xff] }
 0x53f   : > { %v5732_v23 = vpop.f32.mrf.mxu1  ;;  %v5523_v37 = vadd.f32 %v11272_v21, %v11249_v8  ;;  %v8633_v46 = vrot.slane %v6254_v29, 11  ;;  %v7036_v3 = vsel %vm9403_vm6, %v7034_v7, %v7035_v53 }
 0x540   : > { %v5776_v58 = vadd.f32 %v5732_v23, %v5522_v30  ;;  %v6406_v6 = vrot.slane %v6404_v34, 4  ;;  %v6914_v30 = vld [vmem:[#allocation3 + $0x94] sm:$0xe]  ;;  %v11471_v23 = vpop.f32.mrf.mxu0  ;;  %v7120_v29 = vunpack.c.l.b16 %v7036_v3  ;;  %v6919_v3 = vld [vmem:[#allocation3 + $0xac] sm:$0x1] }
 0x541   : > { %v6405_v8 = vsel %vm9417_vm10, %v8633_v46, %v6404_v34  ;;  %v6257_v34 = vld [vmem:[#allocation3 + $0x120] sm:$0x8]  ;;  %v6259_v46 = vld [vmem:[#allocation3 + $0x128] sm:$0x7] }
 0x542   : > { %8649 = vmatmul.msk.bf16.gmra.mxu3 %vm4340_vm12, %v6469_v16  ;;  %8755 = vmatmul.msk.bf16.gmra.mxu1 %vm4340_vm12, %v7145_v43  ;;  %v8739_v16 = vrot.slane %v6914_v30, 9 }
 0x544   : > { %v7033_v47 = vsel %vm9403_vm6, %v8739_v16, %v7032_v9  ;;  %v6414_v16 = vrot.slane %v6259_v46, 7 }
 0x545   : > { %v6159_v57 = vpop.f32.mrf.mxu2 }
 0x546   : > { %v11462_v41 = vadd.f32 %v6159_v57, %v5775_v14  ;;  %v6408_v14 = vsel %vm9417_vm10, %v6406_v6, %v6407_v45  ;;  %v5524_v45 = vadd.f32 %v11288_v31, %v11263_v19  ;;  %v6918_v6 = vld [vmem:[#allocation3 + $0xa8] sm:$0xf] }
 0x547   : > { %v5734_v24 = vpop.f32.mrf.mxu1  ;;  %v6452_v43 = vunpack.c.l.b16 %v6408_v14  ;;  %v7039_v9 = vrot.slane %v6918_v6, 5 }
 0x548   : > { %v5777_v35 = vadd.f32 %v5734_v24, %v5523_v37  ;;  %v6411_v37 = vrot.slane %v6258_v20, 7  ;;  %v11485_v19 = vpop.f32.mrf.mxu0  ;;  %v7042_v20 = vrot.slane %v6919_v3, 5  ;;  %v5526_v3 = vadd.f32 %v11324_v36, %v11291_v51  ;;  %v8946_v51 = vld [vmem:[#allocation3 + $0x134] sm:$0xff] }
 0x549   : > { %8731 = vmatmul.msk.bf16.gmra.mxu0 %vm4340_vm12, %v8944_v18  ;;  %v7119_v18 = vunpack.c.l.b16 %v7033_v47  ;;  %v7041_v47 = vrot.slane %v7039_v9, 4 }
 0x54a   : > { %8835 = vmatmul.msk.bf16.gmra.mxu2 %vm887_vm3, %v8951_v12  ;;  %v6451_v12 = vunpack.c.l.b16 %v6405_v8  ;;  %v6413_v14 = vrot.slane %v6411_v37, 4  ;;  %v8945_v8 = vld [vmem:[#allocation3 + $0x124] sm:$0xff] }
 0x54b   : > { %v7146_v24 = vpack.c.b16 %v7120_v29, %v7119_v18  ;;  %v5525_v29 = vadd.f32 %v11305_v62, %v11277_v13  ;;  %v6917_v18 = vld [vmem:[#allocation3 + $0xa4] sm:$0xe]  ;;  %v7043_v46 = vsel %vm9403_vm6, %v7041_v47, %v7042_v20  ;;  %v6260_v47 = vld [vmem:[#allocation3 + $0x130] sm:$0x8]  ;;  %v6262_v20 = vld [vmem:[#allocation3 + $0x138] sm:$0x7] }
 0x54c   : > { %v6470_v53 = vpack.c.b16 %v6452_v43, %v6451_v12  ;;  %v8952_v43 = vld [vmem:[%s9062_s20 + $0x28] sm:$0xff] }
 0x54d   : > { %v6162_v21 = vpop.f32.mrf.mxu2 }
 0x54e   : > { %v11479_v57 = vadd.f32 %v6162_v21, %v5776_v58  ;;  %v8634_v58 = vrot.slane %v6257_v34, 11  ;;  %v8740_v34 = vrot.slane %v6917_v18, 9 }
 0x54f   : > { %v5737_v7 = vpop.f32.mrf.mxu1 }
 0x550   : > { %v5778_v30 = vadd.f32 %v5737_v7, %v5524_v45  ;;  %v6412_v12 = vsel %vm9417_vm10, %v8634_v58, %v6411_v37  ;;  %v6415_v45 = vsel %vm9417_vm10, %v6413_v14, %v6414_v16  ;;  %v7040_v62 = vsel %vm9403_vm6, %v8740_v34, %v7039_v9  ;;  %v6261_v37 = vld [vmem:[#allocation3 + $0x134] sm:$0xf]  ;;  %v11504_v14 = vpop.f32.mrf.mxu0 }
 0x551   : > { %v7122_v58 = vunpack.c.l.b16 %v7043_v46  ;;  %v8635_v9 = vrot.slane %v6260_v47, 11  ;;  %v8953_v34 = vld [vmem:[%s9062_s20 + $0x30] sm:$0xff] }
 0x552   : > { %8650 = vmatmul.msk.bf16.gmra.mxu3 %vm4340_vm12, %v6470_v53  ;;  %8756 = vmatmul.msk.bf16.gmra.mxu1 %vm4340_vm12, %v7146_v24  ;;  %v6454_v53 = vunpack.c.l.b16 %v6415_v45 }
 0x555   : > { %v6164_v31 = vpop.f32.mrf.mxu2 }
 0x556   : > { %v11487_v21 = vadd.f32 %v6164_v31, %v5777_v35  ;;  %v6453_v35 = vunpack.c.l.b16 %v6412_v12  ;;  %v7121_v31 = vunpack.c.l.b16 %v7040_v62  ;;  %v5527_v62 = vadd.f32 %v11340_v28, %v11303_v11 }
 0x557   : > { %v5739_v6 = vpop.f32.mrf.mxu1 }
 0x558   : > { %v5779_v7 = vadd.f32 %v5739_v6, %v5525_v29  ;;  %v6471_v16 = vpack.c.b16 %v6454_v53, %v6453_v35  ;;  %v7147_v45 = vpack.c.b16 %v7122_v58, %v7121_v31  ;;  %v6421_v6 = vrot.slane %v6262_v20, 7  ;;  %v6922_v35 = vld [vmem:[#allocation3 + $0xbc] sm:$0x1] }
 0x559   : > { %8732 = vmatmul.msk.bf16.gmra.mxu0 %vm4340_vm12, %v8945_v8  ;;  %v6418_v8 = vrot.slane %v6261_v37, 7 }
 0x55a   : > { %8836 = vmatmul.msk.bf16.gmra.mxu2 %vm887_vm3, %v8952_v43  ;;  %v6921_v43 = vld [vmem:[#allocation3 + $0xb8] sm:$0xf] }
 0x55b   : > { %v6420_v18 = vrot.slane %v6418_v8, 4  ;;  %v6419_v37 = vsel %vm9417_vm10, %v8635_v9, %v6418_v8  ;;  %v5528_v9 = vadd.f32 %v11362_v26, %v11317_v2  ;;  %v5529_v2 = vadd.f32 %v11379_v48, %v11335_v40  ;;  %v6923_v26 = vld [vmem:[#allocation3 + $0xc4] sm:$0xe] }
 0x55d   : > { %v6167_v13 = vpop.f32.mrf.mxu2  ;;  %v6422_v58 = vsel %vm9417_vm10, %v6420_v18, %v6421_v6  ;;  %v6924_v6 = vld [vmem:[#allocation3 + $0xc8] sm:$0xf] }
 0x55e   : > { %v11502_v24 = vadd.f32 %v6167_v13, %v5778_v30  ;;  %v7046_v30 = vrot.slane %v6921_v43, 5  ;;  %v7049_v13 = vrot.slane %v6922_v35, 5  ;;  %v6455_v43 = vunpack.c.l.b16 %v6419_v37 }
 0x55f   : > { %v5742_v29 = vpop.f32.mrf.mxu1 }
 0x560   : > { %v5780_v12 = vadd.f32 %v5742_v29, %v5526_v3  ;;  %v7048_v46 = vrot.slane %v7046_v30, 4  ;;  %v11519_v3 = vpop.f32.mrf.mxu0  ;;  %v6456_v29 = vunpack.c.l.b16 %v6422_v58 }
 0x562   : > { %8651 = vmatmul.msk.bf16.gmra.mxu3 %vm4340_vm12, %v6471_v16  ;;  %8757 = vmatmul.msk.bf16.gmra.mxu1 %vm4340_vm12, %v7147_v45  ;;  %v6920_v16 = vld [vmem:[#allocation3 + $0xb4] sm:$0xe]  ;;  %v7050_v11 = vsel %vm9403_vm6, %v7048_v46, %v7049_v13  ;;  %v6472_v45 = vpack.c.b16 %v6456_v29, %v6455_v43  ;;  %v6925_v46 = vld [vmem:[#allocation3 + $0xcc] sm:$0x1] }
 0x563   : > { %v8741_v47 = vrot.slane %v6920_v16, 9  ;;  %v7124_v20 = vunpack.c.l.b16 %v7050_v11  ;;  %v7056_v37 = vrot.slane %v6925_v46, 5  ;;  %v11554_v46 = vld [vmem:[%s11918_s5] ss:$0 sm:$0xff] }
 0x565   : > { %v6169_v53 = vpop.f32.mrf.mxu2  ;;  %v7047_v25 = vsel %vm9403_vm6, %v8741_v47, %v7046_v30 }
 0x566   : > { %v11510_v36 = vadd.f32 %v6169_v53, %v5779_v7  ;;  %v7123_v18 = vunpack.c.l.b16 %v7047_v25  ;;  %v6927_v25 = vld [vmem:[#allocation3 + $0xd8] sm:$0xf] }
 0x567   : > { %v5744_v31 = vpop.f32.mrf.mxu1 }
 0x568   : > { %v5781_v7 = vadd.f32 %v5744_v31, %v5527_v62  ;;  %v8742_v31 = vrot.slane %v6923_v26, 9  ;;  %v11573_v26 = vld [vmem:[%s11922_s9] ss:$0 sm:$0xff] }
 0x569   : > { %8733 = vmatmul.msk.bf16.gmra.mxu0 %vm4340_vm12, %v8946_v51  ;;  %v7148_v51 = vpack.c.b16 %v7124_v20, %v7123_v18  ;;  %v7060_v20 = vrot.slane %v6927_v25, 5  ;;  %v6867_v18 = vadd.f32 %v11398_v55, %v11346_v17 }
 0x56a   : > { %8837 = vmatmul.msk.bf16.gmra.mxu2 %vm887_vm3, %v8953_v34  ;;  %v7053_v34 = vrot.slane %v6924_v6, 5 }
 0x56c   : > { %v7055_v62 = vrot.slane %v7053_v34, 4 }
 0x56d   : > { %v6172_v28 = vpop.f32.mrf.mxu2 }
 0x56e   : > { %v11527_v8 = vadd.f32 %v6172_v28, %v5780_v12  ;;  %v8954_v12 = vld [vmem:[%s9062_s20 + $0x38] sm:$0xff]  ;;  %v7057_v43 = vsel %vm9403_vm6, %v7055_v62, %v7056_v37  ;;  %v11560_v62 = vld [vmem:[%s11921_s8] ss:$0 sm:$0xff] }
 0x56f   : > { %v5747_v35 = vpop.f32.mrf.mxu1  ;;  %v7126_v11 = vunpack.c.l.b16 %v7057_v43 }
 0x570   : > { %v5782_v53 = vadd.f32 %v5747_v35, %v5528_v9  ;;  %v8955_v35 = vld [vmem:[%s9062_s20 + $0x40] sm:$0xff] }
 0x572   : > { %8652 = vmatmul.msk.bf16.gmra.mxu3 %vm4340_vm12, %v6472_v45  ;;  %8758 = vmatmul.msk.bf16.gmra.mxu1 %vm4340_vm12, %v7148_v51  ;;  %v6928_v45 = vld [vmem:[#allocation3 + $0xdc] sm:$0x1]  ;;  %v7062_v51 = vrot.slane %v7060_v20, 4 }
 0x575   : > { %v6174_v30 = vpop.f32.mrf.mxu2 }
 0x576   : > { %v11533_v13 = vadd.f32 %v6174_v30, %v5781_v7  ;;  %v7054_v7 = vsel %vm9403_vm6, %v8742_v31, %v7053_v34  ;;  %v7063_v34 = vrot.slane %v6928_v45, 5  ;;  %v6926_v30 = vld [vmem:[#allocation3 + $0xd4] sm:$0xe]  ;;  %v6868_v31 = vadd.f32 %v11418_v42, %v11365_v63 }
 0x577   : > { %v5749_v58 = vpop.f32.mrf.mxu1  ;;  %v7125_v28 = vunpack.c.l.b16 %v7054_v7  ;;  %v8743_v17 = vrot.slane %v6926_v30, 9  ;;  %v8956_v30 = vld [vmem:[%s9062_s20 + $0x48] sm:$0xff] }
 0x578   : > { %v5783_v16 = vadd.f32 %v5749_v58, %v5529_v2  ;;  %v7064_v55 = vsel %vm9403_vm6, %v7062_v51, %v7063_v34  ;;  %v11568_v2 = vld [vmem:[%s11919_s6] ss:$0 sm:$0xff]  ;;  %v6869_v34 = vadd.f32 %v11434_v39, %v11375_v56 }
 0x579   : > { %v7149_v48 = vpack.c.b16 %v7126_v11, %v7125_v28 }
 0x57a   : > { %8838 = vmatmul.msk.bf16.gmra.mxu2 %vm887_vm3, %v8954_v12 }
 0x57d   : > { %v6177_v29 = vpop.f32.mrf.mxu2 }
 0x57e   : > { %v11543_v47 = vadd.f32 %v6177_v29, %v5782_v53  ;;  %v7128_v29 = vunpack.c.l.b16 %v7064_v55 }
 0x57f   : > { %v7217_v40 = vpop.f32.mrf.mxu1 }
 0x580   : > { %v7297_v53 = vadd.f32 %v7217_v40, %v6867_v18  ;;  %v6930_v40 = vld [vmem:[#allocation3 + $0xe8] sm:$0xf] }
 0x581   : > { %v7067_v18 = vrot.slane %v6930_v40, 5 }
 0x582   : > { %8759 = vmatmul.msk.bf16.gmra.mxu1 %vm4340_vm12, %v7149_v48  ;;  %v7658_v37 = vmul.f32 %v11554_v46, %v7297_v53  ;;  %v11582_v48 = vpop.f32.mrf.mxu3 }
 0x584   : > { %v7694_v7 = vadd.f32 %v11568_v2, %v7658_v37 }
 0x585   : > { %v6179_v9 = vpop.f32.mrf.mxu2 }
 0x586   : > { %v11548_v6 = vadd.f32 %v6179_v9, %v5783_v16  ;;  %v7061_v16 = vsel %vm9403_vm6, %v8743_v17, %v7060_v20  ;;  %v7069_v17 = vrot.slane %v7067_v18, 4 }
 0x587   : > { %v7219_v12 = vpop.f32.mrf.mxu1  ;;  %v7127_v25 = vunpack.c.l.b16 %v7061_v16 }
 0x588   : > { %v7298_v11 = vadd.f32 %v7219_v12, %v6868_v31  ;;  %v11592_v12 = vpop.f32.mrf.mxu0  ;;  %v6929_v31 = vld [vmem:[#allocation3 + $0xe4] sm:$0xe] }
 0x589   : > { %v7150_v20 = vpack.c.b16 %v7128_v29, %v7127_v25  ;;  %v8744_v56 = vrot.slane %v6929_v31, 9  ;;  %v6871_v31 = vadd.f32 %v11471_v23, %v11406_v49 }
 0x58a   : > { %8839 = vmatmul.msk.bf16.gmra.mxu2 %vm887_vm3, %v8955_v35  ;;  %v7659_v63 = vmul.f32 %v11554_v46, %v7298_v11  ;;  %v6931_v35 = vld [vmem:[#allocation3 + $0xec] sm:$0x1] }
 0x58b   : > { %v7070_v55 = vrot.slane %v6931_v35, 5  ;;  %v7068_v40 = vsel %vm9403_vm6, %v8744_v56, %v7067_v18 }
 0x58c   : > { %v7695_v37 = vadd.f32 %v11568_v2, %v7659_v63 }
 0x58d   : > { %v7502_v58 = vpop.f32.mrf.mxu2  ;;  %v7071_v39 = vsel %vm9403_vm6, %v7069_v17, %v7070_v55 }
 0x58e   : > { %v7586_v43 = vmul.f32 %v11560_v62, %v7502_v58 }
 0x58f   : > { %v7222_v45 = vpop.f32.mrf.mxu1 }
 0x590   : > { %v7622_v28 = vadd.f32 %v11573_v26, %v7586_v43  ;;  %v7299_v58 = vadd.f32 %v7222_v45, %v6869_v34  ;;  %v6870_v45 = vadd.f32 %v11458_v44, %v11394_v0  ;;  %v6933_v34 = vld [vmem:[#allocation3 + $0xf8] sm:$0xf] }
 0x591   : > { %v7074_v55 = vrot.slane %v6933_v34, 5  ;;  %v6872_v34 = vadd.f32 %v11485_v19, %v11425_v15 }
 0x592   : > { %v7726_v9 = vadd.f32 %v7694_v7, %v7622_v28  ;;  %8760 = vmatmul.msk.bf16.gmra.mxu1 %vm4340_vm12, %v7150_v20  ;;  %v11597_v7 = vpop.f32.mrf.mxu3  ;;  %v7660_v11 = vmul.f32 %v11554_v46, %v7299_v58  ;;  %v7130_v20 = vunpack.c.l.b16 %v7071_v39 }
 0x593   : > { %v7076_v56 = vrot.slane %v7074_v55, 4 }
 0x594   : > { %v7758_v42 = vmax.f32 %v7726_v9, 0.0  ;;  %v7696_v63 = vadd.f32 %v11568_v2, %v7660_v11 }
 0x595   : > { %v7504_v51 = vpop.f32.mrf.mxu2 }
 0x596   : > { %7790 = vst.msk [vmem:[%s9067_s23] sm:$0xff] %vm4340_vm12, %v7758_v42  ;;  %v7587_v53 = vmul.f32 %v11560_v62, %v7504_v51  ;;  %v7129_v51 = vunpack.c.l.b16 %v7068_v40  ;;  %v6932_v40 = vld [vmem:[#allocation3 + $0xf4] sm:$0xe] }
 0x597   : > { %v7224_v43 = vpop.f32.mrf.mxu1 }
 0x598   : > { %v7623_v16 = vadd.f32 %v11573_v26, %v7587_v53  ;;  %v7300_v42 = vadd.f32 %v7224_v43, %v6870_v45  ;;  %v11611_v53 = vpop.f32.mrf.mxu0  ;;  %v7151_v17 = vpack.c.b16 %v7130_v20, %v7129_v51 }
 0x59a   : > { %v7727_v29 = vadd.f32 %v7695_v37, %v7623_v16  ;;  %8840 = vmatmul.msk.bf16.gmra.mxu2 %vm887_vm3, %v8956_v30  ;;  %v7661_v0 = vmul.f32 %v11554_v46, %v7300_v42  ;;  %v6934_v37 = vld [vmem:[#allocation3 + $0xfc] sm:$0x1]  ;;  %v11615_v58 = vpop.f32.mrf.mxu3 }
 0x59b   : > { %v7077_v39 = vrot.slane %v6934_v37, 5 }
 0x59c   : > { %v7759_v28 = vmax.f32 %v7727_v29, 0.0  ;;  %v8957_v29 = vld [vmem:[%s9062_s20 + $0x50] sm:$0xff]  ;;  %v7697_v11 = vadd.f32 %v11568_v2, %v7661_v0 }
 0x59d   : > { %v7507_v25 = vpop.f32.mrf.mxu2  ;;  %v7078_v49 = vsel %vm9403_vm6, %v7076_v56, %v7077_v39  ;;  %v6937_v39 = vld [vmem:[#allocation3 + $0x10c] sm:$0x1] }
 0x59e   : > { %7791 = vst.msk [vmem:[%s9067_s23 + $0x8] sm:$0xff] %vm4340_vm12, %v7759_v28  ;;  %v7588_v9 = vmul.f32 %v11560_v62, %v7507_v25 }
 0x59f   : > { %v7227_v18 = vpop.f32.mrf.mxu1 }
 0x5a0   : > { %v7624_v35 = vadd.f32 %v11573_v26, %v7588_v9  ;;  %v7301_v28 = vadd.f32 %v7227_v18, %v6871_v31  ;;  %v11626_v20 = vpop.f32.mrf.mxu0  ;;  %v6936_v31 = vld [vmem:[#allocation3 + $0x108] sm:$0xf] }
 0x5a1   : > { %v7081_v56 = vrot.slane %v6936_v31, 5 }
 0x5a2   : > { %v7728_v30 = vadd.f32 %v7696_v63, %v7624_v35  ;;  %8761 = vmatmul.msk.bf16.gmra.mxu1 %vm4340_vm12, %v7151_v17  ;;  %v8745_v63 = vrot.slane %v6932_v40, 9  ;;  %v7662_v23 = vmul.f32 %v11554_v46, %v7301_v28  ;;  %v11638_v17 = vpop.f32.mrf.mxu3 }
 0x5a4   : > { %v7760_v44 = vmax.f32 %v7728_v30, 0.0  ;;  %v7075_v51 = vsel %vm9403_vm6, %v8745_v63, %v7074_v55  ;;  %v7132_v30 = vunpack.c.l.b16 %v7078_v49  ;;  %v7698_v0 = vadd.f32 %v11568_v2, %v7662_v23 }
 0x5a5   : > { %v7509_v16 = vpop.f32.mrf.mxu2  ;;  %v7084_v63 = vrot.slane %v6937_v39, 5 }
 0x5a6   : > { %7792 = vst.msk [vmem:[%s9067_s23 + $0x10] sm:$0xff] %vm4340_vm12, %v7760_v44  ;;  %v7589_v43 = vmul.f32 %v11560_v62, %v7509_v16  ;;  %v7131_v16 = vunpack.c.l.b16 %v7075_v51 }
 0x5a7   : > { %v7229_v45 = vpop.f32.mrf.mxu1 }
 0x5a8   : > { %v7625_v25 = vadd.f32 %v11573_v26, %v7589_v43  ;;  %v7302_v44 = vadd.f32 %v7229_v45, %v6872_v34  ;;  %v8958_v45 = vld [vmem:[%s9062_s20 + $0x58] sm:$0xff] }
 0x5aa   : > { %v7729_v9 = vadd.f32 %v7697_v11, %v7625_v25  ;;  %8841 = vmatmul.msk.bf16.gmra.mxu2 %vm887_vm3, %v8957_v29  ;;  %v7152_v29 = vpack.c.b16 %v7132_v30, %v7131_v16  ;;  %v7663_v15 = vmul.f32 %v11554_v46, %v7302_v44  ;;  %v11644_v11 = vpop.f32.mrf.mxu0  ;;  %v6873_v25 = vadd.f32 %v11504_v14, %v11437_v59  ;;  %v11654_v51 = vpop.f32.mrf.mxu3 }
 0x5ab   : > { %v6874_v16 = vadd.f32 %v11519_v3, %v11454_v22 }
 0x5ac   : > { %v7761_v42 = vmax.f32 %v7729_v9, 0.0  ;;  %v7083_v9 = vrot.slane %v7081_v56, 4  ;;  %v7699_v49 = vadd.f32 %v11568_v2, %v7663_v15 }
 0x5ad   : > { %v7512_v35 = vpop.f32.mrf.mxu2 }
 0x5ae   : > { %7793 = vst.msk [vmem:[%s9067_s23 + $0x18] sm:$0xff] %vm4340_vm12, %v7761_v42  ;;  %v7590_v18 = vmul.f32 %v11560_v62, %v7512_v35  ;;  %v6935_v35 = vld [vmem:[#allocation3 + $0x104] sm:$0xe]  ;;  %v7085_v59 = vsel %vm9403_vm6, %v7083_v9, %v7084_v63 }
 0x5af   : > { %v7232_v55 = vpop.f32.mrf.mxu1  ;;  %v8746_v30 = vrot.slane %v6935_v35, 9 }
 0x5b0   : > { %v7626_v37 = vadd.f32 %v11573_v26, %v7590_v18  ;;  %v7303_v23 = vadd.f32 %v7232_v55, %v6873_v25  ;;  %v7134_v55 = vunpack.c.l.b16 %v7085_v59  ;;  %v6621_v25 = vadd.f32 %v11582_v48, %v11246_v5 }
 0x5b2   : > { %v7730_v43 = vadd.f32 %v7698_v0, %v7626_v37  ;;  %8762 = vmatmul.msk.bf16.gmra.mxu1 %vm4340_vm12, %v7152_v29  ;;  %v7664_v14 = vmul.f32 %v11554_v46, %v7303_v23  ;;  %v7082_v37 = vsel %vm9403_vm6, %v8746_v30, %v7081_v56  ;;  %v11673_v3 = vpop.f32.mrf.mxu3 }
 0x5b3   : > { %v7133_v39 = vunpack.c.l.b16 %v7082_v37  ;;  %v6622_v37 = vadd.f32 %v11597_v7, %v11260_v33 }
 0x5b4   : > { %v7762_v19 = vmax.f32 %v7730_v43, 0.0  ;;  %v11667_v43 = vpop.f32.mrf.mxu0  ;;  %v7700_v29 = vadd.f32 %v11568_v2, %v7664_v14  ;;  %v6938_v14 = vld [vmem:[#allocation3 + $0x114] sm:$0xe] }
 0x5b5   : > { %v7514_v28 = vpop.f32.mrf.mxu2  ;;  %v7153_v22 = vpack.c.b16 %v7134_v55, %v7133_v39  ;;  %v6876_v33 = vadd.f32 %v11611_v53, %v6622_v37  ;;  %v6941_v53 = vld [vmem:[#allocation3 + $0x124] sm:$0xe] }
 0x5b6   : > { %7794 = vst.msk [vmem:[%s9067_s23 + $0x20] sm:$0xff] %vm4340_vm12, %v7762_v19  ;;  %v7591_v40 = vmul.f32 %v11560_v62, %v7514_v28  ;;  %v6939_v28 = vld [vmem:[#allocation3 + $0x118] sm:$0xf] }
 0x5b7   : > { %v7234_v34 = vpop.f32.mrf.mxu1 }
 0x5b8   : > { %v7627_v42 = vadd.f32 %v11573_v26, %v7591_v40  ;;  %v7304_v15 = vadd.f32 %v7234_v34, %v6874_v16  ;;  %v8959_v34 = vld [vmem:[%s9062_s20 + $0x60] sm:$0xff] }
 0x5ba   : > { %v7731_v18 = vadd.f32 %v7699_v49, %v7627_v42  ;;  %8842 = vmatmul.msk.bf16.gmra.mxu2 %vm887_vm3, %v8958_v45  ;;  %v7088_v45 = vrot.slane %v6939_v28, 5  ;;  %v7665_v9 = vmul.f32 %v11554_v46, %v7304_v15  ;;  %v6940_v49 = vld [vmem:[#allocation3 + $0x11c] sm:$0x1]  ;;  %v6875_v42 = vadd.f32 %v11592_v12, %v6621_v25  ;;  %v11692_v15 = vpop.f32.mrf.mxu3 }
 0x5bb   : > { %v7091_v48 = vrot.slane %v6940_v49, 5  ;;  %v8747_v12 = vrot.slane %v6938_v14, 9 }
 0x5bc   : > { %v7763_v0 = vmax.f32 %v7731_v18, 0.0  ;;  %v7090_v5 = vrot.slane %v7088_v45, 4  ;;  %v7701_v18 = vadd.f32 %v11568_v2, %v7665_v9 }
 0x5bd   : > { %v7517_v44 = vpop.f32.mrf.mxu2  ;;  %v7089_v39 = vsel %vm9403_vm6, %v8747_v12, %v7088_v45 }
 0x5be   : > { %7795 = vst.msk [vmem:[%s9067_s23 + $0x28] sm:$0xff] %vm4340_vm12, %v7763_v0  ;;  %v7592_v31 = vmul.f32 %v11560_v62, %v7517_v44  ;;  %v11684_v0 = vpop.f32.mrf.mxu0  ;;  %v7135_v9 = vunpack.c.l.b16 %v7089_v39 }
 0x5bf   : > { %v7237_v56 = vpop.f32.mrf.mxu1 }
 0x5c0   : > { %v7628_v19 = vadd.f32 %v11573_v26, %v7592_v31  ;;  %v7305_v30 = vadd.f32 %v7237_v56, %v6875_v42  ;;  %v7092_v31 = vsel %vm9403_vm6, %v7090_v5, %v7091_v48  ;;  %v6942_v56 = vld [vmem:[#allocation3 + $0x128] sm:$0xf] }
 0x5c1   : > { %v7136_v28 = vunpack.c.l.b16 %v7092_v31  ;;  %v7095_v49 = vrot.slane %v6942_v56, 5 }
 0x5c2   : > { %v7732_v40 = vadd.f32 %v7700_v29, %v7628_v19  ;;  %8763 = vmatmul.msk.bf16.gmra.mxu1 %vm4340_vm12, %v7153_v22  ;;  %v7666_v55 = vmul.f32 %v11554_v46, %v7305_v30  ;;  %v11713_v12 = vpop.f32.mrf.mxu3 }
 0x5c3   : > { %v7097_v14 = vrot.slane %v7095_v49, 4 }
 0x5c4   : > { %v7764_v63 = vmax.f32 %v7732_v40, 0.0  ;;  %v7702_v25 = vadd.f32 %v11568_v2, %v7666_v55 }
 0x5c5   : > { %v7519_v23 = vpop.f32.mrf.mxu2 }
 0x5c6   : > { %7796 = vst.msk [vmem:[%s9067_s23 + $0x30] sm:$0xff] %vm4340_vm12, %v7764_v63  ;;  %v7593_v35 = vmul.f32 %v11560_v62, %v7519_v23  ;;  %v11965_v23 = vld [vmem:[#allocation4_spill] sm:$0xff]  ;;  %v11704_v5 = vpop.f32.mrf.mxu0 }
 0x5c7   : > { %v7239_v44 = vpop.f32.mrf.mxu1  ;;  %v6623_v45 = vadd.f32 %v11615_v58, %v11965_v23 }
 0x5c8   : > { %v7629_v59 = vadd.f32 %v11573_v26, %v7593_v35  ;;  %v7306_v40 = vadd.f32 %v7239_v44, %v6876_v33  ;;  %v7154_v35 = vpack.c.b16 %v7136_v28, %v7135_v9 }
 0x5c9   : > { %v6877_v58 = vadd.f32 %v11626_v20, %v6623_v45  ;;  %v6945_v45 = vld [vmem:[#allocation3 + $0x138] sm:$0xf] }
 0x5ca   : > { %v7733_v16 = vadd.f32 %v7701_v18, %v7629_v59  ;;  %8843 = vmatmul.msk.bf16.gmra.mxu2 %vm887_vm3, %v8959_v34  ;;  %v6943_v34 = vld [vmem:[#allocation3 + $0x12c] sm:$0x1]  ;;  %v7667_v48 = vmul.f32 %v11554_v46, %v7306_v40  ;;  %v8748_v59 = vrot.slane %v6941_v53, 9 }
 0x5cb   : > { %v7098_v44 = vrot.slane %v6943_v34, 5  ;;  %v11733_v34 = vpop.f32.mrf.mxu3 }
 0x5cc   : > { %v7765_v29 = vmax.f32 %v7733_v16, 0.0  ;;  %v8960_v16 = vld [vmem:[%s9062_s20 + $0x68] sm:$0xff]  ;;  %v7703_v31 = vadd.f32 %v11568_v2, %v7667_v48  ;;  %v7096_v39 = vsel %vm9403_vm6, %v8748_v59, %v7095_v49 }
 0x5cd   : > { %v7522_v19 = vpop.f32.mrf.mxu2  ;;  %v7099_v33 = vsel %vm9403_vm6, %v7097_v14, %v7098_v44  ;;  %v7137_v40 = vunpack.c.l.b16 %v7096_v39  ;;  %v6946_v44 = vld [vmem:[#allocation3 + $0x13c] sm:$0x1] }
 0x5ce   : > { %7797 = vst.msk [vmem:[%s9067_s23 + $0x38] sm:$0xff] %vm4340_vm12, %v7765_v29  ;;  %v7594_v7 = vmul.f32 %v11560_v62, %v7522_v19  ;;  %v11725_v9 = vpop.f32.mrf.mxu0 }
 0x5cf   : > { %v7242_v63 = vpop.f32.mrf.mxu1 }
 0x5d0   : > { %v7630_v22 = vadd.f32 %v11573_v26, %v7594_v7  ;;  %v7307_v55 = vadd.f32 %v7242_v63, %v6877_v58  ;;  %v11966_v7 = vld [vmem:[#allocation7_spill] sm:$0xff] }
 0x5d1   : > { %v6624_v20 = vadd.f32 %v11638_v17, %v11966_v7 }
 0x5d2   : > { %v7734_v42 = vadd.f32 %v7702_v25, %v7630_v22  ;;  %8764 = vmatmul.msk.bf16.gmra.mxu1 %vm4340_vm12, %v7154_v35  ;;  %v7668_v56 = vmul.f32 %v11554_v46, %v7307_v55  ;;  %v7138_v22 = vunpack.c.l.b16 %v7099_v33  ;;  %v8961_v33 = vld [vmem:[%s9062_s20 + $0x70] sm:$0xff] }
 0x5d3   : > { %v6878_v49 = vadd.f32 %v11644_v11, %v6624_v20  ;;  %v6944_v11 = vld [vmem:[#allocation3 + $0x134] sm:$0xe] }
 0x5d4   : > { %v7766_v18 = vmax.f32 %v7734_v42, 0.0  ;;  %v7704_v17 = vadd.f32 %v11568_v2, %v7668_v56  ;;  %v7155_v53 = vpack.c.b16 %v7138_v22, %v7137_v40 }
 0x5d5   : > { %v7524_v30 = vpop.f32.mrf.mxu2 }
 0x5d6   : > { %7798 = vst.msk [vmem:[%s9067_s23 + $0x40] sm:$0xff] %vm4340_vm12, %v7766_v18  ;;  %v7595_v37 = vmul.f32 %v11560_v62, %v7524_v30  ;;  %v7102_v18 = vrot.slane %v6945_v45, 5  ;;  %v11967_v30 = vld [vmem:[#allocation5_spill] sm:$0xff] }
 0x5d7   : > { %v7244_v19 = vpop.f32.mrf.mxu1  ;;  %v6625_v59 = vadd.f32 %v11654_v51, %v11967_v30  ;;  %v6827_v51 = vpop.f32.mrf.mxu0 }
 0x5d8   : > { %v7631_v29 = vadd.f32 %v11573_v26, %v7595_v37  ;;  %v7308_v42 = vadd.f32 %v7244_v19, %v6878_v49  ;;  %v7104_v55 = vrot.slane %v7102_v18, 4 }
 0x5d9   : > { %v6879_v19 = vadd.f32 %v11667_v43, %v6625_v59  ;;  %v6626_v43 = vadd.f32 %v11673_v3, %v11314_v32  ;;  %v6627_v59 = vadd.f32 %v11692_v15, %v11332_v60 }
 0x5da   : > { %v7735_v28 = vadd.f32 %v7703_v31, %v7631_v29  ;;  %8844 = vmatmul.msk.bf16.gmra.mxu2 %vm887_vm3, %v8960_v16  ;;  %v7669_v58 = vmul.f32 %v11554_v46, %v7308_v42  ;;  %v8749_v31 = vrot.slane %v6944_v11, 9  ;;  %v7105_v29 = vrot.slane %v6946_v44, 5 }
 0x5dc   : > { %v7767_v25 = vmax.f32 %v7735_v28, 0.0  ;;  %v7705_v7 = vadd.f32 %v11568_v2, %v7669_v58  ;;  %v7106_v40 = vsel %vm9403_vm6, %v7104_v55, %v7105_v29 }
 0x5dd   : > { %v7527_v63 = vpop.f32.mrf.mxu2 }
 0x5de   : > { %7799 = vst.msk [vmem:[%s9067_s23 + $0x48] sm:$0xff] %vm4340_vm12, %v7767_v25  ;;  %v7596_v23 = vmul.f32 %v11560_v62, %v7527_v63  ;;  %v7103_v25 = vsel %vm9403_vm6, %v8749_v31, %v7102_v18  ;;  %v6575_v63 = vpop.f32.mrf.mxu3  ;;  %v8962_v31 = vld [vmem:[%s9062_s20 + $0x78] sm:$0xff] }
 0x5df   : > { %v7247_v48 = vpop.f32.mrf.mxu1  ;;  %v7139_v45 = vunpack.c.l.b16 %v7103_v25  ;;  %v6829_v18 = vpop.f32.mrf.mxu0 }
 0x5e0   : > { %v7632_v35 = vadd.f32 %v11573_v26, %v7596_v23  ;;  %v7309_v20 = vadd.f32 %v7247_v48, %v6879_v19  ;;  %v6628_v19 = vadd.f32 %v11713_v12, %v11342_v50 }
 0x5e2   : > { %v7736_v14 = vadd.f32 %v7704_v17, %v7632_v35  ;;  %8765 = vmatmul.msk.bf16.gmra.mxu1 %vm4340_vm12, %v7155_v53  ;;  %v7670_v49 = vmul.f32 %v11554_v46, %v7309_v20  ;;  %v7140_v17 = vunpack.c.l.b16 %v7106_v40  ;;  %v6880_v35 = vadd.f32 %v11684_v0, %v6626_v43 }
 0x5e4   : > { %v7768_v37 = vmax.f32 %v7736_v14, 0.0  ;;  %v7706_v53 = vadd.f32 %v11568_v2, %v7670_v49  ;;  %v7156_v48 = vpack.c.b16 %v7140_v17, %v7139_v45 }
 0x5e5   : > { %v7529_v16 = vpop.f32.mrf.mxu2 }
 0x5e6   : > { %7800 = vst.msk [vmem:[%s9067_s23 + $0x50] sm:$0xff] %vm4340_vm12, %v7768_v37  ;;  %v7597_v39 = vmul.f32 %v11560_v62, %v7529_v16  ;;  %v6578_v0 = vpop.f32.mrf.mxu3  ;;  %v6881_v37 = vadd.f32 %v11704_v5, %v6627_v59 }
 0x5e7   : > { %v7249_v56 = vpop.f32.mrf.mxu1 }
 0x5e8   : > { %v7633_v28 = vadd.f32 %v11573_v26, %v7597_v39  ;;  %v7310_v32 = vadd.f32 %v7249_v56, %v6880_v35 }
 0x5ea   : > { %v7737_v22 = vadd.f32 %v7705_v7, %v7633_v28  ;;  %8845 = vmatmul.msk.bf16.gmra.mxu2 %vm887_vm3, %v8961_v33  ;;  %v7671_v11 = vmul.f32 %v11554_v46, %v7310_v32  ;;  %v6832_v33 = vpop.f32.mrf.mxu0  ;;  %v6882_v28 = vadd.f32 %v11725_v9, %v6628_v19 }
 0x5ec   : > { %v7769_v23 = vmax.f32 %v7737_v22, 0.0  ;;  %v7707_v55 = vadd.f32 %v11568_v2, %v7671_v11  ;;  %v6629_v22 = vadd.f32 %v11733_v34, %v11360_v27  ;;  %v6630_v27 = vadd.f32 %v6575_v63, %v11371_v1 }
 0x5ed   : > { %v7532_v42 = vpop.f32.mrf.mxu2  ;;  %v6631_v1 = vadd.f32 %v6578_v0, %v11391_v38 }
 0x5ee   : > { %7801 = vst.msk [vmem:[%s9067_s23 + $0x58] sm:$0xff] %vm4340_vm12, %v7769_v23  ;;  %v7598_v10 = vmul.f32 %v11560_v62, %v7532_v42  ;;  %v6580_v25 = vpop.f32.mrf.mxu3  ;;  %v6883_v9 = vadd.f32 %v6827_v51, %v6629_v22  ;;  %v6884_v51 = vadd.f32 %v6829_v18, %v6630_v27 }
 0x5ef   : > { %v7252_v30 = vpop.f32.mrf.mxu1  ;;  %v6885_v18 = vadd.f32 %v6832_v33, %v6631_v1  ;;  %v6632_v38 = vadd.f32 %v6580_v25, %v11402_v52 }
 0x5f0   : > { %v7634_v3 = vadd.f32 %v11573_v26, %v7598_v10  ;;  %v7311_v29 = vadd.f32 %v7252_v30, %v6881_v37 }
 0x5f2   : > { %v7738_v14 = vadd.f32 %v7706_v53, %v7634_v3  ;;  %8766 = vmatmul.msk.bf16.gmra.mxu1 %vm4340_vm12, %v7156_v48  ;;  %v7672_v7 = vmul.f32 %v11554_v46, %v7311_v29  ;;  %v6834_v17 = vpop.f32.mrf.mxu0 }
 0x5f3   : > { %v6886_v33 = vadd.f32 %v6834_v17, %v6632_v38 }
 0x5f4   : > { %v7770_v44 = vmax.f32 %v7738_v14, 0.0  ;;  %v7708_v40 = vadd.f32 %v11568_v2, %v7672_v7 }
 0x5f5   : > { %v7534_v58 = vpop.f32.mrf.mxu2 }
 0x5f6   : > { %7802 = vst.msk [vmem:[%s9067_s23 + $0x60] sm:$0xff] %vm4340_vm12, %v7770_v44  ;;  %v7599_v16 = vmul.f32 %v11560_v62, %v7534_v58  ;;  %v6583_v3 = vpop.f32.mrf.mxu3 }
 0x5f7   : > { %v7254_v15 = vpop.f32.mrf.mxu1  ;;  %v6633_v52 = vadd.f32 %v6583_v3, %v11422_v61 }
 0x5f8   : > { %v7635_v60 = vadd.f32 %v11573_v26, %v7599_v16  ;;  %v7312_v43 = vadd.f32 %v7254_v15, %v6882_v28 }
 0x5fa   : > { %v7739_v39 = vadd.f32 %v7707_v55, %v7635_v60  ;;  %8846 = vmatmul.msk.bf16.gmra.mxu2 %vm887_vm3, %v8962_v31  ;;  %v7673_v23 = vmul.f32 %v11554_v46, %v7312_v43  ;;  %v6837_v44 = vpop.f32.mrf.mxu0 }
 0x5fb   : > { %v6887_v17 = vadd.f32 %v6837_v44, %v6633_v52 }
 0x5fc   : > { %v7771_v20 = vmax.f32 %v7739_v39, 0.0  ;;  %v7709_v10 = vadd.f32 %v11568_v2, %v7673_v23 }
 0x5fd   : > { %v7537_v5 = vpop.f32.mrf.mxu2 }
 0x5fe   : > { %7803 = vst.msk [vmem:[%s9067_s23 + $0x68] sm:$0xff] %vm4340_vm12, %v7771_v20  ;;  %v7600_v56 = vmul.f32 %v11560_v62, %v7537_v5  ;;  %v6585_v55 = vpop.f32.mrf.mxu3 }
 0x5ff   : > { %v7257_v12 = vpop.f32.mrf.mxu1  ;;  %v6634_v61 = vadd.f32 %v6585_v55, %v11431_v54 }
 0x600   : > { %v7636_v50 = vadd.f32 %v11573_v26, %v7600_v56  ;;  %v7313_v53 = vadd.f32 %v7257_v12, %v6883_v9 }
 0x602   : > { %v7740_v49 = vadd.f32 %v7708_v40, %v7636_v50  ;;  %v7674_v30 = vmul.f32 %v11554_v46, %v7313_v53  ;;  %v6839_v5 = vpop.f32.mrf.mxu0 }
 0x603   : > { %v6888_v44 = vadd.f32 %v6839_v5, %v6634_v61 }
 0x604   : > { %v7772_v45 = vmax.f32 %v7740_v49, 0.0  ;;  %v7710_v58 = vadd.f32 %v11568_v2, %v7674_v30 }
 0x605   : > { %v7539_v42 = vpop.f32.mrf.mxu2 }
 0x606   : > { %7804 = vst.msk [vmem:[%s9067_s23 + $0x70] sm:$0xff] %vm4340_vm12, %v7772_v45  ;;  %v7601_v35 = vmul.f32 %v11560_v62, %v7539_v42  ;;  %v6588_v43 = vpop.f32.mrf.mxu3 }
 0x607   : > { %v7259_v48 = vpop.f32.mrf.mxu1  ;;  %v6635_v54 = vadd.f32 %v6588_v43, %v11451_v4 }
 0x608   : > { %v7637_v32 = vadd.f32 %v11573_v26, %v7601_v35  ;;  %v7314_v37 = vadd.f32 %v7259_v48, %v6884_v51 }
 0x60a   : > { %v7741_v34 = vadd.f32 %v7709_v10, %v7637_v32  ;;  %v7675_v29 = vmul.f32 %v11554_v46, %v7314_v37  ;;  %v6842_v42 = vpop.f32.mrf.mxu0 }
 0x60c   : > { %v7773_v59 = vmax.f32 %v7741_v34, 0.0  ;;  %v7711_v39 = vadd.f32 %v11568_v2, %v7675_v29 }
 0x60d   : > { %v7542_v14 = vpop.f32.mrf.mxu2 }
 0x60e   : > { %7805 = vst.msk [vmem:[%s9067_s23 + $0x78] sm:$0xff] %vm4340_vm12, %v7773_v59  ;;  %v7602_v11 = vmul.f32 %v11560_v62, %v7542_v14  ;;  %v6590_v32 = vpop.f32.mrf.mxu3 }
 0x60f   : > { %v7262_v31 = vpop.f32.mrf.mxu1  ;;  %v6636_v4 = vadd.f32 %v6590_v32, %v11462_v41 }
 0x610   : > { %v7638_v16 = vadd.f32 %v11573_v26, %v7602_v11  ;;  %v7315_v7 = vadd.f32 %v7262_v31, %v6885_v18  ;;  %v6889_v18 = vadd.f32 %v6842_v42, %v6635_v54 }
 0x612   : > { %v7742_v63 = vadd.f32 %v7710_v58, %v7638_v16  ;;  %v7676_v56 = vmul.f32 %v11554_v46, %v7315_v7  ;;  %v6844_v51 = vpop.f32.mrf.mxu0 }
 0x614   : > { %v7774_v60 = vmax.f32 %v7742_v63, 0.0  ;;  %v7712_v22 = vadd.f32 %v11568_v2, %v7676_v56 }
 0x615   : > { %v7544_v15 = vpop.f32.mrf.mxu2 }
 0x616   : > { %7806 = vst.msk [vmem:[%s9067_s23 + $0x80] sm:$0xff] %vm4340_vm12, %v7774_v60  ;;  %v7603_v19 = vmul.f32 %v11560_v62, %v7544_v15  ;;  %v6593_v1 = vpop.f32.mrf.mxu3 }
 0x617   : > { %v7264_v28 = vpop.f32.mrf.mxu1  ;;  %v6637_v41 = vadd.f32 %v6593_v1, %v11479_v57 }
 0x618   : > { %v7639_v20 = vadd.f32 %v11573_v26, %v7603_v19  ;;  %v7316_v49 = vadd.f32 %v7264_v28, %v6886_v33 }
 0x61a   : > { %v7743_v0 = vadd.f32 %v7711_v39, %v7639_v20  ;;  %v7677_v9 = vmul.f32 %v11554_v46, %v7316_v49  ;;  %v6847_v39 = vpop.f32.mrf.mxu0 }
 0x61c   : > { %v7775_v40 = vmax.f32 %v7743_v0, 0.0  ;;  %v7713_v48 = vadd.f32 %v11568_v2, %v7677_v9 }
 0x61d   : > { %v7547_v50 = vpop.f32.mrf.mxu2 }
 0x61e   : > { %7807 = vst.msk [vmem:[%s9067_s23 + $0x88] sm:$0xff] %vm4340_vm12, %v7775_v40  ;;  %v7604_v12 = vmul.f32 %v11560_v62, %v7547_v50  ;;  %v6595_v0 = vpop.f32.mrf.mxu3  ;;  %v6890_v50 = vadd.f32 %v6844_v51, %v6636_v4 }
 0x61f   : > { %v7267_v45 = vpop.f32.mrf.mxu1  ;;  %v6638_v57 = vadd.f32 %v6595_v0, %v11487_v21 }
 0x620   : > { %v7640_v23 = vadd.f32 %v11573_v26, %v7604_v12  ;;  %v7317_v27 = vadd.f32 %v7267_v45, %v6887_v17 }
 0x622   : > { %v7744_v25 = vadd.f32 %v7712_v22, %v7640_v23  ;;  %v7678_v59 = vmul.f32 %v11554_v46, %v7317_v27  ;;  %v6849_v23 = vpop.f32.mrf.mxu0 }
 0x624   : > { %v7776_v35 = vmax.f32 %v7744_v25, 0.0  ;;  %v7714_v37 = vadd.f32 %v11568_v2, %v7678_v59 }
 0x625   : > { %v7549_v10 = vpop.f32.mrf.mxu2 }
 0x626   : > { %7808 = vst.msk [vmem:[%s9067_s23 + $0x90] sm:$0xff] %vm4340_vm12, %v7776_v35  ;;  %v7605_v53 = vmul.f32 %v11560_v62, %v7549_v10  ;;  %v6598_v9 = vpop.f32.mrf.mxu3  ;;  %v6891_v10 = vadd.f32 %v6847_v39, %v6637_v41 }
 0x627   : > { %v7269_v30 = vpop.f32.mrf.mxu1  ;;  %v6639_v21 = vadd.f32 %v6598_v9, %v11502_v24 }
 0x628   : > { %v7641_v34 = vadd.f32 %v11573_v26, %v7605_v53  ;;  %v7318_v16 = vadd.f32 %v7269_v30, %v6888_v44 }
 0x62a   : > { %v7745_v3 = vadd.f32 %v7713_v48, %v7641_v34  ;;  %v7679_v29 = vmul.f32 %v11554_v46, %v7318_v16  ;;  %v6852_v30 = vpop.f32.mrf.mxu0 }
 0x62c   : > { %v7777_v14 = vmax.f32 %v7745_v3, 0.0  ;;  %v7715_v7 = vadd.f32 %v11568_v2, %v7679_v29  ;;  %v6893_v29 = vadd.f32 %v6852_v30, %v6639_v21 }
 0x62d   : > { %v7552_v11 = vpop.f32.mrf.mxu2 }
 0x62e   : > { %7809 = vst.msk [vmem:[%s9067_s23 + $0x98] sm:$0xff] %vm4340_vm12, %v7777_v14  ;;  %v7606_v58 = vmul.f32 %v11560_v62, %v7552_v11  ;;  %v6892_v14 = vadd.f32 %v6849_v23, %v6638_v57  ;;  %v6600_v11 = vpop.f32.mrf.mxu3 }
 0x62f   : > { %v7272_v63 = vpop.f32.mrf.mxu1  ;;  %v6640_v24 = vadd.f32 %v6600_v11, %v11510_v36 }
 0x630   : > { %v7642_v31 = vadd.f32 %v11573_v26, %v7606_v58  ;;  %v7319_v20 = vadd.f32 %v7272_v63, %v6889_v18 }
 0x632   : > { %v7746_v55 = vadd.f32 %v7714_v37, %v7642_v31  ;;  %v7680_v56 = vmul.f32 %v11554_v46, %v7319_v20  ;;  %v6854_v54 = vpop.f32.mrf.mxu0 }
 0x633   : > { %v6894_v0 = vadd.f32 %v6854_v54, %v6640_v24 }
 0x634   : > { %v7778_v60 = vmax.f32 %v7746_v55, 0.0  ;;  %v7716_v12 = vadd.f32 %v11568_v2, %v7680_v56 }
 0x635   : > { %v7554_v15 = vpop.f32.mrf.mxu2 }
 0x636   : > { %7810 = vst.msk [vmem:[%s9067_s23 + $0xa0] sm:$0xff] %vm4340_vm12, %v7778_v60  ;;  %v7607_v19 = vmul.f32 %v11560_v62, %v7554_v15  ;;  %v6603_v39 = vpop.f32.mrf.mxu3 }
 0x637   : > { %v7274_v28 = vpop.f32.mrf.mxu1  ;;  %v6641_v36 = vadd.f32 %v6603_v39, %v11527_v8 }
 0x638   : > { %v7643_v5 = vadd.f32 %v11573_v26, %v7607_v19  ;;  %v7320_v22 = vadd.f32 %v7274_v28, %v6890_v50 }
 0x63a   : > { %v7747_v38 = vadd.f32 %v7715_v7, %v7643_v5  ;;  %v7681_v25 = vmul.f32 %v11554_v46, %v7320_v22  ;;  %v6857_v4 = vpop.f32.mrf.mxu0 }
 0x63b   : > { %v6895_v41 = vadd.f32 %v6857_v4, %v6641_v36 }
 0x63c   : > { %v7779_v40 = vmax.f32 %v7747_v38, 0.0  ;;  %v7717_v53 = vadd.f32 %v11568_v2, %v7681_v25 }
 0x63d   : > { %v7557_v43 = vpop.f32.mrf.mxu2 }
 0x63e   : > { %7811 = vst.msk [vmem:[%s9067_s23 + $0xa8] sm:$0xff] %vm4340_vm12, %v7779_v40  ;;  %v7608_v33 = vmul.f32 %v11560_v62, %v7557_v43  ;;  %v6605_v22 = vpop.f32.mrf.mxu3 }
 0x63f   : > { %v7277_v45 = vpop.f32.mrf.mxu1  ;;  %v6642_v8 = vadd.f32 %v6605_v22, %v11533_v13 }
 0x640   : > { %v7644_v49 = vadd.f32 %v11573_v26, %v7608_v33  ;;  %v7321_v32 = vadd.f32 %v7277_v45, %v6891_v10 }
 0x642   : > { %v7748_v52 = vadd.f32 %v7716_v12, %v7644_v49  ;;  %v7682_v61 = vmul.f32 %v11554_v46, %v7321_v32  ;;  %v6859_v25 = vpop.f32.mrf.mxu0 }
 0x643   : > { %v6896_v57 = vadd.f32 %v6859_v25, %v6642_v8 }
 0x644   : > { %v7780_v42 = vmax.f32 %v7748_v52, 0.0  ;;  %v7718_v44 = vadd.f32 %v11568_v2, %v7682_v61 }
 0x645   : > { %v7559_v35 = vpop.f32.mrf.mxu2 }
 0x646   : > { %7812 = vst.msk [vmem:[%s9067_s23 + $0xb0] sm:$0xff] %vm4340_vm12, %v7780_v42  ;;  %v7609_v17 = vmul.f32 %v11560_v62, %v7559_v35 }
 0x647   : > { %v7279_v27 = vpop.f32.mrf.mxu1 }
 0x648   : > { %v7645_v48 = vadd.f32 %v11573_v26, %v7609_v17  ;;  %v7322_v58 = vadd.f32 %v7279_v27, %v6892_v14 }
 0x64a   : > { %v7749_v34 = vadd.f32 %v7717_v53, %v7645_v48  ;;  %v7683_v1 = vmul.f32 %v11554_v46, %v7322_v58  ;;  %v6608_v48 = vpop.f32.mrf.mxu3 }
 0x64b   : > { %v6643_v13 = vadd.f32 %v6608_v48, %v11543_v47 }
 0x64c   : > { %v7781_v3 = vmax.f32 %v7749_v34, 0.0  ;;  %v7719_v15 = vadd.f32 %v11568_v2, %v7683_v1 }
 0x64d   : > { %v7562_v59 = vpop.f32.mrf.mxu2 }
 0x64e   : > { %7813 = vst.msk [vmem:[%s9067_s23 + $0xb8] sm:$0xff] %vm4340_vm12, %v7781_v3  ;;  %v7610_v51 = vmul.f32 %v11560_v62, %v7562_v59  ;;  %v6862_v59 = vpop.f32.mrf.mxu0 }
 0x64f   : > { %v7282_v16 = vpop.f32.mrf.mxu1 }
 0x650   : > { %v7646_v37 = vadd.f32 %v11573_v26, %v7610_v51  ;;  %v7323_v18 = vadd.f32 %v7282_v16, %v6893_v29 }
 0x652   : > { %v7750_v31 = vadd.f32 %v7718_v44, %v7646_v37  ;;  %v7684_v5 = vmul.f32 %v11554_v46, %v7323_v18  ;;  %v6897_v37 = vadd.f32 %v6862_v59, %v6643_v13  ;;  %v6610_v21 = vpop.f32.mrf.mxu3 }
 0x653   : > { %v6644_v47 = vadd.f32 %v6610_v21, %v11548_v6 }
 0x654   : > { %v7782_v63 = vmax.f32 %v7750_v31, 0.0  ;;  %v7720_v40 = vadd.f32 %v11568_v2, %v7684_v5  ;;  %v8983_v5 = vld [vmem:[%s11918_s5] ss:$0 sm:$0xff] }
 0x655   : > { %v7564_v55 = vpop.f32.mrf.mxu2 }
 0x656   : > { %7814 = vst.msk [vmem:[%s9067_s23 + $0xc0] sm:$0xff] %vm4340_vm12, %v7782_v63  ;;  %v7611_v60 = vmul.f32 %v11560_v62, %v7564_v55  ;;  %v6864_v55 = vpop.f32.mrf.mxu0 }
 0x657   : > { %v7284_v7 = vpop.f32.mrf.mxu1 }
 0x658   : > { %v7647_v19 = vadd.f32 %v11573_v26, %v7611_v60  ;;  %v7324_v43 = vadd.f32 %v7284_v7, %v6894_v0  ;;  %v8986_v0 = vld [vmem:[%s11922_s9] ss:$0 sm:$0xff] }
 0x65a   : > { %v7751_v20 = vadd.f32 %v7719_v15, %v7647_v19  ;;  %v7685_v49 = vmul.f32 %v11554_v46, %v7324_v43  ;;  %v6898_v19 = vadd.f32 %v6864_v55, %v6644_v47 }
 0x65c   : > { %v7783_v28 = vmax.f32 %v7751_v20, 0.0  ;;  %v7721_v42 = vadd.f32 %v11568_v2, %v7685_v49 }
 0x65d   : > { %v7567_v38 = vpop.f32.mrf.mxu2 }
 0x65e   : > { %7815 = vst.msk [vmem:[%s9067_s23 + $0xc8] sm:$0xff] %vm4340_vm12, %v7783_v28  ;;  %v7612_v56 = vmul.f32 %v11560_v62, %v7567_v38 }
 0x65f   : > { %v7287_v33 = vpop.f32.mrf.mxu1 }
 0x660   : > { %v7648_v50 = vadd.f32 %v11573_v26, %v7612_v56  ;;  %v7325_v9 = vadd.f32 %v7287_v33, %v6895_v41 }
 0x662   : > { %v7752_v12 = vadd.f32 %v7720_v40, %v7648_v50  ;;  %v7686_v53 = vmul.f32 %v11554_v46, %v7325_v9 }
 0x664   : > { %v7784_v23 = vmax.f32 %v7752_v12, 0.0  ;;  %v7722_v30 = vadd.f32 %v11568_v2, %v7686_v53 }
 0x665   : > { %v7569_v45 = vpop.f32.mrf.mxu2 }
 0x666   : > { %7816 = vst.msk [vmem:[%s9067_s23 + $0xd0] sm:$0xff] %vm4340_vm12, %v7784_v23  ;;  %v7613_v52 = vmul.f32 %v11560_v62, %v7569_v45 }
 0x667   : > { %v7289_v10 = vpop.f32.mrf.mxu1 }
 0x668   : > { %v7649_v35 = vadd.f32 %v11573_v26, %v7613_v52  ;;  %v7326_v61 = vadd.f32 %v7289_v10, %v6896_v57 }
 0x66a   : > { %v7753_v17 = vadd.f32 %v7721_v42, %v7649_v35  ;;  %v7687_v11 = vmul.f32 %v11554_v46, %v7326_v61 }
 0x66c   : > { %v7785_v32 = vmax.f32 %v7753_v17, 0.0  ;;  %v7723_v31 = vadd.f32 %v11568_v2, %v7687_v11 }
 0x66d   : > { %v7572_v27 = vpop.f32.mrf.mxu2 }
 0x66e   : > { %7817 = vst.msk [vmem:[%s9067_s23 + $0xd8] sm:$0xff] %vm4340_vm12, %v7785_v32  ;;  %v7614_v34 = vmul.f32 %v11560_v62, %v7572_v27 }
 0x66f   : > { %v7292_v51 = vpop.f32.mrf.mxu1 }
 0x670   : > { %v7650_v3 = vadd.f32 %v11573_v26, %v7614_v34  ;;  %v7327_v1 = vadd.f32 %v7292_v51, %v6897_v37 }
 0x672   : > { %v7754_v14 = vadd.f32 %v7722_v30, %v7650_v3  ;;  %v7688_v29 = vmul.f32 %v11554_v46, %v7327_v1 }
 0x674   : > { %v7786_v44 = vmax.f32 %v7754_v14, 0.0  ;;  %v7724_v7 = vadd.f32 %v11568_v2, %v7688_v29  ;;  %v8985_v2 = vld [vmem:[%s11919_s6] ss:$0 sm:$0xff] }
 0x675   : > { %v7574_v58 = vpop.f32.mrf.mxu2 }
 0x676   : > { %7818 = vst.msk [vmem:[%s9067_s23 + $0xe0] sm:$0xff] %vm4340_vm12, %v7786_v44  ;;  %v7615_v16 = vmul.f32 %v11560_v62, %v7574_v58 }
 0x677   : > { %v7294_v15 = vpop.f32.mrf.mxu1 }
 0x678   : > { %v7651_v63 = vadd.f32 %v11573_v26, %v7615_v16  ;;  %v7328_v24 = vadd.f32 %v7294_v15, %v6898_v19 }
 0x67a   : > { %v7755_v54 = vadd.f32 %v7723_v31, %v7651_v63  ;;  %v7689_v46 = vmul.f32 %v8983_v5, %v7328_v24 }
 0x67c   : > { %v7787_v60 = vmax.f32 %v7755_v54, 0.0 }
 0x67d   : > { %v7577_v18 = vpop.f32.mrf.mxu2 }
 0x67e   : > { %7819 = vst.msk [vmem:[%s9067_s23 + $0xe8] sm:$0xff] %vm4340_vm12, %v7787_v60  ;;  %v7616_v39 = vmul.f32 %v11560_v62, %v7577_v18  ;;  %v8984_v62 = vld [vmem:[%s11921_s8] ss:$0 sm:$0xff] }
 0x680   : > { %v7652_v20 = vadd.f32 %v11573_v26, %v7616_v39  ;;  %v7725_v26 = vadd.f32 %v8985_v2, %v7689_v46 }
 0x682   : > { %v7756_v6 = vadd.f32 %v7724_v7, %v7652_v20 }
 0x684   : > { %v7788_v28 = vmax.f32 %v7756_v6, 0.0 }
 0x685   : > { %v7579_v4 = vpop.f32.mrf.mxu2 }
 0x686   : > { %7820 = vst.msk [vmem:[%s9067_s23 + $0xf0] sm:$0xff] %vm4340_vm12, %v7788_v28  ;;  %v7617_v38 = vmul.f32 %v8984_v62, %v7579_v4 }
 0x688   : > { %v7653_v56 = vadd.f32 %v8986_v0, %v7617_v38 }
 0x68a   : > { %v7757_v40 = vadd.f32 %v7725_v26, %v7653_v56 }
 0x68c   : > { %v7789_v43 = vmax.f32 %v7757_v40, 0.0 }
 0x68e   : > { %7821 = vst.msk [vmem:[%s9067_s23 + $0xf8] sm:$0xff] %vm4340_vm12, %v7789_v43 }
 0x68f PF: > { %s20_s13 = sadd.s32 1, %s8993_s13  }
 0x690   : > { %p17_p5 = scmp.ge.s32.totalorder %s20_s13, 4  }
 0x692   :  { %19 = sbr.rel (!%p17_p5) target bundleno = 1 (0x1), region = 114 }

</bundles_post_ra>
